<compile_context>
chip_gen: v5e
topology: v5e:2x2
jax: 0.10.0
libtpu: 0.0.40
codegen_flags: <defaults>
</compile_context>

<pallas_src>
import math

import numpy as np
import jax
import jax.numpy as jnp
from jax.experimental import pallas as pl
from jax.experimental.pallas import tpu as pltpu


# ----------------------------------------------------------------------------
# Host-side helpers
# ----------------------------------------------------------------------------
def sinusoidal_emb(t, dim):
    half = dim // 2
    freqs = jnp.exp(
        -math.log(10000.0) * jnp.arange(half, dtype=jnp.float32) / (half - 1)
    )
    args = t.astype(jnp.float32)[:, None] * freqs[None, :]
    return jnp.concatenate([jnp.sin(args), jnp.cos(args)], axis=-1)


# ----------------------------------------------------------------------------
# Fused reverse-diffusion kernel: grid = (batch, timestep)
# ----------------------------------------------------------------------------
def _make_kernel(H, W, Cg, base):
    HW = H * W

    def kernel(sched_ref, noise_ref, xT_ref, temb_ref, cond_ref,
               w_in_ref, w1_ref, w2_ref, b2_ref, w_out_ref, b_out_ref,
               out_ref,
               x_ref, pad_ref, col_ref):
        s = pl.program_id(1)          # step s  <->  timestep i = T-1-s (host pre-reversed)

        # ---------------- one-time init per batch element ---------------------
        @pl.when(s == 0)
        def _init():
            pad_ref[...] = jnp.zeros(pad_ref.shape, pad_ref.dtype)   # zero halo once
            x_ref[...] = xT_ref[...]                                 # x_T ~ N(0, I)

        def conv3x3(h, w_ref):
            """3x3 'same' conv: K-stacked im2col (bf16) + ONE MXU matmul."""
            pad_ref[1:H + 1, 1:W + 1, :] = h.reshape(H, W, base)
            k = 0
            for dy in range(3):
                for dx in range(3):
                    patch = pad_ref[dy:dy + H, dx:dx + W, :]         # (H, W, base) f32
                    col_ref[:, k * base:(k + 1) * base] = (
                        patch.reshape(HW, base).astype(jnp.bfloat16))
                    k += 1
            return jnp.dot(col_ref[...], w_ref[...],
                           preferred_element_type=jnp.float32)       # (HW, base) f32

        # ---------------- denoiser: z = model(concat(x_t, cond), t) -----------
        x = x_ref[...]                                               # (HW, Cg) f32
        h0 = jnp.dot(x.astype(jnp.bfloat16), w_in_ref[...],
                     preferred_element_type=jnp.float32) + cond_ref[...]
        temb = temb_ref[pl.ds(s, 1), :]                              # (1, base), b1 folded in
        h1 = jax.nn.gelu(conv3x3(h0, w1_ref) + temb)
        h2 = jax.nn.gelu(conv3x3(h1, w2_ref) + b2_ref[...]) + h0
        z = jnp.dot(h2.astype(jnp.bfloat16), w_out_ref[...],
                    preferred_element_type=jnp.float32) + b_out_ref[...]   # (HW, Cg)

        # ---------------- DDPM ancestral update -------------------------------
        c1 = sched_ref[s, 0]
        c1c2 = sched_ref[s, 1]
        sg = sched_ref[s, 2]                                         # 0 at the last step
        x_new = c1 * x - c1c2 * z + sg * noise_ref[...]
        x_ref[...] = x_new

        @pl.when(s == pl.num_programs(1) - 1)
        def _emit():
            out_ref[...] = x_new                                     # single final store

    return kernel


def _build_sampler(B, H, W, Cg, base, T):
    HW = H * W
    kernel = _make_kernel(H, W, Cg, base)

    const2 = lambda b, s: (0, 0)
    per_b3 = lambda b, s: (b, 0, 0)

    in_specs = [
        pl.BlockSpec(memory_space=pltpu.MemorySpace.SMEM),               # sched (T,3) f32
        pl.BlockSpec((None, None, HW, Cg), lambda b, s: (s, b, 0, 0)),   # per-step noise
        pl.BlockSpec((None, HW, Cg), per_b3),                            # x_T
        pl.BlockSpec((T, base), const2),                                 # temb (+b1), reversed
        pl.BlockSpec((None, HW, base), per_b3),                          # cond stem features
        pl.BlockSpec((Cg, base), const2),                                # w_in  (1x1 x-stem)
        pl.BlockSpec((9 * base, base), const2),                          # w1    (K-stacked)
        pl.BlockSpec((9 * base, base), const2),                          # w2    (K-stacked)
        pl.BlockSpec((1, base), const2),                                 # b2
        pl.BlockSpec((base, Cg), const2),                                # w_out
        pl.BlockSpec((1, Cg), const2),                                   # b_out
    ]
    scratch_shapes = [
        pltpu.VMEM((HW, Cg), jnp.float32),                               # x_t carry
        pltpu.VMEM((H + 2, W + 2, base), jnp.float32),                   # zero-halo hidden
        pltpu.VMEM((HW, 9 * base), jnp.bfloat16),                        # K-stacked im2col
    ]
    return pl.pallas_call(
        kernel,
        out_shape=jax.ShapeDtypeStruct((B, HW, Cg), jnp.float32),
        grid=(B, T),
        in_specs=in_specs,
        out_specs=pl.BlockSpec((None, HW, Cg), per_b3),
        scratch_shapes=scratch_shapes,
        compiler_params=pltpu.CompilerParams(
            dimension_semantics=("parallel", "arbitrary"),
            vmem_limit_bytes=32 * 1024 * 1024,
        ),
    )


# ----------------------------------------------------------------------------
# DenoisingDiffusionConditionalProcess (forward = full reverse-diffusion loop)
# ----------------------------------------------------------------------------
class DenoisingDiffusionConditionalProcessPallas:
    def __init__(self, key, generated_channels, conditioning_channels,
                 num_timesteps=8, base=128):
        self.Cg = generated_channels
        self.Cc = conditioning_channels
        self.T = num_timesteps
        self.base = base
        self._samplers = {}

        # DDPM linear-beta schedule -> per-step (c1, c1*c2, sigma), pre-reversed so
        # grid step s corresponds to timestep i = T-1-s.
        betas = np.linspace(1e-4, 0.02, num_timesteps, dtype=np.float64)
        alphas = 1.0 - betas
        acp = np.cumprod(alphas)
        acp_prev = np.concatenate([[1.0], acp[:-1]])
        post_var = betas * (1.0 - acp_prev) / (1.0 - acp)
        c1 = 1.0 / np.sqrt(alphas)
        c2 = betas / np.sqrt(1.0 - acp)
        sigma = np.sqrt(post_var)
        sigma[0] = 0.0                               # no noise when producing x_0
        sched = np.stack([c1, c1 * c2, sigma], axis=1).astype(np.float32)
        self.sched_rev = jnp.asarray(sched[::-1].copy())              # (T, 3)

        ks = jax.random.split(key, 7)

        def w(k, shape, fan_in):
            return jax.random.normal(k, shape, jnp.float32) / np.sqrt(fan_in)

        Cg, Cc = self.Cg, self.Cc
        # stem: 1x1 conv on x (in kernel) + 3x3 conv on the condition (host, hoisted)
        self.w_in = w(ks[0], (Cg, base), Cg).astype(jnp.bfloat16)
        self.w_cond = w(ks[1], (3, 3, Cc, base), 9 * Cc)              # HWIO, host conv
        self.b_in = jnp.zeros((base,), jnp.float32)
        # two 3x3 hidden convs, weights pre-reshaped to K-stacked (9*base, base)
        self.w1 = w(ks[2], (9, base, base), 9 * base).reshape(9 * base, base).astype(jnp.bfloat16)
        self.b1 = jnp.zeros((1, base), jnp.float32)
        self.w2 = w(ks[3], (9, base, base), 9 * base).reshape(9 * base, base).astype(jnp.bfloat16)
        self.b2 = jnp.zeros((1, base), jnp.float32)
        # 1x1 output projection
        self.w_out = w(ks[4], (base, Cg), base).astype(jnp.bfloat16)
        self.b_out = jnp.zeros((1, Cg), jnp.float32)

        # time-embedding MLP depends only on t -> evaluated once on the host for all
        # T steps; b1 is folded in so the kernel does a single broadcast add per step.
        tw1 = w(ks[5], (base, 4 * base), base)
        tw2 = w(ks[6], (4 * base, base), 4 * base)
        emb = sinusoidal_emb(jnp.arange(num_timesteps, dtype=jnp.float32), base)
        temb = jax.nn.gelu(emb @ tw1) @ tw2 + self.b1                 # (T, base)
        self.temb_rev = jnp.flip(temb, axis=0).astype(jnp.float32)

    def _sampler(self, B, H, W):
        k = (B, H, W)
        if k not in self._samplers:
            self._samplers[k] = _build_sampler(B, H, W, self.Cg, self.base, self.T)
        return self._samplers[k]

    def __call__(self, condition_nchw, key):
        B, C, H, W = condition_nchw.shape
        assert C == self.Cc
        HW = H * W
        cond = jnp.transpose(condition_nchw, (0, 2, 3, 1)).astype(jnp.float32)

        # timestep-invariant condition stem (3x3 'same' conv) hoisted out of the loop.
        cond_h0 = jax.lax.conv_general_dilated(
            cond, self.w_cond, window_strides=(1, 1), padding="SAME",
            dimension_numbers=("NHWC", "HWIO", "NHWC")) + self.b_in
        cond_h0 = cond_h0.reshape(B, HW, self.base)

        # all Gaussian noise for the trajectory drawn up front; per-step rows are
        # streamed into the kernel one block at a time (row s <-> timestep T-1-s).
        k_xT, k_eps = jax.random.split(key)
        x_T = jax.random.normal(k_xT, (B, HW, self.Cg), jnp.float32)
        noise = jax.random.normal(k_eps, (self.T, B, HW, self.Cg), jnp.float32)

        x0 = self._sampler(B, H, W)(
            self.sched_rev, noise, x_T, self.temb_rev, cond_h0,
            self.w_in, self.w1, self.w2, self.b2, self.w_out, self.b_out)

        return jnp.transpose(x0.reshape(B, H, W, self.Cg), (0, 3, 1, 2))  # NCHW


# ----------------------------------------------------------------------------
if __name__ == "__main__":
    key = jax.random.PRNGKey(0)
    k_cond, k_params, k_run = jax.random.split(key, 3)

    generated_channels = 4
    conditioning_channels = 4
    B, H, W = 2, 16, 16

    condition = jax.random.normal(
        k_cond, (B, conditioning_channels, H, W), jnp.float32
    )

    ddpm = DenoisingDiffusionConditionalProcessPallas(
        k_params,
        generated_channels=generated_channels,
        conditioning_channels=conditioning_channels,
        num_timesteps=8,
        base=128,
    )

    x_out = jax.block_until_ready(ddpm(condition, k_run))

    assert x_out.shape == (B, generated_channels, H, W)
    assert bool(jnp.all(jnp.isfinite(x_out)))
    print("KERNEL_OK")
</pallas_src>

<mosaic_0001>
module attributes {stable_mosaic.version = 11 : i64} {
  func.func @kernel(%arg0: i32, %arg1: i32, %arg2: memref<8x3xf32, #tpu.memory_space<smem>>, %arg3: memref<1x1x256x4xf32, #tpu.memory_space<vmem>>, %arg4: memref<1x256x4xf32, #tpu.memory_space<vmem>>, %arg5: memref<8x128xf32, #tpu.memory_space<vmem>>, %arg6: memref<1x256x128xf32, #tpu.memory_space<vmem>>, %arg7: memref<4x128xbf16, #tpu.memory_space<vmem>>, %arg8: memref<1152x128xbf16, #tpu.memory_space<vmem>>, %arg9: memref<1152x128xbf16, #tpu.memory_space<vmem>>, %arg10: memref<1x128xf32, #tpu.memory_space<vmem>>, %arg11: memref<128x4xbf16, #tpu.memory_space<vmem>>, %arg12: memref<1x4xf32, #tpu.memory_space<vmem>>, %arg13: memref<1x256x4xf32, #tpu.memory_space<vmem>>, %arg14: memref<256x4xf32, #tpu.memory_space<vmem>>, %arg15: memref<18x18x128xf32, #tpu.memory_space<vmem>>, %arg16: memref<256x1152xbf16, #tpu.memory_space<vmem>>) attributes {dimension_semantics = [#tpu.dimension_semantics<parallel>, #tpu.dimension_semantics<arbitrary>], iteration_bounds = array<i64: 2, 8>, scalar_prefetch = 0 : i64, scratch_operands = 3 : i64, tpu.core_type = #tpu.core_type<tc>, window_params = [{transform_indices = @transform_0, window_bounds = array<i64: 8, 3>}, {transform_indices = @transform_1, window_bounds = array<i64: 1, 1, 256, 4>}, {transform_indices = @transform_2, window_bounds = array<i64: 1, 256, 4>}, {pipeline_mode = #tpu.pipeline_mode<synchronous>, transform_indices = @transform_3, window_bounds = array<i64: 8, 128>}, {transform_indices = @transform_4, window_bounds = array<i64: 1, 256, 128>}, {pipeline_mode = #tpu.pipeline_mode<synchronous>, transform_indices = @transform_5, window_bounds = array<i64: 4, 128>}, {pipeline_mode = #tpu.pipeline_mode<synchronous>, transform_indices = @transform_6, window_bounds = array<i64: 1152, 128>}, {pipeline_mode = #tpu.pipeline_mode<synchronous>, transform_indices = @transform_7, window_bounds = array<i64: 1152, 128>}, {pipeline_mode = #tpu.pipeline_mode<synchronous>, transform_indices = @transform_8, window_bounds = array<i64: 1, 128>}, {pipeline_mode = #tpu.pipeline_mode<synchronous>, transform_indices = @transform_9, window_bounds = array<i64: 128, 4>}, {pipeline_mode = #tpu.pipeline_mode<synchronous>, transform_indices = @transform_10, window_bounds = array<i64: 1, 4>}, {transform_indices = @transform_11, window_bounds = array<i64: 1, 256, 4>}]} {
    %c0_i32 = arith.constant 0 : i32
    %0 = arith.cmpi eq, %arg1, %c0_i32 : i32
    %1 = arith.extui %0 : i1 to i32
    %c0_i32_0 = arith.constant 0 : i32
    %2 = arith.cmpi ne, %1, %c0_i32_0 : i32
    scf.if %2 {
      %cst_129 = arith.constant 0.000000e+00 : f32
      %152 = vector.broadcast %cst_129 : f32 to vector<18x18x128xf32>
      %c0_130 = arith.constant 0 : index
      %c0_131 = arith.constant 0 : index
      %c0_132 = arith.constant 0 : index
      %153 = vector.load %arg15[%c0_130, %c0_131, %c0_132] : memref<18x18x128xf32, #tpu.memory_space<vmem>>, vector<18x18x128xf32>
      tpu.vector_store %arg15[%c0_130, %c0_131, %c0_132], %152 {strides = array<i32>} : memref<18x18x128xf32, #tpu.memory_space<vmem>>, vector<18x18x128xf32>,
      %c0_133 = arith.constant 0 : index
      %c0_134 = arith.constant 0 : index
      %c0_135 = arith.constant 0 : index
      %154 = vector.load %arg4[%c0_133, %c0_134, %c0_135] : memref<1x256x4xf32, #tpu.memory_space<vmem>>, vector<1x256x4xf32>
      %155 = vector.shape_cast %154 : vector<1x256x4xf32> to vector<256x4xf32>
      %c0_136 = arith.constant 0 : index
      %c0_137 = arith.constant 0 : index
      %156 = vector.load %arg14[%c0_136, %c0_137] : memref<256x4xf32, #tpu.memory_space<vmem>>, vector<256x4xf32>
      tpu.vector_store %arg14[%c0_136, %c0_137], %155 {strides = array<i32>} : memref<256x4xf32, #tpu.memory_space<vmem>>, vector<256x4xf32>,
    } else {
    }
    %c0 = arith.constant 0 : index
    %c0_1 = arith.constant 0 : index
    %3 = vector.load %arg14[%c0, %c0_1] : memref<256x4xf32, #tpu.memory_space<vmem>>, vector<256x4xf32>
    %4 = arith.truncf %3 : vector<256x4xf32> to vector<256x4xbf16>
    %c0_2 = arith.constant 0 : index
    %c0_3 = arith.constant 0 : index
    %5 = vector.load %arg7[%c0_2, %c0_3] : memref<4x128xbf16, #tpu.memory_space<vmem>>, vector<4x128xbf16>
    %cst = arith.constant dense<0.000000e+00> : vector<256x128xf32>
    %6 = tpu.matmul %4, %5, %cst {dimension_numbers = #tpu.dot_dimension_numbers<[1], [0], [0], [1], [0, 0, 1, 1], [], []>} : vector<256x4xbf16>, vector<4x128xbf16>, vector<256x128xf32> -> vector<256x128xf32>
    %c0_4 = arith.constant 0 : index
    %c0_5 = arith.constant 0 : index
    %c0_6 = arith.constant 0 : index
    %7 = vector.load %arg6[%c0_4, %c0_5, %c0_6] : memref<1x256x128xf32, #tpu.memory_space<vmem>>, vector<1x256x128xf32>
    %8 = vector.shape_cast %7 : vector<1x256x128xf32> to vector<256x128xf32>
    %9 = arith.addf %6, %8 : vector<256x128xf32>
    %10 = arith.index_cast %arg1 : i32 to index
    %c0_7 = arith.constant 0 : index
    %11 = vector.load %arg5[%10, %c0_7] : memref<8x128xf32, #tpu.memory_space<vmem>>, vector<1x128xf32>
    %12 = vector.shape_cast %9 : vector<256x128xf32> to vector<16x16x128xf32>
    %c1 = arith.constant 1 : index
    %c1_8 = arith.constant 1 : index
    %c0_9 = arith.constant 0 : index
    %13 = vector.load %arg15[%c1, %c1_8, %c0_9] : memref<18x18x128xf32, #tpu.memory_space<vmem>>, vector<16x16x128xf32>
    tpu.vector_store %arg15[%c1, %c1_8, %c0_9], %12 {strides = array<i32>} : memref<18x18x128xf32, #tpu.memory_space<vmem>>, vector<16x16x128xf32>,
    %c0_10 = arith.constant 0 : index
    %c0_11 = arith.constant 0 : index
    %c0_12 = arith.constant 0 : index
    %14 = vector.load %arg15[%c0_10, %c0_11, %c0_12] : memref<18x18x128xf32, #tpu.memory_space<vmem>>, vector<16x16x128xf32>
    %15 = vector.shape_cast %14 : vector<16x16x128xf32> to vector<256x128xf32>
    %16 = arith.truncf %15 : vector<256x128xf32> to vector<256x128xbf16>
    %c0_13 = arith.constant 0 : index
    %c0_14 = arith.constant 0 : index
    %17 = vector.load %arg16[%c0_13, %c0_14] : memref<256x1152xbf16, #tpu.memory_space<vmem>>, vector<256x128xbf16>
    tpu.vector_store %arg16[%c0_13, %c0_14], %16 {strides = array<i32>} : memref<256x1152xbf16, #tpu.memory_space<vmem>>, vector<256x128xbf16>,
    %c0_15 = arith.constant 0 : index
    %c1_16 = arith.constant 1 : index
    %c0_17 = arith.constant 0 : index
    %18 = vector.load %arg15[%c0_15, %c1_16, %c0_17] : memref<18x18x128xf32, #tpu.memory_space<vmem>>, vector<16x16x128xf32>
    %19 = vector.shape_cast %18 : vector<16x16x128xf32> to vector<256x128xf32>
    %20 = arith.truncf %19 : vector<256x128xf32> to vector<256x128xbf16>
    %c0_18 = arith.constant 0 : index
    %c128 = arith.constant 128 : index
    %21 = vector.load %arg16[%c0_18, %c128] : memref<256x1152xbf16, #tpu.memory_space<vmem>>, vector<256x128xbf16>
    tpu.vector_store %arg16[%c0_18, %c128], %20 {strides = array<i32>} : memref<256x1152xbf16, #tpu.memory_space<vmem>>, vector<256x128xbf16>,
    %c0_19 = arith.constant 0 : index
    %c2 = arith.constant 2 : index
    %c0_20 = arith.constant 0 : index
    %22 = vector.load %arg15[%c0_19, %c2, %c0_20] : memref<18x18x128xf32, #tpu.memory_space<vmem>>, vector<16x16x128xf32>
    %23 = vector.shape_cast %22 : vector<16x16x128xf32> to vector<256x128xf32>
    %24 = arith.truncf %23 : vector<256x128xf32> to vector<256x128xbf16>
    %c0_21 = arith.constant 0 : index
    %c256 = arith.constant 256 : index
    %25 = vector.load %arg16[%c0_21, %c256] : memref<256x1152xbf16, #tpu.memory_space<vmem>>, vector<256x128xbf16>
    tpu.vector_store %arg16[%c0_21, %c256], %24 {strides = array<i32>} : memref<256x1152xbf16, #tpu.memory_space<vmem>>, vector<256x128xbf16>,
    %c1_22 = arith.constant 1 : index
    %c0_23 = arith.constant 0 : index
    %c0_24 = arith.constant 0 : index
    %26 = vector.load %arg15[%c1_22, %c0_23, %c0_24] : memref<18x18x128xf32, #tpu.memory_space<vmem>>, vector<16x16x128xf32>
    %27 = vector.shape_cast %26 : vector<16x16x128xf32> to vector<256x128xf32>
    %28 = arith.truncf %27 : vector<256x128xf32> to vector<256x128xbf16>
    %c0_25 = arith.constant 0 : index
    %c384 = arith.constant 384 : index
    %29 = vector.load %arg16[%c0_25, %c384] : memref<256x1152xbf16, #tpu.memory_space<vmem>>, vector<256x128xbf16>
    tpu.vector_store %arg16[%c0_25, %c384], %28 {strides = array<i32>} : memref<256x1152xbf16, #tpu.memory_space<vmem>>, vector<256x128xbf16>,
    %c1_26 = arith.constant 1 : index
    %c1_27 = arith.constant 1 : index
    %c0_28 = arith.constant 0 : index
    %30 = vector.load %arg15[%c1_26, %c1_27, %c0_28] : memref<18x18x128xf32, #tpu.memory_space<vmem>>, vector<16x16x128xf32>
    %31 = vector.shape_cast %30 : vector<16x16x128xf32> to vector<256x128xf32>
    %32 = arith.truncf %31 : vector<256x128xf32> to vector<256x128xbf16>
    %c0_29 = arith.constant 0 : index
    %c512 = arith.constant 512 : index
    %33 = vector.load %arg16[%c0_29, %c512] : memref<256x1152xbf16, #tpu.memory_space<vmem>>, vector<256x128xbf16>
    tpu.vector_store %arg16[%c0_29, %c512], %32 {strides = array<i32>} : memref<256x1152xbf16, #tpu.memory_space<vmem>>, vector<256x128xbf16>,
    %c1_30 = arith.constant 1 : index
    %c2_31 = arith.constant 2 : index
    %c0_32 = arith.constant 0 : index
    %34 = vector.load %arg15[%c1_30, %c2_31, %c0_32] : memref<18x18x128xf32, #tpu.memory_space<vmem>>, vector<16x16x128xf32>
    %35 = vector.shape_cast %34 : vector<16x16x128xf32> to vector<256x128xf32>
    %36 = arith.truncf %35 : vector<256x128xf32> to vector<256x128xbf16>
    %c0_33 = arith.constant 0 : index
    %c640 = arith.constant 640 : index
    %37 = vector.load %arg16[%c0_33, %c640] : memref<256x1152xbf16, #tpu.memory_space<vmem>>, vector<256x128xbf16>
    tpu.vector_store %arg16[%c0_33, %c640], %36 {strides = array<i32>} : memref<256x1152xbf16, #tpu.memory_space<vmem>>, vector<256x128xbf16>,
    %c2_34 = arith.constant 2 : index
    %c0_35 = arith.constant 0 : index
    %c0_36 = arith.constant 0 : index
    %38 = vector.load %arg15[%c2_34, %c0_35, %c0_36] : memref<18x18x128xf32, #tpu.memory_space<vmem>>, vector<16x16x128xf32>
    %39 = vector.shape_cast %38 : vector<16x16x128xf32> to vector<256x128xf32>
    %40 = arith.truncf %39 : vector<256x128xf32> to vector<256x128xbf16>
    %c0_37 = arith.constant 0 : index
    %c768 = arith.constant 768 : index
    %41 = vector.load %arg16[%c0_37, %c768] : memref<256x1152xbf16, #tpu.memory_space<vmem>>, vector<256x128xbf16>
    tpu.vector_store %arg16[%c0_37, %c768], %40 {strides = array<i32>} : memref<256x1152xbf16, #tpu.memory_space<vmem>>, vector<256x128xbf16>,
    %c2_38 = arith.constant 2 : index
    %c1_39 = arith.constant 1 : index
    %c0_40 = arith.constant 0 : index
    %42 = vector.load %arg15[%c2_38, %c1_39, %c0_40] : memref<18x18x128xf32, #tpu.memory_space<vmem>>, vector<16x16x128xf32>
    %43 = vector.shape_cast %42 : vector<16x16x128xf32> to vector<256x128xf32>
    %44 = arith.truncf %43 : vector<256x128xf32> to vector<256x128xbf16>
    %c0_41 = arith.constant 0 : index
    %c896 = arith.constant 896 : index
    %45 = vector.load %arg16[%c0_41, %c896] : memref<256x1152xbf16, #tpu.memory_space<vmem>>, vector<256x128xbf16>
    tpu.vector_store %arg16[%c0_41, %c896], %44 {strides = array<i32>} : memref<256x1152xbf16, #tpu.memory_space<vmem>>, vector<256x128xbf16>,
    %c2_42 = arith.constant 2 : index
    %c2_43 = arith.constant 2 : index
    %c0_44 = arith.constant 0 : index
    %46 = vector.load %arg15[%c2_42, %c2_43, %c0_44] : memref<18x18x128xf32, #tpu.memory_space<vmem>>, vector<16x16x128xf32>
    %47 = vector.shape_cast %46 : vector<16x16x128xf32> to vector<256x128xf32>
    %48 = arith.truncf %47 : vector<256x128xf32> to vector<256x128xbf16>
    %c0_45 = arith.constant 0 : index
    %c1024 = arith.constant 1024 : index
    %49 = vector.load %arg16[%c0_45, %c1024] : memref<256x1152xbf16, #tpu.memory_space<vmem>>, vector<256x128xbf16>
    tpu.vector_store %arg16[%c0_45, %c1024], %48 {strides = array<i32>} : memref<256x1152xbf16, #tpu.memory_space<vmem>>, vector<256x128xbf16>,
    %c0_46 = arith.constant 0 : index
    %c0_47 = arith.constant 0 : index
    %50 = vector.load %arg16[%c0_46, %c0_47] : memref<256x1152xbf16, #tpu.memory_space<vmem>>, vector<256x1152xbf16>
    %c0_48 = arith.constant 0 : index
    %c0_49 = arith.constant 0 : index
    %51 = vector.load %arg8[%c0_48, %c0_49] : memref<1152x128xbf16, #tpu.memory_space<vmem>>, vector<1152x128xbf16>
    %cst_50 = arith.constant dense<0.000000e+00> : vector<256x128xf32>
    %52 = tpu.matmul %50, %51, %cst_50 {dimension_numbers = #tpu.dot_dimension_numbers<[1], [0], [0], [1], [0, 0, 1, 1], [], []>} : vector<256x1152xbf16>, vector<1152x128xbf16>, vector<256x128xf32> -> vector<256x128xf32>
    %53 = vector.broadcast %11 : vector<1x128xf32> to vector<256x128xf32>
    %54 = arith.addf %52, %53 : vector<256x128xf32>
    %55 = arith.mulf %54, %54 : vector<256x128xf32>
    %56 = arith.mulf %54, %55 : vector<256x128xf32>
    %cst_51 = arith.constant 4.471500e-02 : f32
    %57 = vector.broadcast %cst_51 : f32 to vector<256x128xf32>
    %58 = arith.mulf %57, %56 : vector<256x128xf32>
    %59 = arith.addf %54, %58 : vector<256x128xf32>
    %cst_52 = arith.constant 0.797884583 : f32
    %60 = vector.broadcast %cst_52 : f32 to vector<256x128xf32>
    %61 = arith.mulf %60, %59 : vector<256x128xf32>
    %62 = math.tanh %61 : vector<256x128xf32>
    %cst_53 = arith.constant 1.000000e+00 : f32
    %63 = vector.broadcast %cst_53 : f32 to vector<256x128xf32>
    %64 = arith.addf %63, %62 : vector<256x128xf32>
    %cst_54 = arith.constant 5.000000e-01 : f32
    %65 = vector.broadcast %cst_54 : f32 to vector<256x128xf32>
    %66 = arith.mulf %65, %64 : vector<256x128xf32>
    %67 = arith.mulf %54, %66 : vector<256x128xf32>
    %68 = vector.shape_cast %67 : vector<256x128xf32> to vector<16x16x128xf32>
    %c1_55 = arith.constant 1 : index
    %c1_56 = arith.constant 1 : index
    %c0_57 = arith.constant 0 : index
    %69 = vector.load %arg15[%c1_55, %c1_56, %c0_57] : memref<18x18x128xf32, #tpu.memory_space<vmem>>, vector<16x16x128xf32>
    tpu.vector_store %arg15[%c1_55, %c1_56, %c0_57], %68 {strides = array<i32>} : memref<18x18x128xf32, #tpu.memory_space<vmem>>, vector<16x16x128xf32>,
    %c0_58 = arith.constant 0 : index
    %c0_59 = arith.constant 0 : index
    %c0_60 = arith.constant 0 : index
    %70 = vector.load %arg15[%c0_58, %c0_59, %c0_60] : memref<18x18x128xf32, #tpu.memory_space<vmem>>, vector<16x16x128xf32>
    %71 = vector.shape_cast %70 : vector<16x16x128xf32> to vector<256x128xf32>
    %72 = arith.truncf %71 : vector<256x128xf32> to vector<256x128xbf16>
    %c0_61 = arith.constant 0 : index
    %c0_62 = arith.constant 0 : index
    %73 = vector.load %arg16[%c0_61, %c0_62] : memref<256x1152xbf16, #tpu.memory_space<vmem>>, vector<256x128xbf16>
    tpu.vector_store %arg16[%c0_61, %c0_62], %72 {strides = array<i32>} : memref<256x1152xbf16, #tpu.memory_space<vmem>>, vector<256x128xbf16>,
    %c0_63 = arith.constant 0 : index
    %c1_64 = arith.constant 1 : index
    %c0_65 = arith.constant 0 : index
    %74 = vector.load %arg15[%c0_63, %c1_64, %c0_65] : memref<18x18x128xf32, #tpu.memory_space<vmem>>, vector<16x16x128xf32>
    %75 = vector.shape_cast %74 : vector<16x16x128xf32> to vector<256x128xf32>
    %76 = arith.truncf %75 : vector<256x128xf32> to vector<256x128xbf16>
    %c0_66 = arith.constant 0 : index
    %c128_67 = arith.constant 128 : index
    %77 = vector.load %arg16[%c0_66, %c128_67] : memref<256x1152xbf16, #tpu.memory_space<vmem>>, vector<256x128xbf16>
    tpu.vector_store %arg16[%c0_66, %c128_67], %76 {strides = array<i32>} : memref<256x1152xbf16, #tpu.memory_space<vmem>>, vector<256x128xbf16>,
    %c0_68 = arith.constant 0 : index
    %c2_69 = arith.constant 2 : index
    %c0_70 = arith.constant 0 : index
    %78 = vector.load %arg15[%c0_68, %c2_69, %c0_70] : memref<18x18x128xf32, #tpu.memory_space<vmem>>, vector<16x16x128xf32>
    %79 = vector.shape_cast %78 : vector<16x16x128xf32> to vector<256x128xf32>
    %80 = arith.truncf %79 : vector<256x128xf32> to vector<256x128xbf16>
    %c0_71 = arith.constant 0 : index
    %c256_72 = arith.constant 256 : index
    %81 = vector.load %arg16[%c0_71, %c256_72] : memref<256x1152xbf16, #tpu.memory_space<vmem>>, vector<256x128xbf16>
    tpu.vector_store %arg16[%c0_71, %c256_72], %80 {strides = array<i32>} : memref<256x1152xbf16, #tpu.memory_space<vmem>>, vector<256x128xbf16>,
    %c1_73 = arith.constant 1 : index
    %c0_74 = arith.constant 0 : index
    %c0_75 = arith.constant 0 : index
    %82 = vector.load %arg15[%c1_73, %c0_74, %c0_75] : memref<18x18x128xf32, #tpu.memory_space<vmem>>, vector<16x16x128xf32>
    %83 = vector.shape_cast %82 : vector<16x16x128xf32> to vector<256x128xf32>
    %84 = arith.truncf %83 : vector<256x128xf32> to vector<256x128xbf16>
    %c0_76 = arith.constant 0 : index
    %c384_77 = arith.constant 384 : index
    %85 = vector.load %arg16[%c0_76, %c384_77] : memref<256x1152xbf16, #tpu.memory_space<vmem>>, vector<256x128xbf16>
    tpu.vector_store %arg16[%c0_76, %c384_77], %84 {strides = array<i32>} : memref<256x1152xbf16, #tpu.memory_space<vmem>>, vector<256x128xbf16>,
    %c1_78 = arith.constant 1 : index
    %c1_79 = arith.constant 1 : index
    %c0_80 = arith.constant 0 : index
    %86 = vector.load %arg15[%c1_78, %c1_79, %c0_80] : memref<18x18x128xf32, #tpu.memory_space<vmem>>, vector<16x16x128xf32>
    %87 = vector.shape_cast %86 : vector<16x16x128xf32> to vector<256x128xf32>
    %88 = arith.truncf %87 : vector<256x128xf32> to vector<256x128xbf16>
    %c0_81 = arith.constant 0 : index
    %c512_82 = arith.constant 512 : index
    %89 = vector.load %arg16[%c0_81, %c512_82] : memref<256x1152xbf16, #tpu.memory_space<vmem>>, vector<256x128xbf16>
    tpu.vector_store %arg16[%c0_81, %c512_82], %88 {strides = array<i32>} : memref<256x1152xbf16, #tpu.memory_space<vmem>>, vector<256x128xbf16>,
    %c1_83 = arith.constant 1 : index
    %c2_84 = arith.constant 2 : index
    %c0_85 = arith.constant 0 : index
    %90 = vector.load %arg15[%c1_83, %c2_84, %c0_85] : memref<18x18x128xf32, #tpu.memory_space<vmem>>, vector<16x16x128xf32>
    %91 = vector.shape_cast %90 : vector<16x16x128xf32> to vector<256x128xf32>
    %92 = arith.truncf %91 : vector<256x128xf32> to vector<256x128xbf16>
    %c0_86 = arith.constant 0 : index
    %c640_87 = arith.constant 640 : index
    %93 = vector.load %arg16[%c0_86, %c640_87] : memref<256x1152xbf16, #tpu.memory_space<vmem>>, vector<256x128xbf16>
    tpu.vector_store %arg16[%c0_86, %c640_87], %92 {strides = array<i32>} : memref<256x1152xbf16, #tpu.memory_space<vmem>>, vector<256x128xbf16>,
    %c2_88 = arith.constant 2 : index
    %c0_89 = arith.constant 0 : index
    %c0_90 = arith.constant 0 : index
    %94 = vector.load %arg15[%c2_88, %c0_89, %c0_90] : memref<18x18x128xf32, #tpu.memory_space<vmem>>, vector<16x16x128xf32>
    %95 = vector.shape_cast %94 : vector<16x16x128xf32> to vector<256x128xf32>
    %96 = arith.truncf %95 : vector<256x128xf32> to vector<256x128xbf16>
    %c0_91 = arith.constant 0 : index
    %c768_92 = arith.constant 768 : index
    %97 = vector.load %arg16[%c0_91, %c768_92] : memref<256x1152xbf16, #tpu.memory_space<vmem>>, vector<256x128xbf16>
    tpu.vector_store %arg16[%c0_91, %c768_92], %96 {strides = array<i32>} : memref<256x1152xbf16, #tpu.memory_space<vmem>>, vector<256x128xbf16>,
    %c2_93 = arith.constant 2 : index
    %c1_94 = arith.constant 1 : index
    %c0_95 = arith.constant 0 : index
    %98 = vector.load %arg15[%c2_93, %c1_94, %c0_95] : memref<18x18x128xf32, #tpu.memory_space<vmem>>, vector<16x16x128xf32>
    %99 = vector.shape_cast %98 : vector<16x16x128xf32> to vector<256x128xf32>
    %100 = arith.truncf %99 : vector<256x128xf32> to vector<256x128xbf16>
    %c0_96 = arith.constant 0 : index
    %c896_97 = arith.constant 896 : index
    %101 = vector.load %arg16[%c0_96, %c896_97] : memref<256x1152xbf16, #tpu.memory_space<vmem>>, vector<256x128xbf16>
    tpu.vector_store %arg16[%c0_96, %c896_97], %100 {strides = array<i32>} : memref<256x1152xbf16, #tpu.memory_space<vmem>>, vector<256x128xbf16>,
    %c2_98 = arith.constant 2 : index
    %c2_99 = arith.constant 2 : index
    %c0_100 = arith.constant 0 : index
    %102 = vector.load %arg15[%c2_98, %c2_99, %c0_100] : memref<18x18x128xf32, #tpu.memory_space<vmem>>, vector<16x16x128xf32>
    %103 = vector.shape_cast %102 : vector<16x16x128xf32> to vector<256x128xf32>
    %104 = arith.truncf %103 : vector<256x128xf32> to vector<256x128xbf16>
    %c0_101 = arith.constant 0 : index
    %c1024_102 = arith.constant 1024 : index
    %105 = vector.load %arg16[%c0_101, %c1024_102] : memref<256x1152xbf16, #tpu.memory_space<vmem>>, vector<256x128xbf16>
    tpu.vector_store %arg16[%c0_101, %c1024_102], %104 {strides = array<i32>} : memref<256x1152xbf16, #tpu.memory_space<vmem>>, vector<256x128xbf16>,
    %c0_103 = arith.constant 0 : index
    %c0_104 = arith.constant 0 : index
    %106 = vector.load %arg16[%c0_103, %c0_104] : memref<256x1152xbf16, #tpu.memory_space<vmem>>, vector<256x1152xbf16>
    %c0_105 = arith.constant 0 : index
    %c0_106 = arith.constant 0 : index
    %107 = vector.load %arg9[%c0_105, %c0_106] : memref<1152x128xbf16, #tpu.memory_space<vmem>>, vector<1152x128xbf16>
    %cst_107 = arith.constant dense<0.000000e+00> : vector<256x128xf32>
    %108 = tpu.matmul %106, %107, %cst_107 {dimension_numbers = #tpu.dot_dimension_numbers<[1], [0], [0], [1], [0, 0, 1, 1], [], []>} : vector<256x1152xbf16>, vector<1152x128xbf16>, vector<256x128xf32> -> vector<256x128xf32>
    %c0_108 = arith.constant 0 : index
    %c0_109 = arith.constant 0 : index
    %109 = vector.load %arg10[%c0_108, %c0_109] : memref<1x128xf32, #tpu.memory_space<vmem>>, vector<1x128xf32>
    %110 = vector.broadcast %109 : vector<1x128xf32> to vector<256x128xf32>
    %111 = arith.addf %108, %110 : vector<256x128xf32>
    %112 = arith.mulf %111, %111 : vector<256x128xf32>
    %113 = arith.mulf %111, %112 : vector<256x128xf32>
    %cst_110 = arith.constant 4.471500e-02 : f32
    %114 = vector.broadcast %cst_110 : f32 to vector<256x128xf32>
    %115 = arith.mulf %114, %113 : vector<256x128xf32>
    %116 = arith.addf %111, %115 : vector<256x128xf32>
    %cst_111 = arith.constant 0.797884583 : f32
    %117 = vector.broadcast %cst_111 : f32 to vector<256x128xf32>
    %118 = arith.mulf %117, %116 : vector<256x128xf32>
    %119 = math.tanh %118 : vector<256x128xf32>
    %cst_112 = arith.constant 1.000000e+00 : f32
    %120 = vector.broadcast %cst_112 : f32 to vector<256x128xf32>
    %121 = arith.addf %120, %119 : vector<256x128xf32>
    %cst_113 = arith.constant 5.000000e-01 : f32
    %122 = vector.broadcast %cst_113 : f32 to vector<256x128xf32>
    %123 = arith.mulf %122, %121 : vector<256x128xf32>
    %124 = arith.mulf %111, %123 : vector<256x128xf32>
    %125 = arith.addf %124, %9 : vector<256x128xf32>
    %126 = arith.truncf %125 : vector<256x128xf32> to vector<256x128xbf16>
    %c0_114 = arith.constant 0 : index
    %c0_115 = arith.constant 0 : index
    %127 = vector.load %arg11[%c0_114, %c0_115] : memref<128x4xbf16, #tpu.memory_space<vmem>>, vector<128x4xbf16>
    %cst_116 = arith.constant dense<0.000000e+00> : vector<256x4xf32>
    %128 = tpu.matmul %126, %127, %cst_116 {dimension_numbers = #tpu.dot_dimension_numbers<[1], [0], [0], [1], [0, 0, 1, 1], [], []>} : vector<256x128xbf16>, vector<128x4xbf16>, vector<256x4xf32> -> vector<256x4xf32>
    %c0_117 = arith.constant 0 : index
    %c0_118 = arith.constant 0 : index
    %129 = vector.load %arg12[%c0_117, %c0_118] : memref<1x4xf32, #tpu.memory_space<vmem>>, vector<1x4xf32>
    %130 = vector.broadcast %129 : vector<1x4xf32> to vector<256x4xf32>
    %131 = arith.addf %128, %130 : vector<256x4xf32>
    %132 = arith.index_cast %arg1 : i32 to index
    %c0_119 = arith.constant 0 : index
    %133 = memref.load %arg2[%132, %c0_119] : memref<8x3xf32, #tpu.memory_space<smem>>
    %134 = arith.index_cast %arg1 : i32 to index
    %c1_120 = arith.constant 1 : index
    %135 = memref.load %arg2[%134, %c1_120] : memref<8x3xf32, #tpu.memory_space<smem>>
    %136 = arith.index_cast %arg1 : i32 to index
    %c2_121 = arith.constant 2 : index
    %137 = memref.load %arg2[%136, %c2_121] : memref<8x3xf32, #tpu.memory_space<smem>>
    %138 = vector.broadcast %133 : f32 to vector<256x4xf32>
    %139 = arith.mulf %138, %3 : vector<256x4xf32>
    %140 = vector.broadcast %135 : f32 to vector<256x4xf32>
    %141 = arith.mulf %140, %131 : vector<256x4xf32>
    %142 = arith.subf %139, %141 : vector<256x4xf32>
    %c0_122 = arith.constant 0 : index
    %c0_123 = arith.constant 0 : index
    %c0_124 = arith.constant 0 : index
    %c0_125 = arith.constant 0 : index
    %143 = vector.load %arg3[%c0_122, %c0_123, %c0_124, %c0_125] : memref<1x1x256x4xf32, #tpu.memory_space<vmem>>, vector<1x1x256x4xf32>
    %144 = vector.shape_cast %143 : vector<1x1x256x4xf32> to vector<256x4xf32>
    %145 = vector.broadcast %137 : f32 to vector<256x4xf32>
    %146 = arith.mulf %145, %144 : vector<256x4xf32>
    %147 = arith.addf %142, %146 : vector<256x4xf32>
    %c0_126 = arith.constant 0 : index
    %c0_127 = arith.constant 0 : index
    %148 = vector.load %arg14[%c0_126, %c0_127] : memref<256x4xf32, #tpu.memory_space<vmem>>, vector<256x4xf32>
    tpu.vector_store %arg14[%c0_126, %c0_127], %147 {strides = array<i32>} : memref<256x4xf32, #tpu.memory_space<vmem>>, vector<256x4xf32>,
    %c7_i32 = arith.constant 7 : i32
    %149 = arith.cmpi eq, %arg1, %c7_i32 : i32
    %150 = arith.extui %149 : i1 to i32
    %c0_i32_128 = arith.constant 0 : i32
    %151 = arith.cmpi ne, %150, %c0_i32_128 : i32
    scf.if %151 {
      %c0_129 = arith.constant 0 : index
      %c0_130 = arith.constant 0 : index
      %c0_131 = arith.constant 0 : index
      %152 = vector.load %arg13[%c0_129, %c0_130, %c0_131] : memref<1x256x4xf32, #tpu.memory_space<vmem>>, vector<1x256x4xf32>
      %153 = vector.shape_cast %152 : vector<1x256x4xf32> to vector<256x4xf32>
      %154 = vector.shape_cast %147 : vector<256x4xf32> to vector<1x256x4xf32>
      tpu.vector_store %arg13[%c0_129, %c0_130, %c0_131], %154 {strides = array<i32>} : memref<1x256x4xf32, #tpu.memory_space<vmem>>, vector<1x256x4xf32>,
    } else {
    }
    return
  }
  func.func @transform_0(%arg0: i32, %arg1: i32) -> (i32, i32) {
    %c0_i32 = arith.constant 0 : i32
    %c0_i32_0 = arith.constant 0 : i32
    %c0_i32_1 = arith.constant 0 : i32
    return %c0_i32, %c0_i32_0 : i32, i32
  }
  func.func @transform_1(%arg0: i32, %arg1: i32) -> (i32, i32, i32, i32) {
    %c0_i32 = arith.constant 0 : i32
    %c0_i32_0 = arith.constant 0 : i32
    %c0_i32_1 = arith.constant 0 : i32
    return %arg1, %arg0, %c0_i32, %c0_i32_0 : i32, i32, i32, i32
  }
  func.func @transform_2(%arg0: i32, %arg1: i32) -> (i32, i32, i32) {
    %c0_i32 = arith.constant 0 : i32
    %c0_i32_0 = arith.constant 0 : i32
    %c0_i32_1 = arith.constant 0 : i32
    return %arg0, %c0_i32, %c0_i32_0 : i32, i32, i32
  }
  func.func @transform_3(%arg0: i32, %arg1: i32) -> (i32, i32) {
    %c0_i32 = arith.constant 0 : i32
    %c0_i32_0 = arith.constant 0 : i32
    %c0_i32_1 = arith.constant 0 : i32
    return %c0_i32, %c0_i32_0 : i32, i32
  }
  func.func @transform_4(%arg0: i32, %arg1: i32) -> (i32, i32, i32) {
    %c0_i32 = arith.constant 0 : i32
    %c0_i32_0 = arith.constant 0 : i32
    %c0_i32_1 = arith.constant 0 : i32
    return %arg0, %c0_i32, %c0_i32_0 : i32, i32, i32
  }
  func.func @transform_5(%arg0: i32, %arg1: i32) -> (i32, i32) {
    %c0_i32 = arith.constant 0 : i32
    %c0_i32_0 = arith.constant 0 : i32
    %c0_i32_1 = arith.constant 0 : i32
    return %c0_i32, %c0_i32_0 : i32, i32
  }
  func.func @transform_6(%arg0: i32, %arg1: i32) -> (i32, i32) {
    %c0_i32 = arith.constant 0 : i32
    %c0_i32_0 = arith.constant 0 : i32
    %c0_i32_1 = arith.constant 0 : i32
    return %c0_i32, %c0_i32_0 : i32, i32
  }
  func.func @transform_7(%arg0: i32, %arg1: i32) -> (i32, i32) {
    %c0_i32 = arith.constant 0 : i32
    %c0_i32_0 = arith.constant 0 : i32
    %c0_i32_1 = arith.constant 0 : i32
    return %c0_i32, %c0_i32_0 : i32, i32
  }
  func.func @transform_8(%arg0: i32, %arg1: i32) -> (i32, i32) {
    %c0_i32 = arith.constant 0 : i32
    %c0_i32_0 = arith.constant 0 : i32
    %c0_i32_1 = arith.constant 0 : i32
    return %c0_i32, %c0_i32_0 : i32, i32
  }
  func.func @transform_9(%arg0: i32, %arg1: i32) -> (i32, i32) {
    %c0_i32 = arith.constant 0 : i32
    %c0_i32_0 = arith.constant 0 : i32
    %c0_i32_1 = arith.constant 0 : i32
    return %c0_i32, %c0_i32_0 : i32, i32
  }
  func.func @transform_10(%arg0: i32, %arg1: i32) -> (i32, i32) {
    %c0_i32 = arith.constant 0 : i32
    %c0_i32_0 = arith.constant 0 : i32
    %c0_i32_1 = arith.constant 0 : i32
    return %c0_i32, %c0_i32_0 : i32, i32
  }
  func.func @transform_11(%arg0: i32, %arg1: i32) -> (i32, i32, i32) {
    %c0_i32 = arith.constant 0 : i32
    %c0_i32_0 = arith.constant 0 : i32
    %c0_i32_1 = arith.constant 0 : i32
    return %arg0, %c0_i32, %c0_i32_0 : i32, i32, i32
  }
}

</mosaic_0001>

<bundles_post_ra>
// kernel: tpu_custom_call.1
= control target key start
LH: loop header
LB: loop body
LE: loop exit
PB: predicated region body
PF: predicated region fallthrough
CT: control target
= control target key end

     0   :  { %s14070_s0 = inlined_call_operand.vmem [shape: f32[8,3], index: 0, kind: input, shape index: {}]   ;;  %s14071_s1 = inlined_call_operand.vmem [shape: f32[8,2,256,4], index: 1, kind: input, shape index: {}]   ;;  %s14072_s2 = inlined_call_operand.vmem [shape: f32[2,256,4], index: 2, kind: input, shape index: {}]   ;;  %s14073_s3 = inlined_call_operand.vmem [shape: f32[8,128], index: 3, kind: input, shape index: {}]   ;;  %s14074_s4 = inlined_call_operand.vmem [shape: f32[2,256,128], index: 4, kind: input, shape index: {}]   ;;  %s14075_s5 = inlined_call_operand.vmem [shape: bf16[4,128], index: 5, kind: input, shape index: {}]   ;;  %s14076_s6 = inlined_call_operand.vmem [shape: bf16[1152,128], index: 6, kind: input, shape index: {}]   ;;  %s14077_s7 = inlined_call_operand.vmem [shape: bf16[1152,128], index: 7, kind: input, shape index: {}]   ;;  %s14078_s8 = inlined_call_operand.vmem [shape: f32[1,128], index: 8, kind: input, shape index: {}]   ;;  %s14079_s9 = inlined_call_operand.vmem [shape: bf16[128,4], index: 9, kind: input, shape index: {}]   ;;  %s14080_s10 = inlined_call_operand.vmem [shape: f32[1,4], index: 10, kind: input, shape index: {}]   ;;  %s14081_s11 = inlined_call_operand.vmem [shape: f32[2,256,4], index: 11, kind: output, shape index: {}]  }
   0x1   :  { %14115 = sst [smem:[#allocation66_spill]] %s14070_s0 }
   0x2   :  { %16 = vsyncpa [#allocation6], 0  ;;  %s10923_s17 = smov 0   ;;  %s10925_s18 = smov 0  }
   0x3   :  { %s10927_s19 = smov 0   ;;  %s10929_s20 = smov 0  }
   0x4   :  { %s10931_s21 = smov 0  }
   0x5 LB: > { %14116 = sst [smem:[#allocation8_spill]] %s10855_s20  ;;  %s8324_s22 = sadd.s32 4294967295, %s10859_s21   ;;  %s10859_s21 = sphi %s10931_s21, %s22_s21   ;;  %s10855_s20 = sphi %s10929_s20, %s14242_s20   ;;  %s10851_s19 = sphi %s10927_s19, %s14244_s19   ;;  %s10847_s18 = sphi %s10925_s18, %s14240_s18   ;;  %s10843_s17 = sphi %s10923_s17, %s14243_s17  }
   0x6   : > { %s31_s23 = sadd.s32 1, %s10851_s19  ;;  %s34_s24 = sadd.s32 1, %s10855_s20 }
   0x7   : > { %p32_p0 = scmp.ge.s32.totalorder %s31_s23, 8  ;;  %p8326_p1 = scmp.ge.s32.totalorder %s10859_s21, 1 }
   0x8   : > { %p313_p2 = scmp.lt.s32.totalorder %s10859_s21, 17  ;;  %p10572_p5 = scmp.eq.s32.totalorder %s8324_s22, 0 }
   0x9   : > { %s14246_s23 = smov (%p32_p0, %s31_s23), 0  ;;  %s14248_s24 = smov (!%p32_p0, %s34_s24), %s10855_s20 }
   0xa   : > { %14117 = sst [smem:[#allocation9_spill]] %s14246_s23  ;;  %p314_p3 = pnand %p8326_p1, %p313_p2 }
   0xb   : > { %p36_p4 = scmp.ge.s32.totalorder %s14248_s24, 2  ;;  %s14118_s0 = sld [smem:[#allocation66_spill]] }
   0xc   : > { %p10568_p6 = pneg %p314_p3  ;;  %s10861_s28 = smov [#allocation5]  }
   0xd   : > { %s14250_s24 = smov (%p36_p4, %s14248_s24), 0 }
   0xe   : > { %14119 = sst [smem:[#allocation10_spill]] %s14250_s24  ;;  %p10569_p7 = pnand %p10572_p5, %p10568_p6 }
   0xf   : > { %387 = sbr.rel (%p314_p3) target bundleno = 2096 (0x830), region = 64 }
  0x11   : > { %s325_s27 = sshll.u32 %s14118_s0, 4  ;;  %s326_s27 = int_to_ptr.vmem [resolvable:$true] %s325_s27 }
  0x12   : > { %10571 = dma.vmem_to_smem (!%p10569_p7), %s326_s27, 128, %s10861_s28, [#allocation6]  }
  0x14   : > { %10838 = dma.done.wait (%p10572_p5), [#allocation6], 128  }
  0x15   : > { %10840 = vsyncadd (%p10572_p5), [#allocation6], 4294967168 }
  0x16   : > { %394 = sfence }
  0x17   : > { %p443_p8 = scmp.lt.s32.totalorder %s10843_s17, 7  ;;  %p445_p9 = scmp.lt.s32.totalorder %s10847_s18, 1 }
  0x18   : > { %p8340_p10 = scmp.ne.s32.totalorder %s10843_s17, 0 }
  0x19   : > { %s444_s29 = scalar_select %p443_p8, %s10843_s17, 7 }
  0x1a   : > { %s14252_s18 = smov (!%p445_p9, %s10847_s18), 1 }
  0x1b   : > { %s8332_s30 = sshll.u32 %s444_s29, 6  ;;  %s8331_s12 = sshll.u32 %s14252_s18, 5 }
  0x1c   : > { %s10121_s13 = sshll.u32 %s14252_s18, 8  ;;  %s449_s14 = sadd.s32 %s8332_s30, %s8331_s12 }
  0x1d   : > { %s10964_s22 = scalar_lea.vmem %s14072_s2, %s10121_s13  ;;  %s8333_s25 = sshll.u32 %s449_s14, 3 }
  0x1e   : > { %s10969_s28 = scalar_lea.vmem %s14074_s4, %s10121_s13  ;;  %s10974_s23 = scalar_lea.vmem %s14071_s1, %s8333_s25 }
  0x1f   : > { %s10979_s18 = scalar_lea.vmem %s14081_s11, %s10121_s13  ;;  %471 = sbr.rel (%p8340_p10) target bundleno = 123 (0x7b), region = 72 }
  0x24   : > { %v10862_v0 = vmov 0.0   ;;  %v526_v1 = vld [vmem:[%s10964_s22] sm:$0xff]  ;;  %vm558_vm0 = vcmask 31744   ;;  %v527_v2 = vld [vmem:[%s10964_s22 + $0x8] sm:$0xff]  ;;  %v528_v3 = vld [vmem:[%s10964_s22 + $0x10] sm:$0xff] }
  0x25   : > { %472 = vst [vmem:[#allocation3] sm:$0xff] %v10862_v0  ;;  %v529_v4 = vld [vmem:[%s10964_s22 + $0x18] sm:$0xff]  ;;  %v530_v5 = vld [vmem:[%s10964_s22 + $0x20] sm:$0xff]  ;;  %v531_v6 = vld [vmem:[%s10964_s22 + $0x28] sm:$0xff] }
  0x26   : > { %473 = vst [vmem:[#allocation3 + $0x8] sm:$0xff] %v10862_v0  ;;  %v532_v7 = vld [vmem:[%s10964_s22 + $0x30] sm:$0xff]  ;;  %v533_v8 = vld [vmem:[%s10964_s22 + $0x38] sm:$0xff]  ;;  %v534_v9 = vld [vmem:[%s10964_s22 + $0x40] sm:$0xff] }
  0x27   : > { %474 = vst [vmem:[#allocation3 + $0x10] sm:$0x3] %v10862_v0  ;;  %v535_v10 = vld [vmem:[%s10964_s22 + $0x48] sm:$0xff]  ;;  %v536_v11 = vld [vmem:[%s10964_s22 + $0x50] sm:$0xff]  ;;  %v537_v12 = vld [vmem:[%s10964_s22 + $0x58] sm:$0xff] }
  0x28   : > { %475 = vst [vmem:[#allocation3 + $0x18] sm:$0xff] %v10862_v0  ;;  %v538_v13 = vld [vmem:[%s10964_s22 + $0x60] sm:$0xff]  ;;  %v539_v14 = vld [vmem:[%s10964_s22 + $0x68] sm:$0xff]  ;;  %v540_v15 = vld [vmem:[%s10964_s22 + $0x70] sm:$0xff] }
  0x29   : > { %476 = vst [vmem:[#allocation3 + $0x20] sm:$0xff] %v10862_v0  ;;  %v541_v16 = vld [vmem:[%s10964_s22 + $0x78] sm:$0xff]  ;;  %v542_v17 = vld [vmem:[%s10964_s22 + $0x80] sm:$0xff]  ;;  %v543_v18 = vld [vmem:[%s10964_s22 + $0x88] sm:$0xff] }
  0x2a   : > { %477 = vst [vmem:[#allocation3 + $0x28] sm:$0x3] %v10862_v0  ;;  %v544_v19 = vld [vmem:[%s10964_s22 + $0x90] sm:$0xff]  ;;  %v545_v20 = vld [vmem:[%s10964_s22 + $0x98] sm:$0xff]  ;;  %v546_v21 = vld [vmem:[%s10964_s22 + $0xa0] sm:$0xff] }
  0x2b   : > { %478 = vst [vmem:[#allocation3 + $0x30] sm:$0xff] %v10862_v0  ;;  %v547_v22 = vld [vmem:[%s10964_s22 + $0xa8] sm:$0xff]  ;;  %v548_v23 = vld [vmem:[%s10964_s22 + $0xb0] sm:$0xff]  ;;  %v549_v24 = vld [vmem:[%s10964_s22 + $0xb8] sm:$0xff] }
  0x2c   : > { %479 = vst [vmem:[#allocation3 + $0x38] sm:$0xff] %v10862_v0  ;;  %v550_v25 = vld [vmem:[%s10964_s22 + $0xc0] sm:$0xff]  ;;  %v551_v26 = vld [vmem:[%s10964_s22 + $0xc8] sm:$0xff]  ;;  %v552_v27 = vld [vmem:[%s10964_s22 + $0xd0] sm:$0xff] }
  0x2d   : > { %480 = vst [vmem:[#allocation3 + $0x40] sm:$0x3] %v10862_v0  ;;  %v553_v28 = vld [vmem:[%s10964_s22 + $0xd8] sm:$0xff]  ;;  %v554_v29 = vld [vmem:[%s10964_s22 + $0xe0] sm:$0xff]  ;;  %v555_v30 = vld [vmem:[%s10964_s22 + $0xe8] sm:$0xff] }
  0x2e   : > { %481 = vst [vmem:[#allocation3 + $0x48] sm:$0xff] %v10862_v0  ;;  %v556_v31 = vld [vmem:[%s10964_s22 + $0xf0] sm:$0xff]  ;;  %v557_v32 = vld [vmem:[%s10964_s22 + $0xf8] sm:$0xff] }
  0x2f   : > { %482 = vst [vmem:[#allocation3 + $0x50] sm:$0xff] %v10862_v0 }
  0x30   : > { %483 = vst [vmem:[#allocation3 + $0x58] sm:$0x3] %v10862_v0 }
  0x31   : > { %484 = vst [vmem:[#allocation3 + $0x60] sm:$0xff] %v10862_v0 }
  0x32   : > { %485 = vst [vmem:[#allocation3 + $0x68] sm:$0xff] %v10862_v0 }
  0x33   : > { %486 = vst [vmem:[#allocation3 + $0x70] sm:$0x3] %v10862_v0 }
  0x34   : > { %487 = vst [vmem:[#allocation3 + $0x78] sm:$0xff] %v10862_v0 }
  0x35   : > { %488 = vst [vmem:[#allocation3 + $0x80] sm:$0xff] %v10862_v0 }
  0x36   : > { %489 = vst [vmem:[#allocation3 + $0x88] sm:$0x3] %v10862_v0 }
  0x37   : > { %490 = vst [vmem:[#allocation3 + $0x90] sm:$0xff] %v10862_v0 }
  0x38   : > { %491 = vst [vmem:[#allocation3 + $0x98] sm:$0xff] %v10862_v0 }
  0x39   : > { %492 = vst [vmem:[#allocation3 + $0xa0] sm:$0x3] %v10862_v0 }
  0x3a   : > { %493 = vst [vmem:[#allocation3 + $0xa8] sm:$0xff] %v10862_v0 }
  0x3b   : > { %494 = vst [vmem:[#allocation3 + $0xb0] sm:$0xff] %v10862_v0 }
  0x3c   : > { %495 = vst [vmem:[#allocation3 + $0xb8] sm:$0x3] %v10862_v0 }
  0x3d   : > { %496 = vst [vmem:[#allocation3 + $0xc0] sm:$0xff] %v10862_v0 }
  0x3e   : > { %497 = vst [vmem:[#allocation3 + $0xc8] sm:$0xff] %v10862_v0 }
  0x3f   : > { %498 = vst [vmem:[#allocation3 + $0xd0] sm:$0x3] %v10862_v0 }
  0x40   : > { %499 = vst [vmem:[#allocation3 + $0xd8] sm:$0xff] %v10862_v0 }
  0x41   : > { %500 = vst [vmem:[#allocation3 + $0xe0] sm:$0xff] %v10862_v0 }
  0x42   : > { %501 = vst [vmem:[#allocation3 + $0xe8] sm:$0x3] %v10862_v0 }
  0x43   : > { %502 = vst [vmem:[#allocation3 + $0xf0] sm:$0xff] %v10862_v0 }
  0x44   : > { %503 = vst [vmem:[#allocation3 + $0xf8] sm:$0xff] %v10862_v0 }
  0x45   : > { %504 = vst [vmem:[#allocation3 + $0x100] sm:$0x3] %v10862_v0 }
  0x46   : > { %505 = vst [vmem:[#allocation3 + $0x108] sm:$0xff] %v10862_v0 }
  0x47   : > { %506 = vst [vmem:[#allocation3 + $0x110] sm:$0xff] %v10862_v0 }
  0x48   : > { %507 = vst [vmem:[#allocation3 + $0x118] sm:$0x3] %v10862_v0 }
  0x49   : > { %508 = vst [vmem:[#allocation3 + $0x120] sm:$0xff] %v10862_v0 }
  0x4a   : > { %509 = vst [vmem:[#allocation3 + $0x128] sm:$0xff] %v10862_v0 }
  0x4b   : > { %510 = vst [vmem:[#allocation3 + $0x130] sm:$0x3] %v10862_v0 }
  0x4c   : > { %511 = vst [vmem:[#allocation3 + $0x138] sm:$0xff] %v10862_v0 }
  0x4d   : > { %512 = vst [vmem:[#allocation3 + $0x140] sm:$0xff] %v10862_v0 }
  0x4e   : > { %513 = vst [vmem:[#allocation3 + $0x148] sm:$0x3] %v10862_v0 }
  0x4f   : > { %514 = vst [vmem:[#allocation3 + $0x150] sm:$0xff] %v10862_v0 }
  0x50   : > { %515 = vst [vmem:[#allocation3 + $0x158] sm:$0xff] %v10862_v0 }
  0x51   : > { %516 = vst [vmem:[#allocation3 + $0x160] sm:$0x3] %v10862_v0 }
  0x52   : > { %517 = vst [vmem:[#allocation3 + $0x168] sm:$0xff] %v10862_v0 }
  0x53   : > { %518 = vst [vmem:[#allocation3 + $0x170] sm:$0xff] %v10862_v0 }
  0x54   : > { %519 = vst [vmem:[#allocation3 + $0x178] sm:$0x3] %v10862_v0 }
  0x55   : > { %520 = vst [vmem:[#allocation3 + $0x180] sm:$0xff] %v10862_v0 }
  0x56   : > { %521 = vst [vmem:[#allocation3 + $0x188] sm:$0xff] %v10862_v0 }
  0x57   : > { %522 = vst [vmem:[#allocation3 + $0x190] sm:$0x3] %v10862_v0 }
  0x58   : > { %523 = vst [vmem:[#allocation3 + $0x198] sm:$0xff] %v10862_v0 }
  0x59   : > { %524 = vst [vmem:[#allocation3 + $0x1a0] sm:$0xff] %v10862_v0 }
  0x5a   : > { %525 = vst [vmem:[#allocation3 + $0x1a8] sm:$0x3] %v10862_v0 }
  0x5b   : > { %559 = vst.msk [vmem:[#allocation2] sm:$0xff] %vm558_vm0, %v526_v1 }
  0x5c   : > { %560 = vst.msk [vmem:[#allocation2 + $0x8] sm:$0xff] %vm558_vm0, %v527_v2 }
  0x5d   : > { %561 = vst.msk [vmem:[#allocation2 + $0x10] sm:$0xff] %vm558_vm0, %v528_v3 }
  0x5e   : > { %562 = vst.msk [vmem:[#allocation2 + $0x18] sm:$0xff] %vm558_vm0, %v529_v4 }
  0x5f   : > { %563 = vst.msk [vmem:[#allocation2 + $0x20] sm:$0xff] %vm558_vm0, %v530_v5 }
  0x60   : > { %564 = vst.msk [vmem:[#allocation2 + $0x28] sm:$0xff] %vm558_vm0, %v531_v6 }
  0x61   : > { %565 = vst.msk [vmem:[#allocation2 + $0x30] sm:$0xff] %vm558_vm0, %v532_v7 }
  0x62   : > { %566 = vst.msk [vmem:[#allocation2 + $0x38] sm:$0xff] %vm558_vm0, %v533_v8 }
  0x63   : > { %567 = vst.msk [vmem:[#allocation2 + $0x40] sm:$0xff] %vm558_vm0, %v534_v9 }
  0x64   : > { %568 = vst.msk [vmem:[#allocation2 + $0x48] sm:$0xff] %vm558_vm0, %v535_v10 }
  0x65   : > { %569 = vst.msk [vmem:[#allocation2 + $0x50] sm:$0xff] %vm558_vm0, %v536_v11 }
  0x66   : > { %570 = vst.msk [vmem:[#allocation2 + $0x58] sm:$0xff] %vm558_vm0, %v537_v12 }
  0x67   : > { %571 = vst.msk [vmem:[#allocation2 + $0x60] sm:$0xff] %vm558_vm0, %v538_v13 }
  0x68   : > { %572 = vst.msk [vmem:[#allocation2 + $0x68] sm:$0xff] %vm558_vm0, %v539_v14 }
  0x69   : > { %573 = vst.msk [vmem:[#allocation2 + $0x70] sm:$0xff] %vm558_vm0, %v540_v15 }
  0x6a   : > { %574 = vst.msk [vmem:[#allocation2 + $0x78] sm:$0xff] %vm558_vm0, %v541_v16 }
  0x6b   : > { %575 = vst.msk [vmem:[#allocation2 + $0x80] sm:$0xff] %vm558_vm0, %v542_v17 }
  0x6c   : > { %576 = vst.msk [vmem:[#allocation2 + $0x88] sm:$0xff] %vm558_vm0, %v543_v18 }
  0x6d   : > { %577 = vst.msk [vmem:[#allocation2 + $0x90] sm:$0xff] %vm558_vm0, %v544_v19 }
  0x6e   : > { %578 = vst.msk [vmem:[#allocation2 + $0x98] sm:$0xff] %vm558_vm0, %v545_v20 }
  0x6f   : > { %579 = vst.msk [vmem:[#allocation2 + $0xa0] sm:$0xff] %vm558_vm0, %v546_v21 }
  0x70   : > { %580 = vst.msk [vmem:[#allocation2 + $0xa8] sm:$0xff] %vm558_vm0, %v547_v22 }
  0x71   : > { %581 = vst.msk [vmem:[#allocation2 + $0xb0] sm:$0xff] %vm558_vm0, %v548_v23 }
  0x72   : > { %582 = vst.msk [vmem:[#allocation2 + $0xb8] sm:$0xff] %vm558_vm0, %v549_v24 }
  0x73   : > { %583 = vst.msk [vmem:[#allocation2 + $0xc0] sm:$0xff] %vm558_vm0, %v550_v25 }
  0x74   : > { %584 = vst.msk [vmem:[#allocation2 + $0xc8] sm:$0xff] %vm558_vm0, %v551_v26 }
  0x75   : > { %585 = vst.msk [vmem:[#allocation2 + $0xd0] sm:$0xff] %vm558_vm0, %v552_v27 }
  0x76   : > { %586 = vst.msk [vmem:[#allocation2 + $0xd8] sm:$0xff] %vm558_vm0, %v553_v28 }
  0x77   : > { %587 = vst.msk [vmem:[#allocation2 + $0xe0] sm:$0xff] %vm558_vm0, %v554_v29 }
  0x78   : > { %588 = vst.msk [vmem:[#allocation2 + $0xe8] sm:$0xff] %vm558_vm0, %v555_v30 }
  0x79   : > { %589 = vst.msk [vmem:[#allocation2 + $0xf0] sm:$0xff] %vm558_vm0, %v556_v31 }
  0x7a   : > { %590 = vst.msk [vmem:[#allocation2 + $0xf8] sm:$0xff] %vm558_vm0, %v557_v32 }
  0x7b PF: > { %v639_v33 = vld [vmem:[%s14075_s5] sm:$0x3]  ;;  %vm721_vm1 = vcmask 1041408   ;;  %v592_v35 = vld [vmem:[#allocation2 + $0x8] sm:$0xff]  ;;  %vm672_vm2 = vcmask 31744   ;;  %v593_v38 = vld [vmem:[#allocation2 + $0x10] sm:$0xff]  ;;  %s11153_s0 = scalar_lea.vmem %s14073_s3, %s10843_s17 }
  0x7c   : > { %v591_v34 = vld [vmem:[#allocation2] sm:$0xff]  ;;  %v723_v36 = vsel %vm721_vm1, %v639_v33, 0  ;;  %v594_v39 = vld [vmem:[#allocation2 + $0x18] sm:$0xff]  ;;  %v596_v42 = vld [vmem:[#allocation2 + $0x28] sm:$0xff]  ;;  %s10117_s25 = sshll.u32 %s10843_s17, 7  ;;  %p10118_p11 = scmp.ne.s32.totalorder %s10843_s17, 7 }
  0x7d   : > { %v623_v37 = vpack.c.bf16 %v592_v35, %v591_v34  ;;  %732 = vmatpush.bf16.msra.mxu0 %v723_v36  ;;  %v624_v40 = vpack.c.bf16 %v594_v39, %v593_v38  ;;  %v595_v41 = vld [vmem:[#allocation2 + $0x20] sm:$0xff]  ;;  %v597_v44 = vld [vmem:[#allocation2 + $0x30] sm:$0xff]  ;;  %v598_v45 = vld [vmem:[#allocation2 + $0x38] sm:$0xff]  ;;  %s7944_s26 = sadd.s32 1, %s10117_s25  ;;  %s7946_s27 = sadd.s32 2, %s10117_s25 }
  0x7e   : > { %v625_v43 = vpack.c.bf16 %v596_v42, %v595_v41  ;;  %v626_v46 = vpack.c.bf16 %v598_v45, %v597_v44  ;;  %v599_v47 = vld [vmem:[#allocation2 + $0x40] sm:$0xff]  ;;  %v600_v48 = vld [vmem:[#allocation2 + $0x48] sm:$0xff]  ;;  %v10283_v50 = vld [vmem:[%s14076_s6 + $0x78] sm:$0xff]  ;;  %s7943_s29 = sld [smem:[#allocation5 + %s10117_s25]] }
  0x7f   : > { %v627_v49 = vpack.c.bf16 %v600_v48, %v599_v47  ;;  %v10291_v51 = vld [vmem:[%s14076_s6 + $0xb8] sm:$0xff]  ;;  %3276 = vmatpush.bf16.msra.mxu2 %v10283_v50  ;;  %v10282_v53 = vld [vmem:[%s14076_s6 + $0x70] sm:$0xff]  ;;  %v10281_v56 = vld [vmem:[%s14076_s6 + $0x68] sm:$0xff]  ;;  %s7947_s20 = sld [smem:[#allocation5 + %s7946_s27]] }
  0x80   : > { %8341 = vmatmul.msk.bf16.vlgmr.msra.gmra.mxu0 %vm672_vm2, %v623_v37  ;;  %v10275_v52 = vld [vmem:[%s14076_s6 + $0x38] sm:$0xff]  ;;  %3365 = vmatpush.bf16.msra.mxu3 %v10291_v51  ;;  %v10290_v54 = vld [vmem:[%s14076_s6 + $0xb0] sm:$0xff]  ;;  %v10289_v57 = vld [vmem:[%s14076_s6 + $0xa8] sm:$0xff] }
  0x81   : > { %3187 = vmatpush.bf16.msra.mxu1 %v10275_v52  ;;  %v10274_v55 = vld [vmem:[%s14076_s6 + $0x30] sm:$0xff]  ;;  %v10273_v58 = vld [vmem:[%s14076_s6 + $0x28] sm:$0xff]  ;;  %v602_v60 = vld [vmem:[#allocation2 + $0x58] sm:$0xff] }
  0x82   : > { %v601_v59 = vld [vmem:[#allocation2 + $0x50] sm:$0xff]  ;;  %v10280_v61 = vld [vmem:[%s14076_s6 + $0x60] sm:$0xff]  ;;  %v10279_v1 = vld [vmem:[%s14076_s6 + $0x58] sm:$0xff] }
  0x83   : > { %3277 = vmatpush.bf16.msra.mxu2 %v10282_v53  ;;  %v10288_v62 = vld [vmem:[%s14076_s6 + $0xa0] sm:$0xff]  ;;  %v628_v63 = vpack.c.bf16 %v602_v60, %v601_v59  ;;  %v10287_v2 = vld [vmem:[%s14076_s6 + $0x98] sm:$0xff]  ;;  %v10278_v4 = vld [vmem:[%s14076_s6 + $0x50] sm:$0xff] }
  0x84   : > { %3366 = vmatpush.bf16.msra.mxu3 %v10290_v54  ;;  %v10272_v0 = vld [vmem:[%s14076_s6 + $0x20] sm:$0xff]  ;;  %v10271_v3 = vld [vmem:[%s14076_s6 + $0x18] sm:$0xff]  ;;  %v10286_v5 = vld [vmem:[%s14076_s6 + $0x90] sm:$0xff] }
  0x85   : > { %3188 = vmatpush.bf16.msra.mxu1 %v10274_v55  ;;  %v945_v6 = vld [vmem:[#allocation3 + $0x1] sm:$0xff]  ;;  %v946_v7 = vld [vmem:[#allocation3 + $0x9] sm:$0xff]  ;;  %v606_v38 = vld [vmem:[#allocation2 + $0x78] sm:$0xff] }
  0x86   : > { %v10270_v8 = vld [vmem:[%s14076_s6 + $0x10] sm:$0xff]  ;;  %v977_v9 = vpack.c.bf16 %v945_v6, %v945_v6  ;;  %v978_v10 = vpack.c.bf16 %v946_v7, %v946_v7  ;;  %v10277_v11 = vld [vmem:[%s14076_s6 + $0x48] sm:$0xff]  ;;  %v849_v17 = vld [vmem:[#allocation3] sm:$0xff] }
  0x87   : > { %3278 = vmatpush.bf16.msra.mxu2 %v10281_v56  ;;  %v1041_v12 = vld [vmem:[#allocation3 + $0x2] sm:$0xff]  ;;  %v1042_v13 = vld [vmem:[#allocation3 + $0xa] sm:$0xff]  ;;  %v881_v19 = vpack.c.bf16 %v849_v17, %v849_v17  ;;  %v10307_v41 = vld [vmem:[%s14076_s6 + $0x138] sm:$0xff] }
  0x88   : > { %3367 = vmatpush.bf16.msra.mxu3 %v10289_v57  ;;  %v10285_v14 = vld [vmem:[%s14076_s6 + $0x88] sm:$0xff]  ;;  %1009 = vst [vmem:[#allocation4 + $0x4] sm:$0xf] %v977_v9  ;;  %v1073_v15 = vpack.c.bf16 %v1041_v12, %v1041_v12  ;;  %v1074_v16 = vpack.c.bf16 %v1042_v13, %v1042_v13  ;;  %v603_v21 = vld [vmem:[#allocation2 + $0x60] sm:$0xff]  ;;  %v605_v37 = vld [vmem:[#allocation2 + $0x70] sm:$0xff] }
  0x89   : > { %3189 = vmatpush.bf16.msra.mxu1 %v10273_v58  ;;  %1010 = vst [vmem:[#allocation4 + $0x28] sm:$0xf] %v978_v10  ;;  %v850_v18 = vld [vmem:[#allocation3 + $0x8] sm:$0xff]  ;;  %v10276_v24 = vld [vmem:[%s14076_s6 + $0x40] sm:$0xff]  ;;  %v630_v39 = vpack.c.bf16 %v606_v38, %v605_v37  ;;  %v609_v55 = vld [vmem:[#allocation2 + $0x90] sm:$0xff] }
  0x8a   : > { %1105 = vst [vmem:[#allocation4 + $0x8] sm:$0xf] %v1073_v15  ;;  %v882_v20 = vpack.c.bf16 %v850_v18, %v850_v18  ;;  %v604_v22 = vld [vmem:[#allocation2 + $0x68] sm:$0xff]  ;;  %v10284_v26 = vld [vmem:[%s14076_s6 + $0x80] sm:$0xff]  ;;  %v610_v56 = vld [vmem:[#allocation2 + $0x98] sm:$0xff] }
  0x8b   : > { %3279 = vmatpush.bf16.msra.mxu2 %v10280_v61  ;;  %1106 = vst [vmem:[#allocation4 + $0x2c] sm:$0xf] %v1074_v16  ;;  %v10269_v23 = vld [vmem:[%s14076_s6 + $0x8] sm:$0xff]  ;;  %v629_v25 = vpack.c.bf16 %v604_v22, %v603_v21  ;;  %v10268_v30 = vld [vmem:[%s14076_s6] sm:$0xff]  ;;  %v642_v57 = vld [vmem:[%s10969_s28 + $0x10] sm:$0xff]  ;;  %v632_v59 = vpack.c.bf16 %v610_v56, %v609_v55 }
  0x8c   : > { %3368 = vmatpush.bf16.msra.mxu3 %v10288_v62  ;;  %913 = vst [vmem:[#allocation4] sm:$0xf] %v881_v19  ;;  %v607_v42 = vld [vmem:[#allocation2 + $0x80] sm:$0xff]  ;;  %v647_v55 = vld [vmem:[%s10969_s28 + $0x38] sm:$0xff] }
  0x8d   : > { %3190 = vmatpush.bf16.msra.mxu1 %v10272_v0  ;;  %914 = vst [vmem:[#allocation4 + $0x24] sm:$0xf] %v882_v20  ;;  %v640_v44 = vld [vmem:[%s10969_s28] sm:$0xff] }
  0x8e   : > { %v644_v17 = vld [vmem:[%s10969_s28 + $0x20] sm:$0xff] }
  0x8f   : > { %3280 = vmatpush.bf16.msra.mxu2 %v10279_v1  ;;  %v10124_v27 = vld [vmem:[#allocation4 + $0x4] sm:$0xf] }
  0x90   : > { %8342 = vmatmul.msk.bf16.gmra.mxu0 %vm672_vm2, %v624_v40  ;;  %3369 = vmatpush.bf16.msra.mxu3 %v10287_v2  ;;  %v8361_v28 = vld [vmem:[#allocation4 + $0x24] sm:$0xf0]  ;;  %4468 = vst [vmem:[#allocation4 + $0x4] sm:$0xf] %v977_v9 }
  0x91   : > { %3191 = vmatpush.bf16.msra.mxu1 %v10271_v3  ;;  %v8364_v29 = vor.u32 %v10124_v27, %v8361_v28  ;;  %v8367_v31 = vld [vmem:[#allocation4 + $0x8] sm:$0xf]  ;;  %4469 = vst [vmem:[#allocation4 + $0x28] sm:$0xf] %v978_v10 }
  0x92   : > { %v10129_v32 = vld [vmem:[#allocation4 + $0x28] sm:$0xf0]  ;;  %4564 = vst [vmem:[#allocation4 + $0x8] sm:$0xf] %v1073_v15  ;;  %v612_v15 = vld [vmem:[#allocation2 + $0xa8] sm:$0xff] }
  0x93   : > { %3281 = vmatpush.bf16.msra.mxu2 %v10278_v4  ;;  %v8368_v33 = vor.u32 %v10129_v32, %v8367_v31  ;;  %v8359_v34 = vld [vmem:[#allocation4] sm:$0xf]  ;;  %4565 = vst [vmem:[#allocation4 + $0x2c] sm:$0xf] %v1074_v16  ;;  %v10299_v40 = vld [vmem:[%s14076_s6 + $0xf8] sm:$0xff]  ;;  %v645_v32 = vld [vmem:[%s10969_s28 + $0x28] sm:$0xff] }
  0x94   : > { %3370 = vmatpush.bf16.msra.mxu3 %v10286_v5  ;;  %v10128_v35 = vld [vmem:[#allocation4 + $0x20] sm:$0xf0]  ;;  %4372 = vst [vmem:[#allocation4] sm:$0xf] %v881_v19  ;;  %3454 = vmatpush.bf16.msrb.mxu0 %v10299_v40  ;;  %v643_v4 = vld [vmem:[%s10969_s28 + $0x18] sm:$0xff] }
  0x95   : > { %3192 = vmatpush.bf16.msra.mxu1 %v10270_v8  ;;  %v8360_v36 = vor.u32 %v10128_v35, %v8359_v34  ;;  %4373 = vst [vmem:[#allocation4 + $0x24] sm:$0xf] %v882_v20  ;;  %v10298_v5 = vld [vmem:[%s14076_s6 + $0xf0] sm:$0xff] }
  0x96   : > { %v10306_v16 = vld [vmem:[%s14076_s6 + $0x130] sm:$0xff] }
  0x97   : > { %3282 = vmatpush.bf16.msra.mxu2 %v10277_v11  ;;  %v613_v40 = vld [vmem:[#allocation2 + $0xb0] sm:$0xff] }
  0x98   : > { %3371 = vmatpush.bf16.msra.mxu3 %v10285_v14  ;;  %3455 = vmatpush.bf16.msrb.mxu0 %v10298_v5  ;;  %v611_v14 = vld [vmem:[#allocation2 + $0xa0] sm:$0xff] }
  0x99   : > { %3193 = vmatpush.bf16.msra.mxu1 %v10269_v23  ;;  %v633_v19 = vpack.c.bf16 %v612_v15, %v611_v14 }
  0x9b   : > { %3283 = vmatpush.bf16.msra.mxu2 %v10276_v24 }
  0x9c   : > { %3372 = vmatpush.bf16.msra.mxu3 %v10284_v26 }
  0x9d   : > { %3194 = vmatpush.bf16.msra.mxu1 %v10268_v30 }
  0x9e   : > { %3284 = vmatmul.bf16.vlgmr.msra.gmra.mxu2 %v8364_v29 }
  0x9f   : > { %3373 = vmatmul.bf16.vlgmr.msra.gmra.mxu3 %v8368_v33 }
  0xa0   : > { %8343 = vmatmul.msk.bf16.gmra.mxu0 %vm672_vm2, %v625_v43  ;;  %3195 = vmatmul.bf16.vlgmr.msra.gmra.mxu1 %v8360_v36  ;;  %v608_v43 = vld [vmem:[#allocation2 + $0x88] sm:$0xff] }
  0xa1   : > { %3543 = vmatpush.bf16.msrb.mxu1 %v10307_v41  ;;  %v631_v45 = vpack.c.bf16 %v608_v43, %v607_v42  ;;  %v614_v41 = vld [vmem:[#allocation2 + $0xb8] sm:$0xff]  ;;  %v646_v42 = vld [vmem:[%s10969_s28 + $0x30] sm:$0xff] }
  0xa5   : > { %3544 = vmatpush.bf16.msrb.mxu1 %v10306_v16 }
  0xb0   : > { %8344 = vmatmul.msk.bf16.gmra.mxu0 %vm672_vm2, %v626_v46 }
  0xc0   : > { %8345 = vmatmul.msk.bf16.gmra.mxu0 %vm672_vm2, %v627_v49  ;;  %v641_v49 = vld [vmem:[%s10969_s28 + $0x8] sm:$0xff] }
  0xd0   : > { %8346 = vmatmul.msk.bf16.gmra.mxu0 %vm672_vm2, %v628_v63 }
  0xe0   : > { %8347 = vmatmul.msk.bf16.gmra.mxu0 %vm672_vm2, %v629_v25 }
  0xf0   : > { %8348 = vmatmul.msk.bf16.gmra.mxu0 %vm672_vm2, %v630_v39 }
  0xfd   : > { %v734_v46 = vpop.f32.mrf.mxu0 }
  0xfe   : > { %v11136_v47 = vadd.f32 %v734_v46, %v640_v44  ;;  %v634_v44 = vpack.c.bf16 %v614_v41, %v613_v40  ;;  %v617_v40 = vld [vmem:[#allocation2 + $0xd0] sm:$0xff]  ;;  %v618_v41 = vld [vmem:[#allocation2 + $0xd8] sm:$0xff] }
 0x100   : > { %14120 = vst [vmem:[#allocation11_spill] sm:$0xff] %v11136_v47  ;;  %v1265_v48 = vpack.c.bf16 %v11136_v47, %v11136_v47  ;;  %8349 = vmatmul.msk.bf16.gmra.mxu0 %vm672_vm2, %v631_v45 }
 0x101   : > { %817 = vst [vmem:[#allocation3 + $0x19] sm:$0xff] %v11136_v47 }
 0x102   : > { %1297 = vst [vmem:[#allocation4 + $0x10] sm:$0xf] %v1265_v48 }
 0x103   : > { %1011 = vst [vmem:[#allocation4 + $0x4c] sm:$0xf] %v1265_v48 }
 0x105   : > { %v736_v50 = vpop.f32.mrf.mxu0 }
 0x106   : > { %v11143_v51 = vadd.f32 %v736_v50, %v641_v49 }
 0x108   : > { %14121 = vst [vmem:[#allocation12_spill] sm:$0xff] %v11143_v51  ;;  %v851_v52 = vld [vmem:[#allocation3 + $0x18] sm:$0xff]  ;;  %v1266_v54 = vpack.c.bf16 %v11143_v51, %v11143_v51 }
 0x109   : > { %v1169_v53 = vpack.c.bf16 %v851_v52, %v851_v52  ;;  %818 = vst [vmem:[#allocation3 + $0x21] sm:$0xff] %v11143_v51 }
 0x10a   : > { %1298 = vst [vmem:[#allocation4 + $0x34] sm:$0xf] %v1266_v54  ;;  %v10133_v6 = vld [vmem:[#allocation4 + $0x4c] sm:$0xf] }
 0x10b   : > { %1201 = vst [vmem:[#allocation4 + $0xc] sm:$0xf] %v1169_v53 }
 0x10c   : > { %915 = vst [vmem:[#allocation4 + $0x48] sm:$0xf] %v1169_v53 }
 0x10d   : > { %v739_v58 = vpop.f32.mrf.mxu0  ;;  %1012 = vst [vmem:[#allocation4 + $0x70] sm:$0xf] %v1266_v54 }
 0x10e   : > { %v11155_v60 = vadd.f32 %v739_v58, %v642_v57  ;;  %v10297_v57 = vld [vmem:[%s14076_s6 + $0xe8] sm:$0xff] }
 0x10f   : > { %3456 = vmatpush.bf16.msrb.mxu0 %v10297_v57 }
 0x110   : > { %14122 = vst [vmem:[#allocation13_spill] sm:$0xff] %v11155_v60  ;;  %v852_v61 = vld [vmem:[#allocation3 + $0x20] sm:$0xff]  ;;  %v1267_v3 = vpack.c.bf16 %v11155_v60, %v11155_v60  ;;  %8350 = vmatmul.msk.bf16.gmra.mxu0 %vm672_vm2, %v632_v59 }
 0x111   : > { %v1043_v62 = vld [vmem:[#allocation3 + $0x1a] sm:$0xff]  ;;  %v1044_v63 = vld [vmem:[#allocation3 + $0x22] sm:$0xff]  ;;  %v1170_v0 = vpack.c.bf16 %v852_v61, %v852_v61  ;;  %819 = vst [vmem:[#allocation3 + $0x31] sm:$0xff] %v11155_v60 }
 0x112   : > { %v1361_v1 = vpack.c.bf16 %v1043_v62, %v1043_v62  ;;  %v1362_v2 = vpack.c.bf16 %v1044_v63, %v1044_v63  ;;  %1299 = vst [vmem:[#allocation4 + $0x58] sm:$0xf] %v1267_v3 }
 0x113   : > { %1202 = vst [vmem:[#allocation4 + $0x30] sm:$0xf] %v1170_v0  ;;  %v8395_v20 = vld [vmem:[#allocation4 + $0x48] sm:$0xf] }
 0x114   : > { %1393 = vst [vmem:[#allocation4 + $0x14] sm:$0xf] %v1361_v1  ;;  %v8397_v7 = vld [vmem:[#allocation4 + $0x6c] sm:$0xf0] }
 0x115   : > { %1394 = vst [vmem:[#allocation4 + $0x38] sm:$0xf] %v1362_v2  ;;  %v741_v8 = vpop.f32.mrf.mxu0  ;;  %v8400_v9 = vor.u32 %v10133_v6, %v8397_v7  ;;  %v615_v7 = vld [vmem:[#allocation2 + $0xc0] sm:$0xff] }
 0x116   : > { %1586 = vst [vmem:[#allocation4 + $0x1c] sm:$0xf] %v1267_v3  ;;  %v11165_v10 = vadd.f32 %v741_v8, %v643_v4  ;;  %v616_v8 = vld [vmem:[#allocation2 + $0xc8] sm:$0xff] }
 0x117   : > { %916 = vst [vmem:[#allocation4 + $0x6c] sm:$0xf] %v1170_v0  ;;  %3289 = vmatmul.bf16.gmra.mxu2 %v8400_v9  ;;  %v10305_v9 = vld [vmem:[%s14076_s6 + $0x128] sm:$0xff]  ;;  %v635_v14 = vpack.c.bf16 %v616_v8, %v615_v7 }
 0x118   : > { %14123 = vst [vmem:[#allocation14_spill] sm:$0xff] %v11165_v10  ;;  %v853_v11 = vld [vmem:[#allocation3 + $0x30] sm:$0xff]  ;;  %v1268_v13 = vpack.c.bf16 %v11165_v10, %v11165_v10  ;;  %3545 = vmatpush.bf16.msrb.mxu1 %v10305_v9 }
 0x119   : > { %v1171_v12 = vpack.c.bf16 %v853_v11, %v853_v11  ;;  %820 = vst [vmem:[#allocation3 + $0x39] sm:$0xff] %v11165_v10 }
 0x11a   : > { %1107 = vst [vmem:[#allocation4 + $0x50] sm:$0xf] %v1361_v1 }
 0x11b   : > { %1203 = vst [vmem:[#allocation4 + $0x54] sm:$0xf] %v1171_v12 }
 0x11c   : > { %1490 = vst [vmem:[#allocation4 + $0x18] sm:$0xf] %v1171_v12 }
 0x11d   : > { %1587 = vst [vmem:[#allocation4 + $0x40] sm:$0xf] %v1268_v13  ;;  %v744_v18 = vpop.f32.mrf.mxu0  ;;  %v10127_v10 = vld [vmem:[#allocation4 + $0x1c] sm:$0xf] }
 0x11e   : > { %1300 = vst [vmem:[#allocation4 + $0x7c] sm:$0xf] %v1268_v13  ;;  %v10137_v21 = vld [vmem:[#allocation4 + $0x68] sm:$0xf0]  ;;  %v11174_v22 = vadd.f32 %v744_v18, %v644_v17 }
 0x11f   : > { %1108 = vst [vmem:[#allocation4 + $0x74] sm:$0xf] %v1362_v2  ;;  %v8396_v26 = vor.u32 %v10137_v21, %v8395_v20 }
 0x120   : > { %14124 = vst [vmem:[#allocation15_spill] sm:$0xff] %v11174_v22  ;;  %v854_v23 = vld [vmem:[#allocation3 + $0x38] sm:$0xff]  ;;  %8351 = vmatmul.msk.bf16.gmra.mxu0 %vm672_vm2, %v633_v19  ;;  %v11183_v30 = vpack.c.bf16 %v11174_v22, %v11174_v22 }
 0x121   : > { %v1045_v24 = vld [vmem:[#allocation3 + $0x32] sm:$0xff]  ;;  %v1046_v25 = vld [vmem:[#allocation3 + $0x3a] sm:$0xff]  ;;  %917 = vst [vmem:[#allocation4 + $0x90] sm:$0xf] %v1171_v12  ;;  %v11176_v28 = vpack.c.bf16 %v854_v23, %v854_v23  ;;  %3200 = vmatmul.bf16.gmra.mxu1 %v8396_v26 }
 0x122   : > { %v1364_v27 = vpack.c.bf16 %v1046_v25, %v1046_v25  ;;  %v1650_v29 = vpack.c.bf16 %v1045_v24, %v1045_v24  ;;  %821 = vst [vmem:[#allocation3 + $0x49] sm:$0xff] %v11174_v22  ;;  %v8403_v31 = vld [vmem:[#allocation4 + $0x50] sm:$0xf]  ;;  %v649_v24 = vld [vmem:[%s10969_s28 + $0x48] sm:$0xff] }
 0x123   : > { %1013 = vst [vmem:[#allocation4 + $0x94] sm:$0xf] %v1267_v3  ;;  %v648_v12 = vld [vmem:[%s10969_s28 + $0x40] sm:$0xff] }
 0x124   : > { %1491 = vst [vmem:[#allocation4 + $0x3c] sm:$0xf] %v11176_v28 }
 0x125   : > { %1682 = vst [vmem:[#allocation4 + $0x20] sm:$0xf] %v1650_v29  ;;  %v746_v34 = vpop.f32.mrf.mxu0 }
 0x126   : > { %1683 = vst [vmem:[#allocation4 + $0x44] sm:$0xf] %v1364_v27  ;;  %v10138_v33 = vld [vmem:[#allocation4 + $0x70] sm:$0xf0]  ;;  %v11187_v36 = vadd.f32 %v746_v34, %v645_v32 }
 0x127   : > { %1396 = vst [vmem:[#allocation4 + $0x80] sm:$0xf] %v1364_v27  ;;  %v8404_v35 = vor.u32 %v10138_v33, %v8403_v31 }
 0x128   : > { %1301 = vst [vmem:[#allocation4 + $0xa0] sm:$0xf] %v11183_v30  ;;  %v11193_v39 = vpack.c.bf16 %v11187_v36, %v11187_v36  ;;  %v8431_v48 = vld [vmem:[#allocation4 + $0x90] sm:$0xf] }
 0x129   : > { %14125 = vst [vmem:[#allocation16_spill] sm:$0xff] %v11187_v36  ;;  %v855_v37 = vld [vmem:[#allocation3 + $0x48] sm:$0xff]  ;;  %3378 = vmatmul.bf16.gmra.mxu3 %v8404_v35 }
 0x12a   : > { %1588 = vst [vmem:[#allocation4 + $0x64] sm:$0xf] %v11183_v30  ;;  %v1173_v38 = vpack.c.bf16 %v855_v37, %v855_v37  ;;  %v10142_v58 = vld [vmem:[#allocation4 + $0x94] sm:$0xf] }
 0x12b   : > { %822 = vst [vmem:[#allocation3 + $0x51] sm:$0xff] %v11187_v36 }
 0x12c   : > { %918 = vst [vmem:[#allocation4 + $0xb4] sm:$0xf] %v11176_v28 }
 0x12d   : > { %1205 = vst [vmem:[#allocation4 + $0x9c] sm:$0xf] %v1173_v38  ;;  %v749_v43 = vpop.f32.mrf.mxu0 }
 0x12e   : > { %1492 = vst [vmem:[#allocation4 + $0x60] sm:$0xf] %v1173_v38  ;;  %v11199_v45 = vadd.f32 %v749_v43, %v646_v42  ;;  %v650_v43 = vld [vmem:[%s10969_s28 + $0x50] sm:$0xff] }
 0x12f   : > { %1302 = vst [vmem:[#allocation4 + $0xc4] sm:$0xf] %v11193_v39 }
 0x130   : > { %1589 = vst [vmem:[#allocation4 + $0x88] sm:$0xf] %v11193_v39  ;;  %v11203_v53 = vpack.c.bf16 %v11199_v45, %v11199_v45  ;;  %8352 = vmatmul.msk.bf16.gmra.mxu0 %vm672_vm2, %v634_v44 }
 0x131   : > { %1014 = vst [vmem:[#allocation4 + $0xb8] sm:$0xf] %v1268_v13 }
 0x132   : > { %14126 = vst [vmem:[#allocation17_spill] sm:$0xff] %v11199_v45  ;;  %v1048_v46 = vld [vmem:[#allocation3 + $0x52] sm:$0xff]  ;;  %v1047_v2 = vld [vmem:[#allocation3 + $0x4a] sm:$0xff] }
 0x133   : > { %1109 = vst [vmem:[#allocation4 + $0x98] sm:$0xf] %v1650_v29  ;;  %v856_v49 = vld [vmem:[#allocation3 + $0x50] sm:$0xff]  ;;  %v1366_v50 = vpack.c.bf16 %v1048_v46, %v1048_v46  ;;  %v10146_v52 = vld [vmem:[#allocation4 + $0xb0] sm:$0xf0]  ;;  %v1079_v11 = vpack.c.bf16 %v1047_v2, %v1047_v2  ;;  %v636_v46 = vpack.c.bf16 %v618_v41, %v617_v40  ;;  %v10293_v40 = vld [vmem:[%s14076_s6 + $0xc8] sm:$0xff] }
 0x134   : > { %1110 = vst [vmem:[#allocation4 + $0xbc] sm:$0xf] %v1364_v27  ;;  %v8432_v54 = vor.u32 %v10146_v52, %v8431_v48  ;;  %v11208_v56 = vpack.c.bf16 %v856_v49, %v856_v49 }
 0x135   : > { %823 = vst [vmem:[#allocation3 + $0x61] sm:$0xff] %v11199_v45  ;;  %v751_v61 = vpop.f32.mrf.mxu0 }
 0x136   : > { %1398 = vst [vmem:[#allocation4 + $0xc8] sm:$0xf] %v1366_v50  ;;  %3205 = vmatmul.bf16.gmra.mxu1 %v8432_v54  ;;  %v11215_v0 = vadd.f32 %v751_v61, %v647_v55  ;;  %v10296_v61 = vld [vmem:[%s14076_s6 + $0xe0] sm:$0xff] }
 0x137   : > { %1685 = vst [vmem:[#allocation4 + $0x8c] sm:$0xf] %v1366_v50  ;;  %3457 = vmatpush.bf16.msrb.mxu0 %v10296_v61  ;;  %v654_v61 = vld [vmem:[%s10969_s28 + $0x70] sm:$0xff] }
 0x138   : > { %1303 = vst [vmem:[#allocation4 + $0xe8] sm:$0xf] %v11203_v53  ;;  %v8433_v59 = vld [vmem:[#allocation4 + $0xb4] sm:$0xf0]  ;;  %v11221_v5 = vpack.c.bf16 %v11215_v0, %v11215_v0 }
 0x139   : > { %1590 = vst [vmem:[#allocation4 + $0xac] sm:$0xf] %v11203_v53  ;;  %v8436_v62 = vor.u32 %v10142_v58, %v8433_v59  ;;  %v651_v58 = vld [vmem:[%s10969_s28 + $0x58] sm:$0xff] }
 0x13a   : > { %v8439_v63 = vld [vmem:[#allocation4 + $0x98] sm:$0xf]  ;;  %14127 = vst [vmem:[#allocation18_spill] sm:$0xff] %v11215_v0 }
 0x13b   : > { %919 = vst [vmem:[#allocation4 + $0xd8] sm:$0xf] %v1173_v38  ;;  %v10147_v1 = vld [vmem:[#allocation4 + $0xb8] sm:$0xf0]  ;;  %3294 = vmatmul.bf16.gmra.mxu2 %v8436_v62 }
 0x13c   : > { %920 = vst [vmem:[#allocation4 + $0xfc] sm:$0xf] %v11208_v56  ;;  %v8440_v3 = vor.u32 %v10147_v1, %v8439_v63  ;;  %v857_v4 = vld [vmem:[#allocation3 + $0x60] sm:$0xff] }
 0x13d   : > { %824 = vst [vmem:[#allocation3 + $0x69] sm:$0xff] %v11215_v0  ;;  %v1175_v6 = vpack.c.bf16 %v857_v4, %v857_v4  ;;  %v754_v13 = vpop.f32.mrf.mxu0 }
 0x13e   : > { %1015 = vst [vmem:[#allocation4 + $0xdc] sm:$0xf] %v11183_v30  ;;  %3383 = vmatmul.bf16.gmra.mxu3 %v8440_v3  ;;  %v11231_v17 = vadd.f32 %v754_v13, %v648_v12  ;;  %v619_v12 = vld [vmem:[#allocation2 + $0xe0] sm:$0xff]  ;;  %v620_v13 = vld [vmem:[#allocation2 + $0xe8] sm:$0xff] }
 0x13f   : > { %1304 = vst [vmem:[#allocation4 + $0x10c] sm:$0xf] %v11221_v5 }
 0x140   : > { %1207 = vst [vmem:[#allocation4 + $0xe4] sm:$0xf] %v1175_v6  ;;  %v11235_v23 = vpack.c.bf16 %v11231_v17, %v11231_v17  ;;  %8353 = vmatmul.msk.bf16.gmra.mxu0 %vm672_vm2, %v635_v14  ;;  %v10304_v14 = vld [vmem:[%s14076_s6 + $0x120] sm:$0xff] }
 0x141   : > { %1494 = vst [vmem:[#allocation4 + $0xa8] sm:$0xf] %v1175_v6  ;;  %3546 = vmatpush.bf16.msrb.mxu1 %v10304_v14 }
 0x142   : > { %1591 = vst [vmem:[#allocation4 + $0xd0] sm:$0xf] %v11221_v5  ;;  %v8467_v15 = vld [vmem:[#allocation4 + $0xd8] sm:$0xf] }
 0x143   : > { %v10155_v16 = vld [vmem:[#allocation4 + $0xf8] sm:$0xf0]  ;;  %1016 = vst [vmem:[#allocation4 + $0x100] sm:$0xf] %v11193_v39 }
 0x144   : > { %14128 = vst [vmem:[#allocation19_spill] sm:$0xff] %v11231_v17  ;;  %v1050_v18 = vld [vmem:[#allocation3 + $0x6a] sm:$0xff]  ;;  %v8468_v19 = vor.u32 %v10155_v16, %v8467_v15  ;;  %v1049_v34 = vld [vmem:[#allocation3 + $0x62] sm:$0xff] }
 0x145   : > { %1111 = vst [vmem:[#allocation4 + $0xe0] sm:$0xf] %v1079_v11  ;;  %v858_v20 = vld [vmem:[#allocation3 + $0x68] sm:$0xff]  ;;  %v1368_v21 = vpack.c.bf16 %v1050_v18, %v1050_v18  ;;  %v756_v29 = vpop.f32.mrf.mxu0  ;;  %v1081_v42 = vpack.c.bf16 %v1049_v34, %v1049_v34  ;;  %v652_v16 = vld [vmem:[%s10969_s28 + $0x60] sm:$0xff]  ;;  %v10295_v18 = vld [vmem:[%s14076_s6 + $0xd8] sm:$0xff] }
 0x146   : > { %1112 = vst [vmem:[#allocation4 + $0x104] sm:$0xf] %v1366_v50  ;;  %3210 = vmatmul.bf16.gmra.mxu1 %v8468_v19  ;;  %v11240_v25 = vpack.c.bf16 %v858_v20, %v858_v20  ;;  %v10151_v26 = vld [vmem:[#allocation4 + $0xdc] sm:$0xf]  ;;  %v11244_v32 = vadd.f32 %v756_v29, %v649_v24  ;;  %v637_v20 = vpack.c.bf16 %v620_v13, %v619_v12 }
 0x147   : > { %825 = vst [vmem:[#allocation3 + $0x79] sm:$0xff] %v11231_v17  ;;  %3458 = vmatpush.bf16.msrb.mxu0 %v10295_v18 }
 0x148   : > { %1400 = vst [vmem:[#allocation4 + $0x110] sm:$0xf] %v1368_v21  ;;  %v11250_v38 = vpack.c.bf16 %v11244_v32, %v11244_v32 }
 0x149   : > { %1687 = vst [vmem:[#allocation4 + $0xd4] sm:$0xf] %v1368_v21 }
 0x14a   : > { %1305 = vst [vmem:[#allocation4 + $0x130] sm:$0xf] %v11235_v23  ;;  %v8469_v27 = vld [vmem:[#allocation4 + $0xfc] sm:$0xf0] }
 0x14b   : > { %1592 = vst [vmem:[#allocation4 + $0xf4] sm:$0xf] %v11235_v23  ;;  %v8472_v30 = vor.u32 %v10151_v26, %v8469_v27 }
 0x14c   : > { %v8475_v31 = vld [vmem:[#allocation4 + $0xe0] sm:$0xf]  ;;  %14129 = vst [vmem:[#allocation20_spill] sm:$0xff] %v11244_v32 }
 0x14d   : > { %921 = vst [vmem:[#allocation4 + $0x120] sm:$0xf] %v1175_v6  ;;  %v10156_v33 = vld [vmem:[#allocation4 + $0x100] sm:$0xf0]  ;;  %3299 = vmatmul.bf16.gmra.mxu2 %v8472_v30  ;;  %v759_v44 = vpop.f32.mrf.mxu0 }
 0x14e   : > { %922 = vst [vmem:[#allocation4 + $0x144] sm:$0xf] %v11240_v25  ;;  %v8476_v35 = vor.u32 %v10156_v33, %v8475_v31  ;;  %v859_v37 = vld [vmem:[#allocation3 + $0x78] sm:$0xff]  ;;  %v11257_v50 = vadd.f32 %v759_v44, %v650_v43  ;;  %v653_v33 = vld [vmem:[%s10969_s28 + $0x68] sm:$0xff] }
 0x14f   : > { %826 = vst [vmem:[#allocation3 + $0x81] sm:$0xff] %v11244_v32  ;;  %v1177_v39 = vpack.c.bf16 %v859_v37, %v859_v37 }
 0x150   : > { %1017 = vst [vmem:[#allocation4 + $0x124] sm:$0xf] %v11203_v53  ;;  %3388 = vmatmul.bf16.gmra.mxu3 %v8476_v35  ;;  %v11261_v57 = vpack.c.bf16 %v11257_v50, %v11257_v50  ;;  %8354 = vmatmul.msk.bf16.gmra.mxu0 %vm672_vm2, %v636_v46  ;;  %v10294_v35 = vld [vmem:[%s14076_s6 + $0xd0] sm:$0xff] }
 0x151   : > { %1306 = vst [vmem:[#allocation4 + $0x154] sm:$0xf] %v11250_v38  ;;  %3459 = vmatpush.bf16.msrb.mxu0 %v10294_v35 }
 0x152   : > { %1209 = vst [vmem:[#allocation4 + $0x12c] sm:$0xf] %v1177_v39 }
 0x153   : > { %1496 = vst [vmem:[#allocation4 + $0xf0] sm:$0xf] %v1177_v39 }
 0x154   : > { %1593 = vst [vmem:[#allocation4 + $0x118] sm:$0xf] %v11250_v38  ;;  %v8503_v48 = vld [vmem:[#allocation4 + $0x120] sm:$0xf] }
 0x155   : > { %v10164_v49 = vld [vmem:[#allocation4 + $0x140] sm:$0xf0]  ;;  %1018 = vst [vmem:[#allocation4 + $0x148] sm:$0xf] %v11221_v5  ;;  %v761_v1 = vpop.f32.mrf.mxu0  ;;  %3460 = vmatpush.bf16.msrb.mxu0 %v10293_v40 }
 0x156   : > { %14130 = vst [vmem:[#allocation21_spill] sm:$0xff] %v11257_v50  ;;  %v1052_v52 = vld [vmem:[#allocation3 + $0x82] sm:$0xff]  ;;  %v8504_v53 = vor.u32 %v10164_v49, %v8503_v48  ;;  %v11273_v4 = vadd.f32 %v761_v1, %v651_v58  ;;  %v1051_v6 = vld [vmem:[#allocation3 + $0x7a] sm:$0xff] }
 0x157   : > { %1113 = vst [vmem:[#allocation4 + $0x128] sm:$0xf] %v1081_v42  ;;  %v860_v54 = vld [vmem:[#allocation3 + $0x80] sm:$0xff]  ;;  %v1370_v55 = vpack.c.bf16 %v1052_v52, %v1052_v52  ;;  %v10160_v62 = vld [vmem:[#allocation4 + $0x124] sm:$0xf]  ;;  %v1083_v15 = vpack.c.bf16 %v1051_v6, %v1051_v6 }
 0x158   : > { %1114 = vst [vmem:[#allocation4 + $0x14c] sm:$0xf] %v1368_v21  ;;  %3215 = vmatmul.bf16.gmra.mxu1 %v8504_v53  ;;  %v11266_v59 = vpack.c.bf16 %v860_v54, %v860_v54  ;;  %v11279_v9 = vpack.c.bf16 %v11273_v4, %v11273_v4  ;;  %v621_v54 = vld [vmem:[#allocation2 + $0xf0] sm:$0xff] }
 0x159   : > { %827 = vst [vmem:[#allocation3 + $0x91] sm:$0xff] %v11257_v50 }
 0x15a   : > { %1402 = vst [vmem:[#allocation4 + $0x158] sm:$0xf] %v1370_v55 }
 0x15b   : > { %1689 = vst [vmem:[#allocation4 + $0x11c] sm:$0xf] %v1370_v55 }
 0x15c   : > { %1307 = vst [vmem:[#allocation4 + $0x178] sm:$0xf] %v11261_v57  ;;  %v8505_v63 = vld [vmem:[#allocation4 + $0x144] sm:$0xf0] }
 0x15d   : > { %1594 = vst [vmem:[#allocation4 + $0x13c] sm:$0xf] %v11261_v57  ;;  %v8508_v2 = vor.u32 %v10160_v62, %v8505_v63  ;;  %v764_v19 = vpop.f32.mrf.mxu0  ;;  %v10292_v62 = vld [vmem:[%s14076_s6 + $0xc0] sm:$0xff] }
 0x15e   : > { %v8511_v3 = vld [vmem:[#allocation4 + $0x128] sm:$0xf]  ;;  %14131 = vst [vmem:[#allocation22_spill] sm:$0xff] %v11273_v4  ;;  %v11292_v24 = vadd.f32 %v764_v19, %v652_v16  ;;  %v11326_v63 = vld [vmem:[%s11153_s0] ss:$0 sm:$0xff]  ;;  %3461 = vmatpush.bf16.msrb.mxu0 %v10292_v62  ;;  %v3374_v19 = vpop.f32.mrf.mxu3 }
 0x15f   : > { %923 = vst [vmem:[#allocation4 + $0x168] sm:$0xf] %v1177_v39  ;;  %v10165_v5 = vld [vmem:[#allocation4 + $0x148] sm:$0xf0]  ;;  %3304 = vmatmul.bf16.gmra.mxu2 %v8508_v2  ;;  %v3196_v2 = vpop.f32.mrf.mxu1 }
 0x160   : > { %924 = vst [vmem:[#allocation4 + $0x18c] sm:$0xf] %v11266_v59  ;;  %v8512_v7 = vor.u32 %v10165_v5, %v8511_v3  ;;  %v861_v8 = vld [vmem:[#allocation3 + $0x90] sm:$0xff]  ;;  %v11296_v31 = vpack.c.bf16 %v11292_v24, %v11292_v24  ;;  %8355 = vmatmul.msk.bf16.gmra.mxu0 %vm672_vm2, %v637_v20  ;;  %v655_v16 = vld [vmem:[%s10969_s28 + $0x78] sm:$0xff] }
 0x161   : > { %828 = vst [vmem:[#allocation3 + $0x99] sm:$0xff] %v11273_v4  ;;  %v1179_v11 = vpack.c.bf16 %v861_v8, %v861_v8 }
 0x162   : > { %1019 = vst [vmem:[#allocation4 + $0x16c] sm:$0xf] %v11235_v23  ;;  %3393 = vmatmul.bf16.gmra.mxu3 %v8512_v7  ;;  %v3197_v7 = vadd.f32 %v11326_v63, %v3196_v2 }
 0x163   : > { %1308 = vst [vmem:[#allocation4 + $0x19c] sm:$0xf] %v11279_v9 }
 0x164   : > { %1211 = vst [vmem:[#allocation4 + $0x174] sm:$0xf] %v1179_v11 }
 0x165   : > { %1498 = vst [vmem:[#allocation4 + $0x138] sm:$0xf] %v1179_v11  ;;  %v766_v39 = vpop.f32.mrf.mxu0 }
 0x166   : > { %1595 = vst [vmem:[#allocation4 + $0x160] sm:$0xf] %v11279_v9  ;;  %v8539_v21 = vld [vmem:[#allocation4 + $0x168] sm:$0xf]  ;;  %v11311_v43 = vadd.f32 %v766_v39, %v653_v33 }
 0x167   : > { %v10173_v23 = vld [vmem:[#allocation4 + $0x188] sm:$0xf0]  ;;  %1020 = vst [vmem:[#allocation4 + $0x190] sm:$0xf] %v11250_v38 }
 0x168   : > { %14132 = vst [vmem:[#allocation23_spill] sm:$0xff] %v11292_v24  ;;  %v1054_v26 = vld [vmem:[#allocation3 + $0x9a] sm:$0xff]  ;;  %v8540_v27 = vor.u32 %v10173_v23, %v8539_v21  ;;  %v1053_v46 = vld [vmem:[#allocation3 + $0x92] sm:$0xff]  ;;  %v11317_v52 = vpack.c.bf16 %v11311_v43, %v11311_v43 }
 0x169   : > { %1115 = vst [vmem:[#allocation4 + $0x170] sm:$0xf] %v1083_v15  ;;  %v862_v29 = vld [vmem:[#allocation3 + $0x98] sm:$0xff]  ;;  %v1372_v30 = vpack.c.bf16 %v1054_v26, %v1054_v26  ;;  %v1085_v58 = vpack.c.bf16 %v1053_v46, %v1053_v46  ;;  %v3285_v15 = vpop.f32.mrf.mxu2  ;;  %v8369_v46 = vld [vmem:[#allocation4 + $0x2c] sm:$0xf0] }
 0x16a   : > { %1116 = vst [vmem:[#allocation4 + $0x194] sm:$0xf] %v1370_v55  ;;  %3220 = vmatmul.bf16.gmra.mxu1 %v8540_v27  ;;  %v11301_v34 = vpack.c.bf16 %v862_v29, %v862_v29  ;;  %v10169_v37 = vld [vmem:[#allocation4 + $0x16c] sm:$0xf] }
 0x16b   : > { %829 = vst [vmem:[#allocation3 + $0xa9] sm:$0xff] %v11292_v24  ;;  %v622_v55 = vld [vmem:[#allocation2 + $0xf8] sm:$0xff] }
 0x16c   : > { %1404 = vst [vmem:[#allocation4 + $0x1a0] sm:$0xf] %v1372_v30 }
 0x16d   : > { %1691 = vst [vmem:[#allocation4 + $0x164] sm:$0xf] %v1372_v30  ;;  %v769_v1 = vpop.f32.mrf.mxu0 }
 0x16e   : > { %1309 = vst [vmem:[#allocation4 + $0x1c0] sm:$0xf] %v11296_v31  ;;  %v8541_v38 = vld [vmem:[#allocation4 + $0x18c] sm:$0xf0]  ;;  %v11330_v6 = vadd.f32 %v769_v1, %v654_v61 }
 0x16f   : > { %1596 = vst [vmem:[#allocation4 + $0x184] sm:$0xf] %v11296_v31  ;;  %v8544_v41 = vor.u32 %v10169_v37, %v8541_v38 }
 0x170   : > { %v8547_v42 = vld [vmem:[#allocation4 + $0x170] sm:$0xf]  ;;  %14133 = vst [vmem:[#allocation24_spill] sm:$0xff] %v11311_v43  ;;  %v11335_v14 = vpack.c.bf16 %v11330_v6, %v11330_v6 }
 0x171   : > { %925 = vst [vmem:[#allocation4 + $0x1b0] sm:$0xf] %v1179_v11  ;;  %v10174_v44 = vld [vmem:[#allocation4 + $0x190] sm:$0xf0]  ;;  %3309 = vmatmul.bf16.gmra.mxu2 %v8544_v41  ;;  %v10303_v41 = vld [vmem:[%s14076_s6 + $0x118] sm:$0xff] }
 0x172   : > { %926 = vst [vmem:[#allocation4 + $0x1d4] sm:$0xf] %v11301_v34  ;;  %v8548_v48 = vor.u32 %v10174_v44, %v8547_v42  ;;  %v863_v49 = vld [vmem:[#allocation3 + $0xa8] sm:$0xff]  ;;  %v656_v44 = vld [vmem:[%s10969_s28 + $0x80] sm:$0xff]  ;;  %3547 = vmatpush.bf16.msrb.mxu1 %v10303_v41 }
 0x173   : > { %830 = vst [vmem:[#allocation3 + $0xb1] sm:$0xff] %v11311_v43  ;;  %v1181_v53 = vpack.c.bf16 %v863_v49, %v863_v49  ;;  %v10125_v49 = vld [vmem:[#allocation4 + $0xc] sm:$0xf] }
 0x174   : > { %1021 = vst [vmem:[#allocation4 + $0x1b4] sm:$0xf] %v11261_v57  ;;  %3398 = vmatmul.bf16.gmra.mxu3 %v8548_v48  ;;  %v638_v57 = vpack.c.bf16 %v622_v55, %v621_v54  ;;  %v8372_v61 = vor.u32 %v10125_v49, %v8369_v46 }
 0x175   : > { %1310 = vst [vmem:[#allocation4 + $0x1e4] sm:$0xf] %v11317_v52  ;;  %v771_v26 = vpop.f32.mrf.mxu0  ;;  %v8591_v17 = vld [vmem:[#allocation4 + $0x1c0] sm:$0xf] }
 0x176   : > { %1213 = vst [vmem:[#allocation4 + $0x1bc] sm:$0xf] %v1181_v53  ;;  %8356 = vmatmul.msk.bf16.gmra.mxu0 %vm672_vm2, %v638_v57 }
 0x177   : > { %1500 = vst [vmem:[#allocation4 + $0x180] sm:$0xf] %v1181_v53 }
 0x178   : > { %1597 = vst [vmem:[#allocation4 + $0x1a8] sm:$0xf] %v11317_v52  ;;  %v8575_v3 = vld [vmem:[#allocation4 + $0x1b0] sm:$0xf] }
 0x179   : > { %v10182_v5 = vld [vmem:[#allocation4 + $0x1d0] sm:$0xf0]  ;;  %1022 = vst [vmem:[#allocation4 + $0x1d8] sm:$0xf] %v11279_v9  ;;  %v3286_v9 = vadd.f32 %v3285_v15, %v3197_v7 }
 0x17a   : > { %14134 = vst [vmem:[#allocation25_spill] sm:$0xff] %v11330_v6  ;;  %v1056_v8 = vld [vmem:[#allocation3 + $0xb2] sm:$0xff]  ;;  %v8576_v11 = vor.u32 %v10182_v5, %v8575_v3  ;;  %v1055_v35 = vld [vmem:[#allocation3 + $0xaa] sm:$0xff] }
 0x17b   : > { %1117 = vst [vmem:[#allocation4 + $0x1b8] sm:$0xf] %v1085_v58  ;;  %v864_v12 = vld [vmem:[#allocation3 + $0xb0] sm:$0xff]  ;;  %v1374_v13 = vpack.c.bf16 %v1056_v8, %v1056_v8  ;;  %v11343_v20 = vadd.f32 %v3374_v19, %v3286_v9  ;;  %v10178_v21 = vld [vmem:[#allocation4 + $0x1b4] sm:$0xf]  ;;  %v1087_v42 = vpack.c.bf16 %v1055_v35, %v1055_v35 }
 0x17c   : > { %1118 = vst [vmem:[#allocation4 + $0x1dc] sm:$0xf] %v1372_v30  ;;  %3225 = vmatmul.bf16.gmra.mxu1 %v8576_v11  ;;  %v11340_v18 = vpack.c.bf16 %v864_v12, %v864_v12  ;;  %v11346_v30 = vadd.f32 %v771_v26, %v655_v16  ;;  %v658_v26 = vld [vmem:[%s10969_s28 + $0x90] sm:$0xff] }
 0x17d   : > { %831 = vst [vmem:[#allocation3 + $0xc1] sm:$0xff] %v11330_v6  ;;  %v774_v48 = vpop.f32.mrf.mxu0 }
 0x17e   : > { %1406 = vst [vmem:[#allocation4 + $0x1e8] sm:$0xf] %v1374_v13  ;;  %v1280_v39 = vpack.c.bf16 %v11346_v30, %v11346_v30  ;;  %v8563_v32 = vld [vmem:[#allocation4 + $0x180] sm:$0xf] }
 0x17f   : > { %1693 = vst [vmem:[#allocation4 + $0x1ac] sm:$0xf] %v1374_v13 }
 0x180   : > { %1311 = vst [vmem:[#allocation4 + $0x208] sm:$0xf] %v11335_v14  ;;  %v8577_v23 = vld [vmem:[#allocation4 + $0x1d4] sm:$0xf0] }
 0x181   : > { %1598 = vst [vmem:[#allocation4 + $0x1cc] sm:$0xf] %v11335_v14  ;;  %v8580_v27 = vor.u32 %v10178_v21, %v8577_v23 }
 0x182   : > { %v8583_v29 = vld [vmem:[#allocation4 + $0x1b8] sm:$0xf]  ;;  %14135 = vst [vmem:[#allocation26_spill] sm:$0xff] %v11346_v30 }
 0x183   : > { %927 = vst [vmem:[#allocation4 + $0x1f8] sm:$0xf] %v1181_v53  ;;  %v10183_v33 = vld [vmem:[#allocation4 + $0x1d8] sm:$0xf0]  ;;  %3314 = vmatmul.bf16.gmra.mxu2 %v8580_v27 }
 0x184   : > { %928 = vst [vmem:[#allocation4 + $0x21c] sm:$0xf] %v11340_v18  ;;  %v8584_v37 = vor.u32 %v10183_v33, %v8583_v29  ;;  %v865_v38 = vld [vmem:[#allocation3 + $0xc0] sm:$0xff] }
 0x185   : > { %832 = vst [vmem:[#allocation3 + $0xc9] sm:$0xff] %v11346_v30  ;;  %v1183_v40 = vpack.c.bf16 %v865_v38, %v865_v38  ;;  %v776_v7 = vpop.f32.mrf.mxu0 }
 0x186   : > { %1023 = vst [vmem:[#allocation4 + $0x1fc] sm:$0xf] %v11296_v31  ;;  %3403 = vmatmul.bf16.gmra.mxu3 %v8584_v37  ;;  %v11358_v31 = vadd.f32 %v774_v48, %v656_v44  ;;  %3462 = vmatmul.bf16.vlgmr.msrb.gmra.mxu0 %v8372_v61  ;;  %v11394_v48 = vpop.f32.mrf.mxu1  ;;  %v11399_v61 = vpop.f32.mrf.mxu2 }
 0x187   : > { %1312 = vst [vmem:[#allocation4 + $0x22c] sm:$0xf] %v1280_v39 }
 0x188   : > { %1215 = vst [vmem:[#allocation4 + $0x204] sm:$0xf] %v1183_v40  ;;  %v11362_v57 = vpack.c.bf16 %v11358_v31, %v11358_v31 }
 0x189   : > { %1502 = vst [vmem:[#allocation4 + $0x1c8] sm:$0xf] %v1183_v40 }
 0x18a   : > { %1599 = vst [vmem:[#allocation4 + $0x1f0] sm:$0xf] %v1280_v39  ;;  %v8611_v53 = vld [vmem:[#allocation4 + $0x1f8] sm:$0xf] }
 0x18b   : > { %v10191_v54 = vld [vmem:[#allocation4 + $0x218] sm:$0xf0]  ;;  %1024 = vst [vmem:[#allocation4 + $0x220] sm:$0xf] %v11317_v52 }
 0x18c   : > { %14136 = vst [vmem:[#allocation27_spill] sm:$0xff] %v11358_v31  ;;  %v1058_v55 = vld [vmem:[#allocation3 + $0xca] sm:$0xff]  ;;  %v8612_v58 = vor.u32 %v10191_v54, %v8611_v53  ;;  %v1057_v15 = vld [vmem:[#allocation3 + $0xc2] sm:$0xff] }
 0x18d   : > { %1119 = vst [vmem:[#allocation4 + $0x200] sm:$0xf] %v1087_v42  ;;  %v866_v62 = vld [vmem:[#allocation3 + $0xc8] sm:$0xff]  ;;  %v1376_v1 = vpack.c.bf16 %v1058_v55, %v1058_v55  ;;  %v1089_v23 = vpack.c.bf16 %v1057_v15, %v1057_v15  ;;  %v779_v33 = vpop.f32.mrf.mxu0 }
 0x18e   : > { %1120 = vst [vmem:[#allocation4 + $0x224] sm:$0xf] %v1374_v13  ;;  %3230 = vmatmul.bf16.gmra.mxu1 %v8612_v58  ;;  %v657_v52 = vld [vmem:[%s10969_s28 + $0x88] sm:$0xff]  ;;  %v11366_v2 = vpack.c.bf16 %v866_v62, %v866_v62  ;;  %v11382_v38 = vadd.f32 %v779_v33, %v658_v26 }
 0x18f   : > { %833 = vst [vmem:[#allocation3 + $0xd9] sm:$0xff] %v11358_v31  ;;  %v10187_v3 = vld [vmem:[#allocation4 + $0x1fc] sm:$0xf]  ;;  %v11370_v12 = vadd.f32 %v776_v7, %v657_v52  ;;  %v660_v7 = vld [vmem:[%s10969_s28 + $0xa0] sm:$0xff] }
 0x190   : > { %1408 = vst [vmem:[#allocation4 + $0x230] sm:$0xf] %v1376_v1  ;;  %v11387_v41 = vpack.c.bf16 %v11382_v38, %v11382_v38 }
 0x191   : > { %1695 = vst [vmem:[#allocation4 + $0x1f4] sm:$0xf] %v1376_v1  ;;  %v11376_v19 = vpack.c.bf16 %v11370_v12, %v11370_v12 }
 0x192   : > { %1313 = vst [vmem:[#allocation4 + $0x250] sm:$0xf] %v11362_v57  ;;  %v8613_v5 = vld [vmem:[#allocation4 + $0x21c] sm:$0xf0] }
 0x193   : > { %1600 = vst [vmem:[#allocation4 + $0x214] sm:$0xf] %v11362_v57  ;;  %v8616_v8 = vor.u32 %v10187_v3, %v8613_v5 }
 0x194   : > { %v8619_v11 = vld [vmem:[#allocation4 + $0x200] sm:$0xf]  ;;  %14137 = vst [vmem:[#allocation28_spill] sm:$0xff] %v11370_v12 }
 0x195   : > { %929 = vst [vmem:[#allocation4 + $0x240] sm:$0xf] %v1183_v40  ;;  %v10192_v13 = vld [vmem:[#allocation4 + $0x220] sm:$0xf0]  ;;  %3319 = vmatmul.bf16.gmra.mxu2 %v8616_v8  ;;  %v781_v54 = vpop.f32.mrf.mxu0 }
 0x196   : > { %930 = vst [vmem:[#allocation4 + $0x264] sm:$0xf] %v11366_v2  ;;  %v8620_v9 = vor.u32 %v10192_v13, %v8619_v11  ;;  %v867_v16 = vld [vmem:[#allocation3 + $0xd8] sm:$0xff]  ;;  %v10302_v8 = vld [vmem:[%s14076_s6 + $0x110] sm:$0xff]  ;;  %v10134_v11 = vld [vmem:[#allocation4 + $0x54] sm:$0xf] }
 0x197   : > { %834 = vst [vmem:[#allocation3 + $0xe1] sm:$0xff] %v11370_v12  ;;  %v1185_v21 = vpack.c.bf16 %v867_v16, %v867_v16  ;;  %3548 = vmatpush.bf16.msrb.mxu1 %v10302_v8 }
 0x198   : > { %1025 = vst [vmem:[#allocation4 + $0x244] sm:$0xf] %v11335_v14  ;;  %3408 = vmatmul.bf16.gmra.mxu3 %v8620_v9 }
 0x199   : > { %1314 = vst [vmem:[#allocation4 + $0x274] sm:$0xf] %v11376_v19 }
 0x19a   : > { %1217 = vst [vmem:[#allocation4 + $0x24c] sm:$0xf] %v1185_v21  ;;  %v3290_v33 = vpop.f32.mrf.mxu2 }
 0x19b   : > { %1504 = vst [vmem:[#allocation4 + $0x210] sm:$0xf] %v1185_v21 }
 0x19c   : > { %1601 = vst [vmem:[#allocation4 + $0x238] sm:$0xf] %v11376_v19  ;;  %v8647_v27 = vld [vmem:[#allocation4 + $0x240] sm:$0xf] }
 0x19d   : > { %v10200_v29 = vld [vmem:[#allocation4 + $0x260] sm:$0xf0]  ;;  %1026 = vst [vmem:[#allocation4 + $0x268] sm:$0xf] %v1280_v39  ;;  %v659_v39 = vld [vmem:[%s10969_s28 + $0x98] sm:$0xff]  ;;  %v784_v16 = vpop.f32.mrf.mxu0 }
 0x19e   : > { %v1060_v35 = vld [vmem:[#allocation3 + $0xe2] sm:$0xff]  ;;  %v8648_v37 = vor.u32 %v10200_v29, %v8647_v27  ;;  %1121 = vst [vmem:[#allocation4 + $0x248] sm:$0xf] %v1089_v23  ;;  %v11397_v58 = vadd.f32 %v781_v54, %v659_v39  ;;  %v1059_v52 = vld [vmem:[#allocation3 + $0xda] sm:$0xff]  ;;  %v3201_v9 = vpop.f32.mrf.mxu1  ;;  %v11416_v26 = vadd.f32 %v784_v16, %v660_v7 }
 0x19f   : > { %14138 = vst [vmem:[#allocation29_spill] sm:$0xff] %v11382_v38  ;;  %v1378_v14 = vpack.c.bf16 %v1060_v35, %v1060_v35  ;;  %v868_v40 = vld [vmem:[#allocation3 + $0xe0] sm:$0xff]  ;;  %v10196_v44 = vld [vmem:[#allocation4 + $0x244] sm:$0xf]  ;;  %v1091_v5 = vpack.c.bf16 %v1059_v52, %v1059_v52  ;;  %v10315_v39 = vld [vmem:[%s14076_s6 + $0x178] sm:$0xff] }
 0x1a0   : > { %1122 = vst [vmem:[#allocation4 + $0x26c] sm:$0xf] %v1376_v1  ;;  %3235 = vmatmul.bf16.gmra.mxu1 %v8648_v37  ;;  %v11391_v42 = vpack.c.bf16 %v868_v40, %v868_v40  ;;  %v11420_v37 = vpack.c.bf16 %v11416_v26, %v11416_v26  ;;  %3632 = vmatpush.bf16.msrb.mxu2 %v10315_v39 }
 0x1a1   : > { %835 = vst [vmem:[#allocation3 + $0xf1] sm:$0xff] %v11382_v38 }
 0x1a2   : > { %1410 = vst [vmem:[#allocation4 + $0x278] sm:$0xf] %v1378_v14 }
 0x1a3   : > { %1697 = vst [vmem:[#allocation4 + $0x23c] sm:$0xf] %v1378_v14 }
 0x1a4   : > { %1315 = vst [vmem:[#allocation4 + $0x298] sm:$0xf] %v11387_v41  ;;  %v8649_v46 = vld [vmem:[#allocation4 + $0x264] sm:$0xf0] }
 0x1a5   : > { %1602 = vst [vmem:[#allocation4 + $0x25c] sm:$0xf] %v11387_v41  ;;  %v8652_v49 = vor.u32 %v10196_v44, %v8649_v46  ;;  %v8655_v53 = vld [vmem:[#allocation4 + $0x248] sm:$0xf]  ;;  %v661_v46 = vld [vmem:[%s10969_s28 + $0xa8] sm:$0xff]  ;;  %v786_v54 = vpop.f32.mrf.mxu0 }
 0x1a6   : > { %1204 = vst [vmem:[#allocation4 + $0x78] sm:$0xf] %v11176_v28  ;;  %v11405_v28 = vpack.c.bf16 %v11397_v58, %v11397_v58  ;;  %v11436_v52 = vadd.f32 %v786_v54, %v661_v46 }
 0x1a7   : > { %v10201_v55 = vld [vmem:[#allocation4 + $0x268] sm:$0xf0]  ;;  %14139 = vst [vmem:[#allocation30_spill] sm:$0xff] %v11397_v58  ;;  %3324 = vmatmul.bf16.gmra.mxu2 %v8652_v49 }
 0x1a8   : > { %931 = vst [vmem:[#allocation4 + $0x288] sm:$0xf] %v1185_v21  ;;  %v8656_v62 = vor.u32 %v10201_v55, %v8655_v53  ;;  %v869_v1 = vld [vmem:[#allocation3 + $0xf0] sm:$0xff]  ;;  %v11431_v53 = vpop.f32.mrf.mxu1 }
 0x1a9   : > { %932 = vst [vmem:[#allocation4 + $0x2ac] sm:$0xf] %v11391_v42  ;;  %v1187_v3 = vpack.c.bf16 %v869_v1, %v869_v1 }
 0x1aa   : > { %836 = vst [vmem:[#allocation3 + $0xf9] sm:$0xff] %v11397_v58  ;;  %3413 = vmatmul.bf16.gmra.mxu3 %v8656_v62 }
 0x1ab   : > { %1027 = vst [vmem:[#allocation4 + $0x28c] sm:$0xf] %v11362_v57  ;;  %v3202_v57 = vadd.f32 %v11326_v63, %v3201_v9  ;;  %v662_v9 = vld [vmem:[%s10969_s28 + $0xb0] sm:$0xff] }
 0x1ac   : > { %1219 = vst [vmem:[#allocation4 + $0x294] sm:$0xf] %v1187_v3 }
 0x1ad   : > { %1506 = vst [vmem:[#allocation4 + $0x258] sm:$0xf] %v1187_v3  ;;  %v8405_v13 = vld [vmem:[#allocation4 + $0x74] sm:$0xf0]  ;;  %v3291_v40 = vadd.f32 %v3290_v33, %v3202_v57  ;;  %v10143_v57 = vld [vmem:[#allocation4 + $0x9c] sm:$0xf] }
 0x1ae   : > { %1316 = vst [vmem:[#allocation4 + $0x2bc] sm:$0xf] %v11405_v28  ;;  %v8408_v15 = vor.u32 %v10134_v11, %v8405_v13  ;;  %v11441_v11 = vpack.c.bf16 %v11436_v52, %v11436_v52 }
 0x1af   : > { %1603 = vst [vmem:[#allocation4 + $0x280] sm:$0xf] %v11405_v28  ;;  %v8683_v21 = vld [vmem:[#allocation4 + $0x288] sm:$0xf] }
 0x1b0   : > { %v10209_v23 = vld [vmem:[#allocation4 + $0x2a8] sm:$0xf0]  ;;  %1028 = vst [vmem:[#allocation4 + $0x2b0] sm:$0xf] %v11376_v19  ;;  %3467 = vmatmul.bf16.gmra.mxu0 %v8408_v15  ;;  %v11426_v19 = vpop.f32.mrf.mxu3 }
 0x1b1   : > { %14140 = vst [vmem:[#allocation31_spill] sm:$0xff] %v11416_v26  ;;  %v1062_v27 = vld [vmem:[#allocation3 + $0xfa] sm:$0xff]  ;;  %v8684_v29 = vor.u32 %v10209_v23, %v8683_v21  ;;  %v1061_v13 = vld [vmem:[#allocation3 + $0xf2] sm:$0xff]  ;;  %v789_v23 = vpop.f32.mrf.mxu0 }
 0x1b2   : > { %1123 = vst [vmem:[#allocation4 + $0x290] sm:$0xf] %v1091_v5  ;;  %v1380_v35 = vpack.c.bf16 %v1062_v27, %v1062_v27  ;;  %v870_v44 = vld [vmem:[#allocation3 + $0xf8] sm:$0xff]  ;;  %v1093_v16 = vpack.c.bf16 %v1061_v13, %v1061_v13 }
 0x1b3   : > { %1124 = vst [vmem:[#allocation4 + $0x2b4] sm:$0xf] %v1378_v14  ;;  %3240 = vmatmul.bf16.gmra.mxu1 %v8684_v29  ;;  %v10205_v14 = vld [vmem:[#allocation4 + $0x28c] sm:$0xf]  ;;  %v11433_v55 = vpack.c.bf16 %v870_v44, %v870_v44  ;;  %v11454_v29 = vadd.f32 %v789_v23, %v662_v9  ;;  %v3206_v39 = vpop.f32.mrf.mxu1  ;;  %v11459_v44 = vpop.f32.mrf.mxu2 }
 0x1b4   : > { %837 = vst [vmem:[#allocation3 + $0x109] sm:$0xff] %v11416_v26  ;;  %v10179_v26 = vld [vmem:[#allocation4 + $0x1bc] sm:$0xf] }
 0x1b5   : > { %1412 = vst [vmem:[#allocation4 + $0x2c0] sm:$0xf] %v1380_v35 }
 0x1b6   : > { %1699 = vst [vmem:[#allocation4 + $0x284] sm:$0xf] %v1380_v35 }
 0x1b7   : > { %1317 = vst [vmem:[#allocation4 + $0x2e0] sm:$0xf] %v11420_v37  ;;  %v8685_v49 = vld [vmem:[#allocation4 + $0x2ac] sm:$0xf0] }
 0x1b8   : > { %1604 = vst [vmem:[#allocation4 + $0x2a4] sm:$0xf] %v11420_v37  ;;  %v8688_v62 = vor.u32 %v10205_v14, %v8685_v49 }
 0x1b9   : > { %v8691_v1 = vld [vmem:[#allocation4 + $0x290] sm:$0xf]  ;;  %1206 = vst [vmem:[#allocation4 + $0xc0] sm:$0xf] %v11208_v56  ;;  %v3379_v56 = vpop.f32.mrf.mxu3 }
 0x1ba   : > { %14141 = vst [vmem:[#allocation32_spill] sm:$0xff] %v11436_v52  ;;  %v10210_v5 = vld [vmem:[#allocation4 + $0x2b0] sm:$0xf0]  ;;  %3329 = vmatmul.bf16.gmra.mxu2 %v8688_v62  ;;  %v791_v62 = vpop.f32.mrf.mxu0 }
 0x1bb   : > { %933 = vst [vmem:[#allocation4 + $0x2d0] sm:$0xf] %v1187_v3  ;;  %v8692_v7 = vor.u32 %v10210_v5, %v8691_v1  ;;  %v871_v8 = vld [vmem:[#allocation3 + $0x108] sm:$0xff]  ;;  %v11448_v3 = vadd.f32 %v3379_v56, %v3291_v40  ;;  %v3208_v56 = vpop.f32.mrf.mxu1 }
 0x1bc   : > { %838 = vst [vmem:[#allocation3 + $0x111] sm:$0xff] %v11436_v52  ;;  %v11443_v15 = vpack.c.bf16 %v871_v8, %v871_v8 }
 0x1bd   : > { %934 = vst [vmem:[#allocation4 + $0x2f4] sm:$0xf] %v11433_v55  ;;  %3418 = vmatmul.bf16.gmra.mxu3 %v8692_v7 }
 0x1be   : > { %1318 = vst [vmem:[#allocation4 + $0x304] sm:$0xf] %v11441_v11  ;;  %v3295_v23 = vpop.f32.mrf.mxu2 }
 0x1bf   : > { %1221 = vst [vmem:[#allocation4 + $0x2dc] sm:$0xf] %v11443_v15 }
 0x1c0   : > { %1508 = vst [vmem:[#allocation4 + $0x2a0] sm:$0xf] %v11443_v15  ;;  %v8441_v21 = vld [vmem:[#allocation4 + $0xbc] sm:$0xf0] }
 0x1c1   : > { %1605 = vst [vmem:[#allocation4 + $0x2c8] sm:$0xf] %v11441_v11  ;;  %v8444_v27 = vor.u32 %v10143_v57, %v8441_v21  ;;  %v11464_v54 = vpop.f32.mrf.mxu3 }
 0x1c2   : > { %1029 = vst [vmem:[#allocation4 + $0x2d4] sm:$0xf] %v11387_v41  ;;  %v8719_v46 = vld [vmem:[#allocation4 + $0x2d0] sm:$0xf]  ;;  %v1001_v41 = vpack.c.bf16 %v11454_v29, %v11454_v29 }
 0x1c3   : > { %14142 = vst [vmem:[#allocation33_spill] sm:$0xff] %v11454_v29  ;;  %v1064_v33 = vld [vmem:[#allocation3 + $0x112] sm:$0xff]  ;;  %3472 = vmatmul.bf16.gmra.mxu0 %v8444_v27 }
 0x1c4   : > { %1030 = vst [vmem:[#allocation4 + $0x2f8] sm:$0xf] %v11405_v28  ;;  %v11457_v40 = vpack.c.bf16 %v1064_v33, %v1064_v33  ;;  %v10218_v14 = vld [vmem:[#allocation4 + $0x2f0] sm:$0xf0]  ;;  %v663_v28 = vld [vmem:[%s10969_s28 + $0xb8] sm:$0xff]  ;;  %v872_v21 = vld [vmem:[#allocation3 + $0x110] sm:$0xff] }
 0x1c5   : > { %1125 = vst [vmem:[#allocation4 + $0x2d8] sm:$0xf] %v1093_v16  ;;  %v8720_v49 = vor.u32 %v10218_v14, %v8719_v46  ;;  %v11469_v7 = vadd.f32 %v791_v62, %v663_v28  ;;  %v3209_v62 = vadd.f32 %v11326_v63, %v3208_v56  ;;  %v10301_v56 = vld [vmem:[%s14076_s6 + $0x108] sm:$0xff] }
 0x1c6   : > { %1126 = vst [vmem:[#allocation4 + $0x2fc] sm:$0xf] %v1380_v35  ;;  %v3207_v35 = vadd.f32 %v11326_v63, %v3206_v39  ;;  %3549 = vmatpush.bf16.msrb.mxu1 %v10301_v56 }
 0x1c7   : > { %1414 = vst [vmem:[#allocation4 + $0x308] sm:$0xf] %v11457_v40  ;;  %3245 = vmatmul.bf16.gmra.mxu1 %v8720_v49  ;;  %v1002_v16 = vpack.c.bf16 %v11469_v7, %v11469_v7  ;;  %v794_v49 = vpop.f32.mrf.mxu0 }
 0x1c8   : > { %1701 = vst [vmem:[#allocation4 + $0x2cc] sm:$0xf] %v11457_v40  ;;  %v3296_v33 = vadd.f32 %v3295_v23, %v3207_v35  ;;  %v1063_v35 = vld [vmem:[#allocation3 + $0x10a] sm:$0xff] }
 0x1c9   : > { %839 = vst [vmem:[#allocation3 + $0x121] sm:$0xff] %v11454_v29  ;;  %v10214_v1 = vld [vmem:[#allocation4 + $0x2d4] sm:$0xf]  ;;  %v3384_v46 = vpop.f32.mrf.mxu3  ;;  %v10314_v23 = vld [vmem:[%s14076_s6 + $0x170] sm:$0xff] }
 0x1ca   : > { %1033 = vst [vmem:[#allocation4 + $0x364] sm:$0xf] %v1001_v41  ;;  %v11476_v14 = vadd.f32 %v3384_v46, %v3296_v33  ;;  %v665_v33 = vld [vmem:[%s10969_s28 + $0xc8] sm:$0xff]  ;;  %3633 = vmatpush.bf16.msrb.mxu2 %v10314_v23 }
 0x1cb   : > { %v8721_v5 = vld [vmem:[#allocation4 + $0x2f4] sm:$0xf0]  ;;  %1319 = vst [vmem:[#allocation4 + $0x328] sm:$0xf] %v1001_v41 }
 0x1cc   : > { %14143 = vst [vmem:[#allocation34_spill] sm:$0xff] %v11469_v7  ;;  %v8724_v8 = vor.u32 %v10214_v1, %v8721_v5  ;;  %v8727_v13 = vld [vmem:[#allocation4 + $0x2d8] sm:$0xf]  ;;  %v3211_v1 = vpop.f32.mrf.mxu1  ;;  %v664_v5 = vld [vmem:[%s10969_s28 + $0xc0] sm:$0xff] }
 0x1cd   : > { %1606 = vst [vmem:[#allocation4 + $0x2ec] sm:$0xf] %v1001_v41  ;;  %v10219_v9 = vld [vmem:[#allocation4 + $0x2f8] sm:$0xf0]  ;;  %v10152_v41 = vld [vmem:[#allocation4 + $0xe4] sm:$0xf] }
 0x1ce   : > { %1208 = vst [vmem:[#allocation4 + $0x108] sm:$0xf] %v11240_v25  ;;  %3334 = vmatmul.bf16.gmra.mxu2 %v8724_v8  ;;  %v8728_v57 = vor.u32 %v10219_v9, %v8727_v13  ;;  %v11478_v25 = vpack.c.bf16 %v872_v21, %v872_v21  ;;  %v1095_v21 = vpack.c.bf16 %v1063_v35, %v1063_v35 }
 0x1cf   : > { %840 = vst [vmem:[#allocation3 + $0x129] sm:$0xff] %v11469_v7 }
 0x1d0   : > { %1034 = vst [vmem:[#allocation4 + $0x388] sm:$0xf] %v1002_v16  ;;  %3423 = vmatmul.bf16.gmra.mxu3 %v8728_v57  ;;  %v873_v27 = vld [vmem:[#allocation3 + $0x120] sm:$0xff] }
 0x1d1   : > { %1320 = vst [vmem:[#allocation4 + $0x34c] sm:$0xf] %v1002_v16  ;;  %v905_v39 = vpack.c.bf16 %v873_v27, %v873_v27  ;;  %v3386_v27 = vpop.f32.mrf.mxu3 }
 0x1d2   : > { %1607 = vst [vmem:[#allocation4 + $0x310] sm:$0xf] %v1002_v16  ;;  %v3297_v16 = vpop.f32.mrf.mxu2 }
 0x1d3   : > { %935 = vst [vmem:[#allocation4 + $0x318] sm:$0xf] %v11443_v15  ;;  %v11485_v15 = vadd.f32 %v794_v49, %v664_v5  ;;  %v3298_v57 = vadd.f32 %v3297_v16, %v3209_v62  ;;  %v3212_v49 = vadd.f32 %v11326_v63, %v3211_v1 }
 0x1d4   : > { %937 = vst [vmem:[#allocation4 + $0x360] sm:$0xf] %v905_v39 }
 0x1d5   : > { %1223 = vst [vmem:[#allocation4 + $0x324] sm:$0xf] %v905_v39  ;;  %v8477_v28 = vld [vmem:[#allocation4 + $0x104] sm:$0xf0]  ;;  %v1003_v46 = vpack.c.bf16 %v11485_v15, %v11485_v15 }
 0x1d6   : > { %1510 = vst [vmem:[#allocation4 + $0x2e8] sm:$0xf] %v905_v39  ;;  %v8480_v8 = vor.u32 %v10152_v41, %v8477_v28  ;;  %v1066_v13 = vld [vmem:[#allocation3 + $0x12a] sm:$0xff]  ;;  %v11494_v39 = vadd.f32 %v3386_v27, %v3298_v57  ;;  %v3213_v41 = vpop.f32.mrf.mxu1 }
 0x1d7   : > { %v1098_v9 = vpack.c.bf16 %v1066_v13, %v1066_v13  ;;  %936 = vst [vmem:[#allocation4 + $0x33c] sm:$0xf] %v11478_v25  ;;  %v874_v13 = vld [vmem:[#allocation3 + $0x128] sm:$0xff] }
 0x1d8   : > { %3477 = vmatmul.bf16.gmra.mxu0 %v8480_v8  ;;  %1031 = vst [vmem:[#allocation4 + $0x31c] sm:$0xf] %v11420_v37  ;;  %v796_v37 = vpop.f32.mrf.mxu0  ;;  %v11510_v27 = vpack.c.bf16 %v874_v13, %v874_v13 }
 0x1d9   : > { %14144 = vst [vmem:[#allocation35_spill] sm:$0xff] %v11485_v15  ;;  %v11500_v28 = vadd.f32 %v796_v37, %v665_v33  ;;  %v1065_v33 = vld [vmem:[#allocation3 + $0x122] sm:$0xff] }
 0x1da   : > { %1130 = vst [vmem:[#allocation4 + $0x38c] sm:$0xf] %v1098_v9  ;;  %v8755_v62 = vld [vmem:[#allocation4 + $0x318] sm:$0xf]  ;;  %v3300_v8 = vpop.f32.mrf.mxu2  ;;  %v1097_v13 = vpack.c.bf16 %v1065_v33, %v1065_v33 }
 0x1db   : > { %1416 = vst [vmem:[#allocation4 + $0x350] sm:$0xf] %v1098_v9  ;;  %v1004_v1 = vpack.c.bf16 %v11500_v28, %v11500_v28 }
 0x1dc   : > { %1703 = vst [vmem:[#allocation4 + $0x314] sm:$0xf] %v1098_v9  ;;  %v3389_v9 = vpop.f32.mrf.mxu3 }
 0x1dd   : > { %1032 = vst [vmem:[#allocation4 + $0x340] sm:$0xf] %v11441_v11  ;;  %v3301_v11 = vadd.f32 %v3300_v8, %v3212_v49  ;;  %v3214_v49 = vadd.f32 %v11326_v63, %v3213_v41  ;;  %v10161_v41 = vld [vmem:[#allocation4 + $0x12c] sm:$0xf] }
 0x1de   : > { %1127 = vst [vmem:[#allocation4 + $0x320] sm:$0xf] %v1095_v21  ;;  %v10227_v5 = vld [vmem:[#allocation4 + $0x338] sm:$0xf0] }
 0x1df   : > { %14145 = vst [vmem:[#allocation36_spill] sm:$0xff] %v11500_v28  ;;  %v8756_v35 = vor.u32 %v10227_v5, %v8755_v62  ;;  %v10223_v16 = vld [vmem:[#allocation4 + $0x31c] sm:$0xf]  ;;  %v11506_v57 = vadd.f32 %v3389_v9, %v3301_v11 }
 0x1e0   : > { %1128 = vst [vmem:[#allocation4 + $0x344] sm:$0xf] %v11457_v40  ;;  %v799_v40 = vpop.f32.mrf.mxu0 }
 0x1e1   : > { %841 = vst [vmem:[#allocation3 + $0x139] sm:$0xff] %v11485_v15  ;;  %3250 = vmatmul.bf16.gmra.mxu1 %v8756_v35  ;;  %v666_v35 = vld [vmem:[%s10969_s28 + $0xd0] sm:$0xff] }
 0x1e2   : > { %1035 = vst [vmem:[#allocation4 + $0x3ac] sm:$0xf] %v1003_v46  ;;  %v11515_v9 = vadd.f32 %v799_v40, %v666_v35  ;;  %v8793_v35 = vld [vmem:[#allocation4 + $0x384] sm:$0xf0] }
 0x1e3   : > { %1321 = vst [vmem:[#allocation4 + $0x370] sm:$0xf] %v1003_v46 }
 0x1e4   : > { %1608 = vst [vmem:[#allocation4 + $0x334] sm:$0xf] %v1003_v46  ;;  %v8757_v56 = vld [vmem:[#allocation4 + $0x33c] sm:$0xf0]  ;;  %v3216_v46 = vpop.f32.mrf.mxu1  ;;  %v1005_v40 = vpack.c.bf16 %v11515_v9, %v11515_v9 }
 0x1e5   : > { %1210 = vst [vmem:[#allocation4 + $0x150] sm:$0xf] %v11266_v59  ;;  %v8760_v21 = vor.u32 %v10223_v16, %v8757_v56  ;;  %v8763_v23 = vld [vmem:[#allocation4 + $0x320] sm:$0xf]  ;;  %v3302_v59 = vpop.f32.mrf.mxu2  ;;  %v3391_v56 = vpop.f32.mrf.mxu3  ;;  %v3217_v33 = vadd.f32 %v11326_v63, %v3216_v46 }
 0x1e6   : > { %842 = vst [vmem:[#allocation3 + $0x141] sm:$0xff] %v11500_v28  ;;  %v3303_v11 = vadd.f32 %v3302_v59, %v3214_v49  ;;  %v8791_v59 = vld [vmem:[#allocation4 + $0x360] sm:$0xf] }
 0x1e7   : > { %v10228_v37 = vld [vmem:[#allocation4 + $0x340] sm:$0xf0]  ;;  %1036 = vst [vmem:[#allocation4 + $0x3d0] sm:$0xf] %v1004_v1  ;;  %3339 = vmatmul.bf16.gmra.mxu2 %v8760_v21 }
 0x1e8   : > { %v8764_v62 = vor.u32 %v10228_v37, %v8763_v23  ;;  %v875_v5 = vld [vmem:[#allocation3 + $0x138] sm:$0xff]  ;;  %1322 = vst [vmem:[#allocation4 + $0x394] sm:$0xf] %v1004_v1  ;;  %v11517_v37 = vadd.f32 %v3391_v56, %v3303_v11 }
 0x1e9   : > { %v907_v8 = vpack.c.bf16 %v875_v5, %v875_v5  ;;  %1609 = vst [vmem:[#allocation4 + $0x358] sm:$0xf] %v1004_v1  ;;  %v667_v1 = vld [vmem:[%s10969_s28 + $0xd8] sm:$0xff]  ;;  %v801_v5 = vpop.f32.mrf.mxu0 }
 0x1ea   : > { %3428 = vmatmul.bf16.gmra.mxu3 %v8764_v62  ;;  %938 = vst [vmem:[#allocation4 + $0x384] sm:$0xf] %v11510_v27  ;;  %v10237_v56 = vld [vmem:[#allocation4 + $0x388] sm:$0xf0] }
 0x1eb   : > { %939 = vst [vmem:[#allocation4 + $0x3a8] sm:$0xf] %v907_v8 }
 0x1ec   : > { %14146 = vst [vmem:[#allocation37_spill] sm:$0xff] %v11515_v9  ;;  %v8513_v16 = vld [vmem:[#allocation4 + $0x14c] sm:$0xf0]  ;;  %v3218_v49 = vpop.f32.mrf.mxu1 }
 0x1ed   : > { %1225 = vst [vmem:[#allocation4 + $0x36c] sm:$0xf] %v907_v8  ;;  %v8516_v21 = vor.u32 %v10161_v41, %v8513_v16  ;;  %v1068_v23 = vld [vmem:[#allocation3 + $0x142] sm:$0xff]  ;;  %v3305_v16 = vpop.f32.mrf.mxu2 }
 0x1ee   : > { %1512 = vst [vmem:[#allocation4 + $0x330] sm:$0xf] %v907_v8  ;;  %v1100_v62 = vpack.c.bf16 %v1068_v23, %v1068_v23  ;;  %v11524_v8 = vadd.f32 %v801_v5, %v667_v1  ;;  %v3306_v46 = vadd.f32 %v3305_v16, %v3217_v33  ;;  %v3394_v23 = vpop.f32.mrf.mxu3  ;;  %v3219_v33 = vadd.f32 %v11326_v63, %v3218_v49  ;;  %v668_v16 = vld [vmem:[%s10969_s28 + $0xe0] sm:$0xff] }
 0x1ef   : > { %1129 = vst [vmem:[#allocation4 + $0x368] sm:$0xf] %v1097_v13  ;;  %3482 = vmatmul.bf16.gmra.mxu0 %v8516_v21  ;;  %v10232_v13 = vld [vmem:[#allocation4 + $0x364] sm:$0xf] }
 0x1f0   : > { %843 = vst [vmem:[#allocation3 + $0x151] sm:$0xff] %v11515_v9  ;;  %v8796_v21 = vor.u32 %v10232_v13, %v8793_v35  ;;  %v1006_v9 = vpack.c.bf16 %v11524_v8, %v11524_v8  ;;  %v11528_v1 = vadd.f32 %v3394_v23, %v3306_v46 }
 0x1f1   : > { %1132 = vst [vmem:[#allocation4 + $0x3d4] sm:$0xf] %v1100_v62  ;;  %v10236_v11 = vld [vmem:[#allocation4 + $0x380] sm:$0xf0]  ;;  %v804_v5 = vpop.f32.mrf.mxu0 }
 0x1f2   : > { %14147 = vst [vmem:[#allocation38_spill] sm:$0xff] %v11524_v8  ;;  %v8792_v41 = vor.u32 %v10236_v11, %v8791_v59  ;;  %v876_v11 = vld [vmem:[#allocation3 + $0x140] sm:$0xff]  ;;  %v11539_v23 = vadd.f32 %v804_v5, %v668_v16  ;;  %v669_v5 = vld [vmem:[%s10969_s28 + $0xe8] sm:$0xff] }
 0x1f3   : > { %1418 = vst [vmem:[#allocation4 + $0x398] sm:$0xf] %v1100_v62  ;;  %v11534_v13 = vpack.c.bf16 %v876_v11, %v876_v11 }
 0x1f4   : > { %1705 = vst [vmem:[#allocation4 + $0x35c] sm:$0xf] %v1100_v62  ;;  %3255 = vmatmul.bf16.gmra.mxu1 %v8792_v41  ;;  %v3221_v35 = vpop.f32.mrf.mxu1  ;;  %v1067_v41 = vld [vmem:[#allocation3 + $0x13a] sm:$0xff] }
 0x1f5   : > { %1037 = vst [vmem:[#allocation4 + $0x3f4] sm:$0xf] %v1005_v40  ;;  %v1099_v49 = vpack.c.bf16 %v1067_v41, %v1067_v41 }
 0x1f6   : > { %1323 = vst [vmem:[#allocation4 + $0x3b8] sm:$0xf] %v1005_v40  ;;  %v8799_v28 = vld [vmem:[#allocation4 + $0x368] sm:$0xf]  ;;  %v3396_v46 = vpop.f32.mrf.mxu3 }
 0x1f7   : > { %1610 = vst [vmem:[#allocation4 + $0x37c] sm:$0xf] %v1005_v40  ;;  %v8800_v62 = vor.u32 %v10237_v56, %v8799_v28  ;;  %v877_v59 = vld [vmem:[#allocation3 + $0x150] sm:$0xff]  ;;  %3344 = vmatmul.bf16.gmra.mxu2 %v8796_v21  ;;  %v3307_v40 = vpop.f32.mrf.mxu2  ;;  %v10300_v28 = vld [vmem:[%s14076_s6 + $0x100] sm:$0xff]  ;;  %v10323_v21 = vld [vmem:[%s14076_s6 + $0x1b8] sm:$0xff] }
 0x1f8   : > { %1212 = vst [vmem:[#allocation4 + $0x198] sm:$0xf] %v11301_v34  ;;  %v909_v15 = vpack.c.bf16 %v877_v59, %v877_v59  ;;  %v3308_v56 = vadd.f32 %v3307_v40, %v3219_v33  ;;  %3550 = vmatpush.bf16.msrb.mxu1 %v10300_v28  ;;  %v10170_v59 = vld [vmem:[#allocation4 + $0x174] sm:$0xf]  ;;  %3721 = vmatpush.bf16.msrb.mxu3 %v10323_v21  ;;  %v10322_v21 = vld [vmem:[%s14076_s6 + $0x1b0] sm:$0xff] }
 0x1f9   : > { %844 = vst [vmem:[#allocation3 + $0x159] sm:$0xff] %v11524_v8  ;;  %v806_v33 = vpop.f32.mrf.mxu0  ;;  %v3222_v28 = vadd.f32 %v11326_v63, %v3221_v35  ;;  %v10241_v35 = vld [vmem:[#allocation4 + $0x3ac] sm:$0xf] }
 0x1fa   : > { %1038 = vst [vmem:[#allocation4 + $0x418] sm:$0xf] %v1006_v9  ;;  %3433 = vmatmul.bf16.gmra.mxu3 %v8800_v62  ;;  %v10313_v62 = vld [vmem:[%s14076_s6 + $0x168] sm:$0xff] }
 0x1fb   : > { %941 = vst [vmem:[#allocation4 + $0x3f0] sm:$0xf] %v909_v15  ;;  %3634 = vmatpush.bf16.msrb.mxu2 %v10313_v62 }
 0x1fc   : > { %1227 = vst [vmem:[#allocation4 + $0x3b4] sm:$0xf] %v909_v15  ;;  %v3223_v8 = vpop.f32.mrf.mxu1  ;;  %3722 = vmatpush.bf16.msrb.mxu3 %v10322_v21 }
 0x1fd   : > { %1514 = vst [vmem:[#allocation4 + $0x378] sm:$0xf] %v909_v15  ;;  %v11547_v15 = vadd.f32 %v3396_v46, %v3308_v56  ;;  %v8829_v56 = vld [vmem:[#allocation4 + $0x3cc] sm:$0xf0]  ;;  %v11555_v46 = vadd.f32 %v806_v33, %v669_v5  ;;  %v8827_v5 = vld [vmem:[#allocation4 + $0x3a8] sm:$0xf] }
 0x1fe   : > { %1324 = vst [vmem:[#allocation4 + $0x3dc] sm:$0xf] %v1006_v9  ;;  %v8832_v33 = vor.u32 %v10241_v35, %v8829_v56  ;;  %v3224_v56 = vadd.f32 %v11326_v63, %v3223_v8  ;;  %v10311_v8 = vld [vmem:[%s14076_s6 + $0x158] sm:$0xff] }
 0x1ff   : > { %14148 = vst [vmem:[#allocation39_spill] sm:$0xff] %v11539_v23  ;;  %v8549_v11 = vld [vmem:[#allocation4 + $0x194] sm:$0xf0]  ;;  %v3310_v62 = vpop.f32.mrf.mxu2 }
 0x200   : > { %1611 = vst [vmem:[#allocation4 + $0x3a0] sm:$0xf] %v1006_v9  ;;  %v8552_v41 = vor.u32 %v10170_v59, %v8549_v11  ;;  %v1070_v40 = vld [vmem:[#allocation3 + $0x15a] sm:$0xff]  ;;  %v1007_v9 = vpack.c.bf16 %v11539_v23, %v11539_v23  ;;  %v10321_v59 = vld [vmem:[%s14076_s6 + $0x1a8] sm:$0xff] }
 0x201   : > { %940 = vst [vmem:[#allocation4 + $0x3cc] sm:$0xf] %v11534_v13  ;;  %v1102_v16 = vpack.c.bf16 %v1070_v40, %v1070_v40  ;;  %v10312_v11 = vld [vmem:[%s14076_s6 + $0x160] sm:$0xff]  ;;  %v3399_v40 = vpop.f32.mrf.mxu3  ;;  %3723 = vmatpush.bf16.msrb.mxu3 %v10321_v59 }
 0x202   : > { %1131 = vst [vmem:[#allocation4 + $0x3b0] sm:$0xf] %v1099_v49  ;;  %3487 = vmatmul.bf16.gmra.mxu0 %v8552_v41  ;;  %v3311_v49 = vadd.f32 %v3310_v62, %v3222_v28  ;;  %v10246_v41 = vld [vmem:[#allocation4 + $0x3d0] sm:$0xf0]  ;;  %v809_v28 = vpop.f32.mrf.mxu0  ;;  %3635 = vmatpush.bf16.msrb.mxu2 %v10312_v11 }
 0x203   : > { %845 = vst [vmem:[#allocation3 + $0x169] sm:$0xff] %v11539_v23 }
 0x204   : > { %1134 = vst [vmem:[#allocation4 + $0x41c] sm:$0xf] %v1102_v16  ;;  %v11566_v7 = vadd.f32 %v3399_v40, %v3311_v49  ;;  %v3226_v35 = vpop.f32.mrf.mxu1  ;;  %v10320_v49 = vld [vmem:[%s14076_s6 + $0x1a0] sm:$0xff]  ;;  %v878_v40 = vld [vmem:[#allocation3 + $0x158] sm:$0xff] }
 0x205   : > { %14149 = vst [vmem:[#allocation40_spill] sm:$0xff] %v11555_v46  ;;  %3724 = vmatpush.bf16.msrb.mxu3 %v10320_v49 }
 0x206   : > { %1420 = vst [vmem:[#allocation4 + $0x3e0] sm:$0xf] %v1102_v16  ;;  %3636 = vmatpush.bf16.msrb.mxu2 %v10311_v8  ;;  %v671_v8 = vld [vmem:[%s10969_s28 + $0xf8] sm:$0xff] }
 0x207   : > { %1707 = vst [vmem:[#allocation4 + $0x3a4] sm:$0xf] %v1102_v16  ;;  %v1008_v16 = vpack.c.bf16 %v11555_v46, %v11555_v46  ;;  %3349 = vmatmul.bf16.gmra.mxu2 %v8832_v33 }
 0x208   : > { %1039 = vst [vmem:[#allocation4 + $0x43c] sm:$0xf] %v1007_v9  ;;  %v10245_v23 = vld [vmem:[#allocation4 + $0x3c8] sm:$0xf0] }
 0x209   : > { %1325 = vst [vmem:[#allocation4 + $0x400] sm:$0xf] %v1007_v9  ;;  %v8828_v21 = vor.u32 %v10245_v23, %v8827_v5  ;;  %v8835_v62 = vld [vmem:[#allocation4 + $0x3b0] sm:$0xf]  ;;  %v1069_v23 = vld [vmem:[#allocation3 + $0x152] sm:$0xff]  ;;  %v11580_v5 = vpack.c.bf16 %v878_v40, %v878_v40  ;;  %v3401_v33 = vpop.f32.mrf.mxu3 }
 0x20a   : > { %1612 = vst [vmem:[#allocation4 + $0x3c4] sm:$0xf] %v1007_v9  ;;  %v8836_v29 = vor.u32 %v10246_v41, %v8835_v62  ;;  %v879_v52 = vld [vmem:[#allocation3 + $0x168] sm:$0xff]  ;;  %v3312_v9 = vpop.f32.mrf.mxu2  ;;  %v670_v41 = vld [vmem:[%s10969_s28 + $0xf0] sm:$0xff]  ;;  %s7945_s28 = sld [smem:[#allocation5 + %s7944_s26]] }
 0x20b   : > { %1214 = vst [vmem:[#allocation4 + $0x1e0] sm:$0xf] %v11340_v18  ;;  %3260 = vmatmul.bf16.gmra.mxu1 %v8828_v21  ;;  %v911_v11 = vpack.c.bf16 %v879_v52, %v879_v52  ;;  %v3313_v59 = vadd.f32 %v3312_v9, %v3224_v56  ;;  %v10319_v52 = vld [vmem:[%s14076_s6 + $0x198] sm:$0xff]  ;;  %v1101_v21 = vpack.c.bf16 %v1069_v23, %v1069_v23 }
 0x20c   : > { %846 = vst [vmem:[#allocation3 + $0x171] sm:$0xff] %v11555_v46  ;;  %3438 = vmatmul.bf16.gmra.mxu3 %v8836_v29  ;;  %v11587_v62 = vadd.f32 %v809_v28, %v670_v41  ;;  %v811_v46 = vpop.f32.mrf.mxu0  ;;  %v3227_v9 = vadd.f32 %v11326_v63, %v3226_v35  ;;  %v10318_v63 = vld [vmem:[%s14076_s6 + $0x190] sm:$0xff] }
 0x20d   : > { %1040 = vst [vmem:[#allocation4 + $0x460] sm:$0xf] %v1008_v16  ;;  %v11585_v29 = vadd.f32 %v3401_v33, %v3313_v59  ;;  %3725 = vmatpush.bf16.msrb.mxu3 %v10319_v52  ;;  %v8865_v59 = vld [vmem:[#allocation4 + $0x414] sm:$0xf0]  ;;  %v11601_v52 = vadd.f32 %v811_v46, %v671_v8  ;;  %v8863_v46 = vld [vmem:[#allocation4 + $0x3f0] sm:$0xf] }
 0x20e   : > { %943 = vst [vmem:[#allocation4 + $0x438] sm:$0xf] %v911_v11  ;;  %v1295_v28 = vpack.c.bf16 %v11587_v62, %v11587_v62  ;;  %v10309_v33 = vld [vmem:[%s14076_s6 + $0x148] sm:$0xff] }
 0x20f   : > { %1229 = vst [vmem:[#allocation4 + $0x3fc] sm:$0xf] %v911_v11 }
 0x210   : > { %1516 = vst [vmem:[#allocation4 + $0x3c0] sm:$0xf] %v911_v11  ;;  %v3228_v11 = vpop.f32.mrf.mxu1 }
 0x211   : > { %1326 = vst [vmem:[#allocation4 + $0x424] sm:$0xf] %v1008_v16  ;;  %3726 = vmatpush.bf16.msrb.mxu3 %v10318_v63 }
 0x212   : > { %14150 = vst [vmem:[#allocation41_spill] sm:$0xff] %v11587_v62  ;;  %v8585_v56 = vld [vmem:[#allocation4 + $0x1dc] sm:$0xf0]  ;;  %v3315_v35 = vpop.f32.mrf.mxu2 }
 0x213   : > { %1613 = vst [vmem:[#allocation4 + $0x3e8] sm:$0xf] %v1008_v16  ;;  %v8588_v40 = vor.u32 %v10179_v26, %v8585_v56  ;;  %v1072_v49 = vld [vmem:[#allocation3 + $0x172] sm:$0xff]  ;;  %v10250_v16 = vld [vmem:[#allocation4 + $0x3f4] sm:$0xf]  ;;  %v3316_v41 = vadd.f32 %v3315_v35, %v3227_v9 }
 0x214   : > { %942 = vst [vmem:[#allocation4 + $0x414] sm:$0xf] %v11580_v5  ;;  %v1104_v23 = vpack.c.bf16 %v1072_v49, %v1072_v49  ;;  %v10310_v26 = vld [vmem:[%s14076_s6 + $0x150] sm:$0xff]  ;;  %v10331_v56 = vld [vmem:[%s14076_s6 + $0x1f8] sm:$0xff]  ;;  %v3404_v49 = vpop.f32.mrf.mxu3  ;;  %v10255_v9 = vld [vmem:[#allocation4 + $0x418] sm:$0xf0]  ;;  %v3463_v63 = vpop.f32.mrf.mxu0 }
 0x215   : > { %1133 = vst [vmem:[#allocation4 + $0x3f8] sm:$0xf] %v1101_v21  ;;  %3492 = vmatmul.bf16.gmra.mxu0 %v8588_v40  ;;  %3637 = vmatpush.bf16.msrb.mxu2 %v10310_v26  ;;  %v10317_v21 = vld [vmem:[%s14076_s6 + $0x188] sm:$0xff]  ;;  %v8868_v40 = vor.u32 %v10250_v16, %v8865_v59  ;;  %v11612_v8 = vadd.f32 %v3404_v49, %v3316_v41  ;;  %v880_v35 = vld [vmem:[#allocation3 + $0x170] sm:$0xff]  ;;  %v11621_v16 = vld [vmem:[%s11153_s0] ss:$0 sm:$0xff] }
 0x216   : > { %847 = vst [vmem:[#allocation3 + $0x181] sm:$0xff] %v11587_v62  ;;  %v1296_v26 = vpack.c.bf16 %v11601_v52, %v11601_v52  ;;  %3810 = vmatpush.bf16.msra.mxu0 %v10331_v56  ;;  %v1071_v62 = vld [vmem:[#allocation3 + $0x16a] sm:$0xff]  ;;  %v11617_v38 = vadd.f32 %v3463_v63, %v11343_v20  ;;  %v3229_v41 = vadd.f32 %v11621_v16, %v3228_v11  ;;  %v10308_v56 = vld [vmem:[%s14076_s6 + $0x140] sm:$0xff]  ;;  %v10339_v63 = vld [vmem:[%s14076_s6 + $0x238] sm:$0xff] }
 0x217   : > { %1136 = vst [vmem:[#allocation4 + $0x464] sm:$0xf] %v1104_v23  ;;  %3727 = vmatpush.bf16.msrb.mxu3 %v10317_v21  ;;  %v10316_v20 = vld [vmem:[%s14076_s6 + $0x180] sm:$0xff]  ;;  %3354 = vmatmul.bf16.gmra.mxu2 %v8868_v40  ;;  %v11631_v11 = vpack.c.bf16 %v880_v35, %v880_v35  ;;  %v11633_v21 = vpack.c.bf16 %v1071_v62, %v1071_v62  ;;  %v10748_v35 = vld [vmem:[#allocation3 + $0x32] sm:$0xff]  ;;  %v8899_v31 = vld [vmem:[#allocation4 + $0x438] sm:$0xf] }
 0x218   : > { %1422 = vst [vmem:[#allocation4 + $0x428] sm:$0xf] %v1104_v23  ;;  %v3231_v49 = vpop.f32.mrf.mxu1  ;;  %3899 = vmatpush.bf16.msra.mxu1 %v10339_v63 }
 0x219   : > { %14151 = vst [vmem:[#allocation42_spill] sm:$0xff] %v11601_v52  ;;  %3638 = vmatpush.bf16.msrb.mxu2 %v10309_v33 }
 0x21a   : > { %1709 = vst [vmem:[#allocation4 + $0x3ec] sm:$0xf] %v1104_v23  ;;  %v3317_v33 = vpop.f32.mrf.mxu2 }
 0x21b   : > { %1327 = vst [vmem:[#allocation4 + $0x448] sm:$0xf] %v1295_v28  ;;  %v10254_v58 = vld [vmem:[#allocation4 + $0x410] sm:$0xf0]  ;;  %v3318_v40 = vadd.f32 %v3317_v33, %v3229_v41  ;;  %3728 = vmatpush.bf16.msrb.mxu3 %v10316_v20  ;;  %v10749_v20 = vld [vmem:[#allocation3 + $0x50] sm:$0xff] }
 0x21c   : > { %1614 = vst [vmem:[#allocation4 + $0x40c] sm:$0xf] %v1295_v28  ;;  %v8864_v23 = vor.u32 %v10254_v58, %v8863_v46  ;;  %v8871_v59 = vld [vmem:[#allocation4 + $0x3f8] sm:$0xf]  ;;  %v8901_v33 = vld [vmem:[#allocation4 + $0x45c] sm:$0xf0] }
 0x21d   : > { %1216 = vst [vmem:[#allocation4 + $0x228] sm:$0xf] %v11366_v2  ;;  %v8872_v58 = vor.u32 %v10255_v9, %v8871_v59  ;;  %v1167_v28 = vld [vmem:[#allocation3 + $0x180] sm:$0xff]  ;;  %3639 = vmatpush.bf16.msrb.mxu2 %v10308_v56  ;;  %v3406_v9 = vpop.f32.mrf.mxu3  ;;  %v10188_v59 = vld [vmem:[#allocation4 + $0x204] sm:$0xf] }
 0x21e   : > { %848 = vst [vmem:[#allocation3 + $0x189] sm:$0xff] %v11601_v52  ;;  %3265 = vmatmul.bf16.gmra.mxu1 %v8864_v23  ;;  %v1199_v46 = vpack.c.bf16 %v1167_v28, %v1167_v28  ;;  %v11638_v23 = vadd.f32 %v3406_v9, %v3318_v40  ;;  %v3232_v52 = vadd.f32 %v11621_v16, %v3231_v49  ;;  %v10750_v40 = vld [vmem:[#allocation3 + $0x4a] sm:$0xff] }
 0x21f   : > { %1328 = vst [vmem:[#allocation4 + $0x46c] sm:$0xf] %v1296_v26  ;;  %3443 = vmatmul.bf16.gmra.mxu3 %v8872_v58  ;;  %v11645_v9 = vpack.c.bf16 %v10750_v40, %v10750_v40 }
 0x220   : > { %1615 = vst [vmem:[#allocation4 + $0x430] sm:$0xf] %v1296_v26  ;;  %v1363_v26 = vpack.c.bf16 %v10748_v35, %v10748_v35  ;;  %v3233_v41 = vpop.f32.mrf.mxu1  ;;  %v10259_v35 = vld [vmem:[#allocation4 + $0x43c] sm:$0xf] }
 0x221   : > { %1231 = vst [vmem:[#allocation4 + $0x444] sm:$0xf] %v1199_v46  ;;  %v8904_v30 = vor.u32 %v10259_v35, %v8901_v33  ;;  %v10754_v35 = vld [vmem:[#allocation3 + $0x7a] sm:$0xff] }
 0x222   : > { %1518 = vst [vmem:[#allocation4 + $0x408] sm:$0xf] %v1199_v46  ;;  %v1461_v46 = vpack.c.bf16 %v10749_v20, %v10749_v20  ;;  %v3320_v63 = vpop.f32.mrf.mxu2 }
 0x223   : > { %944 = vst [vmem:[#allocation4 + $0x45c] sm:$0xf] %v11631_v11  ;;  %v3321_v49 = vadd.f32 %v3320_v63, %v3232_v52  ;;  %v3234_v52 = vadd.f32 %v11621_v16, %v3233_v41  ;;  %v10753_v63 = vld [vmem:[#allocation3 + $0x80] sm:$0xff]  ;;  %v10253_v60 = vld [vmem:[#allocation4 + $0x40c] sm:$0xf] }
 0x224   : > { %v8621_v62 = vld [vmem:[#allocation4 + $0x224] sm:$0xf0]  ;;  %1135 = vst [vmem:[#allocation4 + $0x440] sm:$0xf] %v11633_v21 }
 0x225   : > { %v8624_v58 = vor.u32 %v10188_v59, %v8621_v62  ;;  %v1360_v28 = vld [vmem:[#allocation3 + $0x18a] sm:$0xff]  ;;  %1218 = vst [vmem:[#allocation4 + $0x270] sm:$0xf] %v11391_v42  ;;  %v10264_v59 = vld [vmem:[#allocation4 + $0x460] sm:$0xf0]  ;;  %v3409_v6 = vpop.f32.mrf.mxu3 }
 0x226   : > { %v1392_v56 = vpack.c.bf16 %v1360_v28, %v1360_v28  ;;  %1220 = vst [vmem:[#allocation4 + $0x2b8] sm:$0xf] %v11433_v55  ;;  %v10751_v62 = vld [vmem:[#allocation3 + $0x68] sm:$0xff]  ;;  %v11647_v43 = vadd.f32 %v3409_v6, %v3321_v49 }
 0x227   : > { %3497 = vmatmul.bf16.gmra.mxu0 %v8624_v58  ;;  %1395 = vst [vmem:[#allocation4 + $0x5c] sm:$0xf] %v1363_v26  ;;  %v1463_v12 = vpack.c.bf16 %v10751_v62, %v10751_v62  ;;  %v10752_v26 = vld [vmem:[#allocation3 + $0x62] sm:$0xff]  ;;  %3359 = vmatmul.bf16.gmra.mxu2 %v8904_v30  ;;  %v10197_v30 = vld [vmem:[#allocation4 + $0x24c] sm:$0xf] }
 0x228   : > { %1424 = vst [vmem:[#allocation4 + $0x470] sm:$0xf] %v1392_v56  ;;  %v1367_v40 = vpack.c.bf16 %v10752_v26, %v10752_v26  ;;  %v8377_v49 = vld [vmem:[#allocation4 + $0x34] sm:$0xf0]  ;;  %v8889_v51 = vld [vmem:[#allocation4 + $0x42c] sm:$0xf0] }
 0x229   : > { %1711 = vst [vmem:[#allocation4 + $0x434] sm:$0xf] %v1392_v56  ;;  %v3236_v56 = vpop.f32.mrf.mxu1 }
 0x22a   : > { %v10263_v28 = vld [vmem:[#allocation4 + $0x458] sm:$0xf0]  ;;  %1493 = vst [vmem:[#allocation4 + $0x84] sm:$0xf] %v1461_v46  ;;  %v3322_v6 = vpop.f32.mrf.mxu2 }
 0x22b   : > { %v8900_v20 = vor.u32 %v10263_v28, %v8899_v31  ;;  %v8907_v58 = vld [vmem:[#allocation4 + $0x440] sm:$0xf]  ;;  %1222 = vst [vmem:[#allocation4 + $0x300] sm:$0xf] %v11478_v25  ;;  %v11653_v31 = vpop.f32.mrf.mxu0  ;;  %v3323_v25 = vadd.f32 %v3322_v6, %v3234_v52  ;;  %v10130_v28 = vld [vmem:[#allocation4 + $0x30] sm:$0xf0] }
 0x22c   : > { %v8908_v24 = vor.u32 %v10264_v59, %v8907_v58  ;;  %1397 = vst [vmem:[#allocation4 + $0xa4] sm:$0xf] %v11645_v9  ;;  %v8657_v46 = vld [vmem:[#allocation4 + $0x26c] sm:$0xf0]  ;;  %v1369_v59 = vpack.c.bf16 %v10754_v35, %v10754_v35  ;;  %v10755_v35 = vld [vmem:[#allocation3 + $0x92] sm:$0xff] }
 0x22d   : > { %1495 = vst [vmem:[#allocation4 + $0xcc] sm:$0xf] %v1463_v12  ;;  %v3411_v33 = vpop.f32.mrf.mxu3  ;;  %v3237_v12 = vadd.f32 %v11621_v16, %v3236_v56  ;;  %v8375_v56 = vld [vmem:[#allocation4 + $0x10] sm:$0xf] }
 0x22e   : > { %1224 = vst [vmem:[#allocation4 + $0x348] sm:$0xf] %v11510_v27  ;;  %3270 = vmatmul.bf16.gmra.mxu1 %v8900_v20  ;;  %v11658_v41 = vadd.f32 %v3411_v33, %v3323_v25  ;;  %v8376_v25 = vor.u32 %v10130_v28, %v8375_v56  ;;  %v10139_v28 = vld [vmem:[#allocation4 + $0x78] sm:$0xf0] }
 0x22f   : > { %1399 = vst [vmem:[#allocation4 + $0xec] sm:$0xf] %v1367_v40  ;;  %3448 = vmatmul.bf16.gmra.mxu3 %v8908_v24  ;;  %v8660_v24 = vor.u32 %v10197_v30, %v8657_v46  ;;  %v8383_v46 = vld [vmem:[#allocation4 + $0x18] sm:$0xf] }
 0x230   : > { %1226 = vst [vmem:[#allocation4 + $0x390] sm:$0xf] %v11534_v13  ;;  %v1465_v13 = vpack.c.bf16 %v10753_v63, %v10753_v63 }
 0x231   : > { %1499 = vst [vmem:[#allocation4 + $0x15c] sm:$0xf] %v11301_v34  ;;  %v3238_v27 = vpop.f32.mrf.mxu1  ;;  %v10330_v34 = vld [vmem:[%s14076_s6 + $0x1f0] sm:$0xff] }
 0x232   : > { %1228 = vst [vmem:[#allocation4 + $0x3d8] sm:$0xf] %v11580_v5  ;;  %v10126_v5 = vld [vmem:[#allocation4 + $0x14] sm:$0xf]  ;;  %3811 = vmatpush.bf16.msra.mxu0 %v10330_v34 }
 0x233   : > { %1501 = vst [vmem:[#allocation4 + $0x1a4] sm:$0xf] %v11340_v18  ;;  %v3325_v18 = vpop.f32.mrf.mxu2  ;;  %v3468_v20 = vpop.f32.mrf.mxu0  ;;  %v8380_v6 = vor.u32 %v10126_v5, %v8377_v49  ;;  %v10135_v5 = vld [vmem:[#allocation4 + $0x5c] sm:$0xf]  ;;  %v8413_v49 = vld [vmem:[#allocation4 + $0x7c] sm:$0xf0] }
 0x234   : > { %1230 = vst [vmem:[#allocation4 + $0x420] sm:$0xf] %v11631_v11  ;;  %v3326_v62 = vadd.f32 %v3325_v18, %v3237_v12  ;;  %v11670_v26 = vadd.f32 %v3468_v20, %v11448_v3  ;;  %v10338_v3 = vld [vmem:[%s14076_s6 + $0x230] sm:$0xff] }
 0x235   : > { %1503 = vst [vmem:[#allocation4 + $0x1ec] sm:$0xf] %v11366_v2  ;;  %v3414_v58 = vpop.f32.mrf.mxu3  ;;  %v10131_v2 = vld [vmem:[#allocation4 + $0x38] sm:$0xf0]  ;;  %3900 = vmatpush.bf16.msra.mxu1 %v10338_v3 }
 0x236   : > { %1497 = vst [vmem:[#allocation4 + $0x114] sm:$0xf] %v1465_v13  ;;  %v11672_v52 = vadd.f32 %v3414_v58, %v3326_v62  ;;  %v8384_v33 = vor.u32 %v10131_v2, %v8383_v46  ;;  %v10140_v58 = vld [vmem:[#allocation4 + $0x80] sm:$0xf0] }
 0x237   : > { %3502 = vmatmul.bf16.gmra.mxu0 %v8660_v24  ;;  %1401 = vst [vmem:[#allocation4 + $0x134] sm:$0xf] %v1369_v59  ;;  %3640 = vmatmul.bf16.vlgmr.msrb.gmra.mxu2 %v8380_v6  ;;  %v8411_v6 = vld [vmem:[#allocation4 + $0x58] sm:$0xf] }
 0x238   : > { %1505 = vst [vmem:[#allocation4 + $0x234] sm:$0xf] %v11391_v42  ;;  %v3239_v42 = vadd.f32 %v11621_v16, %v3238_v27  ;;  %v10206_v27 = vld [vmem:[#allocation4 + $0x294] sm:$0xf] }
 0x239   : > { %1507 = vst [vmem:[#allocation4 + $0x27c] sm:$0xf] %v11433_v55  ;;  %v3241_v30 = vpop.f32.mrf.mxu1 }
 0x23a   : > { %1684 = vst [vmem:[#allocation4 + $0x68] sm:$0xf] %v11645_v9  ;;  %v8693_v9 = vld [vmem:[#allocation4 + $0x2b4] sm:$0xf0]  ;;  %v3242_v34 = vadd.f32 %v11621_v16, %v3241_v30  ;;  %v8419_v30 = vld [vmem:[#allocation4 + $0x60] sm:$0xf] }
 0x23b   : > { %1686 = vst [vmem:[#allocation4 + $0xb0] sm:$0xf] %v1367_v40  ;;  %v3327_v55 = vpop.f32.mrf.mxu2  ;;  %v11679_v12 = vpop.f32.mrf.mxu0  ;;  %v8696_v13 = vor.u32 %v10206_v27, %v8693_v9  ;;  %v8729_v9 = vld [vmem:[#allocation4 + $0x2fc] sm:$0xf0] }
 0x23c   : > { %1688 = vst [vmem:[#allocation4 + $0xf8] sm:$0xf] %v1369_v59  ;;  %v3328_v24 = vadd.f32 %v3327_v55, %v3239_v42  ;;  %v1371_v59 = vpack.c.bf16 %v10755_v35, %v10755_v35  ;;  %v8420_v55 = vor.u32 %v10140_v58, %v8419_v30 }
 0x23d   : > { %v3416_v40 = vpop.f32.mrf.mxu3  ;;  %1517 = vst [vmem:[#allocation4 + $0x3e4] sm:$0xf] %v11631_v11 }
 0x23e   : > { %3551 = vmatmul.bf16.vlgmr.msrb.gmra.mxu1 %v8376_v25  ;;  %v11681_v63 = vadd.f32 %v3416_v40, %v3328_v24  ;;  %1403 = vst [vmem:[#allocation4 + $0x17c] sm:$0xf] %v1371_v59  ;;  %v8416_v25 = vor.u32 %v10135_v5, %v8413_v49  ;;  %v10756_v5 = vld [vmem:[#allocation3 + $0xaa] sm:$0xff] }
 0x23f   : > { %3729 = vmatmul.bf16.vlgmr.msrb.gmra.mxu3 %v8384_v33  ;;  %1690 = vst [vmem:[#allocation4 + $0x140] sm:$0xf] %v1371_v59  ;;  %v8412_v33 = vor.u32 %v10139_v28, %v8411_v6  ;;  %v10215_v59 = vld [vmem:[#allocation4 + $0x2dc] sm:$0xf]  ;;  %v1373_v49 = vpack.c.bf16 %v10756_v5, %v10756_v5  ;;  %v8449_v28 = vld [vmem:[#allocation4 + $0xc4] sm:$0xf0] }
 0x240   : > { %v8447_v6 = vld [vmem:[#allocation4 + $0xa0] sm:$0xf]  ;;  %v8765_v5 = vld [vmem:[#allocation4 + $0x344] sm:$0xf0]  ;;  %1421 = vst [vmem:[#allocation4 + $0x404] sm:$0xf] %v11633_v21 }
 0x241   : > { %v3243_v18 = vpop.f32.mrf.mxu1  ;;  %1405 = vst [vmem:[#allocation4 + $0x1c4] sm:$0xf] %v1373_v49 }
 0x242   : > { %v3244_v3 = vadd.f32 %v11621_v16, %v3243_v18  ;;  %v10144_v18 = vld [vmem:[#allocation4 + $0xa4] sm:$0xf]  ;;  %1692 = vst [vmem:[#allocation4 + $0x188] sm:$0xf] %v1373_v49 }
 0x243   : > { %v3330_v62 = vpop.f32.mrf.mxu2  ;;  %v3473_v2 = vpop.f32.mrf.mxu0  ;;  %1708 = vst [vmem:[#allocation4 + $0x3c8] sm:$0xf] %v11633_v21  ;;  %v10333_v21 = vld [vmem:[%s14076_s6 + $0x208] sm:$0xff] }
 0x244   : > { %v3331_v20 = vadd.f32 %v3330_v62, %v3242_v34  ;;  %v11685_v46 = vadd.f32 %v3473_v2, %v11476_v14  ;;  %v8732_v34 = vor.u32 %v10215_v59, %v8729_v9  ;;  %v10149_v2 = vld [vmem:[#allocation4 + $0xc8] sm:$0xf0] }
 0x245   : > { %v3419_v56 = vpop.f32.mrf.mxu3 }
 0x246   : > { %v11687_v42 = vadd.f32 %v3419_v56, %v3331_v20  ;;  %v10148_v20 = vld [vmem:[#allocation4 + $0xc0] sm:$0xf0] }
 0x247   : > { %3507 = vmatmul.bf16.gmra.mxu0 %v8696_v13  ;;  %3645 = vmatmul.bf16.gmra.mxu2 %v8416_v25  ;;  %v8452_v25 = vor.u32 %v10144_v18, %v8449_v28  ;;  %v10224_v18 = vld [vmem:[#allocation4 + $0x324] sm:$0xf] }
 0x249   : > { %v3246_v27 = vpop.f32.mrf.mxu1 }
 0x24a   : > { %v3247_v62 = vadd.f32 %v11621_v16, %v3246_v27 }
 0x24b   : > { %v3332_v24 = vpop.f32.mrf.mxu2  ;;  %v11690_v13 = vpop.f32.mrf.mxu0 }
 0x24c   : > { %v3333_v40 = vadd.f32 %v3332_v24, %v3244_v3  ;;  %v8448_v3 = vor.u32 %v10148_v20, %v8447_v6  ;;  %v8455_v24 = vld [vmem:[#allocation4 + $0xa8] sm:$0xf]  ;;  %v8768_v20 = vor.u32 %v10224_v18, %v8765_v5 }
 0x24d   : > { %v3421_v35 = vpop.f32.mrf.mxu3  ;;  %v8456_v27 = vor.u32 %v10149_v2, %v8455_v24 }
 0x24e   : > { %3556 = vmatmul.bf16.gmra.mxu1 %v8412_v33  ;;  %v11692_v14 = vadd.f32 %v3421_v35, %v3333_v40 }
 0x24f   : > { %3734 = vmatmul.bf16.gmra.mxu3 %v8420_v55  ;;  %v10329_v55 = vld [vmem:[%s14076_s6 + $0x1e8] sm:$0xff] }
 0x250   : > { %3812 = vmatpush.bf16.msra.mxu0 %v10329_v55  ;;  %v10158_v55 = vld [vmem:[#allocation4 + $0x110] sm:$0xf0] }
 0x251   : > { %v3248_v30 = vpop.f32.mrf.mxu1 }
 0x252   : > { %v3249_v59 = vadd.f32 %v11621_v16, %v3248_v30  ;;  %v10157_v30 = vld [vmem:[#allocation4 + $0x108] sm:$0xf0] }
 0x253   : > { %v3335_v58 = vpop.f32.mrf.mxu2 }
 0x254   : > { %v3336_v56 = vadd.f32 %v3335_v58, %v3247_v62 }
 0x255   : > { %v3424_v33 = vpop.f32.mrf.mxu3  ;;  %v3478_v9 = vpop.f32.mrf.mxu0 }
 0x256   : > { %v11698_v40 = vadd.f32 %v3424_v33, %v3336_v56  ;;  %v11701_v35 = vadd.f32 %v3478_v9, %v11506_v57  ;;  %v10757_v57 = vld [vmem:[#allocation3 + $0xc2] sm:$0xff] }
 0x257   : > { %3512 = vmatmul.bf16.gmra.mxu0 %v8732_v34  ;;  %3650 = vmatmul.bf16.gmra.mxu2 %v8452_v25  ;;  %v10337_v34 = vld [vmem:[%s14076_s6 + $0x228] sm:$0xff]  ;;  %v1375_v2 = vpack.c.bf16 %v10757_v57, %v10757_v57  ;;  %v10153_v25 = vld [vmem:[#allocation4 + $0xec] sm:$0xf]  ;;  %v8485_v33 = vld [vmem:[#allocation4 + $0x10c] sm:$0xf0] }
 0x258   : > { %3901 = vmatpush.bf16.msra.mxu1 %v10337_v34  ;;  %v8488_v24 = vor.u32 %v10153_v25, %v8485_v33  ;;  %v10233_v25 = vld [vmem:[#allocation4 + $0x36c] sm:$0xf] }
 0x259   : > { %1407 = vst [vmem:[#allocation4 + $0x20c] sm:$0xf] %v1375_v2 }
 0x25a   : > { %1694 = vst [vmem:[#allocation4 + $0x1d0] sm:$0xf] %v1375_v2 }
 0x25b   : > { %v3337_v49 = vpop.f32.mrf.mxu2 }
 0x25c   : > { %v3338_v62 = vadd.f32 %v3337_v49, %v3249_v59 }
 0x25d   : > { %v3426_v28 = vpop.f32.mrf.mxu3  ;;  %v11709_v6 = vpop.f32.mrf.mxu0 }
 0x25e   : > { %3561 = vmatmul.bf16.gmra.mxu1 %v8448_v3  ;;  %v11707_v58 = vadd.f32 %v3426_v28, %v3338_v62  ;;  %v3251_v56 = vpop.f32.mrf.mxu1  ;;  %v8483_v3 = vld [vmem:[#allocation4 + $0xe8] sm:$0xf]  ;;  %v8801_v28 = vld [vmem:[#allocation4 + $0x38c] sm:$0xf0] }
 0x25f   : > { %3739 = vmatmul.bf16.gmra.mxu3 %v8456_v27  ;;  %v8484_v9 = vor.u32 %v10157_v30, %v8483_v3  ;;  %v8491_v27 = vld [vmem:[#allocation4 + $0xf0] sm:$0xf]  ;;  %v3252_v59 = vadd.f32 %v11621_v16, %v3251_v56  ;;  %v8804_v33 = vor.u32 %v10233_v25, %v8801_v28 }
 0x260   : > { %v8492_v34 = vor.u32 %v10158_v55, %v8491_v27  ;;  %v10758_v30 = vld [vmem:[#allocation3 + $0xda] sm:$0xff]  ;;  %v8521_v27 = vld [vmem:[#allocation4 + $0x154] sm:$0xf0] }
 0x261   : > { %v1377_v3 = vpack.c.bf16 %v10758_v30, %v10758_v30  ;;  %v10328_v30 = vld [vmem:[%s14076_s6 + $0x1e0] sm:$0xff] }
 0x262   : > { %3813 = vmatpush.bf16.msra.mxu0 %v10328_v30 }
 0x263   : > { %1409 = vst [vmem:[#allocation4 + $0x254] sm:$0xf] %v1377_v3 }
 0x264   : > { %1696 = vst [vmem:[#allocation4 + $0x218] sm:$0xf] %v1377_v3 }
 0x266   : > { %v3253_v5 = vpop.f32.mrf.mxu1 }
 0x267   : > { %3517 = vmatmul.bf16.gmra.mxu0 %v8768_v20  ;;  %3655 = vmatmul.bf16.gmra.mxu2 %v8488_v24  ;;  %v3254_v56 = vadd.f32 %v11621_v16, %v3253_v5 }
 0x26a   : > { %v3340_v49 = vpop.f32.mrf.mxu2 }
 0x26b   : > { %v3341_v18 = vadd.f32 %v3340_v49, %v3252_v59  ;;  %v10166_v49 = vld [vmem:[#allocation4 + $0x150] sm:$0xf0] }
 0x26c   : > { %v3483_v62 = vpop.f32.mrf.mxu0 }
 0x26d   : > { %v11713_v20 = vadd.f32 %v3483_v62, %v11528_v1  ;;  %v3429_v57 = vpop.f32.mrf.mxu3 }
 0x26e   : > { %3566 = vmatmul.bf16.gmra.mxu1 %v8484_v9  ;;  %v11715_v2 = vadd.f32 %v3429_v57, %v3341_v18  ;;  %v10162_v9 = vld [vmem:[#allocation4 + $0x134] sm:$0xf]  ;;  %v10167_v18 = vld [vmem:[#allocation4 + $0x158] sm:$0xf0]  ;;  %v8519_v57 = vld [vmem:[#allocation4 + $0x130] sm:$0xf] }
 0x26f   : > { %3744 = vmatmul.bf16.gmra.mxu3 %v8492_v34  ;;  %v8524_v25 = vor.u32 %v10162_v9, %v8521_v27  ;;  %v8520_v5 = vor.u32 %v10166_v49, %v8519_v57  ;;  %v8837_v27 = vld [vmem:[#allocation4 + $0x3d4] sm:$0xf0] }
 0x271   : > { %v3256_v55 = vpop.f32.mrf.mxu1 }
 0x272   : > { %v3342_v24 = vpop.f32.mrf.mxu2  ;;  %v3257_v4 = vadd.f32 %v11621_v16, %v3256_v55 }
 0x273   : > { %v3343_v34 = vadd.f32 %v3342_v24, %v3254_v56  ;;  %v1168_v24 = vld [vmem:[#allocation3 + $0x188] sm:$0xff] }
 0x274   : > { %v3485_v59 = vpop.f32.mrf.mxu0 }
 0x275   : > { %v11719_v1 = vadd.f32 %v3485_v59, %v11547_v15  ;;  %v3431_v62 = vpop.f32.mrf.mxu3  ;;  %v10336_v15 = vld [vmem:[%s14076_s6 + $0x220] sm:$0xff] }
 0x276   : > { %v11721_v28 = vadd.f32 %v3431_v62, %v3343_v34  ;;  %3902 = vmatpush.bf16.msra.mxu1 %v10336_v15  ;;  %v10171_v15 = vld [vmem:[#allocation4 + $0x17c] sm:$0xf] }
 0x277   : > { %3522 = vmatmul.bf16.gmra.mxu0 %v8804_v33  ;;  %v8527_v33 = vld [vmem:[#allocation4 + $0x138] sm:$0xf]  ;;  %3660 = vmatmul.bf16.gmra.mxu2 %v8524_v25  ;;  %v1200_v25 = vpack.c.bf16 %v1168_v24, %v1168_v24 }
 0x278   : > { %v8528_v56 = vor.u32 %v10167_v18, %v8527_v33  ;;  %v10242_v18 = vld [vmem:[#allocation4 + $0x3b4] sm:$0xf] }
 0x279   : > { %v3258_v59 = vpop.f32.mrf.mxu1  ;;  %v8840_v57 = vor.u32 %v10242_v18, %v8837_v27  ;;  %1232 = vst [vmem:[#allocation4 + $0x468] sm:$0xf] %v1200_v25 }
 0x27a   : > { %v3345_v3 = vpop.f32.mrf.mxu2  ;;  %v3259_v30 = vadd.f32 %v11621_v16, %v3258_v59  ;;  %1519 = vst [vmem:[#allocation4 + $0x42c] sm:$0xf] %v1200_v25  ;;  %v10326_v25 = vld [vmem:[%s14076_s6 + $0x1d0] sm:$0xff] }
 0x27b   : > { %v3346_v9 = vadd.f32 %v3345_v3, %v3257_v4  ;;  %v10327_v4 = vld [vmem:[%s14076_s6 + $0x1d8] sm:$0xff] }
 0x27c   : > { %3814 = vmatpush.bf16.msra.mxu0 %v10327_v4 }
 0x27d   : > { %v3434_v49 = vpop.f32.mrf.mxu3 }
 0x27e   : > { %3571 = vmatmul.bf16.gmra.mxu1 %v8520_v5  ;;  %v11733_v55 = vadd.f32 %v3434_v49, %v3346_v9  ;;  %v10759_v5 = vld [vmem:[#allocation3 + $0xf2] sm:$0xff]  ;;  %v10175_v9 = vld [vmem:[#allocation4 + $0x198] sm:$0xf0] }
 0x27f   : > { %3749 = vmatmul.bf16.gmra.mxu3 %v8528_v56  ;;  %v3488_v34 = vpop.f32.mrf.mxu0  ;;  %v1379_v33 = vpack.c.bf16 %v10759_v5, %v10759_v5 }
 0x280   : > { %v11731_v62 = vadd.f32 %v3488_v34, %v11566_v7  ;;  %v8557_v7 = vld [vmem:[#allocation4 + $0x19c] sm:$0xf0]  ;;  %v10176_v34 = vld [vmem:[#allocation4 + $0x1a0] sm:$0xf0]  ;;  %3815 = vmatpush.bf16.msra.mxu0 %v10326_v25 }
 0x281   : > { %1411 = vst [vmem:[#allocation4 + $0x29c] sm:$0xf] %v1379_v33  ;;  %v8560_v5 = vor.u32 %v10171_v15, %v8557_v7  ;;  %v8564_v4 = vor.u32 %v10176_v34, %v8563_v32  ;;  %v8873_v15 = vld [vmem:[#allocation4 + $0x41c] sm:$0xf0] }
 0x282   : > { %v3347_v56 = vpop.f32.mrf.mxu2  ;;  %1698 = vst [vmem:[#allocation4 + $0x260] sm:$0xf] %v1379_v33  ;;  %v10760_v34 = vld [vmem:[#allocation3 + $0x110] sm:$0xff] }
 0x283   : > { %v3348_v3 = vadd.f32 %v3347_v56, %v3259_v30 }
 0x285   : > { %v3436_v24 = vpop.f32.mrf.mxu3 }
 0x286   : > { %v11742_v49 = vadd.f32 %v3436_v24, %v3348_v3 }
 0x287   : > { %3527 = vmatmul.bf16.gmra.mxu0 %v8840_v57  ;;  %v3490_v27 = vpop.f32.mrf.mxu0  ;;  %v8555_v57 = vld [vmem:[#allocation4 + $0x178] sm:$0xf]  ;;  %3665 = vmatmul.bf16.gmra.mxu2 %v8560_v5 }
 0x288   : > { %v11740_v59 = vadd.f32 %v3490_v27, %v11585_v29  ;;  %v3261_v18 = vpop.f32.mrf.mxu1  ;;  %v8556_v50 = vor.u32 %v10175_v9, %v8555_v57  ;;  %v10325_v29 = vld [vmem:[%s14076_s6 + $0x1c8] sm:$0xff]  ;;  %v1477_v57 = vpack.c.bf16 %v10760_v34, %v10760_v34 }
 0x289   : > { %v3262_v30 = vadd.f32 %v11621_v16, %v3261_v18  ;;  %3816 = vmatpush.bf16.msra.mxu0 %v10325_v29  ;;  %v10251_v27 = vld [vmem:[#allocation4 + $0x3fc] sm:$0xf]  ;;  %v10180_v29 = vld [vmem:[#allocation4 + $0x1c4] sm:$0xf] }
 0x28a   : > { %v3350_v33 = vpop.f32.mrf.mxu2  ;;  %v8876_v32 = vor.u32 %v10251_v27, %v8873_v15  ;;  %v10761_v5 = vld [vmem:[#allocation3 + $0x10a] sm:$0xff]  ;;  %1509 = vst [vmem:[#allocation4 + $0x2c4] sm:$0xf] %v1477_v57 }
 0x28b   : > { %v3351_v56 = vadd.f32 %v3350_v33, %v3262_v30  ;;  %v1381_v25 = vpack.c.bf16 %v10761_v5, %v10761_v5  ;;  %v8593_v33 = vld [vmem:[#allocation4 + $0x1e4] sm:$0xf0] }
 0x28c   : > { %v8596_v5 = vor.u32 %v10180_v29, %v8593_v33 }
 0x28d   : > { %1413 = vst [vmem:[#allocation4 + $0x2e4] sm:$0xf] %v1381_v25 }
 0x28e   : > { %3576 = vmatmul.bf16.gmra.mxu1 %v8556_v50  ;;  %v10324_v50 = vld [vmem:[%s14076_s6 + $0x1c0] sm:$0xff]  ;;  %1700 = vst [vmem:[#allocation4 + $0x2a8] sm:$0xf] %v1381_v25  ;;  %v10335_v25 = vld [vmem:[%s14076_s6 + $0x218] sm:$0xff] }
 0x28f   : > { %3754 = vmatmul.bf16.gmra.mxu3 %v8564_v4  ;;  %v3439_v7 = vpop.f32.mrf.mxu3  ;;  %3817 = vmatpush.bf16.msra.mxu0 %v10324_v50  ;;  %v8599_v50 = vld [vmem:[#allocation4 + $0x1c8] sm:$0xf] }
 0x290   : > { %v11751_v9 = vadd.f32 %v3439_v7, %v3351_v56  ;;  %v3263_v24 = vpop.f32.mrf.mxu1  ;;  %v10184_v56 = vld [vmem:[#allocation4 + $0x1e0] sm:$0xf0]  ;;  %v10185_v7 = vld [vmem:[#allocation4 + $0x1e8] sm:$0xf0]  ;;  %3903 = vmatpush.bf16.msra.mxu1 %v10335_v25  ;;  %v8629_v25 = vld [vmem:[#allocation4 + $0x22c] sm:$0xf0] }
 0x291   : > { %v3264_v30 = vadd.f32 %v11621_v16, %v3263_v24  ;;  %v8600_v0 = vor.u32 %v10185_v7, %v8599_v50  ;;  %v10762_v7 = vld [vmem:[#allocation3 + $0x128] sm:$0xff] }
 0x292   : > { %v3493_v3 = vpop.f32.mrf.mxu0  ;;  %v3352_v4 = vpop.f32.mrf.mxu2 }
 0x293   : > { %v11754_v18 = vadd.f32 %v3493_v3, %v11612_v8  ;;  %v3353_v8 = vadd.f32 %v3352_v4, %v3264_v30  ;;  %v10260_v30 = vld [vmem:[#allocation4 + $0x444] sm:$0xf]  ;;  %v8909_v4 = vld [vmem:[#allocation4 + $0x464] sm:$0xf0] }
 0x297   : > { %3532 = vmatmul.bf16.gmra.mxu0 %v8876_v32  ;;  %v3441_v15 = vpop.f32.mrf.mxu3  ;;  %v8592_v32 = vor.u32 %v10184_v56, %v8591_v17  ;;  %3670 = vmatmul.bf16.gmra.mxu2 %v8596_v5 }
 0x298   : > { %v11760_v27 = vadd.f32 %v3441_v15, %v3353_v8 }
 0x29a   : > { %v3495_v3 = vpop.f32.mrf.mxu0  ;;  %v3355_v8 = vpop.f32.mrf.mxu2 }
 0x29b   : > { %v3266_v34 = vpop.f32.mrf.mxu1  ;;  %v11763_v24 = vadd.f32 %v3495_v3, %v11638_v23  ;;  %v8912_v23 = vor.u32 %v10260_v30, %v8909_v4  ;;  %v10193_v4 = vld [vmem:[#allocation4 + $0x228] sm:$0xf0] }
 0x29c   : > { %v3267_v57 = vadd.f32 %v11621_v16, %v3266_v34  ;;  %v10763_v34 = vld [vmem:[#allocation3 + $0x122] sm:$0xff] }
 0x29d   : > { %v1383_v5 = vpack.c.bf16 %v10763_v34, %v10763_v34 }
 0x29e   : > { %3581 = vmatmul.bf16.gmra.mxu1 %v8592_v32  ;;  %v3356_v15 = vadd.f32 %v3355_v8, %v3267_v57  ;;  %v10189_v57 = vld [vmem:[#allocation4 + $0x20c] sm:$0xf] }
 0x29f   : > { %3759 = vmatmul.bf16.gmra.mxu3 %v8600_v0  ;;  %v1479_v0 = vpack.c.bf16 %v10762_v7, %v10762_v7  ;;  %1415 = vst [vmem:[#allocation4 + $0x32c] sm:$0xf] %v1383_v5  ;;  %v8627_v7 = vld [vmem:[#allocation4 + $0x208] sm:$0xf]  ;;  %v8632_v45 = vor.u32 %v10189_v57, %v8629_v25 }
 0x2a0   : > { %1702 = vst [vmem:[#allocation4 + $0x2f0] sm:$0xf] %v1383_v5  ;;  %v8385_v5 = vld [vmem:[#allocation4 + $0x3c] sm:$0xf0] }
 0x2a1   : > { %1511 = vst [vmem:[#allocation4 + $0x30c] sm:$0xf] %v1479_v0  ;;  %v8388_v25 = vor.u32 %v10127_v10, %v8385_v5 }
 0x2a2   : > { %v3444_v29 = vpop.f32.mrf.mxu3  ;;  %v3357_v50 = vpop.f32.mrf.mxu2 }
 0x2a3   : > { %v11769_v17 = vadd.f32 %v3444_v29, %v3356_v15  ;;  %v3268_v56 = vpop.f32.mrf.mxu1  ;;  %v10194_v15 = vld [vmem:[#allocation4 + $0x230] sm:$0xf0] }
 0x2a4   : > { %v3498_v33 = vpop.f32.mrf.mxu0  ;;  %v3269_v32 = vadd.f32 %v11621_v16, %v3268_v56  ;;  %v8635_v56 = vld [vmem:[#allocation4 + $0x210] sm:$0xf] }
 0x2a5   : > { %v11772_v3 = vadd.f32 %v3498_v33, %v11647_v43  ;;  %v8636_v36 = vor.u32 %v10194_v15, %v8635_v56 }
 0x2a6   : > { %v3358_v30 = vadd.f32 %v3357_v50, %v3269_v32 }
 0x2a7   : > { %3537 = vmatmul.bf16.gmra.mxu0 %v8912_v23  ;;  %v8628_v23 = vor.u32 %v10193_v4, %v8627_v7  ;;  %3675 = vmatmul.bf16.gmra.mxu2 %v8632_v45  ;;  %v10764_v4 = vld [vmem:[#allocation3 + $0x140] sm:$0xff] }
 0x2a8   : > { %v10198_v7 = vld [vmem:[#allocation4 + $0x254] sm:$0xf] }
 0x2aa   : > { %v3446_v8 = vpop.f32.mrf.mxu3  ;;  %v3360_v32 = vpop.f32.mrf.mxu2 }
 0x2ab   : > { %v11775_v43 = vadd.f32 %v3446_v8, %v3358_v30  ;;  %v3271_v33 = vpop.f32.mrf.mxu1 }
 0x2ac   : > { %v3500_v29 = vpop.f32.mrf.mxu0  ;;  %v3272_v0 = vadd.f32 %v11621_v16, %v3271_v33  ;;  %v10765_v33 = vld [vmem:[#allocation3 + $0x13a] sm:$0xff] }
 0x2ad   : > { %v11778_v34 = vadd.f32 %v3500_v29, %v11658_v41  ;;  %v1481_v29 = vpack.c.bf16 %v10764_v4, %v10764_v4  ;;  %v1385_v45 = vpack.c.bf16 %v10765_v33, %v10765_v33  ;;  %v8671_v33 = vld [vmem:[#allocation4 + $0x258] sm:$0xf] }
 0x2ae   : > { %3586 = vmatmul.bf16.gmra.mxu1 %v8628_v23  ;;  %v3361_v50 = vadd.f32 %v3360_v32, %v3272_v0  ;;  %v8665_v23 = vld [vmem:[#allocation4 + $0x274] sm:$0xf0]  ;;  %v10202_v0 = vld [vmem:[#allocation4 + $0x270] sm:$0xf0]  ;;  %v10203_v32 = vld [vmem:[#allocation4 + $0x278] sm:$0xf0] }
 0x2af   : > { %3764 = vmatmul.bf16.gmra.mxu3 %v8636_v36  ;;  %1513 = vst [vmem:[#allocation4 + $0x354] sm:$0xf] %v1481_v29 }
 0x2b0   : > { %1417 = vst [vmem:[#allocation4 + $0x374] sm:$0xf] %v1385_v45 }
 0x2b1   : > { %1704 = vst [vmem:[#allocation4 + $0x338] sm:$0xf] %v1385_v45  ;;  %v10334_v45 = vld [vmem:[%s14076_s6 + $0x210] sm:$0xff] }
 0x2b2   : > { %v3449_v22 = vpop.f32.mrf.mxu3  ;;  %v3362_v36 = vpop.f32.mrf.mxu2  ;;  %3904 = vmatpush.bf16.msra.mxu1 %v10334_v45  ;;  %v3204_v45 = vadd.f32 %v11621_v16, %v11431_v53 }
 0x2b3   : > { %v11781_v8 = vadd.f32 %v3449_v22, %v3361_v50  ;;  %v3273_v57 = vpop.f32.mrf.mxu1  ;;  %v3199_v22 = vadd.f32 %v11621_v16, %v11394_v48 }
 0x2b4   : > { %v3503_v30 = vpop.f32.mrf.mxu0  ;;  %v3274_v15 = vadd.f32 %v11621_v16, %v3273_v57  ;;  %v8668_v57 = vor.u32 %v10198_v7, %v8665_v23  ;;  %v3293_v53 = vadd.f32 %v11459_v44, %v3204_v45  ;;  %v10216_v45 = vld [vmem:[#allocation4 + $0x2e4] sm:$0xf] }
 0x2b5   : > { %v11784_v41 = vadd.f32 %v3503_v30, %v11672_v52  ;;  %v8663_v30 = vld [vmem:[#allocation4 + $0x250] sm:$0xf]  ;;  %v3288_v48 = vadd.f32 %v11399_v61, %v3199_v22  ;;  %v10136_v61 = vld [vmem:[#allocation4 + $0x64] sm:$0xf] }
 0x2b6   : > { %v3363_v56 = vadd.f32 %v3362_v36, %v3274_v15  ;;  %v8664_v29 = vor.u32 %v10202_v0, %v8663_v30  ;;  %v8672_v15 = vor.u32 %v10203_v32, %v8671_v33  ;;  %v10207_v33 = vld [vmem:[#allocation4 + $0x29c] sm:$0xf]  ;;  %v3382_v16 = vadd.f32 %v11464_v54, %v3293_v53  ;;  %v8743_v53 = vld [vmem:[#allocation4 + $0x2e8] sm:$0xf]  ;;  %3905 = vmatpush.bf16.msra.mxu1 %v10333_v21 }
 0x2b7   : > { %3818 = vmatmul.bf16.vlgmr.msra.gmra.mxu0 %v8388_v25  ;;  %3680 = vmatmul.bf16.gmra.mxu2 %v8668_v57  ;;  %v3377_v7 = vadd.f32 %v11426_v19, %v3288_v48  ;;  %v10766_v19 = vld [vmem:[#allocation3 + $0x158] sm:$0xff]  ;;  %v8701_v48 = vld [vmem:[#allocation4 + $0x2bc] sm:$0xf0] }
 0x2b8   : > { %v1483_v30 = vpack.c.bf16 %v10766_v19, %v10766_v19  ;;  %v10767_v57 = vld [vmem:[#allocation3 + $0x152] sm:$0xff] }
 0x2ba   : > { %v3451_v52 = vpop.f32.mrf.mxu3  ;;  %v3641_v36 = vpop.f32.mrf.mxu2  ;;  %1515 = vst [vmem:[#allocation4 + $0x39c] sm:$0xf] %v1483_v30 }
 0x2bb   : > { %v11789_v50 = vadd.f32 %v3451_v52, %v3363_v56  ;;  %v3552_v5 = vpop.f32.mrf.mxu1 }
 0x2bc   : > { %v3505_v10 = vpop.f32.mrf.mxu0  ;;  %v3553_v4 = vadd.f32 %v3552_v5, %v11617_v38  ;;  %v3466_v38 = vadd.f32 %v11653_v31, %v3377_v7  ;;  %v10491_v5 = vld [vmem:[%s14077_s7 + $0x38] sm:$0xff]  ;;  %v10212_v7 = vld [vmem:[#allocation4 + $0x2c0] sm:$0xf0] }
 0x2bd   : > { %v11792_v25 = vadd.f32 %v3505_v10, %v11681_v63  ;;  %v8421_v63 = vld [vmem:[#allocation4 + $0x84] sm:$0xf0]  ;;  %6648 = vmatpush.bf16.msra.mxu2 %v10491_v5  ;;  %v8707_v5 = vld [vmem:[#allocation4 + $0x2a0] sm:$0xf] }
 0x2be   : > { %3591 = vmatmul.bf16.gmra.mxu1 %v8664_v29  ;;  %v3642_v23 = vadd.f32 %v3641_v36, %v3553_v4  ;;  %v8424_v10 = vor.u32 %v10136_v61, %v8421_v63  ;;  %v1387_v4 = vpack.c.bf16 %v10767_v57, %v10767_v57  ;;  %v8708_v19 = vor.u32 %v10212_v7, %v8707_v5  ;;  %v8457_v57 = vld [vmem:[#allocation4 + $0xcc] sm:$0xf0]  ;;  %v10220_v7 = vld [vmem:[#allocation4 + $0x300] sm:$0xf0] }
 0x2bf   : > { %3769 = vmatmul.bf16.gmra.mxu3 %v8672_v15 }
 0x2c0   : > { %1419 = vst [vmem:[#allocation4 + $0x3bc] sm:$0xf] %v1387_v4 }
 0x2c1   : > { %1706 = vst [vmem:[#allocation4 + $0x380] sm:$0xf] %v1387_v4 }
 0x2c2   : > { %v3730_v56 = vpop.f32.mrf.mxu3  ;;  %v3643_v31 = vpop.f32.mrf.mxu2 }
 0x2c3   : > { %v11801_v52 = vadd.f32 %v3730_v56, %v3642_v23  ;;  %v3554_v22 = vpop.f32.mrf.mxu1 }
 0x2c4   : > { %v3508_v0 = vpop.f32.mrf.mxu0  ;;  %v3555_v29 = vadd.f32 %v3554_v22, %v3466_v38  ;;  %v8699_v38 = vld [vmem:[#allocation4 + $0x298] sm:$0xf] }
 0x2c5   : > { %v11804_v32 = vadd.f32 %v3508_v0, %v11687_v42  ;;  %v10211_v42 = vld [vmem:[#allocation4 + $0x2b8] sm:$0xf0]  ;;  %v8704_v0 = vor.u32 %v10207_v33, %v8701_v48 }
 0x2c6   : > { %v3644_v15 = vadd.f32 %v3643_v31, %v3555_v29  ;;  %v3471_v29 = vadd.f32 %v11679_v12, %v3382_v16 }
 0x2c7   : > { %3823 = vmatmul.bf16.gmra.mxu0 %v8424_v10  ;;  %v8700_v10 = vor.u32 %v10211_v42, %v8699_v38  ;;  %3685 = vmatmul.bf16.gmra.mxu2 %v8704_v0 }
 0x2ca   : > { %v3732_v36 = vpop.f32.mrf.mxu3  ;;  %v3646_v30 = vpop.f32.mrf.mxu2 }
 0x2cb   : > { %v11811_v63 = vadd.f32 %v3732_v36, %v3644_v15  ;;  %v3557_v56 = vpop.f32.mrf.mxu1  ;;  %v8737_v36 = vld [vmem:[#allocation4 + $0x304] sm:$0xf0] }
 0x2cc   : > { %v3510_v23 = vpop.f32.mrf.mxu0  ;;  %v3558_v22 = vadd.f32 %v3557_v56, %v11670_v26  ;;  %v10221_v56 = vld [vmem:[#allocation4 + $0x308] sm:$0xf0] }
 0x2cd   : > { %v11814_v61 = vadd.f32 %v3510_v23, %v11692_v14  ;;  %v10145_v14 = vld [vmem:[#allocation4 + $0xac] sm:$0xf]  ;;  %v8744_v16 = vor.u32 %v10221_v56, %v8743_v53  ;;  %v8779_v53 = vld [vmem:[#allocation4 + $0x330] sm:$0xf] }
 0x2ce   : > { %3596 = vmatmul.bf16.gmra.mxu1 %v8700_v10  ;;  %v3647_v4 = vadd.f32 %v3646_v30, %v3558_v22  ;;  %v8460_v26 = vor.u32 %v10145_v14, %v8457_v57  ;;  %v8735_v22 = vld [vmem:[#allocation4 + $0x2e0] sm:$0xf]  ;;  %v8740_v10 = vor.u32 %v10216_v45, %v8737_v36  ;;  %v10154_v14 = vld [vmem:[#allocation4 + $0xf4] sm:$0xf]  ;;  %v10225_v36 = vld [vmem:[#allocation4 + $0x32c] sm:$0xf] }
 0x2cf   : > { %3774 = vmatmul.bf16.gmra.mxu3 %v8708_v19  ;;  %v8736_v19 = vor.u32 %v10220_v7, %v8735_v22 }
 0x2d2   : > { %v3735_v31 = vpop.f32.mrf.mxu3  ;;  %v3648_v54 = vpop.f32.mrf.mxu2 }
 0x2d3   : > { %v11820_v48 = vadd.f32 %v3735_v31, %v3647_v4  ;;  %v3559_v15 = vpop.f32.mrf.mxu1  ;;  %v8493_v4 = vld [vmem:[#allocation4 + $0x114] sm:$0xf0] }
 0x2d4   : > { %v3513_v33 = vpop.f32.mrf.mxu0  ;;  %v3560_v44 = vadd.f32 %v3559_v15, %v3471_v29  ;;  %v8496_v15 = vor.u32 %v10154_v14, %v8493_v4  ;;  %v3481_v4 = vadd.f32 %v11709_v6, %v11517_v37 }
 0x2d5   : > { %v11823_v42 = vadd.f32 %v3513_v33, %v11698_v40 }
 0x2d6   : > { %v3649_v12 = vadd.f32 %v3648_v54, %v3560_v44  ;;  %v10490_v54 = vld [vmem:[%s14077_s7 + $0x30] sm:$0xff] }
 0x2d7   : > { %3828 = vmatmul.bf16.gmra.mxu0 %v8460_v26  ;;  %3690 = vmatmul.bf16.gmra.mxu2 %v8740_v10 }
 0x2d8   : > { %6649 = vmatpush.bf16.msra.mxu2 %v10490_v54  ;;  %v10234_v54 = vld [vmem:[#allocation4 + $0x374] sm:$0xf] }
 0x2da   : > { %v3737_v23 = vpop.f32.mrf.mxu3  ;;  %v3651_v30 = vpop.f32.mrf.mxu2 }
 0x2db   : > { %v11828_v0 = vadd.f32 %v3737_v23, %v3649_v12  ;;  %v3562_v40 = vpop.f32.mrf.mxu1  ;;  %v10229_v12 = vld [vmem:[#allocation4 + $0x348] sm:$0xf0]  ;;  %v10230_v23 = vld [vmem:[#allocation4 + $0x350] sm:$0xf0] }
 0x2dc   : > { %v3515_v38 = vpop.f32.mrf.mxu0  ;;  %v3563_v11 = vadd.f32 %v3562_v40, %v11685_v46  ;;  %v8771_v40 = vld [vmem:[#allocation4 + $0x328] sm:$0xf] }
 0x2dd   : > { %v11831_v5 = vadd.f32 %v3515_v38, %v11707_v58  ;;  %v3476_v58 = vadd.f32 %v11690_v13, %v11494_v39  ;;  %v8773_v39 = vld [vmem:[#allocation4 + $0x34c] sm:$0xf0] }
 0x2de   : > { %3601 = vmatmul.bf16.gmra.mxu1 %v8736_v19  ;;  %v3652_v57 = vadd.f32 %v3651_v30, %v3563_v11  ;;  %v8776_v22 = vor.u32 %v10225_v36, %v8773_v39  ;;  %v8772_v19 = vor.u32 %v10229_v12, %v8771_v40  ;;  %v10238_v39 = vld [vmem:[#allocation4 + $0x390] sm:$0xf0]  ;;  %v10239_v12 = vld [vmem:[#allocation4 + $0x398] sm:$0xf0] }
 0x2df   : > { %3779 = vmatmul.bf16.gmra.mxu3 %v8744_v16  ;;  %v8780_v16 = vor.u32 %v10230_v23, %v8779_v53  ;;  %v8807_v23 = vld [vmem:[#allocation4 + $0x370] sm:$0xf] }
 0x2e0   : > { %v8808_v40 = vor.u32 %v10238_v39, %v8807_v23 }
 0x2e2   : > { %v3740_v29 = vpop.f32.mrf.mxu3  ;;  %v3653_v45 = vpop.f32.mrf.mxu2 }
 0x2e3   : > { %v11839_v46 = vadd.f32 %v3740_v29, %v3652_v57  ;;  %v3564_v33 = vpop.f32.mrf.mxu1  ;;  %v8529_v57 = vld [vmem:[#allocation4 + $0x15c] sm:$0xf0] }
 0x2e4   : > { %v3518_v31 = vpop.f32.mrf.mxu0  ;;  %v3565_v44 = vadd.f32 %v3564_v33, %v3476_v58 }
 0x2e5   : > { %v11842_v26 = vadd.f32 %v3518_v31, %v11715_v2 }
 0x2e6   : > { %v3654_v13 = vadd.f32 %v3653_v45, %v3565_v44  ;;  %v8809_v45 = vld [vmem:[#allocation4 + $0x394] sm:$0xf0] }
 0x2e7   : > { %3833 = vmatmul.bf16.gmra.mxu0 %v8496_v15  ;;  %3695 = vmatmul.bf16.gmra.mxu2 %v8776_v22  ;;  %v8815_v22 = vld [vmem:[#allocation4 + $0x378] sm:$0xf] }
 0x2ea   : > { %v3742_v7 = vpop.f32.mrf.mxu3  ;;  %v3656_v21 = vpop.f32.mrf.mxu2 }
 0x2eb   : > { %v11847_v38 = vadd.f32 %v3742_v7, %v3654_v13  ;;  %v3567_v2 = vpop.f32.mrf.mxu1 }
 0x2ec   : > { %v3520_v56 = vpop.f32.mrf.mxu0  ;;  %v3568_v11 = vadd.f32 %v3567_v2, %v11701_v35 }
 0x2ed   : > { %v11850_v10 = vadd.f32 %v3520_v56, %v11721_v28  ;;  %v10163_v28 = vld [vmem:[#allocation4 + $0x13c] sm:$0xf]  ;;  %v8812_v56 = vor.u32 %v10234_v54, %v8809_v45  ;;  %v1359_v54 = vld [vmem:[#allocation3 + $0x182] sm:$0xff] }
 0x2ee   : > { %3606 = vmatmul.bf16.gmra.mxu1 %v8772_v19  ;;  %v3657_v30 = vadd.f32 %v3656_v21, %v3568_v11  ;;  %v8532_v33 = vor.u32 %v10163_v28, %v8529_v57  ;;  %v8816_v11 = vor.u32 %v10239_v12, %v8815_v22  ;;  %v10332_v19 = vld [vmem:[%s14076_s6 + $0x200] sm:$0xff]  ;;  %v8565_v21 = vld [vmem:[#allocation4 + $0x1a4] sm:$0xf0]  ;;  %v11886_v23 = vpack.c.bf16 %v1359_v54, %v1359_v54 }
 0x2ef   : > { %3784 = vmatmul.bf16.gmra.mxu3 %v8780_v16  ;;  %3906 = vmatpush.bf16.msra.mxu1 %v10332_v19 }
 0x2f0   : > { %1423 = vst [vmem:[#allocation4 + $0x44c] sm:$0xf] %v11886_v23 }
 0x2f1   : > { %1710 = vst [vmem:[#allocation4 + $0x410] sm:$0xf] %v11886_v23 }
 0x2f2   : > { %v3745_v58 = vpop.f32.mrf.mxu3  ;;  %v3658_v44 = vpop.f32.mrf.mxu2 }
 0x2f3   : > { %v11855_v31 = vadd.f32 %v3745_v58, %v3657_v30  ;;  %v3569_v14 = vpop.f32.mrf.mxu1 }
 0x2f4   : > { %v3523_v29 = vpop.f32.mrf.mxu0  ;;  %v3570_v15 = vadd.f32 %v3569_v14, %v3481_v4  ;;  %v10243_v14 = vld [vmem:[#allocation4 + $0x3bc] sm:$0xf] }
 0x2f5   : > { %v11858_v35 = vadd.f32 %v3523_v29, %v11733_v55  ;;  %v10489_v29 = vld [vmem:[%s14077_s7 + $0x28] sm:$0xff] }
 0x2f6   : > { %v3659_v36 = vadd.f32 %v3658_v44, %v3570_v15  ;;  %6650 = vmatpush.bf16.msra.mxu2 %v10489_v29  ;;  %v10247_v15 = vld [vmem:[#allocation4 + $0x3d8] sm:$0xf0]  ;;  %v10248_v44 = vld [vmem:[#allocation4 + $0x3e0] sm:$0xf0] }
 0x2f7   : > { %3838 = vmatmul.bf16.gmra.mxu0 %v8532_v33  ;;  %3700 = vmatmul.bf16.gmra.mxu2 %v8812_v56  ;;  %v8845_v33 = vld [vmem:[#allocation4 + $0x3dc] sm:$0xf0]  ;;  %v10252_v29 = vld [vmem:[#allocation4 + $0x404] sm:$0xf] }
 0x2f8   : > { %v8848_v39 = vor.u32 %v10243_v14, %v8845_v33  ;;  %v8881_v14 = vld [vmem:[#allocation4 + $0x424] sm:$0xf0]  ;;  %v10256_v33 = vld [vmem:[#allocation4 + $0x420] sm:$0xf0] }
 0x2fa   : > { %v3747_v13 = vpop.f32.mrf.mxu3  ;;  %v3661_v53 = vpop.f32.mrf.mxu2 }
 0x2fb   : > { %v11860_v6 = vadd.f32 %v3747_v13, %v3659_v36  ;;  %v3572_v7 = vpop.f32.mrf.mxu1  ;;  %v8843_v36 = vld [vmem:[#allocation4 + $0x3b8] sm:$0xf] }
 0x2fc   : > { %v3525_v37 = vpop.f32.mrf.mxu0  ;;  %v3573_v55 = vadd.f32 %v3572_v7, %v11713_v20  ;;  %v8844_v12 = vor.u32 %v10247_v15, %v8843_v36  ;;  %v8887_v15 = vld [vmem:[#allocation4 + $0x408] sm:$0xf] }
 0x2fd   : > { %v11863_v2 = vadd.f32 %v3525_v37, %v11742_v49  ;;  %v10172_v49 = vld [vmem:[#allocation4 + $0x184] sm:$0xf]  ;;  %v8851_v37 = vld [vmem:[#allocation4 + $0x3c0] sm:$0xf] }
 0x2fe   : > { %3611 = vmatmul.bf16.gmra.mxu1 %v8808_v40  ;;  %v11869_v16 = vadd.f32 %v3661_v53, %v3573_v55  ;;  %v8568_v4 = vor.u32 %v10172_v49, %v8565_v21  ;;  %v8852_v7 = vor.u32 %v10248_v44, %v8851_v37  ;;  %v8601_v40 = vld [vmem:[#allocation4 + $0x1ec] sm:$0xf0]  ;;  %v1456_v21 = vld [vmem:[#allocation3 + $0x198] sm:$0xff] }
 0x2ff   : > { %3789 = vmatmul.bf16.gmra.mxu3 %v8816_v11  ;;  %v10181_v11 = vld [vmem:[#allocation4 + $0x1cc] sm:$0xf]  ;;  %v1488_v49 = vpack.c.bf16 %v1456_v21, %v1456_v21  ;;  %v10488_v21 = vld [vmem:[%s14077_s7 + $0x20] sm:$0xff] }
 0x300   : > { %v10257_v44 = vld [vmem:[#allocation4 + $0x428] sm:$0xf0]  ;;  %6651 = vmatpush.bf16.msra.mxu2 %v10488_v21 }
 0x301   : > { %1520 = vst [vmem:[#allocation4 + $0x450] sm:$0xf] %v1488_v49 }
 0x302   : > { %v11880_v28 = vpop.f32.mrf.mxu2 }
 0x303   : > { %v3574_v57 = vpop.f32.mrf.mxu1 }
 0x304   : > { %v3528_v30 = vpop.f32.mrf.mxu0  ;;  %v11875_v58 = vadd.f32 %v3574_v57, %v11719_v1 }
 0x305   : > { %v11872_v20 = vadd.f32 %v3528_v30, %v11751_v9  ;;  %v1457_v30 = vld [vmem:[#allocation3 + $0x1a0] sm:$0xff] }
 0x306   : > { %v1489_v57 = vpack.c.bf16 %v1457_v30, %v1457_v30 }
 0x307   : > { %3843 = vmatmul.bf16.gmra.mxu0 %v8568_v4  ;;  %3705 = vmatmul.bf16.gmra.mxu2 %v8848_v39 }
 0x308   : > { %1521 = vst [vmem:[#allocation4 + $0x474] sm:$0xf] %v1489_v57 }
 0x30a   : > { %v3666_v56 = vpop.f32.mrf.mxu2 }
 0x30b   : > { %v3577_v9 = vpop.f32.mrf.mxu1 }
 0x30c   : > { %v3530_v45 = vpop.f32.mrf.mxu0  ;;  %v3578_v13 = vadd.f32 %v3577_v9, %v11731_v62  ;;  %v8604_v62 = vor.u32 %v10181_v11, %v8601_v40  ;;  %v8884_v9 = vor.u32 %v10252_v29, %v8881_v14  ;;  %v8637_v40 = vld [vmem:[#allocation4 + $0x234] sm:$0xf0]  ;;  %v10190_v11 = vld [vmem:[#allocation4 + $0x214] sm:$0xf]  ;;  %v8915_v29 = vld [vmem:[#allocation4 + $0x448] sm:$0xf] }
 0x30d   : > { %v11883_v1 = vadd.f32 %v3530_v45, %v11760_v27  ;;  %v8879_v45 = vld [vmem:[#allocation4 + $0x400] sm:$0xf]  ;;  %v10265_v14 = vld [vmem:[#allocation4 + $0x468] sm:$0xf0] }
 0x30e   : > { %3616 = vmatmul.bf16.gmra.mxu1 %v8844_v12  ;;  %v11889_v55 = vadd.f32 %v3666_v56, %v3578_v13  ;;  %v8880_v39 = vor.u32 %v10256_v33, %v8879_v45  ;;  %v8888_v13 = vor.u32 %v10257_v44, %v8887_v15  ;;  %v8923_v12 = vld [vmem:[#allocation4 + $0x450] sm:$0xf] }
 0x30f   : > { %3794 = vmatmul.bf16.gmra.mxu3 %v8852_v7  ;;  %v10266_v37 = vld [vmem:[#allocation4 + $0x470] sm:$0xf0]  ;;  %4978 = vst [vmem:[#allocation4 + $0x450] sm:$0xf] %v1488_v49  ;;  %v10261_v49 = vld [vmem:[#allocation4 + $0x44c] sm:$0xf] }
 0x310   : > { %4979 = vst [vmem:[#allocation4 + $0x474] sm:$0xf] %v1489_v57  ;;  %v8917_v57 = vld [vmem:[#allocation4 + $0x46c] sm:$0xf0]  ;;  %v8924_v44 = vor.u32 %v10266_v37, %v8923_v12  ;;  %v8391_v37 = vld [vmem:[#allocation4 + $0x20] sm:$0xf] }
 0x312   : > { %v11897_v4 = vpop.f32.mrf.mxu2 }
 0x313   : > { %v3579_v27 = vpop.f32.mrf.mxu1 }
 0x314   : > { %v3533_v22 = vpop.f32.mrf.mxu0  ;;  %v11895_v53 = vadd.f32 %v3579_v27, %v11740_v59 }
 0x315   : > { %v11892_v19 = vadd.f32 %v3533_v22, %v11769_v17 }
 0x317   : > { %3848 = vmatmul.bf16.gmra.mxu0 %v8604_v62  ;;  %3710 = vmatmul.bf16.gmra.mxu2 %v8884_v9 }
 0x31a   : > { %v3671_v7 = vpop.f32.mrf.mxu2 }
 0x31b   : > { %v3582_v54 = vpop.f32.mrf.mxu1 }
 0x31c   : > { %v3535_v17 = vpop.f32.mrf.mxu0  ;;  %v3583_v36 = vadd.f32 %v3582_v54, %v11754_v18  ;;  %v8640_v18 = vor.u32 %v10190_v11, %v8637_v40  ;;  %v8916_v54 = vor.u32 %v10265_v14, %v8915_v29  ;;  %v8709_v29 = vld [vmem:[#allocation4 + $0x2c4] sm:$0xf0]  ;;  %v10208_v14 = vld [vmem:[#allocation4 + $0x2a4] sm:$0xf] }
 0x31d   : > { %v11900_v59 = vadd.f32 %v3535_v17, %v11775_v43 }
 0x31e   : > { %3621 = vmatmul.bf16.gmra.mxu1 %v8880_v39  ;;  %v11903_v56 = vadd.f32 %v3671_v7, %v3583_v36  ;;  %v8673_v36 = vld [vmem:[#allocation4 + $0x27c] sm:$0xf0] }
 0x31f   : > { %3799 = vmatmul.bf16.gmra.mxu3 %v8888_v13  ;;  %v10199_v13 = vld [vmem:[#allocation4 + $0x25c] sm:$0xf] }
 0x320   : > { %v8676_v12 = vor.u32 %v10199_v13, %v8673_v36 }
 0x322   : > { %v11914_v30 = vpop.f32.mrf.mxu2 }
 0x323   : > { %v3584_v27 = vpop.f32.mrf.mxu1 }
 0x324   : > { %v3538_v22 = vpop.f32.mrf.mxu0  ;;  %v11909_v62 = vadd.f32 %v3584_v27, %v11763_v24 }
 0x325   : > { %v11906_v43 = vadd.f32 %v3538_v22, %v11781_v8  ;;  %v8920_v8 = vor.u32 %v10261_v49, %v8917_v57  ;;  %v10132_v22 = vld [vmem:[#allocation4 + $0x40] sm:$0xf0] }
 0x326   : > { %v8392_v49 = vor.u32 %v10132_v22, %v8391_v37  ;;  %v10217_v22 = vld [vmem:[#allocation4 + $0x2ec] sm:$0xf] }
 0x327   : > { %3853 = vmatmul.bf16.gmra.mxu0 %v8640_v18  ;;  %3715 = vmatmul.bf16.gmra.mxu2 %v8920_v8  ;;  %v8712_v8 = vor.u32 %v10208_v14, %v8709_v29 }
 0x32a   : > { %v3676_v45 = vpop.f32.mrf.mxu2 }
 0x32b   : > { %v3587_v15 = vpop.f32.mrf.mxu1 }
 0x32c   : > { %v3540_v33 = vpop.f32.mrf.mxu0  ;;  %v3588_v24 = vadd.f32 %v3587_v15, %v11772_v3 }
 0x32d   : > { %v11917_v17 = vadd.f32 %v3540_v33, %v11789_v50 }
 0x32e   : > { %3626 = vmatmul.bf16.gmra.mxu1 %v8916_v54  ;;  %v11920_v9 = vadd.f32 %v3676_v45, %v3588_v24  ;;  %v8427_v24 = vld [vmem:[#allocation4 + $0x68] sm:$0xf]  ;;  %v10141_v54 = vld [vmem:[#allocation4 + $0x88] sm:$0xf0] }
 0x32f   : > { %3804 = vmatmul.bf16.gmra.mxu3 %v8924_v44  ;;  %v8428_v13 = vor.u32 %v10141_v54, %v8427_v24  ;;  %v8781_v24 = vld [vmem:[#allocation4 + $0x354] sm:$0xf0]  ;;  %v10226_v54 = vld [vmem:[#allocation4 + $0x334] sm:$0xf] }
 0x332   : > { %v11928_v3 = vpop.f32.mrf.mxu2 }
 0x333   : > { %v3589_v7 = vpop.f32.mrf.mxu1 }
 0x334   : > { %v3819_v39 = vpop.f32.mrf.mxu0  ;;  %v11926_v50 = vadd.f32 %v3589_v7, %v11778_v34 }
 0x335   : > { %v11923_v40 = vadd.f32 %v3819_v39, %v11801_v52 }
 0x337   : > { %3858 = vmatmul.bf16.gmra.mxu0 %v8676_v12  ;;  %v8745_v12 = vld [vmem:[#allocation4 + $0x30c] sm:$0xf0] }
 0x33a   : > { %v3681_v52 = vpop.f32.mrf.mxu2 }
 0x33b   : > { %v3592_v27 = vpop.f32.mrf.mxu1 }
 0x33c   : > { %v3821_v11 = vpop.f32.mrf.mxu0  ;;  %v3593_v21 = vadd.f32 %v3592_v27, %v11784_v41  ;;  %v10487_v41 = vld [vmem:[%s14077_s7 + $0x18] sm:$0xff] }
 0x33d   : > { %v11931_v18 = vadd.f32 %v3821_v11, %v11811_v63  ;;  %6652 = vmatpush.bf16.msra.mxu2 %v10487_v41 }
 0x33e   : > { %3907 = vmatmul.bf16.vlgmr.msra.gmra.mxu1 %v8392_v49  ;;  %v11934_v57 = vadd.f32 %v3681_v52, %v3593_v21  ;;  %v8748_v21 = vor.u32 %v10217_v22, %v8745_v12  ;;  %v10150_v52 = vld [vmem:[#allocation4 + $0xd0] sm:$0xf0]  ;;  %v10159_v12 = vld [vmem:[#allocation4 + $0x118] sm:$0xf0] }
 0x342   : > { %v11945_v63 = vpop.f32.mrf.mxu2 }
 0x343   : > { %v3594_v33 = vpop.f32.mrf.mxu1 }
 0x344   : > { %v3824_v34 = vpop.f32.mrf.mxu0  ;;  %v11940_v44 = vadd.f32 %v3594_v33, %v11792_v25 }
 0x345   : > { %v11937_v15 = vadd.f32 %v3824_v34, %v11820_v48 }
 0x347   : > { %3863 = vmatmul.bf16.gmra.mxu0 %v8712_v8 }
 0x34a   : > { %v3686_v25 = vpop.f32.mrf.mxu2 }
 0x34b   : > { %v3597_v36 = vpop.f32.mrf.mxu1 }
 0x34c   : > { %v3826_v45 = vpop.f32.mrf.mxu0  ;;  %v3598_v48 = vadd.f32 %v3597_v36, %v11804_v32  ;;  %v8463_v32 = vld [vmem:[#allocation4 + $0xb0] sm:$0xf] }
 0x34d   : > { %v11948_v39 = vadd.f32 %v3826_v45, %v11828_v0  ;;  %v8464_v8 = vor.u32 %v10150_v52, %v8463_v32  ;;  %v11986_v32 = vpop.f32.mrf.mxu3 }
 0x34e   : > { %3912 = vmatmul.bf16.gmra.mxu1 %v8428_v13  ;;  %v11951_v7 = vadd.f32 %v3686_v25, %v3598_v48  ;;  %v8784_v48 = vor.u32 %v10226_v54, %v8781_v24  ;;  %v8499_v25 = vld [vmem:[#allocation4 + $0xf8] sm:$0xf]  ;;  %v10168_v54 = vld [vmem:[#allocation4 + $0x160] sm:$0xf0] }
 0x352   : > { %v11959_v0 = vpop.f32.mrf.mxu2 }
 0x353   : > { %v3599_v11 = vpop.f32.mrf.mxu1  ;;  %14153 = vst [vmem:[#allocation44_spill] sm:$0xff] %v11959_v0 }
 0x354   : > { %v3829_v37 = vpop.f32.mrf.mxu0  ;;  %v11957_v49 = vadd.f32 %v3599_v11, %v11814_v61 }
 0x355   : > { %v11954_v27 = vadd.f32 %v3829_v37, %v11839_v46  ;;  %v11995_v24 = vpop.f32.mrf.mxu3 }
 0x356   : > { %14152 = vst [vmem:[#allocation43_spill] sm:$0xff] %v11957_v49  ;;  %v10231_v49 = vld [vmem:[#allocation4 + $0x358] sm:$0xf0] }
 0x357   : > { %3868 = vmatmul.bf16.gmra.mxu0 %v8748_v21  ;;  %v8500_v21 = vor.u32 %v10159_v12, %v8499_v25 }
 0x35a   : > { %v3691_v46 = vpop.f32.mrf.mxu2 }
 0x35b   : > { %v3602_v34 = vpop.f32.mrf.mxu1 }
 0x35c   : > { %v3831_v29 = vpop.f32.mrf.mxu0  ;;  %v3603_v33 = vadd.f32 %v3602_v34, %v11823_v42  ;;  %v10486_v42 = vld [vmem:[%s14077_s7 + $0x10] sm:$0xff] }
 0x35d   : > { %v11962_v14 = vadd.f32 %v3831_v29, %v11847_v38  ;;  %6653 = vmatpush.bf16.msra.mxu2 %v10486_v42  ;;  %v8817_v34 = vld [vmem:[#allocation4 + $0x39c] sm:$0xf0] }
 0x35e   : > { %3917 = vmatmul.bf16.gmra.mxu1 %v8464_v8  ;;  %v11965_v41 = vadd.f32 %v3691_v46, %v3603_v33 }
 0x360   : > { %14154 = vst [vmem:[#allocation45_spill] sm:$0xff] %v11965_v41  ;;  %v8751_v41 = vld [vmem:[#allocation4 + $0x2f0] sm:$0xf] }
 0x362   : > { %v11976_v38 = vpop.f32.mrf.mxu2 }
 0x363   : > { %v3604_v45 = vpop.f32.mrf.mxu1  ;;  %14156 = vst [vmem:[#allocation47_spill] sm:$0xff] %v11976_v38 }
 0x364   : > { %v3834_v61 = vpop.f32.mrf.mxu0  ;;  %v11971_v13 = vadd.f32 %v3604_v45, %v11831_v5  ;;  %v10499_v5 = vld [vmem:[%s14077_s7 + $0x78] sm:$0xff] }
 0x365   : > { %v11968_v36 = vadd.f32 %v3834_v61, %v11855_v31  ;;  %6737 = vmatpush.bf16.msra.mxu3 %v10499_v5  ;;  %v8535_v61 = vld [vmem:[#allocation4 + $0x140] sm:$0xf] }
 0x366   : > { %14155 = vst [vmem:[#allocation46_spill] sm:$0xff] %v11971_v13  ;;  %v8536_v25 = vor.u32 %v10168_v54, %v8535_v61 }
 0x367   : > { %3873 = vmatmul.bf16.gmra.mxu0 %v8784_v48 }
 0x36a   : > { %v3696_v52 = vpop.f32.mrf.mxu2 }
 0x36b   : > { %v3607_v22 = vpop.f32.mrf.mxu1 }
 0x36c   : > { %v3836_v37 = vpop.f32.mrf.mxu0  ;;  %v3608_v31 = vadd.f32 %v3607_v22, %v11842_v26 }
 0x36d   : > { %v11979_v11 = vadd.f32 %v3836_v37, %v11860_v6  ;;  %v10235_v6 = vld [vmem:[#allocation4 + $0x37c] sm:$0xf]  ;;  %v12002_v37 = vpop.f32.mrf.mxu3 }
 0x36e   : > { %3922 = vmatmul.bf16.gmra.mxu1 %v8500_v21  ;;  %v11988_v29 = vadd.f32 %v3696_v52, %v3608_v31  ;;  %v8820_v26 = vor.u32 %v10235_v6, %v8817_v34  ;;  %v10244_v21 = vld [vmem:[#allocation4 + $0x3c4] sm:$0xf]  ;;  %v1552_v6 = vld [vmem:[#allocation3 + $0x199] sm:$0xff] }
 0x370   : > { %14157 = vst [vmem:[#allocation48_spill] sm:$0xff] %v11988_v29 }
 0x372   : > { %v11997_v23 = vpop.f32.mrf.mxu2 }
 0x373   : > { %v3609_v8 = vpop.f32.mrf.mxu1  ;;  %14159 = vst [vmem:[#allocation50_spill] sm:$0xff] %v11997_v23 }
 0x374   : > { %v11990_v33 = vpop.f32.mrf.mxu0  ;;  %v11993_v46 = vadd.f32 %v3609_v8, %v11850_v10  ;;  %v8853_v10 = vld [vmem:[#allocation4 + $0x3e4] sm:$0xf0]  ;;  %v1553_v8 = vld [vmem:[#allocation3 + $0x1a1] sm:$0xff] }
 0x375   : > { %v8856_v52 = vor.u32 %v10244_v21, %v8853_v10  ;;  %v1585_v61 = vpack.c.bf16 %v1553_v8, %v1553_v8  ;;  %v10498_v21 = vld [vmem:[%s14077_s7 + $0x70] sm:$0xff] }
 0x376   : > { %14158 = vst [vmem:[#allocation49_spill] sm:$0xff] %v11993_v46  ;;  %6738 = vmatpush.bf16.msra.mxu3 %v10498_v21  ;;  %v8607_v21 = vld [vmem:[#allocation4 + $0x1d0] sm:$0xf] }
 0x377   : > { %3878 = vmatmul.bf16.gmra.mxu0 %v8820_v26  ;;  %v1584_v26 = vpack.c.bf16 %v1552_v6, %v1552_v6  ;;  %1617 = vst [vmem:[#allocation4 + $0x478] sm:$0xf] %v1585_v61 }
 0x379   : > { %1616 = vst [vmem:[#allocation4 + $0x454] sm:$0xf] %v1584_v26 }
 0x37a   : > { %v3701_v12 = vpop.f32.mrf.mxu2 }
 0x37b   : > { %v3612_v48 = vpop.f32.mrf.mxu1 }
 0x37c   : > { %v11999_v45 = vpop.f32.mrf.mxu0  ;;  %v3613_v42 = vadd.f32 %v3612_v48, %v11858_v35  ;;  %v10485_v35 = vld [vmem:[%s14077_s7 + $0x8] sm:$0xff]  ;;  %v8571_v48 = vld [vmem:[#allocation4 + $0x188] sm:$0xf] }
 0x37d   : > { %6654 = vmatpush.bf16.msra.mxu2 %v10485_v35 }
 0x37e   : > { %3927 = vmatmul.bf16.gmra.mxu1 %v8536_v25  ;;  %v12004_v22 = vadd.f32 %v3701_v12, %v3613_v42  ;;  %v10177_v42 = vld [vmem:[#allocation4 + $0x1a8] sm:$0xf0]  ;;  %v12016_v25 = vpop.f32.mrf.mxu3  ;;  %v8925_v35 = vld [vmem:[#allocation4 + $0x474] sm:$0xf0] }
 0x37f   : > { %v8572_v10 = vor.u32 %v10177_v42, %v8571_v48  ;;  %5075 = vst [vmem:[#allocation4 + $0x478] sm:$0xf] %v1585_v61 }
 0x380   : > { %14160 = vst [vmem:[#allocation51_spill] sm:$0xff] %v12004_v22 }
 0x382   : > { %v12014_v54 = vpop.f32.mrf.mxu2 }
 0x383   : > { %v3614_v5 = vpop.f32.mrf.mxu1  ;;  %14162 = vst [vmem:[#allocation53_spill] sm:$0xff] %v12014_v54 }
 0x384   : > { %v12006_v31 = vpop.f32.mrf.mxu0  ;;  %v12009_v34 = vadd.f32 %v3614_v5, %v11863_v2 }
 0x386   : > { %14161 = vst [vmem:[#allocation52_spill] sm:$0xff] %v12009_v34  ;;  %v12029_v42 = vpop.f32.mrf.mxu3 }
 0x387   : > { %3883 = vmatmul.bf16.gmra.mxu0 %v8856_v52  ;;  %v10262_v52 = vld [vmem:[#allocation4 + $0x454] sm:$0xf] }
 0x388   : > { %5074 = vst [vmem:[#allocation4 + $0x454] sm:$0xf] %v1584_v26  ;;  %v10186_v26 = vld [vmem:[#allocation4 + $0x1f0] sm:$0xf0] }
 0x38a   : > { %v3706_v6 = vpop.f32.mrf.mxu2 }
 0x38b   : > { %v3617_v2 = vpop.f32.mrf.mxu1 }
 0x38c   : > { %v3618_v12 = vadd.f32 %v3617_v2, %v11872_v20  ;;  %v12022_v5 = vpop.f32.mrf.mxu0  ;;  %v8892_v20 = vor.u32 %v10253_v60, %v8889_v51 }
 0x38e   : > { %3932 = vmatmul.bf16.gmra.mxu1 %v8572_v10  ;;  %v12024_v8 = vadd.f32 %v3706_v6, %v3618_v12  ;;  %v8608_v12 = vor.u32 %v10186_v26, %v8607_v21  ;;  %v12036_v6 = vpop.f32.mrf.mxu3 }
 0x390   : > { %14163 = vst [vmem:[#allocation54_spill] sm:$0xff] %v12024_v8 }
 0x392   : > { %v12033_v10 = vpop.f32.mrf.mxu2 }
 0x393   : > { %v3619_v47 = vpop.f32.mrf.mxu1  ;;  %14165 = vst [vmem:[#allocation56_spill] sm:$0xff] %v12033_v10 }
 0x394   : > { %v12027_v48 = vadd.f32 %v3619_v47, %v11883_v1  ;;  %v12031_v2 = vpop.f32.mrf.mxu0  ;;  %v8928_v1 = vor.u32 %v10262_v52, %v8925_v35 }
 0x396   : > { %14164 = vst [vmem:[#allocation55_spill] sm:$0xff] %v12027_v48  ;;  %v12047_v8 = vpop.f32.mrf.mxu3 }
 0x397   : > { %3888 = vmatmul.bf16.gmra.mxu0 %v8892_v20 }
 0x39a   : > { %v3711_v51 = vpop.f32.mrf.mxu2 }
 0x39b   : > { %v3622_v54 = vpop.f32.mrf.mxu1 }
 0x39c   : > { %v3623_v61 = vadd.f32 %v3622_v54, %v11892_v19  ;;  %v12038_v60 = vpop.f32.mrf.mxu0  ;;  %v8643_v19 = vld [vmem:[#allocation4 + $0x218] sm:$0xf]  ;;  %v10195_v54 = vld [vmem:[#allocation4 + $0x238] sm:$0xf0] }
 0x39d   : > { %v8644_v34 = vor.u32 %v10195_v54, %v8643_v19  ;;  %v10204_v19 = vld [vmem:[#allocation4 + $0x280] sm:$0xf0] }
 0x39e   : > { %3937 = vmatmul.bf16.gmra.mxu1 %v8608_v12  ;;  %v12040_v47 = vadd.f32 %v3711_v51, %v3623_v61  ;;  %v12054_v35 = vpop.f32.mrf.mxu3 }
 0x3a0   : > { %14166 = vst [vmem:[#allocation57_spill] sm:$0xff] %v12040_v47 }
 0x3a2   : > { %v12045_v10 = vpop.f32.mrf.mxu2 }
 0x3a3   : > { %v3624_v20 = vpop.f32.mrf.mxu1  ;;  %14168 = vst [vmem:[#allocation59_spill] sm:$0xff] %v12045_v10 }
 0x3a4   : > { %v12043_v48 = vadd.f32 %v3624_v20, %v11900_v59  ;;  %v12049_v21 = vpop.f32.mrf.mxu0  ;;  %v10484_v20 = vld [vmem:[%s14077_s7] sm:$0xff] }
 0x3a5   : > { %6655 = vmatpush.bf16.msra.mxu2 %v10484_v20 }
 0x3a6   : > { %14167 = vst [vmem:[#allocation58_spill] sm:$0xff] %v12043_v48 }
 0x3a7   : > { %3893 = vmatmul.bf16.gmra.mxu0 %v8928_v1 }
 0x3aa   : > { %v3716_v61 = vpop.f32.mrf.mxu2 }
 0x3ab   : > { %v3627_v26 = vpop.f32.mrf.mxu1 }
 0x3ac   : > { %v3628_v12 = vadd.f32 %v3627_v26, %v11906_v43  ;;  %v12059_v1 = vpop.f32.mrf.mxu0  ;;  %v10507_v43 = vld [vmem:[%s14077_s7 + $0xb8] sm:$0xff] }
 0x3ad   : > { %6826 = vmatpush.bf16.msrb.mxu0 %v10507_v43  ;;  %v10505_v43 = vld [vmem:[%s14077_s7 + $0xa8] sm:$0xff] }
 0x3ae   : > { %3942 = vmatmul.bf16.gmra.mxu1 %v8644_v34  ;;  %v12052_v52 = vadd.f32 %v3716_v61, %v3628_v12  ;;  %v8679_v34 = vld [vmem:[#allocation4 + $0x260] sm:$0xf]  ;;  %v10497_v61 = vld [vmem:[%s14077_s7 + $0x68] sm:$0xff] }
 0x3af   : > { %v8680_v12 = vor.u32 %v10204_v19, %v8679_v34  ;;  %6739 = vmatpush.bf16.msra.mxu3 %v10497_v61  ;;  %v10495_v61 = vld [vmem:[%s14077_s7 + $0x58] sm:$0xff] }
 0x3b0   : > { %14169 = vst [vmem:[#allocation60_spill] sm:$0xff] %v12052_v52 }
 0x3b3   : > { %v3629_v59 = vpop.f32.mrf.mxu1 }
 0x3b4   : > { %v12057_v51 = vadd.f32 %v3629_v59, %v11917_v17  ;;  %v12068_v17 = vpop.f32.mrf.mxu3  ;;  %v10506_v59 = vld [vmem:[%s14077_s7 + $0xb0] sm:$0xff]  ;;  %v12076_v20 = vpop.f32.mrf.mxu0 }
 0x3b5   : > { %6827 = vmatpush.bf16.msrb.mxu0 %v10506_v59  ;;  %v10504_v59 = vld [vmem:[%s14077_s7 + $0xa0] sm:$0xff] }
 0x3b6   : > { %14170 = vst [vmem:[#allocation61_spill] sm:$0xff] %v12057_v51 }
 0x3b9   : > { %6828 = vmatpush.bf16.msrb.mxu0 %v10505_v43 }
 0x3bb   : > { %v3908_v54 = vpop.f32.mrf.mxu1 }
 0x3bc   : > { %v3909_v26 = vadd.f32 %v3908_v54, %v11923_v40  ;;  %v10496_v40 = vld [vmem:[%s14077_s7 + $0x60] sm:$0xff] }
 0x3bd   : > { %6740 = vmatpush.bf16.msra.mxu3 %v10496_v40  ;;  %6829 = vmatpush.bf16.msrb.mxu0 %v10504_v59  ;;  %v10503_v40 = vld [vmem:[%s14077_s7 + $0x98] sm:$0xff] }
 0x3be   : > { %v3988_v51 = vmul.f32 %v3909_v26, %v3909_v26  ;;  %3947 = vmatmul.bf16.gmra.mxu1 %v8680_v12 }
 0x3c0   : > { %v4020_v34 = vmul.f32 %v3988_v51, %v3909_v26 }
 0x3c1   : > { %6741 = vmatpush.bf16.msra.mxu3 %v10495_v61  ;;  %6830 = vmatpush.bf16.msrb.mxu0 %v10503_v40  ;;  %v9223_v40 = vld [vmem:[#allocation4] sm:$0xf] }
 0x3c2   : > { %v4052_v19 = vmul.f32 0.044715, %v4020_v34  ;;  %v12095_v34 = vpop.f32.mrf.mxu3 }
 0x3c3   : > { %v3910_v54 = vpop.f32.mrf.mxu1 }
 0x3c4   : > { %v4084_v52 = vadd.f32 %v4052_v19, %v3909_v26  ;;  %v12085_v12 = vadd.f32 %v3910_v54, %v11931_v18  ;;  %v10494_v18 = vld [vmem:[%s14077_s7 + $0x50] sm:$0xff]  ;;  %v12104_v19 = vpop.f32.mrf.mxu0  ;;  %v10213_v54 = vld [vmem:[#allocation4 + $0x2c8] sm:$0xf0] }
 0x3c5   : > { %6742 = vmatpush.bf16.msra.mxu3 %v10494_v18 }
 0x3c6   : > { %v4116_v10 = vmul.f32 0.7978846, %v4084_v52  ;;  %v3989_v51 = vmul.f32 %v12085_v12, %v12085_v12  ;;  %v8715_v52 = vld [vmem:[#allocation4 + $0x2a8] sm:$0xf] }
 0x3c7   : > { %v8716_v22 = vor.u32 %v10213_v54, %v8715_v52  ;;  %v10501_v52 = vld [vmem:[%s14077_s7 + $0x88] sm:$0xff] }
 0x3c8   : > { %10619 = vtanh.f32 %v4116_v10  ;;  %v4021_v43 = vmul.f32 %v3989_v51, %v12085_v12  ;;  %v10493_v10 = vld [vmem:[%s14077_s7 + $0x48] sm:$0xff]  ;;  %v10502_v51 = vld [vmem:[%s14077_s7 + $0x90] sm:$0xff] }
 0x3c9   : > { %6743 = vmatpush.bf16.msra.mxu3 %v10493_v10  ;;  %6831 = vmatpush.bf16.msrb.mxu0 %v10502_v51 }
 0x3ca   : > { %v4053_v48 = vmul.f32 0.044715, %v4021_v43 }
 0x3cb   : > { %v3913_v47 = vpop.f32.mrf.mxu1 }
 0x3cc   : > { %v4085_v61 = vadd.f32 %v4053_v48, %v12085_v12  ;;  %v12108_v59 = vadd.f32 %v3913_v47, %v11937_v15  ;;  %v10344_v48 = vld [vmem:[#allocation4 + $0x20] sm:$0xf0]  ;;  %v10492_v15 = vld [vmem:[%s14077_s7 + $0x40] sm:$0xff]  ;;  %v12129_v10 = vpop.f32.mrf.mxu0 }
 0x3cd   : > { %v9224_v47 = vor.u32 %v10344_v48, %v9223_v40  ;;  %6744 = vmatpush.bf16.msra.mxu3 %v10492_v15  ;;  %6832 = vmatpush.bf16.msrb.mxu0 %v10501_v52  ;;  %v9231_v52 = vld [vmem:[#allocation4 + $0x8] sm:$0xf] }
 0x3ce   : > { %v10620_v23 = vpop.eup %10619  ;;  %v4117_v46 = vmul.f32 0.7978846, %v4085_v61  ;;  %v3990_v18 = vmul.f32 %v12108_v59, %v12108_v59  ;;  %3952 = vmatmul.bf16.gmra.mxu1 %v8716_v22  ;;  %v12125_v61 = vpop.f32.mrf.mxu3 }
 0x3cf   : > { %v4180_v43 = vadd.f32 1.0, %v10620_v23  ;;  %6656 = vmatmul.bf16.vlgmr.msra.gmra.mxu2 %v9224_v47 }
 0x3d0   : > { %10621 = vtanh.f32 %v4117_v46  ;;  %v4022_v54 = vmul.f32 %v3990_v18, %v12108_v59  ;;  %v10340_v46 = vld [vmem:[#allocation4 + $0x4] sm:$0xf]  ;;  %v9225_v18 = vld [vmem:[#allocation4 + $0x24] sm:$0xf0] }
 0x3d1   : > { %v4212_v22 = vmul.f32 0.5, %v4180_v43  ;;  %v10500_v43 = vld [vmem:[%s14077_s7 + $0x80] sm:$0xff]  ;;  %v9228_v15 = vor.u32 %v10340_v46, %v9225_v18 }
 0x3d2   : > { %v4054_v29 = vmul.f32 0.044715, %v4022_v54  ;;  %6833 = vmatpush.bf16.msrb.mxu0 %v10500_v43 }
 0x3d3   : > { %v12127_v23 = vmul.f32 %v4212_v22, %v3909_v26  ;;  %v3915_v51 = vpop.f32.mrf.mxu1  ;;  %v10345_v22 = vld [vmem:[#allocation4 + $0x28] sm:$0xf0]  ;;  %6745 = vmatmul.bf16.vlgmr.msra.gmra.mxu3 %v9228_v15 }
 0x3d4   : > { %v4086_v40 = vadd.f32 %v4054_v29, %v12108_v59  ;;  %v12133_v48 = vadd.f32 %v3915_v51, %v11948_v39  ;;  %v9232_v39 = vor.u32 %v10345_v22, %v9231_v52  ;;  %v10523_v51 = vld [vmem:[%s14077_s7 + $0x138] sm:$0xff] }
 0x3d5   : > { %4276 = vst [vmem:[#allocation3 + $0x19] sm:$0xff] %v12127_v23  ;;  %7004 = vmatpush.bf16.msrb.mxu2 %v10523_v51  ;;  %v10515_v15 = vld [vmem:[%s14077_s7 + $0xf8] sm:$0xff] }
 0x3d6   : > { %v10622_v26 = vpop.eup %10621  ;;  %v4118_v47 = vmul.f32 0.7978846, %v4086_v40  ;;  %v3991_v54 = vmul.f32 %v12133_v48, %v12133_v48  ;;  %v10222_v40 = vld [vmem:[#allocation4 + $0x310] sm:$0xf0]  ;;  %6834 = vmatmul.bf16.vlgmr.msrb.gmra.mxu0 %v9232_v39  ;;  %v12145_v46 = vpop.f32.mrf.mxu3  ;;  %6915 = vmatpush.bf16.msrb.mxu1 %v10515_v15  ;;  %v4438_v15 = vpack.c.bf16 %v12127_v23, %v12127_v23 }
 0x3d7   : > { %v4181_v29 = vadd.f32 1.0, %v10622_v26  ;;  %14171 = vst [vmem:[#allocation62_spill] sm:$0xff] %v12145_v46  ;;  %v8787_v46 = vld [vmem:[#allocation4 + $0x338] sm:$0xf] }
 0x3d8   : > { %10623 = vtanh.f32 %v4118_v47  ;;  %v4023_v38 = vmul.f32 %v3991_v54, %v12133_v48  ;;  %v8752_v47 = vor.u32 %v10222_v40, %v8751_v41  ;;  %v12152_v54 = vpop.f32.mrf.mxu0  ;;  %4470 = vst [vmem:[#allocation4 + $0x4c] sm:$0xf] %v4438_v15 }
 0x3d9   : > { %v4213_v13 = vmul.f32 0.5, %v4181_v29  ;;  %14172 = vst [vmem:[#allocation63_spill] sm:$0xff] %v12152_v54 }
 0x3da   : > { %v4055_v0 = vmul.f32 0.044715, %v4023_v38 }
 0x3db   : > { %v4245_v18 = vmul.f32 %v4213_v13, %v12085_v12  ;;  %v3918_v43 = vpop.f32.mrf.mxu1 }
 0x3dc   : > { %v4087_v26 = vadd.f32 %v4055_v0, %v12133_v48  ;;  %v12150_v52 = vadd.f32 %v3918_v43, %v11954_v27 }
 0x3dd   : > { %4277 = vst [vmem:[#allocation3 + $0x21] sm:$0xff] %v4245_v18 }
 0x3de   : > { %v10624_v38 = vpop.eup %10623  ;;  %v4119_v22 = vmul.f32 0.7978846, %v4087_v26  ;;  %v3992_v29 = vmul.f32 %v12150_v52, %v12150_v52  ;;  %3957 = vmatmul.bf16.gmra.mxu1 %v8752_v47  ;;  %v12167_v43 = vpop.f32.mrf.mxu3  ;;  %v4310_v26 = vld [vmem:[#allocation3 + $0x18] sm:$0xff] }
 0x3df   : > { %v4182_v13 = vadd.f32 1.0, %v10624_v38  ;;  %14173 = vst [vmem:[#allocation64_spill] sm:$0xff] %v12167_v43  ;;  %v4439_v38 = vpack.c.bf16 %v4245_v18, %v4245_v18 }
 0x3e0   : > { %10625 = vtanh.f32 %v4119_v22  ;;  %v4024_v27 = vmul.f32 %v3992_v29, %v12150_v52 }
 0x3e1   : > { %v4214_v0 = vmul.f32 0.5, %v4182_v13  ;;  %4471 = vst [vmem:[#allocation4 + $0x70] sm:$0xf] %v4439_v38 }
 0x3e2   : > { %v4056_v41 = vmul.f32 0.044715, %v4024_v27  ;;  %v4342_v27 = vpack.c.bf16 %v4310_v26, %v4310_v26 }
 0x3e3   : > { %v12161_v12 = vmul.f32 %v4214_v0, %v12108_v59  ;;  %v3920_v39 = vpop.f32.mrf.mxu1 }
 0x3e4   : > { %v4088_v51 = vadd.f32 %v4056_v41, %v12150_v52  ;;  %v12165_v40 = vadd.f32 %v3920_v39, %v11962_v14  ;;  %v4311_v47 = vld [vmem:[#allocation3 + $0x20] sm:$0xff]  ;;  %v12174_v41 = vpop.f32.mrf.mxu0  ;;  %4374 = vst [vmem:[#allocation4 + $0x48] sm:$0xf] %v4342_v27 }
 0x3e5   : > { %4278 = vst [vmem:[#allocation3 + $0x31] sm:$0xff] %v12161_v12  ;;  %v4502_v22 = vld [vmem:[#allocation3 + $0x1a] sm:$0xff]  ;;  %v4343_v0 = vpack.c.bf16 %v4311_v47, %v4311_v47  ;;  %v4503_v14 = vld [vmem:[#allocation3 + $0x22] sm:$0xff] }
 0x3e6   : > { %v10626_v29 = vpop.eup %10625  ;;  %v4120_v59 = vmul.f32 0.7978846, %v4088_v51  ;;  %v3993_v13 = vmul.f32 %v12165_v40, %v12165_v40  ;;  %v4534_v43 = vpack.c.bf16 %v4502_v22, %v4502_v22  ;;  %v4535_v23 = vpack.c.bf16 %v4503_v14, %v4503_v14  ;;  %4660 = vst [vmem:[#allocation4 + $0xc] sm:$0xf] %v4342_v27 }
 0x3e7   : > { %v4183_v39 = vadd.f32 1.0, %v10626_v29  ;;  %4375 = vst [vmem:[#allocation4 + $0x6c] sm:$0xf] %v4343_v0  ;;  %v8788_v22 = vor.u32 %v10231_v49, %v8787_v46 }
 0x3e8   : > { %10627 = vtanh.f32 %v4120_v59  ;;  %v4025_v54 = vmul.f32 %v3993_v13, %v12165_v40  ;;  %4566 = vst [vmem:[#allocation4 + $0x50] sm:$0xf] %v4534_v43 }
 0x3e9   : > { %v4215_v18 = vmul.f32 0.5, %v4183_v39  ;;  %4567 = vst [vmem:[#allocation4 + $0x74] sm:$0xf] %v4535_v23  ;;  %v10349_v23 = vld [vmem:[#allocation4 + $0x4c] sm:$0xf] }
 0x3ea   : > { %v4057_v51 = vmul.f32 0.044715, %v4025_v54  ;;  %4661 = vst [vmem:[#allocation4 + $0x30] sm:$0xf] %v4343_v0 }
 0x3eb   : > { %v12178_v26 = vmul.f32 %v4215_v18, %v12133_v48  ;;  %v3923_v47 = vpop.f32.mrf.mxu1  ;;  %v12187_v48 = vpop.f32.mrf.mxu3  ;;  %v9261_v18 = vld [vmem:[#allocation4 + $0x6c] sm:$0xf0] }
 0x3ec   : > { %v4089_v29 = vadd.f32 %v4057_v51, %v12165_v40  ;;  %v12182_v15 = vadd.f32 %v3923_v47, %v11968_v36  ;;  %v9259_v36 = vld [vmem:[#allocation4 + $0x48] sm:$0xf]  ;;  %v12190_v49 = vpop.f32.mrf.mxu0  ;;  %v9264_v47 = vor.u32 %v10349_v23, %v9261_v18 }
 0x3ed   : > { %4279 = vst [vmem:[#allocation3 + $0x39] sm:$0xff] %v12178_v26 }
 0x3ee   : > { %v10628_v59 = vpop.eup %10627  ;;  %v4121_v13 = vmul.f32 0.7978846, %v4089_v29  ;;  %v3994_v54 = vmul.f32 %v12182_v15, %v12182_v15  ;;  %3962 = vmatmul.bf16.gmra.mxu1 %v8788_v22  ;;  %v10353_v14 = vld [vmem:[#allocation4 + $0x68] sm:$0xf0]  ;;  %14174 = vst [vmem:[#allocation65_spill] sm:$0xff] %v12190_v49  ;;  %6750 = vmatmul.bf16.gmra.mxu3 %v9264_v47  ;;  %v10522_v47 = vld [vmem:[%s14077_s7 + $0x130] sm:$0xff] }
 0x3ef   : > { %v4184_v38 = vadd.f32 1.0, %v10628_v59  ;;  %v9260_v39 = vor.u32 %v10353_v14, %v9259_v36  ;;  %v9267_v29 = vld [vmem:[#allocation4 + $0x50] sm:$0xf]  ;;  %7005 = vmatpush.bf16.msrb.mxu2 %v10522_v47 }
 0x3f0   : > { %10629 = vtanh.f32 %v4121_v13  ;;  %v4026_v43 = vmul.f32 %v3994_v54, %v12182_v15  ;;  %v10354_v22 = vld [vmem:[#allocation4 + $0x70] sm:$0xf0] }
 0x3f1   : > { %v4216_v46 = vmul.f32 0.5, %v4184_v38  ;;  %6661 = vmatmul.bf16.gmra.mxu2 %v9260_v39  ;;  %v9268_v13 = vor.u32 %v10354_v22, %v9267_v29  ;;  %v4312_v38 = vld [vmem:[#allocation3 + $0x30] sm:$0xff] }
 0x3f2   : > { %v4058_v51 = vmul.f32 0.044715, %v4026_v43  ;;  %v4440_v43 = vpack.c.bf16 %v12161_v12, %v12161_v12  ;;  %v4344_v18 = vpack.c.bf16 %v4312_v38, %v4312_v38 }
 0x3f3   : > { %v12193_v27 = vmul.f32 %v4216_v46, %v12150_v52  ;;  %v3925_v0 = vpop.f32.mrf.mxu1  ;;  %v4441_v52 = vpack.c.bf16 %v12178_v26, %v12178_v26  ;;  %6839 = vmatmul.bf16.gmra.mxu0 %v9268_v13  ;;  %v3751_v26 = vadd.f32 %v11986_v32, %v11869_v16  ;;  %v12212_v13 = vpop.f32.mrf.mxu3 }
 0x3f4   : > { %v4090_v59 = vadd.f32 %v4058_v51, %v12182_v15  ;;  %v12197_v54 = vadd.f32 %v3925_v0, %v11979_v11  ;;  %v4313_v36 = vld [vmem:[#allocation3 + $0x38] sm:$0xff]  ;;  %4472 = vst [vmem:[#allocation4 + $0x94] sm:$0xf] %v4440_v43  ;;  %v8823_v0 = vld [vmem:[#allocation4 + $0x380] sm:$0xf]  ;;  %v12215_v43 = vpop.f32.mrf.mxu0 }
 0x3f5   : > { %4280 = vst [vmem:[#allocation3 + $0x49] sm:$0xff] %v12193_v27  ;;  %v4504_v14 = vld [vmem:[#allocation3 + $0x32] sm:$0xff]  ;;  %v4345_v11 = vpack.c.bf16 %v4313_v36, %v4313_v36  ;;  %v4505_v51 = vld [vmem:[#allocation3 + $0x3a] sm:$0xff]  ;;  %v3840_v49 = vadd.f32 %v11990_v33, %v3751_v26 }
 0x3f6   : > { %v10630_v46 = vpop.eup %10629  ;;  %v4122_v39 = vmul.f32 0.7978846, %v4090_v59  ;;  %v3995_v23 = vmul.f32 %v12197_v54, %v12197_v54  ;;  %v4536_v12 = vpack.c.bf16 %v4504_v14, %v4504_v14  ;;  %4376 = vst [vmem:[#allocation4 + $0x90] sm:$0xf] %v4344_v18  ;;  %v4537_v59 = vpack.c.bf16 %v4505_v51, %v4505_v51  ;;  %v10240_v36 = vld [vmem:[#allocation4 + $0x3a0] sm:$0xf0] }
 0x3f7   : > { %v4185_v29 = vadd.f32 1.0, %v10630_v46  ;;  %4377 = vst [vmem:[#allocation4 + $0xb4] sm:$0xf] %v4345_v11  ;;  %v10514_v33 = vld [vmem:[%s14077_s7 + $0xf0] sm:$0xff]  ;;  %v3664_v51 = vadd.f32 %v11880_v28, %v11875_v58 }
 0x3f8   : > { %10631 = vtanh.f32 %v4122_v39  ;;  %v4027_v22 = vmul.f32 %v3995_v23, %v12197_v54  ;;  %4473 = vst [vmem:[#allocation4 + $0xb8] sm:$0xf] %v4441_v52  ;;  %v8824_v23 = vor.u32 %v10240_v36, %v8823_v0  ;;  %6916 = vmatpush.bf16.msrb.mxu1 %v10514_v33 }
 0x3f9   : > { %v4217_v38 = vmul.f32 0.5, %v4185_v29  ;;  %4568 = vst [vmem:[#allocation4 + $0x98] sm:$0xf] %v4536_v12  ;;  %v3753_v29 = vadd.f32 %v11995_v24, %v3664_v51 }
 0x3fa   : > { %v4059_v46 = vmul.f32 0.044715, %v4027_v22  ;;  %4569 = vst [vmem:[#allocation4 + $0xbc] sm:$0xf] %v4537_v59 }
 0x3fb   : > { %v12218_v16 = vmul.f32 %v4217_v38, %v12165_v40  ;;  %v3928_v32 = vpop.f32.mrf.mxu1  ;;  %4662 = vst [vmem:[#allocation4 + $0x54] sm:$0xf] %v4344_v18  ;;  %v10358_v38 = vld [vmem:[#allocation4 + $0x94] sm:$0xf]  ;;  %v3842_v28 = vadd.f32 %v11999_v45, %v3753_v29  ;;  %v12234_v18 = vpop.f32.mrf.mxu3 }
 0x3fc   : > { %v4091_v14 = vadd.f32 %v4059_v46, %v12197_v54  ;;  %v12221_v39 = vadd.f32 %v3928_v32, %v3840_v49  ;;  %4663 = vst [vmem:[#allocation4 + $0x78] sm:$0xf] %v4345_v11  ;;  %v12242_v51 = vpop.f32.mrf.mxu0  ;;  %v4314_v45 = vld [vmem:[#allocation3 + $0x48] sm:$0xff] }
 0x3fd   : > { %4281 = vst [vmem:[#allocation3 + $0x51] sm:$0xff] %v12218_v16  ;;  %v9295_v26 = vld [vmem:[#allocation4 + $0x90] sm:$0xf] }
 0x3fe   : > { %v10632_v52 = vpop.eup %10631  ;;  %v4123_v40 = vmul.f32 0.7978846, %v4091_v14  ;;  %v3996_v47 = vmul.f32 %v12221_v39, %v12221_v39  ;;  %3967 = vmatmul.bf16.gmra.mxu1 %v8824_v23  ;;  %v10362_v22 = vld [vmem:[#allocation4 + $0xb0] sm:$0xf0] }
 0x3ff   : > { %v4186_v49 = vadd.f32 1.0, %v10632_v52  ;;  %v9296_v59 = vor.u32 %v10362_v22, %v9295_v26  ;;  %v9297_v58 = vld [vmem:[#allocation4 + $0xb4] sm:$0xf0]  ;;  %v4346_v22 = vpack.c.bf16 %v4314_v45, %v4314_v45 }
 0x400   : > { %10633 = vtanh.f32 %v4123_v40  ;;  %v4028_v12 = vmul.f32 %v3996_v47, %v12221_v39  ;;  %v9300_v46 = vor.u32 %v10358_v38, %v9297_v58  ;;  %v9303_v32 = vld [vmem:[#allocation4 + $0x98] sm:$0xf]  ;;  %v4442_v47 = vpack.c.bf16 %v12193_v27, %v12193_v27 }
 0x401   : > { %v4218_v0 = vmul.f32 0.5, %v4186_v49  ;;  %6666 = vmatmul.bf16.gmra.mxu2 %v9296_v59  ;;  %v10363_v24 = vld [vmem:[#allocation4 + $0xb8] sm:$0xf0]  ;;  %4378 = vst [vmem:[#allocation4 + $0xd8] sm:$0xf] %v4346_v22 }
 0x402   : > { %v4060_v36 = vmul.f32 0.044715, %v4028_v12  ;;  %6755 = vmatmul.bf16.gmra.mxu3 %v9300_v46  ;;  %v9304_v33 = vor.u32 %v10363_v24, %v9303_v32  ;;  %4474 = vst [vmem:[#allocation4 + $0xdc] sm:$0xf] %v4442_v47  ;;  %v10249_v32 = vld [vmem:[#allocation4 + $0x3e8] sm:$0xf0] }
 0x403   : > { %v12237_v11 = vmul.f32 %v4218_v0, %v12182_v15  ;;  %v3930_v14 = vpop.f32.mrf.mxu1  ;;  %v4443_v15 = vpack.c.bf16 %v12218_v16, %v12218_v16  ;;  %v8859_v16 = vld [vmem:[#allocation4 + $0x3c8] sm:$0xf]  ;;  %4664 = vst [vmem:[#allocation4 + $0x9c] sm:$0xf] %v4346_v22 }
 0x404   : > { %v4092_v23 = vadd.f32 %v4060_v36, %v12221_v39  ;;  %v12240_v52 = vadd.f32 %v3930_v14, %v3842_v28  ;;  %v4315_v40 = vld [vmem:[#allocation3 + $0x50] sm:$0xff]  ;;  %6844 = vmatmul.bf16.gmra.mxu0 %v9304_v33  ;;  %v3756_v28 = vadd.f32 %v12002_v37, %v11889_v55  ;;  %v8860_v45 = vor.u32 %v10249_v32, %v8859_v16 }
 0x405   : > { %4282 = vst [vmem:[#allocation3 + $0x61] sm:$0xff] %v12237_v11  ;;  %v4506_v49 = vld [vmem:[#allocation3 + $0x4a] sm:$0xff]  ;;  %v4347_v0 = vpack.c.bf16 %v4315_v40, %v4315_v40  ;;  %v4507_v59 = vld [vmem:[#allocation3 + $0x52] sm:$0xff]  ;;  %v12261_v40 = vpop.f32.mrf.mxu3 }
 0x406   : > { %v10634_v29 = vpop.eup %10633  ;;  %v4124_v12 = vmul.f32 0.7978846, %v4092_v23  ;;  %v3997_v26 = vmul.f32 %v12240_v52, %v12240_v52  ;;  %v4538_v58 = vpack.c.bf16 %v4506_v49, %v4506_v49  ;;  %v4539_v36 = vpack.c.bf16 %v4507_v59, %v4507_v59  ;;  %4475 = vst [vmem:[#allocation4 + $0x100] sm:$0xf] %v4443_v15  ;;  %v12268_v49 = vpop.f32.mrf.mxu0 }
 0x407   : > { %v4187_v38 = vadd.f32 1.0, %v10634_v29  ;;  %4379 = vst [vmem:[#allocation4 + $0xfc] sm:$0xf] %v4347_v0  ;;  %v3845_v24 = vadd.f32 %v12006_v31, %v3756_v28  ;;  %v3669_v31 = vadd.f32 %v11897_v4, %v11895_v53 }
 0x408   : > { %10635 = vtanh.f32 %v4124_v12  ;;  %v4029_v27 = vmul.f32 %v3997_v26, %v12240_v52  ;;  %4570 = vst [vmem:[#allocation4 + $0xe0] sm:$0xf] %v4538_v58  ;;  %v9331_v59 = vld [vmem:[#allocation4 + $0xd8] sm:$0xf] }
 0x409   : > { %v4219_v46 = vmul.f32 0.5, %v4187_v38  ;;  %4571 = vst [vmem:[#allocation4 + $0x104] sm:$0xf] %v4539_v36  ;;  %v3758_v12 = vadd.f32 %v12016_v25, %v3669_v31  ;;  %v10367_v53 = vld [vmem:[#allocation4 + $0xdc] sm:$0xf] }
 0x40a   : > { %v4061_v14 = vmul.f32 0.044715, %v4029_v27  ;;  %4665 = vst [vmem:[#allocation4 + $0xc0] sm:$0xf] %v4347_v0 }
 0x40b   : > { %v12256_v23 = vmul.f32 %v4219_v46, %v12197_v54  ;;  %v3933_v33 = vpop.f32.mrf.mxu1  ;;  %v3847_v27 = vadd.f32 %v12022_v5, %v3758_v12  ;;  %v4444_v5 = vpack.c.bf16 %v12237_v11, %v12237_v11 }
 0x40c   : > { %v4093_v55 = vadd.f32 %v4061_v14, %v12240_v52  ;;  %v12259_v37 = vadd.f32 %v3933_v33, %v3845_v24  ;;  %v4316_v33 = vld [vmem:[#allocation3 + $0x60] sm:$0xff] }
 0x40d   : > { %4283 = vst [vmem:[#allocation3 + $0x69] sm:$0xff] %v12256_v23  ;;  %v9333_v4 = vld [vmem:[#allocation4 + $0xfc] sm:$0xf0] }
 0x40e   : > { %v10636_v47 = vpop.eup %10635  ;;  %v4125_v15 = vmul.f32 0.7978846, %v4093_v55  ;;  %v3998_v54 = vmul.f32 %v12259_v37, %v12259_v37  ;;  %3972 = vmatmul.bf16.gmra.mxu1 %v8860_v45  ;;  %v10371_v38 = vld [vmem:[#allocation4 + $0xf8] sm:$0xf0]  ;;  %v9336_v36 = vor.u32 %v10367_v53, %v9333_v4  ;;  %4476 = vst [vmem:[#allocation4 + $0x124] sm:$0xf] %v4444_v5  ;;  %v12294_v4 = vpop.f32.mrf.mxu0 }
 0x40f   : > { %v4188_v29 = vadd.f32 1.0, %v10636_v47  ;;  %v9332_v28 = vor.u32 %v10371_v38, %v9331_v59  ;;  %v9339_v22 = vld [vmem:[#allocation4 + $0xe0] sm:$0xf]  ;;  %v12289_v59 = vpop.f32.mrf.mxu3 }
 0x410   : > { %10637 = vtanh.f32 %v4125_v15  ;;  %v4030_v26 = vmul.f32 %v3998_v54, %v12259_v37  ;;  %v10372_v0 = vld [vmem:[#allocation4 + $0x100] sm:$0xf0]  ;;  %v4348_v54 = vpack.c.bf16 %v4316_v33, %v4316_v33  ;;  %v3674_v33 = vadd.f32 %v11914_v30, %v11909_v62 }
 0x411   : > { %v4220_v58 = vmul.f32 0.5, %v4188_v29  ;;  %6671 = vmatmul.bf16.gmra.mxu2 %v9332_v28  ;;  %v9340_v24 = vor.u32 %v10372_v0, %v9339_v22  ;;  %v8895_v28 = vld [vmem:[#allocation4 + $0x410] sm:$0xf] }
 0x412   : > { %v4062_v16 = vmul.f32 0.044715, %v4030_v26  ;;  %6760 = vmatmul.bf16.gmra.mxu3 %v9336_v36  ;;  %v10521_v26 = vld [vmem:[%s14077_s7 + $0x128] sm:$0xff]  ;;  %4380 = vst [vmem:[#allocation4 + $0x120] sm:$0xf] %v4348_v54 }
 0x413   : > { %v12274_v46 = vmul.f32 %v4220_v58, %v12221_v39  ;;  %v3935_v25 = vpop.f32.mrf.mxu1  ;;  %v4445_v39 = vpack.c.bf16 %v12256_v23, %v12256_v23  ;;  %v3761_v23 = vadd.f32 %v12029_v42, %v11903_v56  ;;  %7006 = vmatpush.bf16.msrb.mxu2 %v10521_v26  ;;  %4666 = vst [vmem:[#allocation4 + $0xe4] sm:$0xf] %v4348_v54 }
 0x414   : > { %v4094_v32 = vadd.f32 %v4062_v16, %v12259_v37  ;;  %v12277_v14 = vadd.f32 %v3935_v25, %v3847_v27  ;;  %v4317_v55 = vld [vmem:[#allocation3 + $0x68] sm:$0xff]  ;;  %6849 = vmatmul.bf16.gmra.mxu0 %v9340_v24  ;;  %v10258_v16 = vld [vmem:[#allocation4 + $0x430] sm:$0xf0] }
 0x415   : > { %4284 = vst [vmem:[#allocation3 + $0x79] sm:$0xff] %v12274_v46  ;;  %v4508_v45 = vld [vmem:[#allocation3 + $0x62] sm:$0xff]  ;;  %v4349_v29 = vpack.c.bf16 %v4317_v55, %v4317_v55  ;;  %v4509_v12 = vld [vmem:[#allocation3 + $0x6a] sm:$0xff]  ;;  %v3850_v36 = vadd.f32 %v12031_v2, %v3761_v23  ;;  %v10376_v30 = vld [vmem:[#allocation4 + $0x124] sm:$0xf] }
 0x416   : > { %v10638_v47 = vpop.eup %10637  ;;  %v4126_v31 = vmul.f32 0.7978846, %v4094_v32  ;;  %v3999_v15 = vmul.f32 %v12277_v14, %v12277_v14  ;;  %v4540_v38 = vpack.c.bf16 %v4508_v45, %v4508_v45  ;;  %v4541_v53 = vpack.c.bf16 %v4509_v12, %v4509_v12  ;;  %4477 = vst [vmem:[#allocation4 + $0x148] sm:$0xf] %v4445_v39  ;;  %v10513_v24 = vld [vmem:[%s14077_s7 + $0xe8] sm:$0xff] }
 0x417   : > { %v4189_v11 = vadd.f32 1.0, %v10638_v47  ;;  %4381 = vst [vmem:[#allocation4 + $0x144] sm:$0xf] %v4349_v29  ;;  %v8896_v32 = vor.u32 %v10258_v16, %v8895_v28  ;;  %6917 = vmatpush.bf16.msrb.mxu1 %v10513_v24  ;;  %v3763_v39 = vadd.f32 %v12036_v6, %v3674_v33 }
 0x418   : > { %10639 = vtanh.f32 %v4126_v31  ;;  %v4031_v58 = vmul.f32 %v3999_v15, %v12277_v14  ;;  %4572 = vst [vmem:[#allocation4 + $0x128] sm:$0xf] %v4540_v38  ;;  %v12313_v15 = vpop.f32.mrf.mxu3 }
 0x419   : > { %v4221_v27 = vmul.f32 0.5, %v4189_v11  ;;  %4573 = vst [vmem:[#allocation4 + $0x14c] sm:$0xf] %v4541_v53  ;;  %v9367_v47 = vld [vmem:[#allocation4 + $0x120] sm:$0xf]  ;;  %v3852_v11 = vadd.f32 %v12038_v60, %v3763_v39  ;;  %v10512_v60 = vld [vmem:[%s14077_s7 + $0xe0] sm:$0xff] }
 0x41a   : > { %v4063_v22 = vmul.f32 0.044715, %v4031_v58  ;;  %4667 = vst [vmem:[#allocation4 + $0x108] sm:$0xf] %v4349_v29  ;;  %v12316_v58 = vpop.f32.mrf.mxu0 }
 0x41b   : > { %v12298_v0 = vmul.f32 %v4221_v27, %v12240_v52  ;;  %v3938_v56 = vpop.f32.mrf.mxu1  ;;  %6918 = vmatpush.bf16.msrb.mxu1 %v10512_v60 }
 0x41c   : > { %v4095_v42 = vadd.f32 %v4063_v22, %v12277_v14  ;;  %v12301_v25 = vadd.f32 %v3938_v56, %v3850_v36  ;;  %v1648_v36 = vld [vmem:[#allocation3 + $0x19a] sm:$0xff]  ;;  %v1649_v22 = vld [vmem:[#allocation3 + $0x1a2] sm:$0xff] }
 0x41d   : > { %4285 = vst [vmem:[#allocation3 + $0x81] sm:$0xff] %v12298_v0  ;;  %v9369_v26 = vld [vmem:[#allocation4 + $0x144] sm:$0xf0]  ;;  %v1680_v24 = vpack.c.bf16 %v1648_v36, %v1648_v36 }
 0x41e   : > { %v10640_v2 = vpop.eup %10639  ;;  %v4127_v52 = vmul.f32 0.7978846, %v4095_v42  ;;  %v4000_v55 = vmul.f32 %v12301_v25, %v12301_v25  ;;  %3977 = vmatmul.bf16.gmra.mxu1 %v8896_v32  ;;  %v10380_v31 = vld [vmem:[#allocation4 + $0x140] sm:$0xf0]  ;;  %v9372_v54 = vor.u32 %v10376_v30, %v9369_v26  ;;  %v4318_v33 = vld [vmem:[#allocation3 + $0x78] sm:$0xff] }
 0x41f   : > { %v4190_v5 = vadd.f32 1.0, %v10640_v2  ;;  %v9368_v62 = vor.u32 %v10380_v31, %v9367_v47  ;;  %v9375_v23 = vld [vmem:[#allocation4 + $0x128] sm:$0xf]  ;;  %v1681_v2 = vpack.c.bf16 %v1649_v22, %v1649_v22  ;;  %v4350_v39 = vpack.c.bf16 %v4318_v33, %v4318_v33  ;;  %1712 = vst [vmem:[#allocation4 + $0x458] sm:$0xf] %v1680_v24 }
 0x420   : > { %10641 = vtanh.f32 %v4127_v52  ;;  %v4032_v45 = vmul.f32 %v4000_v55, %v12301_v25  ;;  %v10381_v29 = vld [vmem:[#allocation4 + $0x148] sm:$0xf0]  ;;  %v3766_v47 = vadd.f32 %v12047_v8, %v11920_v9 }
 0x421   : > { %v4222_v12 = vmul.f32 0.5, %v4190_v5  ;;  %6676 = vmatmul.bf16.gmra.mxu2 %v9368_v62  ;;  %v9376_v27 = vor.u32 %v10381_v29, %v9375_v23  ;;  %v10511_v5 = vld [vmem:[%s14077_s7 + $0xd8] sm:$0xff]  ;;  %1713 = vst [vmem:[#allocation4 + $0x47c] sm:$0xf] %v1681_v2 }
 0x422   : > { %v4064_v38 = vmul.f32 0.044715, %v4032_v45  ;;  %6765 = vmatmul.bf16.gmra.mxu3 %v9372_v54  ;;  %v3855_v26 = vadd.f32 %v12049_v21, %v3766_v47  ;;  %4382 = vst [vmem:[#allocation4 + $0x168] sm:$0xf] %v4350_v39  ;;  %v12341_v54 = vpop.f32.mrf.mxu3  ;;  %6919 = vmatpush.bf16.msrb.mxu1 %v10511_v5  ;;  %v10510_v21 = vld [vmem:[%s14077_s7 + $0xd0] sm:$0xff] }
 0x423   : > { %v12319_v6 = vmul.f32 %v4222_v12, %v12259_v37  ;;  %v3940_v28 = vpop.f32.mrf.mxu1  ;;  %v4446_v37 = vpack.c.bf16 %v12274_v46, %v12274_v46  ;;  %v4447_v12 = vpack.c.bf16 %v12298_v0, %v12298_v0  ;;  %4668 = vst [vmem:[#allocation4 + $0x12c] sm:$0xf] %v4350_v39 }
 0x424   : > { %v4096_v53 = vadd.f32 %v4064_v38, %v12301_v25  ;;  %v12322_v16 = vadd.f32 %v3940_v28, %v3852_v11  ;;  %6854 = vmatmul.bf16.gmra.mxu0 %v9376_v27  ;;  %v4319_v52 = vld [vmem:[#allocation3 + $0x80] sm:$0xff]  ;;  %v12349_v28 = vpop.f32.mrf.mxu0 }
 0x425   : > { %4286 = vst [vmem:[#allocation3 + $0x91] sm:$0xff] %v12319_v6  ;;  %v4351_v45 = vpack.c.bf16 %v4319_v52, %v4319_v52  ;;  %v4510_v46 = vld [vmem:[#allocation3 + $0x7a] sm:$0xff]  ;;  %v4511_v62 = vld [vmem:[#allocation3 + $0x82] sm:$0xff]  ;;  %v4448_v39 = vpack.c.bf16 %v12319_v6, %v12319_v6 }
 0x426   : > { %v10642_v56 = vpop.eup %10641  ;;  %v4128_v42 = vmul.f32 0.7978846, %v4096_v53  ;;  %v4001_v32 = vmul.f32 %v12322_v16, %v12322_v16  ;;  %4478 = vst [vmem:[#allocation4 + $0x16c] sm:$0xf] %v4446_v37  ;;  %v4542_v38 = vpack.c.bf16 %v4510_v46, %v4510_v46  ;;  %v4543_v8 = vpack.c.bf16 %v4511_v62, %v4511_v62  ;;  %v8931_v22 = vld [vmem:[#allocation4 + $0x458] sm:$0xf]  ;;  %6920 = vmatpush.bf16.msrb.mxu1 %v10510_v21 }
 0x427   : > { %v4191_v55 = vadd.f32 1.0, %v10642_v56  ;;  %4383 = vst [vmem:[#allocation4 + $0x18c] sm:$0xf] %v4351_v45 }
 0x428   : > { %10643 = vtanh.f32 %v4128_v42  ;;  %v4033_v31 = vmul.f32 %v4001_v32, %v12322_v16  ;;  %4479 = vst [vmem:[#allocation4 + $0x190] sm:$0xf] %v4447_v12  ;;  %v10267_v42 = vld [vmem:[#allocation4 + $0x478] sm:$0xf0] }
 0x429   : > { %v4223_v30 = vmul.f32 0.5, %v4191_v55  ;;  %4574 = vst [vmem:[#allocation4 + $0x170] sm:$0xf] %v4542_v38  ;;  %v8932_v32 = vor.u32 %v10267_v42, %v8931_v22  ;;  %v9403_v33 = vld [vmem:[#allocation4 + $0x168] sm:$0xf] }
 0x42a   : > { %v4065_v11 = vmul.f32 0.044715, %v4033_v31  ;;  %4575 = vst [vmem:[#allocation4 + $0x194] sm:$0xf] %v4543_v8  ;;  %v3771_v8 = vadd.f32 %v12068_v17, %v11934_v57  ;;  %v10520_v57 = vld [vmem:[%s14077_s7 + $0x120] sm:$0xff] }
 0x42b   : > { %v12344_v23 = vmul.f32 %v4223_v30, %v12277_v14  ;;  %v3943_v9 = vpop.f32.mrf.mxu1  ;;  %v3679_v14 = vadd.f32 %v11928_v3, %v11926_v50  ;;  %5170 = vst [vmem:[#allocation4 + $0x458] sm:$0xf] %v1680_v24  ;;  %v10509_v50 = vld [vmem:[%s14077_s7 + $0xc8] sm:$0xff]  ;;  %7007 = vmatpush.bf16.msrb.mxu2 %v10520_v57 }
 0x42c   : > { %v4097_v29 = vadd.f32 %v4065_v11, %v12322_v16  ;;  %v12347_v0 = vadd.f32 %v3943_v9, %v3855_v26  ;;  %5171 = vst [vmem:[#allocation4 + $0x47c] sm:$0xf] %v1681_v2  ;;  %6921 = vmatpush.bf16.msrb.mxu1 %v10509_v50  ;;  %v12371_v2 = vpop.f32.mrf.mxu3 }
 0x42d   : > { %4287 = vst [vmem:[#allocation3 + $0x99] sm:$0xff] %v12344_v23  ;;  %v3768_v37 = vadd.f32 %v12054_v35, %v3679_v14  ;;  %v10385_v47 = vld [vmem:[#allocation4 + $0x16c] sm:$0xf]  ;;  %v4320_v14 = vld [vmem:[#allocation3 + $0x90] sm:$0xff] }
 0x42e   : > { %v10644_v53 = vpop.eup %10643  ;;  %v4129_v27 = vmul.f32 0.7978846, %v4097_v29  ;;  %v4002_v60 = vmul.f32 %v12347_v0, %v12347_v0  ;;  %v10389_v5 = vld [vmem:[#allocation4 + $0x188] sm:$0xf0]  ;;  %3982 = vmatmul.bf16.gmra.mxu1 %v8932_v32  ;;  %4669 = vst [vmem:[#allocation4 + $0x150] sm:$0xf] %v4351_v45  ;;  %v4449_v45 = vpack.c.bf16 %v12344_v23, %v12344_v23  ;;  %v12385_v29 = vpop.f32.mrf.mxu0 }
 0x42f   : > { %v4192_v36 = vadd.f32 1.0, %v10644_v53  ;;  %v3857_v52 = vadd.f32 %v12059_v1, %v3768_v37  ;;  %v9404_v46 = vor.u32 %v10389_v5, %v9403_v33  ;;  %v9405_v24 = vld [vmem:[#allocation4 + $0x18c] sm:$0xf0]  ;;  %4480 = vst [vmem:[#allocation4 + $0x1b4] sm:$0xf] %v4448_v39 }
 0x430   : > { %10645 = vtanh.f32 %v4129_v27  ;;  %v4034_v56 = vmul.f32 %v4002_v60, %v12347_v0  ;;  %v9408_v62 = vor.u32 %v10385_v47, %v9405_v24  ;;  %v9411_v1 = vld [vmem:[#allocation4 + $0x170] sm:$0xf]  ;;  %v4352_v60 = vpack.c.bf16 %v4320_v14, %v4320_v14  ;;  %4481 = vst [vmem:[#allocation4 + $0x1d8] sm:$0xf] %v4449_v45 }
 0x431   : > { %v4224_v3 = vmul.f32 0.5, %v4192_v36  ;;  %6681 = vmatmul.bf16.gmra.mxu2 %v9404_v46  ;;  %v10390_v38 = vld [vmem:[#allocation4 + $0x190] sm:$0xf0]  ;;  %v9233_v47 = vld [vmem:[#allocation4 + $0x2c] sm:$0xf0] }
 0x432   : > { %v4066_v55 = vmul.f32 0.044715, %v4034_v56  ;;  %6770 = vmatmul.bf16.gmra.mxu3 %v9408_v62  ;;  %v9412_v53 = vor.u32 %v10390_v38, %v9411_v1  ;;  %v3860_v56 = vadd.f32 %v12076_v20, %v3771_v8  ;;  %4384 = vst [vmem:[#allocation4 + $0x1b0] sm:$0xf] %v4352_v60  ;;  %v3684_v20 = vadd.f32 %v11945_v63, %v11940_v44  ;;  %v10341_v1 = vld [vmem:[#allocation4 + $0xc] sm:$0xf] }
 0x433   : > { %v12366_v35 = vmul.f32 %v4224_v3, %v12301_v25  ;;  %v3945_v31 = vpop.f32.mrf.mxu1  ;;  %v10508_v25 = vld [vmem:[%s14077_s7 + $0xc0] sm:$0xff]  ;;  %4670 = vst [vmem:[#allocation4 + $0x174] sm:$0xf] %v4352_v60  ;;  %v9236_v63 = vor.u32 %v10341_v1, %v9233_v47  ;;  %v14175_v1 = vld [vmem:[#allocation43_spill] sm:$0xff] }
 0x434   : > { %v4098_v12 = vadd.f32 %v4066_v55, %v12347_v0  ;;  %v12369_v30 = vadd.f32 %v3945_v31, %v3857_v52  ;;  %v4321_v27 = vld [vmem:[#allocation3 + $0x98] sm:$0xff]  ;;  %6922 = vmatpush.bf16.msrb.mxu1 %v10508_v25  ;;  %6859 = vmatmul.bf16.gmra.mxu0 %v9412_v53 }
 0x435   : > { %4288 = vst [vmem:[#allocation3 + $0xa9] sm:$0xff] %v12366_v35  ;;  %v4512_v6 = vld [vmem:[#allocation3 + $0x92] sm:$0xff]  ;;  %v4353_v36 = vpack.c.bf16 %v4321_v27, %v4321_v27  ;;  %v4513_v22 = vld [vmem:[#allocation3 + $0x9a] sm:$0xff] }
 0x436   : > { %v10646_v26 = vpop.eup %10645  ;;  %v4130_v11 = vmul.f32 0.7978846, %v4098_v12  ;;  %v4003_v9 = vmul.f32 %v12369_v30, %v12369_v30  ;;  %v4544_v37 = vpack.c.bf16 %v4512_v6, %v4512_v6  ;;  %v4545_v50 = vpack.c.bf16 %v4513_v22, %v4513_v22  ;;  %v12407_v25 = vpop.f32.mrf.mxu0  ;;  %v10394_v39 = vld [vmem:[#allocation4 + $0x1b4] sm:$0xf] }
 0x437   : > { %v4193_v21 = vadd.f32 1.0, %v10646_v26  ;;  %4385 = vst [vmem:[#allocation4 + $0x1d4] sm:$0xf] %v4353_v36  ;;  %v9441_v31 = vld [vmem:[#allocation4 + $0x1d4] sm:$0xf0]  ;;  %v3773_v12 = vadd.f32 %v12095_v34, %v3684_v20 }
 0x438   : > { %10647 = vtanh.f32 %v4130_v11  ;;  %v4035_v23 = vmul.f32 %v4003_v9, %v12369_v30  ;;  %4576 = vst [vmem:[#allocation4 + $0x1b8] sm:$0xf] %v4544_v37  ;;  %v9444_v9 = vor.u32 %v10394_v39, %v9441_v31 }
 0x439   : > { %v4225_v17 = vmul.f32 0.5, %v4193_v21  ;;  %4577 = vst [vmem:[#allocation4 + $0x1dc] sm:$0xf] %v4545_v50  ;;  %v3862_v45 = vadd.f32 %v12104_v19, %v3773_v12  ;;  %v9439_v11 = vld [vmem:[#allocation4 + $0x1b0] sm:$0xf] }
 0x43a   : > { %v4067_v42 = vmul.f32 0.044715, %v4035_v23  ;;  %4671 = vst [vmem:[#allocation4 + $0x198] sm:$0xf] %v4353_v36  ;;  %v4450_v23 = vpack.c.bf16 %v12366_v35, %v12366_v35  ;;  %v3776_v35 = vadd.f32 %v12125_v61, %v11951_v7 }
 0x43b   : > { %v12393_v3 = vmul.f32 %v4225_v17, %v12322_v16  ;;  %v3948_v32 = vpop.f32.mrf.mxu1  ;;  %v12403_v16 = vpop.f32.mrf.mxu3 }
 0x43c   : > { %v4099_v33 = vadd.f32 %v4067_v42, %v12369_v30  ;;  %v12396_v52 = vadd.f32 %v3948_v32, %v3860_v56  ;;  %v4322_v19 = vld [vmem:[#allocation3 + $0xa8] sm:$0xff]  ;;  %4482 = vst [vmem:[#allocation4 + $0x1fc] sm:$0xf] %v4450_v23 }
 0x43d   : > { %4289 = vst [vmem:[#allocation3 + $0xb1] sm:$0xff] %v12393_v3  ;;  %v4354_v37 = vpack.c.bf16 %v4322_v19, %v4322_v19 }
 0x43e   : > { %v10648_v55 = vpop.eup %10647  ;;  %v4131_v5 = vmul.f32 0.7978846, %v4099_v33  ;;  %v4004_v46 = vmul.f32 %v12396_v52, %v12396_v52  ;;  %v10398_v38 = vld [vmem:[#allocation4 + $0x1d0] sm:$0xf0]  ;;  %6923 = vmatmul.bf16.vlgmr.msrb.gmra.mxu1 %v9236_v63  ;;  %v12440_v63 = vpop.f32.mrf.mxu2 }
 0x43f   : > { %v4194_v24 = vadd.f32 1.0, %v10648_v55  ;;  %v9440_v34 = vor.u32 %v10398_v38, %v9439_v11  ;;  %v9447_v21 = vld [vmem:[#allocation4 + $0x1b8] sm:$0xf]  ;;  %4386 = vst [vmem:[#allocation4 + $0x1f8] sm:$0xf] %v4354_v37 }
 0x440   : > { %10649 = vtanh.f32 %v4131_v5  ;;  %v4036_v62 = vmul.f32 %v4004_v46, %v12396_v52  ;;  %v10399_v6 = vld [vmem:[#allocation4 + $0x1d8] sm:$0xf0]  ;;  %v3865_v46 = vadd.f32 %v12129_v10, %v3776_v35  ;;  %4672 = vst [vmem:[#allocation4 + $0x1bc] sm:$0xf] %v4354_v37 }
 0x441   : > { %v4226_v44 = vmul.f32 0.5, %v4194_v24  ;;  %6686 = vmatmul.bf16.gmra.mxu2 %v9440_v34  ;;  %v9448_v22 = vor.u32 %v10399_v6, %v9447_v21  ;;  %v12429_v24 = vpop.f32.mrf.mxu0  ;;  %v14177_v11 = vld [vmem:[#allocation62_spill] sm:$0xff]  ;;  %v10350_v34 = vld [vmem:[#allocation4 + $0x54] sm:$0xf] }
 0x442   : > { %v4068_v26 = vmul.f32 0.044715, %v4036_v62  ;;  %6775 = vmatmul.bf16.gmra.mxu3 %v9444_v9 }
 0x443   : > { %v12411_v8 = vmul.f32 %v4226_v44, %v12347_v0  ;;  %v3950_v53 = vpop.f32.mrf.mxu1  ;;  %v4451_v0 = vpack.c.bf16 %v12393_v3, %v12393_v3  ;;  %v12426_v20 = vpop.f32.mrf.mxu3  ;;  %v14176_v44 = vld [vmem:[#allocation44_spill] sm:$0xff]  ;;  %v10403_v23 = vld [vmem:[#allocation4 + $0x1fc] sm:$0xf] }
 0x444   : > { %v4100_v14 = vadd.f32 %v4068_v26, %v12396_v52  ;;  %v12414_v27 = vadd.f32 %v3950_v53, %v3862_v45  ;;  %v4323_v17 = vld [vmem:[#allocation3 + $0xb0] sm:$0xff]  ;;  %6864 = vmatmul.bf16.gmra.mxu0 %v9448_v22  ;;  %v3689_v10 = vadd.f32 %v14176_v44, %v14175_v1  ;;  %v9269_v45 = vld [vmem:[#allocation4 + $0x74] sm:$0xf0] }
 0x445   : > { %4290 = vst [vmem:[#allocation3 + $0xc1] sm:$0xff] %v12411_v8  ;;  %v4514_v56 = vld [vmem:[#allocation3 + $0xaa] sm:$0xff]  ;;  %v4355_v50 = vpack.c.bf16 %v4323_v17, %v4323_v17  ;;  %v4515_v32 = vld [vmem:[#allocation3 + $0xb2] sm:$0xff]  ;;  %v9272_v6 = vor.u32 %v10350_v34, %v9269_v45 }
 0x446   : > { %v10650_v60 = vpop.eup %10649  ;;  %v4132_v36 = vmul.f32 0.7978846, %v4100_v14  ;;  %v4005_v57 = vmul.f32 %v12414_v27, %v12414_v27  ;;  %v4546_v33 = vpack.c.bf16 %v4514_v56, %v4514_v56  ;;  %v4547_v55 = vpack.c.bf16 %v4515_v32, %v4515_v32  ;;  %4483 = vst [vmem:[#allocation4 + $0x220] sm:$0xf] %v4451_v0  ;;  %v9475_v21 = vld [vmem:[#allocation4 + $0x1f8] sm:$0xf] }
 0x447   : > { %v4195_v42 = vadd.f32 1.0, %v10650_v60  ;;  %4387 = vst [vmem:[#allocation4 + $0x21c] sm:$0xf] %v4355_v50  ;;  %v3778_v38 = vadd.f32 %v14177_v11, %v3689_v10  ;;  %v14178_v60 = vld [vmem:[#allocation63_spill] sm:$0xff] }
 0x448   : > { %10651 = vtanh.f32 %v4132_v36  ;;  %v4037_v3 = vmul.f32 %v4005_v57, %v12414_v27  ;;  %4578 = vst [vmem:[#allocation4 + $0x200] sm:$0xf] %v4546_v33 }
 0x449   : > { %v4227_v5 = vmul.f32 0.5, %v4195_v42  ;;  %4579 = vst [vmem:[#allocation4 + $0x224] sm:$0xf] %v4547_v55  ;;  %v3867_v36 = vadd.f32 %v14178_v60, %v3778_v38  ;;  %v12455_v35 = vpop.f32.mrf.mxu0  ;;  %v12461_v55 = vld [vmem:[%s14078_s8] ss:$0 sm:$0xff] }
 0x44a   : > { %v4069_v47 = vmul.f32 0.044715, %v4037_v3  ;;  %4673 = vst [vmem:[#allocation4 + $0x1e0] sm:$0xf] %v4355_v50 }
 0x44b   : > { %v12432_v31 = vmul.f32 %v4227_v5, %v12369_v30  ;;  %v3953_v7 = vpop.f32.mrf.mxu1  ;;  %v12447_v37 = vpop.f32.mrf.mxu3  ;;  %v4452_v5 = vpack.c.bf16 %v12411_v8, %v12411_v8 }
 0x44c   : > { %v4101_v61 = vadd.f32 %v4069_v47, %v12414_v27  ;;  %v12435_v12 = vadd.f32 %v3953_v7, %v3865_v46 }
 0x44d   : > { %4291 = vst [vmem:[#allocation3 + $0xc9] sm:$0xff] %v12432_v31  ;;  %v9477_v0 = vld [vmem:[#allocation4 + $0x21c] sm:$0xf0]  ;;  %v4453_v44 = vpack.c.bf16 %v12432_v31, %v12432_v31 }
 0x44e   : > { %v10652_v62 = vpop.eup %10651  ;;  %v4133_v39 = vmul.f32 0.7978846, %v4101_v61  ;;  %v4006_v30 = vmul.f32 %v12435_v12, %v12435_v12  ;;  %v10407_v53 = vld [vmem:[#allocation4 + $0x218] sm:$0xf0]  ;;  %v9480_v57 = vor.u32 %v10403_v23, %v9477_v0  ;;  %6928 = vmatmul.bf16.gmra.mxu1 %v9272_v6  ;;  %4484 = vst [vmem:[#allocation4 + $0x244] sm:$0xf] %v4452_v5 }
 0x44f   : > { %v4196_v26 = vadd.f32 1.0, %v10652_v62  ;;  %v9476_v19 = vor.u32 %v10407_v53, %v9475_v21  ;;  %v9483_v17 = vld [vmem:[#allocation4 + $0x200] sm:$0xf]  ;;  %4485 = vst [vmem:[#allocation4 + $0x268] sm:$0xf] %v4453_v44 }
 0x450   : > { %10653 = vtanh.f32 %v4133_v39  ;;  %v4038_v9 = vmul.f32 %v4006_v30, %v12435_v12  ;;  %v10408_v42 = vld [vmem:[#allocation4 + $0x220] sm:$0xf0]  ;;  %v14179_v39 = vld [vmem:[#allocation45_spill] sm:$0xff]  ;;  %v14180_v30 = vld [vmem:[#allocation64_spill] sm:$0xff] }
 0x451   : > { %v4228_v14 = vmul.f32 0.5, %v4196_v26  ;;  %6691 = vmatmul.bf16.gmra.mxu2 %v9476_v19  ;;  %v9484_v3 = vor.u32 %v10408_v42, %v9483_v17  ;;  %v3781_v45 = vadd.f32 %v14180_v30, %v14179_v39  ;;  %v14181_v42 = vld [vmem:[#allocation46_spill] sm:$0xff] }
 0x452   : > { %v4070_v22 = vmul.f32 0.044715, %v4038_v9  ;;  %6780 = vmatmul.bf16.gmra.mxu3 %v9480_v57  ;;  %v6657_v61 = vpop.f32.mrf.mxu2  ;;  %v10519_v9 = vld [vmem:[%s14077_s7 + $0x118] sm:$0xff] }
 0x453   : > { %v12450_v56 = vmul.f32 %v4228_v14, %v12396_v52  ;;  %v3955_v50 = vpop.f32.mrf.mxu1  ;;  %v4324_v52 = vld [vmem:[#allocation3 + $0xc0] sm:$0xff]  ;;  %v6658_v11 = vadd.f32 %v12461_v55, %v6657_v61  ;;  %7008 = vmatpush.bf16.msrb.mxu2 %v10519_v9  ;;  %v3870_v14 = vadd.f32 %v12174_v41, %v3781_v45  ;;  %v6835_v57 = vpop.f32.mrf.mxu0 }
 0x454   : > { %v4102_v32 = vadd.f32 %v4070_v22, %v12435_v12  ;;  %v12453_v33 = vadd.f32 %v3955_v50, %v3867_v36  ;;  %v4325_v62 = vld [vmem:[#allocation3 + $0xc8] sm:$0xff]  ;;  %v4356_v1 = vpack.c.bf16 %v4324_v52, %v4324_v52  ;;  %6869 = vmatmul.bf16.gmra.mxu0 %v9484_v3  ;;  %v14182_v50 = vld [vmem:[#allocation47_spill] sm:$0xff] }
 0x455   : > { %4292 = vst [vmem:[#allocation3 + $0xd9] sm:$0xff] %v12450_v56  ;;  %v4516_v10 = vld [vmem:[#allocation3 + $0xc2] sm:$0xff]  ;;  %v4357_v8 = vpack.c.bf16 %v4325_v62, %v4325_v62  ;;  %v4517_v38 = vld [vmem:[#allocation3 + $0xca] sm:$0xff]  ;;  %v10412_v30 = vld [vmem:[#allocation4 + $0x244] sm:$0xf] }
 0x456   : > { %v10654_v46 = vpop.eup %10653  ;;  %v4134_v47 = vmul.f32 0.7978846, %v4102_v32  ;;  %v4007_v7 = vmul.f32 %v12453_v33, %v12453_v33  ;;  %4388 = vst [vmem:[#allocation4 + $0x240] sm:$0xf] %v4356_v1  ;;  %v4548_v21 = vpack.c.bf16 %v4516_v10, %v4516_v10  ;;  %v4549_v31 = vpack.c.bf16 %v4517_v38, %v4517_v38  ;;  %v6746_v0 = vpop.f32.mrf.mxu3  ;;  %v9305_v52 = vld [vmem:[#allocation4 + $0xbc] sm:$0xf0] }
 0x457   : > { %v4197_v26 = vadd.f32 1.0, %v10654_v46  ;;  %4389 = vst [vmem:[#allocation4 + $0x264] sm:$0xf] %v4357_v8  ;;  %v6747_v22 = vadd.f32 %v6746_v0, %v6658_v11  ;;  %v3694_v32 = vadd.f32 %v14182_v50, %v14181_v42  ;;  %v9513_v45 = vld [vmem:[#allocation4 + $0x264] sm:$0xf0] }
 0x458   : > { %10655 = vtanh.f32 %v4134_v47  ;;  %v4039_v34 = vmul.f32 %v4007_v7, %v12453_v33  ;;  %4580 = vst [vmem:[#allocation4 + $0x248] sm:$0xf] %v4548_v21  ;;  %v10359_v7 = vld [vmem:[#allocation4 + $0x9c] sm:$0xf]  ;;  %v9516_v9 = vor.u32 %v10412_v30, %v9513_v45  ;;  %v14185_v30 = vld [vmem:[#allocation49_spill] sm:$0xff] }
 0x459   : > { %v4229_v53 = vmul.f32 0.5, %v4197_v26  ;;  %4581 = vst [vmem:[#allocation4 + $0x26c] sm:$0xf] %v4549_v31  ;;  %v3783_v46 = vadd.f32 %v12187_v48, %v3694_v32  ;;  %v9308_v10 = vor.u32 %v10359_v7, %v9305_v52  ;;  %v14183_v26 = vld [vmem:[#allocation65_spill] sm:$0xff]  ;;  %v14186_v45 = vld [vmem:[#allocation50_spill] sm:$0xff] }
 0x45a   : > { %v4071_v6 = vmul.f32 0.044715, %v4039_v34  ;;  %4674 = vst [vmem:[#allocation4 + $0x204] sm:$0xf] %v4356_v1 }
 0x45b   : > { %v4261_v19 = vmul.f32 %v4229_v53, %v12414_v27  ;;  %v3958_v23 = vpop.f32.mrf.mxu1  ;;  %v12485_v27 = vadd.f32 %v6835_v57, %v6747_v22  ;;  %4675 = vst [vmem:[#allocation4 + $0x228] sm:$0xf] %v4357_v8  ;;  %v3872_v11 = vadd.f32 %v14183_v26, %v3783_v46  ;;  %v12504_v46 = vpop.f32.mrf.mxu0 }
 0x45c   : > { %v4103_v60 = vadd.f32 %v4071_v6, %v12453_v33  ;;  %v12479_v36 = vadd.f32 %v3958_v23, %v3870_v14  ;;  %v4326_v14 = vld [vmem:[#allocation3 + $0xd8] sm:$0xff]  ;;  %v4454_v6 = vpack.c.bf16 %v12450_v56, %v12450_v56 }
 0x45d   : > { %4293 = vst [vmem:[#allocation3 + $0xe1] sm:$0xff] %v4261_v19  ;;  %v9511_v61 = vld [vmem:[#allocation4 + $0x240] sm:$0xf]  ;;  %v4455_v23 = vpack.c.bf16 %v4261_v19, %v4261_v19  ;;  %v4358_v50 = vpack.c.bf16 %v4326_v14, %v4326_v14 }
 0x45e   : > { %v10656_v17 = vpop.eup %10655  ;;  %v4135_v41 = vmul.f32 0.7978846, %v4103_v60  ;;  %v4008_v3 = vmul.f32 %v12479_v36, %v12479_v36  ;;  %v10416_v62 = vld [vmem:[#allocation4 + $0x260] sm:$0xf0]  ;;  %6933 = vmatmul.bf16.gmra.mxu1 %v9308_v10  ;;  %4486 = vst [vmem:[#allocation4 + $0x28c] sm:$0xf] %v4454_v6  ;;  %v12514_v10 = vpop.f32.mrf.mxu3 }
 0x45f   : > { %v4198_v5 = vadd.f32 1.0, %v10656_v17  ;;  %v9512_v39 = vor.u32 %v10416_v62, %v9511_v61  ;;  %v9519_v1 = vld [vmem:[#allocation4 + $0x248] sm:$0xf]  ;;  %4487 = vst [vmem:[#allocation4 + $0x2b0] sm:$0xf] %v4455_v23 }
 0x460   : > { %10657 = vtanh.f32 %v4135_v41  ;;  %v4040_v47 = vmul.f32 %v4008_v3, %v12479_v36  ;;  %v10417_v48 = vld [vmem:[#allocation4 + $0x268] sm:$0xf0]  ;;  %4390 = vst [vmem:[#allocation4 + $0x288] sm:$0xf] %v4358_v50 }
 0x461   : > { %v4230_v44 = vmul.f32 0.5, %v4198_v5  ;;  %6696 = vmatmul.bf16.gmra.mxu2 %v9512_v39  ;;  %v9520_v53 = vor.u32 %v10417_v48, %v9519_v1  ;;  %v14184_v3 = vld [vmem:[#allocation48_spill] sm:$0xff]  ;;  %4676 = vst [vmem:[#allocation4 + $0x24c] sm:$0xf] %v4358_v50 }
 0x462   : > { %v4072_v38 = vmul.f32 0.044715, %v4040_v47  ;;  %6785 = vmatmul.bf16.gmra.mxu3 %v9516_v9  ;;  %v3786_v52 = vadd.f32 %v12212_v13, %v14184_v3 }
 0x463   : > { %v12491_v8 = vmul.f32 %v4230_v44, %v12435_v12  ;;  %v3960_v34 = vpop.f32.mrf.mxu1 }
 0x464   : > { %v4104_v21 = vadd.f32 %v4072_v38, %v12479_v36  ;;  %v12494_v31 = vadd.f32 %v3960_v34, %v3872_v11  ;;  %v4327_v22 = vld [vmem:[#allocation3 + $0xe0] sm:$0xff]  ;;  %6874 = vmatmul.bf16.gmra.mxu0 %v9520_v53  ;;  %v3875_v47 = vadd.f32 %v12215_v43, %v3786_v52  ;;  %v3699_v43 = vadd.f32 %v14186_v45, %v14185_v30  ;;  %v12518_v11 = vpop.f32.mrf.mxu2  ;;  %v9341_v38 = vld [vmem:[#allocation4 + $0x104] sm:$0xf0] }
 0x465   : > { %4294 = vst [vmem:[#allocation3 + $0xf1] sm:$0xff] %v12491_v8  ;;  %v4518_v57 = vld [vmem:[#allocation3 + $0xda] sm:$0xff]  ;;  %v4519_v17 = vld [vmem:[#allocation3 + $0xe2] sm:$0xff]  ;;  %v4359_v32 = vpack.c.bf16 %v4327_v22, %v4327_v22 }
 0x466   : > { %v10658_v0 = vpop.eup %10657  ;;  %v4136_v60 = vmul.f32 0.7978846, %v4104_v21  ;;  %v4009_v12 = vmul.f32 %v12494_v31, %v12494_v31  ;;  %v4550_v41 = vpack.c.bf16 %v4518_v57, %v4518_v57  ;;  %v4551_v19 = vpack.c.bf16 %v4519_v17, %v4519_v17  ;;  %v9549_v1 = vld [vmem:[#allocation4 + $0x2ac] sm:$0xf0]  ;;  %v10368_v21 = vld [vmem:[#allocation4 + $0xe4] sm:$0xf] }
 0x467   : > { %v4199_v42 = vadd.f32 1.0, %v10658_v0  ;;  %4391 = vst [vmem:[#allocation4 + $0x2ac] sm:$0xf] %v4359_v32  ;;  %v3788_v48 = vadd.f32 %v12234_v18, %v3699_v43  ;;  %v10421_v53 = vld [vmem:[#allocation4 + $0x28c] sm:$0xf]  ;;  %v9344_v6 = vor.u32 %v10368_v21, %v9341_v38  ;;  %v10518_v38 = vld [vmem:[%s14077_s7 + $0x110] sm:$0xff] }
 0x468   : > { %10659 = vtanh.f32 %v4136_v60  ;;  %v4041_v56 = vmul.f32 %v4009_v12, %v12494_v31  ;;  %4582 = vst [vmem:[#allocation4 + $0x290] sm:$0xf] %v4550_v41  ;;  %v9547_v23 = vld [vmem:[#allocation4 + $0x288] sm:$0xf]  ;;  %v9552_v57 = vor.u32 %v10421_v53, %v9549_v1  ;;  %7009 = vmatpush.bf16.msrb.mxu2 %v10518_v38 }
 0x469   : > { %v4231_v5 = vmul.f32 0.5, %v4199_v42  ;;  %4583 = vst [vmem:[#allocation4 + $0x2b4] sm:$0xf] %v4551_v19  ;;  %v3877_v60 = vadd.f32 %v12242_v51, %v3788_v48 }
 0x46a   : > { %v4073_v7 = vmul.f32 0.044715, %v4041_v56  ;;  %4677 = vst [vmem:[#allocation4 + $0x270] sm:$0xf] %v4359_v32  ;;  %v4456_v56 = vpack.c.bf16 %v12491_v8, %v12491_v8 }
 0x46b   : > { %v12508_v61 = vmul.f32 %v4231_v5, %v12453_v33  ;;  %v3963_v62 = vpop.f32.mrf.mxu1 }
 0x46c   : > { %v4105_v13 = vadd.f32 %v4073_v7, %v12494_v31  ;;  %v12511_v44 = vadd.f32 %v3963_v62, %v3875_v47  ;;  %v4328_v52 = vld [vmem:[#allocation3 + $0xf0] sm:$0xff]  ;;  %4488 = vst [vmem:[#allocation4 + $0x2d4] sm:$0xf] %v4456_v56 }
 0x46d   : > { %4295 = vst [vmem:[#allocation3 + $0xf9] sm:$0xff] %v12508_v61  ;;  %v4360_v62 = vpack.c.bf16 %v4328_v52, %v4328_v52 }
 0x46e   : > { %v10660_v39 = vpop.eup %10659  ;;  %v4137_v26 = vmul.f32 0.7978846, %v4105_v13  ;;  %v4010_v33 = vmul.f32 %v12511_v44, %v12511_v44  ;;  %v10425_v0 = vld [vmem:[#allocation4 + $0x2a8] sm:$0xf0]  ;;  %6938 = vmatmul.bf16.gmra.mxu1 %v9344_v6  ;;  %v4457_v13 = vpack.c.bf16 %v12508_v61, %v12508_v61 }
 0x46f   : > { %v4200_v9 = vadd.f32 1.0, %v10660_v39  ;;  %v9548_v22 = vor.u32 %v10425_v0, %v9547_v23  ;;  %v9555_v17 = vld [vmem:[#allocation4 + $0x290] sm:$0xf]  ;;  %4392 = vst [vmem:[#allocation4 + $0x2d0] sm:$0xf] %v4360_v62 }
 0x470   : > { %10661 = vtanh.f32 %v4137_v26  ;;  %v4042_v34 = vmul.f32 %v4010_v33, %v12511_v44  ;;  %v12528_v50 = vpop.f32.mrf.mxu0  ;;  %v10426_v18 = vld [vmem:[#allocation4 + $0x2b0] sm:$0xf0]  ;;  %4489 = vst [vmem:[#allocation4 + $0x2f8] sm:$0xf] %v4457_v13 }
 0x471   : > { %v4232_v14 = vmul.f32 0.5, %v4200_v9  ;;  %6701 = vmatmul.bf16.gmra.mxu2 %v9548_v22  ;;  %v9556_v51 = vor.u32 %v10426_v18, %v9555_v17  ;;  %v6751_v26 = vpop.f32.mrf.mxu3  ;;  %v14187_v9 = vld [vmem:[#allocation51_spill] sm:$0xff]  ;;  %v14188_v22 = vld [vmem:[#allocation52_spill] sm:$0xff]  ;;  %4678 = vst [vmem:[#allocation4 + $0x294] sm:$0xf] %v4360_v62 }
 0x472   : > { %v4074_v12 = vmul.f32 0.044715, %v4042_v34  ;;  %6790 = vmatmul.bf16.gmra.mxu3 %v9552_v57  ;;  %v3791_v1 = vadd.f32 %v12261_v40, %v14187_v9  ;;  %v14189_v57 = vld [vmem:[#allocation53_spill] sm:$0xff] }
 0x473   : > { %v12526_v42 = vmul.f32 %v4232_v14, %v12479_v36  ;;  %v3965_v32 = vpop.f32.mrf.mxu1  ;;  %v10430_v62 = vld [vmem:[#allocation4 + $0x2d4] sm:$0xf] }
 0x474   : > { %v4106_v41 = vadd.f32 %v4074_v12, %v12511_v44  ;;  %v12531_v3 = vadd.f32 %v3965_v32, %v3877_v60  ;;  %v6662_v47 = vpop.f32.mrf.mxu2  ;;  %v4329_v7 = vld [vmem:[#allocation3 + $0xf8] sm:$0xff]  ;;  %6879 = vmatmul.bf16.gmra.mxu0 %v9556_v51  ;;  %v3880_v53 = vadd.f32 %v12268_v49, %v3791_v1 }
 0x475   : > { %4296 = vst [vmem:[#allocation3 + $0x109] sm:$0xff] %v12526_v42  ;;  %v4520_v39 = vld [vmem:[#allocation3 + $0xf2] sm:$0xff]  ;;  %v4521_v30 = vld [vmem:[#allocation3 + $0xfa] sm:$0xff]  ;;  %v6663_v43 = vadd.f32 %v12461_v55, %v6662_v47  ;;  %v4361_v33 = vpack.c.bf16 %v4329_v7, %v4329_v7 }
 0x476   : > { %v10662_v19 = vpop.eup %10661  ;;  %v4138_v36 = vmul.f32 0.7978846, %v4106_v41  ;;  %v4011_v5 = vmul.f32 %v12531_v3, %v12531_v3  ;;  %v4552_v8 = vpack.c.bf16 %v4520_v39, %v4520_v39  ;;  %v4553_v61 = vpack.c.bf16 %v4521_v30, %v4521_v30  ;;  %v10531_v49 = vld [vmem:[%s14077_s7 + $0x178] sm:$0xff]  ;;  %v9377_v41 = vld [vmem:[#allocation4 + $0x14c] sm:$0xf0] }
 0x477   : > { %v4201_v45 = vadd.f32 1.0, %v10662_v19  ;;  %v12547_v21 = vadd.f32 %v6751_v26, %v6663_v43  ;;  %4393 = vst [vmem:[#allocation4 + $0x2f4] sm:$0xf] %v4361_v33  ;;  %7093 = vmatpush.bf16.msrb.mxu3 %v10531_v49  ;;  %v9583_v47 = vld [vmem:[#allocation4 + $0x2d0] sm:$0xf] }
 0x478   : > { %10663 = vtanh.f32 %v4138_v36  ;;  %v4043_v48 = vmul.f32 %v4011_v5, %v12531_v3  ;;  %v12553_v23 = vpop.f32.mrf.mxu0  ;;  %4584 = vst [vmem:[#allocation4 + $0x2d8] sm:$0xf] %v4552_v8  ;;  %v10377_v5 = vld [vmem:[#allocation4 + $0x12c] sm:$0xf]  ;;  %v9585_v43 = vld [vmem:[#allocation4 + $0x2f4] sm:$0xf0] }
 0x479   : > { %v4233_v34 = vmul.f32 0.5, %v4201_v45  ;;  %4585 = vst [vmem:[#allocation4 + $0x2fc] sm:$0xf] %v4553_v61  ;;  %v6753_v56 = vpop.f32.mrf.mxu3  ;;  %v9380_v30 = vor.u32 %v10377_v5, %v9377_v41  ;;  %v9588_v38 = vor.u32 %v10430_v62, %v9585_v43 }
 0x47a   : > { %v4075_v14 = vmul.f32 0.044715, %v4043_v48  ;;  %4679 = vst [vmem:[#allocation4 + $0x2b8] sm:$0xf] %v4361_v33 }
 0x47b   : > { %v12551_v6 = vmul.f32 %v4233_v34, %v12494_v31  ;;  %v3968_v40 = vpop.f32.mrf.mxu1  ;;  %v3704_v31 = vadd.f32 %v14189_v57, %v14188_v22 }
 0x47c   : > { %v4107_v0 = vadd.f32 %v4075_v14, %v12531_v3  ;;  %v12556_v60 = vadd.f32 %v3968_v40, %v3880_v53  ;;  %v6664_v32 = vpop.f32.mrf.mxu2  ;;  %v4458_v14 = vpack.c.bf16 %v12526_v42, %v12526_v42 }
 0x47d   : > { %4297 = vst [vmem:[#allocation3 + $0x111] sm:$0xff] %v12551_v6  ;;  %v6665_v52 = vadd.f32 %v12461_v55, %v6664_v32  ;;  %v3793_v19 = vadd.f32 %v12289_v59, %v3704_v31  ;;  %v4459_v57 = vpack.c.bf16 %v12551_v6, %v12551_v6 }
 0x47e   : > { %v10664_v12 = vpop.eup %10663  ;;  %v4139_v17 = vmul.f32 0.7978846, %v4107_v0  ;;  %v4012_v18 = vmul.f32 %v12556_v60, %v12556_v60  ;;  %v10434_v7 = vld [vmem:[#allocation4 + $0x2f0] sm:$0xf0]  ;;  %6943 = vmatmul.bf16.gmra.mxu1 %v9380_v30  ;;  %4490 = vst [vmem:[#allocation4 + $0x31c] sm:$0xf] %v4458_v14 }
 0x47f   : > { %v4202_v51 = vadd.f32 1.0, %v10664_v12  ;;  %v12569_v39 = vadd.f32 %v6753_v56, %v6665_v52  ;;  %v9584_v45 = vor.u32 %v10434_v7, %v9583_v47  ;;  %v3882_v26 = vadd.f32 %v12294_v4, %v3793_v19  ;;  %v9591_v33 = vld [vmem:[#allocation4 + $0x2d8] sm:$0xf]  ;;  %4491 = vst [vmem:[#allocation4 + $0x340] sm:$0xf] %v4459_v57 }
 0x480   : > { %10665 = vtanh.f32 %v4139_v17  ;;  %v4044_v36 = vmul.f32 %v4012_v18, %v12556_v60  ;;  %v10435_v1 = vld [vmem:[#allocation4 + $0x2f8] sm:$0xf0] }
 0x481   : > { %v4234_v13 = vmul.f32 0.5, %v4202_v51  ;;  %v12575_v9 = vpop.f32.mrf.mxu0  ;;  %6706 = vmatmul.bf16.gmra.mxu2 %v9584_v45  ;;  %v9592_v53 = vor.u32 %v10435_v1, %v9591_v33  ;;  %v4330_v4 = vld [vmem:[#allocation3 + $0x108] sm:$0xff] }
 0x482   : > { %v4076_v8 = vmul.f32 0.044715, %v4044_v36  ;;  %6795 = vmatmul.bf16.gmra.mxu3 %v9588_v38  ;;  %v4362_v22 = vpack.c.bf16 %v4330_v4, %v4330_v4  ;;  %v14190_v52 = vld [vmem:[#allocation54_spill] sm:$0xff] }
 0x483   : > { %v12573_v59 = vmul.f32 %v4234_v13, %v12511_v44  ;;  %v3970_v48 = vpop.f32.mrf.mxu1  ;;  %v3796_v56 = vadd.f32 %v12313_v15, %v14190_v52  ;;  %v9413_v1 = vld [vmem:[#allocation4 + $0x194] sm:$0xf0] }
 0x484   : > { %v4108_v61 = vadd.f32 %v4076_v8, %v12556_v60  ;;  %v12578_v34 = vadd.f32 %v3970_v48, %v3882_v26  ;;  %v6667_v49 = vpop.f32.mrf.mxu2  ;;  %v4331_v12 = vld [vmem:[#allocation3 + $0x110] sm:$0xff]  ;;  %4394 = vst [vmem:[#allocation4 + $0x318] sm:$0xf] %v4362_v22  ;;  %6884 = vmatmul.bf16.gmra.mxu0 %v9592_v53  ;;  %v14192_v8 = vld [vmem:[#allocation56_spill] sm:$0xff] }
 0x485   : > { %4298 = vst [vmem:[#allocation3 + $0x121] sm:$0xff] %v12573_v59  ;;  %v4522_v31 = vld [vmem:[#allocation3 + $0x10a] sm:$0xff]  ;;  %v4523_v17 = vld [vmem:[#allocation3 + $0x112] sm:$0xff]  ;;  %v6668_v32 = vadd.f32 %v12461_v55, %v6667_v49  ;;  %v6756_v41 = vpop.f32.mrf.mxu3  ;;  %v4363_v51 = vpack.c.bf16 %v4331_v12, %v4331_v12  ;;  %v3885_v47 = vadd.f32 %v12316_v58, %v3796_v56 }
 0x486   : > { %v10666_v40 = vpop.eup %10665  ;;  %v4140_v44 = vmul.f32 0.7978846, %v4108_v61  ;;  %v4013_v0 = vmul.f32 %v12578_v34, %v12578_v34  ;;  %v4554_v42 = vpack.c.bf16 %v4522_v31, %v4522_v31  ;;  %v4555_v36 = vpack.c.bf16 %v4523_v17, %v4523_v17  ;;  %v14191_v26 = vld [vmem:[#allocation55_spill] sm:$0xff]  ;;  %4680 = vst [vmem:[#allocation4 + $0x2dc] sm:$0xf] %v4362_v22 }
 0x487   : > { %v4203_v18 = vadd.f32 1.0, %v10666_v40  ;;  %v12591_v6 = vadd.f32 %v6756_v41, %v6668_v32  ;;  %4395 = vst [vmem:[#allocation4 + $0x33c] sm:$0xf] %v4363_v51  ;;  %v3709_v58 = vadd.f32 %v14192_v8, %v14191_v26  ;;  %v10386_v40 = vld [vmem:[#allocation4 + $0x174] sm:$0xf] }
 0x488   : > { %10667 = vtanh.f32 %v4140_v44  ;;  %v4045_v19 = vmul.f32 %v4013_v0, %v12578_v34  ;;  %4586 = vst [vmem:[#allocation4 + $0x320] sm:$0xf] %v4554_v42  ;;  %v9416_v57 = vor.u32 %v10386_v40, %v9413_v1  ;;  %v10439_v17 = vld [vmem:[#allocation4 + $0x31c] sm:$0xf]  ;;  %v9621_v22 = vld [vmem:[#allocation4 + $0x33c] sm:$0xf0] }
 0x489   : > { %v4235_v5 = vmul.f32 0.5, %v4203_v18  ;;  %v12597_v30 = vpop.f32.mrf.mxu0  ;;  %4587 = vst [vmem:[#allocation4 + $0x344] sm:$0xf] %v4555_v36  ;;  %v3798_v4 = vadd.f32 %v12341_v54, %v3709_v58  ;;  %v9624_v41 = vor.u32 %v10439_v17, %v9621_v22 }
 0x48a   : > { %v4077_v7 = vmul.f32 0.044715, %v4045_v19  ;;  %4681 = vst [vmem:[#allocation4 + $0x300] sm:$0xf] %v4363_v51 }
 0x48b   : > { %v12595_v13 = vmul.f32 %v4235_v5, %v12531_v3  ;;  %v3973_v15 = vpop.f32.mrf.mxu1  ;;  %v9619_v44 = vld [vmem:[#allocation4 + $0x318] sm:$0xf]  ;;  %v3887_v18 = vadd.f32 %v12349_v28, %v3798_v4  ;;  %v14193_v4 = vld [vmem:[#allocation57_spill] sm:$0xff] }
 0x48c   : > { %v4109_v45 = vadd.f32 %v4077_v7, %v12578_v34  ;;  %v12600_v62 = vadd.f32 %v3973_v15, %v3885_v47  ;;  %v6669_v33 = vpop.f32.mrf.mxu2  ;;  %v4332_v28 = vld [vmem:[#allocation3 + $0x120] sm:$0xff]  ;;  %v4460_v47 = vpack.c.bf16 %v12573_v59, %v12573_v59 }
 0x48d   : > { %4299 = vst [vmem:[#allocation3 + $0x129] sm:$0xff] %v12595_v13  ;;  %v6670_v61 = vadd.f32 %v12461_v55, %v6669_v33  ;;  %v6758_v53 = vpop.f32.mrf.mxu3  ;;  %v12626_v26 = vpack.c.bf16 %v4332_v28, %v4332_v28  ;;  %v4461_v8 = vpack.c.bf16 %v12595_v13, %v12595_v13  ;;  %v14194_v28 = vld [vmem:[#allocation58_spill] sm:$0xff] }
 0x48e   : > { %v10668_v43 = vpop.eup %10667  ;;  %v4141_v38 = vmul.f32 0.7978846, %v4109_v45  ;;  %v4014_v3 = vmul.f32 %v12600_v62, %v12600_v62  ;;  %v10443_v0 = vld [vmem:[#allocation4 + $0x338] sm:$0xf0]  ;;  %6948 = vmatmul.bf16.gmra.mxu1 %v9416_v57  ;;  %4492 = vst [vmem:[#allocation4 + $0x364] sm:$0xf] %v4460_v47 }
 0x48f   : > { %v4204_v48 = vadd.f32 1.0, %v10668_v43  ;;  %v12610_v12 = vadd.f32 %v6758_v53, %v6670_v61  ;;  %v9620_v31 = vor.u32 %v10443_v0, %v9619_v44  ;;  %v9627_v51 = vld [vmem:[#allocation4 + $0x320] sm:$0xf]  ;;  %v10517_v61 = vld [vmem:[%s14077_s7 + $0x108] sm:$0xff]  ;;  %v4692_v53 = vld [vmem:[#allocation3 + $0x19] sm:$0xff] }
 0x490   : > { %10669 = vtanh.f32 %v4141_v38  ;;  %v4046_v14 = vmul.f32 %v4014_v3, %v12600_v62  ;;  %v10444_v52 = vld [vmem:[#allocation4 + $0x340] sm:$0xf0]  ;;  %4396 = vst [vmem:[#allocation4 + $0x360] sm:$0xf] %v12626_v26  ;;  %7010 = vmatpush.bf16.msrb.mxu2 %v10517_v61  ;;  %v4724_v17 = vpack.c.bf16 %v4692_v53, %v4692_v53 }
 0x491   : > { %v4236_v49 = vmul.f32 0.5, %v4204_v48  ;;  %v12616_v42 = vpop.f32.mrf.mxu0  ;;  %6711 = vmatmul.bf16.gmra.mxu2 %v9620_v31  ;;  %v9628_v5 = vor.u32 %v10444_v52, %v9627_v51  ;;  %4493 = vst [vmem:[#allocation4 + $0x388] sm:$0xf] %v4461_v8  ;;  %v4693_v31 = vld [vmem:[#allocation3 + $0x21] sm:$0xff]  ;;  %v14195_v47 = vld [vmem:[#allocation59_spill] sm:$0xff] }
 0x492   : > { %v4078_v32 = vmul.f32 0.044715, %v4046_v14  ;;  %6800 = vmatmul.bf16.gmra.mxu3 %v9624_v41  ;;  %v3801_v14 = vadd.f32 %v12371_v2, %v14193_v4  ;;  %v4788_v2 = vld [vmem:[#allocation3 + $0x1a] sm:$0xff]  ;;  %v4725_v41 = vpack.c.bf16 %v4693_v31, %v4693_v31  ;;  %v4789_v51 = vld [vmem:[#allocation3 + $0x22] sm:$0xff]  ;;  %v9449_v8 = vld [vmem:[#allocation4 + $0x1dc] sm:$0xf0] }
 0x493   : > { %v12614_v54 = vmul.f32 %v4236_v49, %v12556_v60  ;;  %v3975_v56 = vpop.f32.mrf.mxu1  ;;  %4756 = vst [vmem:[#allocation4 + $0x10] sm:$0xf] %v4724_v17 }
 0x494   : > { %v4110_v19 = vadd.f32 %v4078_v32, %v12600_v62  ;;  %v12619_v36 = vadd.f32 %v3975_v56, %v3887_v18  ;;  %v6672_v45 = vpop.f32.mrf.mxu2  ;;  %v4333_v43 = vld [vmem:[#allocation3 + $0x128] sm:$0xff]  ;;  %6889 = vmatmul.bf16.gmra.mxu0 %v9628_v5  ;;  %v3890_v49 = vadd.f32 %v12385_v29, %v3801_v14  ;;  %v4820_v29 = vpack.c.bf16 %v4788_v2, %v4788_v2  ;;  %v4884_v2 = vld [vmem:[#allocation3 + $0x30] sm:$0xff] }
 0x495   : > { %4300 = vst [vmem:[#allocation3 + $0x139] sm:$0xff] %v12614_v54  ;;  %v4524_v58 = vld [vmem:[#allocation3 + $0x122] sm:$0xff]  ;;  %v4525_v38 = vld [vmem:[#allocation3 + $0x12a] sm:$0xff]  ;;  %v6673_v33 = vadd.f32 %v12461_v55, %v6672_v45  ;;  %v6761_v1 = vpop.f32.mrf.mxu3  ;;  %v12631_v59 = vpack.c.bf16 %v4333_v43, %v4333_v43 }
 0x496   : > { %v10670_v7 = vpop.eup %10669  ;;  %v4142_v60 = vmul.f32 0.7978846, %v4110_v19  ;;  %v4015_v15 = vmul.f32 %v12619_v36, %v12619_v36  ;;  %v4556_v48 = vpack.c.bf16 %v4524_v58, %v4524_v58  ;;  %v4557_v40 = vpack.c.bf16 %v4525_v38, %v4525_v38  ;;  %v10530_v19 = vld [vmem:[%s14077_s7 + $0x170] sm:$0xff]  ;;  %v10395_v43 = vld [vmem:[#allocation4 + $0x1bc] sm:$0xf] }
 0x497   : > { %v4205_v3 = vadd.f32 1.0, %v10670_v7  ;;  %v12640_v0 = vadd.f32 %v6761_v1, %v6673_v33  ;;  %4397 = vst [vmem:[#allocation4 + $0x384] sm:$0xf] %v12631_v59  ;;  %v3714_v7 = vadd.f32 %v14195_v47, %v14194_v28  ;;  %v10448_v33 = vld [vmem:[#allocation4 + $0x364] sm:$0xf]  ;;  %7094 = vmatpush.bf16.msrb.mxu3 %v10530_v19 }
 0x498   : > { %10671 = vtanh.f32 %v4142_v60  ;;  %v4047_v13 = vmul.f32 %v4015_v15, %v12619_v36  ;;  %4588 = vst [vmem:[#allocation4 + $0x368] sm:$0xf] %v4556_v48  ;;  %v9655_v61 = vld [vmem:[#allocation4 + $0x360] sm:$0xf] }
 0x499   : > { %v4237_v44 = vmul.f32 0.5, %v4205_v3  ;;  %v12647_v18 = vpop.f32.mrf.mxu0  ;;  %4589 = vst [vmem:[#allocation4 + $0x38c] sm:$0xf] %v4557_v40  ;;  %v3803_v1 = vadd.f32 %v12403_v16, %v3714_v7  ;;  %v4694_v16 = vld [vmem:[#allocation3 + $0x31] sm:$0xff] }
 0x49a   : > { %v4079_v57 = vmul.f32 0.044715, %v4047_v13  ;;  %4757 = vst [vmem:[#allocation4 + $0x34] sm:$0xf] %v4725_v41  ;;  %v9452_v13 = vor.u32 %v10395_v43, %v9449_v8  ;;  %v4726_v19 = vpack.c.bf16 %v4694_v16, %v4694_v16 }
 0x49b   : > { %v12645_v22 = vmul.f32 %v4237_v44, %v12578_v34  ;;  %v3978_v32 = vpop.f32.mrf.mxu1  ;;  %v4821_v34 = vpack.c.bf16 %v4789_v51, %v4789_v51  ;;  %4852 = vst [vmem:[#allocation4 + $0x14] sm:$0xf] %v4820_v29  ;;  %v9657_v44 = vld [vmem:[#allocation4 + $0x384] sm:$0xf0]  ;;  %v4916_v29 = vpack.c.bf16 %v4884_v2, %v4884_v2 }
 0x49c   : > { %v4111_v52 = vadd.f32 %v4079_v57, %v12619_v36  ;;  %v12650_v56 = vadd.f32 %v3978_v32, %v3890_v49  ;;  %v6674_v45 = vpop.f32.mrf.mxu2  ;;  %v3892_v49 = vadd.f32 %v12407_v25, %v3803_v1  ;;  %v9660_v31 = vor.u32 %v10448_v33, %v9657_v44  ;;  %4682 = vst [vmem:[#allocation4 + $0x324] sm:$0xf] %v12626_v26  ;;  %v14196_v44 = vld [vmem:[#allocation60_spill] sm:$0xff] }
 0x49d   : > { %4301 = vst [vmem:[#allocation3 + $0x141] sm:$0xff] %v12645_v22  ;;  %v6675_v38 = vadd.f32 %v12461_v55, %v6674_v45  ;;  %v6763_v3 = vpop.f32.mrf.mxu3  ;;  %v9485_v2 = vld [vmem:[#allocation4 + $0x224] sm:$0xf0] }
 0x49e   : > { %v10672_v5 = vpop.eup %10671  ;;  %v4143_v60 = vmul.f32 0.7978846, %v4111_v52  ;;  %v4016_v15 = vmul.f32 %v12650_v56, %v12650_v56  ;;  %v10452_v53 = vld [vmem:[#allocation4 + $0x380] sm:$0xf0]  ;;  %4853 = vst [vmem:[#allocation4 + $0x38] sm:$0xf] %v4821_v34  ;;  %6953 = vmatmul.bf16.gmra.mxu1 %v9452_v13  ;;  %v4463_v13 = vpack.c.bf16 %v12645_v22, %v12645_v22 }
 0x49f   : > { %v4206_v58 = vadd.f32 1.0, %v10672_v5  ;;  %v12663_v14 = vadd.f32 %v6763_v3, %v6675_v38  ;;  %v9656_v40 = vor.u32 %v10452_v53, %v9655_v61  ;;  %v9663_v17 = vld [vmem:[#allocation4 + $0x368] sm:$0xf]  ;;  %4683 = vst [vmem:[#allocation4 + $0x348] sm:$0xf] %v12631_v59 }
 0x4a0   : > { %10673 = vtanh.f32 %v4143_v60  ;;  %v4048_v48 = vmul.f32 %v4016_v15, %v12650_v56  ;;  %v10453_v51 = vld [vmem:[#allocation4 + $0x388] sm:$0xf0]  ;;  %4948 = vst [vmem:[#allocation4 + $0x18] sm:$0xf] %v4916_v29 }
 0x4a1   : > { %v4238_v4 = vmul.f32 0.5, %v4206_v58  ;;  %v12669_v41 = vpop.f32.mrf.mxu0  ;;  %6716 = vmatmul.bf16.gmra.mxu2 %v9656_v40  ;;  %4758 = vst [vmem:[#allocation4 + $0x58] sm:$0xf] %v4726_v19  ;;  %v4462_v58 = vpack.c.bf16 %v12614_v54, %v12614_v54  ;;  %v4334_v3 = vld [vmem:[#allocation3 + $0x138] sm:$0xff] }
 0x4a2   : > { %v4080_v57 = vmul.f32 0.044715, %v4048_v48  ;;  %6805 = vmatmul.bf16.gmra.mxu3 %v9660_v31  ;;  %5044 = vst [vmem:[#allocation4 + $0x1c] sm:$0xf] %v4726_v19  ;;  %v12691_v53 = vpack.c.bf16 %v4334_v3, %v4334_v3  ;;  %v4885_v54 = vld [vmem:[#allocation3 + $0x38] sm:$0xff] }
 0x4a3   : > { %v12667_v32 = vmul.f32 %v4238_v4, %v12600_v62  ;;  %v3980_v52 = vpop.f32.mrf.mxu1  ;;  %v9664_v62 = vor.u32 %v10453_v51, %v9663_v17  ;;  %4494 = vst [vmem:[#allocation4 + $0x3ac] sm:$0xf] %v4462_v58  ;;  %v4917_v19 = vpack.c.bf16 %v4885_v54, %v4885_v54 }
 0x4a4   : > { %v4112_v34 = vadd.f32 %v4080_v57, %v12650_v56  ;;  %v12673_v25 = vadd.f32 %v3980_v52, %v3892_v49  ;;  %v6677_v7 = vpop.f32.mrf.mxu2  ;;  %v4335_v33 = vld [vmem:[#allocation3 + $0x140] sm:$0xff]  ;;  %4398 = vst [vmem:[#allocation4 + $0x3a8] sm:$0xf] %v12691_v53 }
 0x4a5   : > { %4302 = vst [vmem:[#allocation3 + $0x151] sm:$0xff] %v12667_v32  ;;  %v6678_v60 = vadd.f32 %v12461_v55, %v6677_v7  ;;  %v6766_v15 = vpop.f32.mrf.mxu3  ;;  %6894 = vmatmul.bf16.gmra.mxu0 %v9664_v62  ;;  %v4526_v1 = vld [vmem:[#allocation3 + $0x13a] sm:$0xff]  ;;  %v12693_v4 = vpack.c.bf16 %v4335_v33, %v4335_v33  ;;  %v4527_v40 = vld [vmem:[#allocation3 + $0x142] sm:$0xff] }
 0x4a6   : > { %v10674_v5 = vpop.eup %10673  ;;  %v4144_v28 = vmul.f32 0.7978846, %v4112_v34  ;;  %v4017_v47 = vmul.f32 %v12673_v25, %v12673_v25  ;;  %v4558_v49 = vpack.c.bf16 %v4526_v1, %v4526_v1  ;;  %v4559_v16 = vpack.c.bf16 %v4527_v40, %v4527_v40  ;;  %v10404_v34 = vld [vmem:[#allocation4 + $0x204] sm:$0xf]  ;;  %4495 = vst [vmem:[#allocation4 + $0x3d0] sm:$0xf] %v4463_v13 }
 0x4a7   : > { %v4207_v26 = vadd.f32 1.0, %v10674_v5  ;;  %v12681_v43 = vadd.f32 %v6766_v15, %v6678_v60  ;;  %4399 = vst [vmem:[#allocation4 + $0x3cc] sm:$0xf] %v12693_v4  ;;  %v14197_v7 = vld [vmem:[#allocation61_spill] sm:$0xff]  ;;  %v12714_v60 = vadd.f32 %v12528_v50, %v12547_v21 }
 0x4a8   : > { %10675 = vtanh.f32 %v4144_v28  ;;  %v4049_v59 = vmul.f32 %v4017_v47, %v12673_v25  ;;  %v9488_v47 = vor.u32 %v10404_v34, %v9485_v2  ;;  %4590 = vst [vmem:[#allocation4 + $0x3b0] sm:$0xf] %v4558_v49  ;;  %v10529_v49 = vld [vmem:[%s14077_s7 + $0x168] sm:$0xff] }
 0x4a9   : > { %v4239_v45 = vmul.f32 0.5, %v4207_v26  ;;  %v12689_v61 = vpop.f32.mrf.mxu0  ;;  %4591 = vst [vmem:[#allocation4 + $0x3d4] sm:$0xf] %v4559_v16  ;;  %v4464_v26 = vpack.c.bf16 %v12667_v32, %v12667_v32  ;;  %7095 = vmatpush.bf16.msrb.mxu3 %v10529_v49  ;;  %v12778_v49 = vadd.f32 %v12575_v9, %v12591_v6  ;;  %v10526_v9 = vld [vmem:[%s14077_s7 + $0x150] sm:$0xff] }
 0x4aa   : > { %v4081_v8 = vmul.f32 0.044715, %v4049_v59  ;;  %4949 = vst [vmem:[#allocation4 + $0x3c] sm:$0xf] %v4917_v19  ;;  %v10457_v33 = vld [vmem:[#allocation4 + $0x3ac] sm:$0xf] }
 0x4ab   : > { %v12686_v38 = vmul.f32 %v4239_v45, %v12619_v36  ;;  %v3806_v36 = vadd.f32 %v12426_v20, %v14196_v44  ;;  %v3983_v20 = vpop.f32.mrf.mxu1  ;;  %4496 = vst [vmem:[#allocation4 + $0x3f4] sm:$0xf] %v4464_v26  ;;  %v9691_v3 = vld [vmem:[#allocation4 + $0x3a8] sm:$0xf]  ;;  %v10528_v19 = vld [vmem:[%s14077_s7 + $0x160] sm:$0xff] }
 0x4ac   : > { %v4113_v48 = vadd.f32 %v4081_v8, %v12673_v25  ;;  %v6679_v17 = vpop.f32.mrf.mxu2  ;;  %v4336_v45 = vld [vmem:[#allocation3 + $0x150] sm:$0xff]  ;;  %4684 = vst [vmem:[#allocation4 + $0x36c] sm:$0xf] %v12691_v53  ;;  %v10524_v53 = vld [vmem:[%s14077_s7 + $0x140] sm:$0xff] }
 0x4ad   : > { %4303 = vst [vmem:[#allocation3 + $0x159] sm:$0xff] %v12686_v38  ;;  %v3895_v51 = vadd.f32 %v12429_v24, %v3806_v36  ;;  %v6680_v22 = vadd.f32 %v12461_v55, %v6679_v17  ;;  %v6768_v29 = vpop.f32.mrf.mxu3  ;;  %v3719_v24 = vadd.f32 %v12440_v63, %v14197_v7  ;;  %v10516_v63 = vld [vmem:[%s14077_s7 + $0x100] sm:$0xff]  ;;  %v12725_v58 = vpack.c.bf16 %v4336_v45, %v4336_v45  ;;  %v4790_v26 = vld [vmem:[#allocation3 + $0x32] sm:$0xff] }
 0x4ae   : > { %v10676_v57 = vpop.eup %10675  ;;  %v4145_v31 = vmul.f32 0.7978846, %v4113_v48  ;;  %6958 = vmatmul.bf16.gmra.mxu1 %v9488_v47  ;;  %v4465_v48 = vpack.c.bf16 %v12686_v38, %v12686_v38  ;;  %v10461_v44 = vld [vmem:[#allocation4 + $0x3c8] sm:$0xf0]  ;;  %7011 = vmatpush.bf16.msrb.mxu2 %v10516_v63  ;;  %v9693_v2 = vld [vmem:[#allocation4 + $0x3cc] sm:$0xf0] }
 0x4af   : > { %v4208_v52 = vadd.f32 1.0, %v10676_v57  ;;  %v12704_v5 = vadd.f32 %v3983_v20, %v3895_v51  ;;  %v12706_v28 = vadd.f32 %v6768_v29, %v6680_v22  ;;  %v3808_v8 = vadd.f32 %v12447_v37, %v3719_v24  ;;  %v10539_v37 = vld [vmem:[%s14077_s7 + $0x1b8] sm:$0xff]  ;;  %4400 = vst [vmem:[#allocation4 + $0x3f0] sm:$0xf] %v12725_v58  ;;  %7096 = vmatpush.bf16.msrb.mxu3 %v10528_v19 }
 0x4b0   : > { %10677 = vtanh.f32 %v4145_v31  ;;  %v4695_v57 = vld [vmem:[#allocation3 + $0x39] sm:$0xff]  ;;  %v9692_v17 = vor.u32 %v10461_v44, %v9691_v3  ;;  %7182 = vmatpush.bf16.msra.mxu0 %v10539_v37  ;;  %v9696_v51 = vor.u32 %v10457_v33, %v9693_v2  ;;  %4497 = vst [vmem:[#allocation4 + $0x418] sm:$0xf] %v4465_v48  ;;  %v12771_v3 = vadd.f32 %v12553_v23, %v12569_v39  ;;  %v4887_v44 = vld [vmem:[#allocation3 + $0x50] sm:$0xff] }
 0x4b1   : > { %v4240_v62 = vmul.f32 0.5, %v4208_v52  ;;  %v4018_v59 = vmul.f32 %v12704_v5, %v12704_v5  ;;  %v3897_v40 = vadd.f32 %v12455_v35, %v3808_v8  ;;  %v12737_v54 = vpop.f32.mrf.mxu0  ;;  %v10538_v35 = vld [vmem:[%s14077_s7 + $0x1b0] sm:$0xff]  ;;  %v9699_v52 = vld [vmem:[#allocation4 + $0x3b0] sm:$0xf]  ;;  %v12756_v63 = vpack.c.bf16 %v4695_v57, %v4695_v57  ;;  %4685 = vst [vmem:[#allocation4 + $0x390] sm:$0xf] %v12693_v4 }
 0x4b2   : > { %6721 = vmatmul.bf16.gmra.mxu2 %v9692_v17  ;;  %6810 = vmatmul.bf16.gmra.mxu3 %v9696_v51  ;;  %v4822_v33 = vpack.c.bf16 %v4790_v26, %v4790_v26  ;;  %v4919_v6 = vpack.c.bf16 %v4887_v44, %v4887_v44  ;;  %4686 = vst [vmem:[#allocation4 + $0x3b4] sm:$0xf] %v12725_v58 }
 0x4b3   : > { %v12717_v15 = vmul.f32 %v4240_v62, %v12650_v56  ;;  %v4050_v56 = vmul.f32 %v4018_v59, %v12704_v5  ;;  %v3985_v22 = vpop.f32.mrf.mxu1  ;;  %v10462_v62 = vld [vmem:[#allocation4 + $0x3d0] sm:$0xf0]  ;;  %4759 = vst [vmem:[#allocation4 + $0x7c] sm:$0xf] %v12756_v63 }
 0x4b4   : > { %v4337_v32 = vld [vmem:[#allocation3 + $0x158] sm:$0xff]  ;;  %v6682_v29 = vpop.f32.mrf.mxu2  ;;  %v12751_v47 = vadd.f32 %v3985_v22, %v3897_v40  ;;  %v9700_v59 = vor.u32 %v10462_v62, %v9699_v52  ;;  %7183 = vmatpush.bf16.msra.mxu0 %v10538_v35  ;;  %v4886_v40 = vld [vmem:[#allocation3 + $0x48] sm:$0xff]  ;;  %v12797_v52 = vld [vmem:[%s14078_s8] ss:$0 sm:$0xff]  ;;  %4854 = vst [vmem:[#allocation4 + $0x5c] sm:$0xf] %v4822_v33 }
 0x4b5   : > { %v4528_v50 = vld [vmem:[#allocation3 + $0x152] sm:$0xff]  ;;  %v4529_v21 = vld [vmem:[#allocation3 + $0x15a] sm:$0xff]  ;;  %4304 = vst [vmem:[#allocation3 + $0x169] sm:$0xff] %v12717_v15  ;;  %v12729_v1 = vpack.c.bf16 %v4337_v32, %v4337_v32  ;;  %v4082_v31 = vmul.f32 0.044715, %v4050_v56  ;;  %v6683_v7 = vadd.f32 %v12461_v55, %v6682_v29  ;;  %v6771_v24 = vpop.f32.mrf.mxu3  ;;  %v4466_v45 = vpack.c.bf16 %v12717_v15, %v12717_v15  ;;  %v10537_v55 = vld [vmem:[%s14077_s7 + $0x1a8] sm:$0xff] }
 0x4b6   : > { %v10678_v13 = vpop.eup %10677  ;;  %v4560_v36 = vpack.c.bf16 %v4528_v50, %v4528_v50  ;;  %v4561_v16 = vpack.c.bf16 %v4529_v21, %v4529_v21  ;;  %v4019_v50 = vmul.f32 %v12751_v47, %v12751_v47  ;;  %v4791_v56 = vld [vmem:[#allocation3 + $0x3a] sm:$0xff]  ;;  %6899 = vmatmul.bf16.gmra.mxu0 %v9700_v59  ;;  %v10466_v59 = vld [vmem:[#allocation4 + $0x3f4] sm:$0xf]  ;;  %4951 = vst [vmem:[#allocation4 + $0x84] sm:$0xf] %v4919_v6  ;;  %v4793_v6 = vld [vmem:[#allocation3 + $0x52] sm:$0xff] }
 0x4b7   : > { %v4209_v38 = vadd.f32 1.0, %v10678_v13  ;;  %4401 = vst [vmem:[#allocation4 + $0x414] sm:$0xf] %v12729_v1  ;;  %v4114_v34 = vadd.f32 %v4082_v31, %v12704_v5  ;;  %v12761_v21 = vadd.f32 %v6771_v24, %v6683_v7  ;;  %v4823_v57 = vpack.c.bf16 %v4791_v56, %v4791_v56  ;;  %v9727_v62 = vld [vmem:[#allocation4 + $0x3f0] sm:$0xf] }
 0x4b8   : > { %4592 = vst [vmem:[#allocation4 + $0x3f8] sm:$0xf] %v4560_v36  ;;  %v4051_v48 = vmul.f32 %v4019_v50, %v12751_v47  ;;  %v9521_v36 = vld [vmem:[#allocation4 + $0x26c] sm:$0xf0]  ;;  %7184 = vmatpush.bf16.msra.mxu0 %v10537_v55  ;;  %v4918_v31 = vpack.c.bf16 %v4886_v40, %v4886_v40  ;;  %v9729_v7 = vld [vmem:[#allocation4 + $0x414] sm:$0xf0] }
 0x4b9   : > { %v4241_v20 = vmul.f32 0.5, %v4209_v38  ;;  %v4146_v32 = vmul.f32 0.7978846, %v4114_v34  ;;  %4593 = vst [vmem:[#allocation4 + $0x41c] sm:$0xf] %v4561_v16  ;;  %v12781_v39 = vpop.f32.mrf.mxu0  ;;  %v10536_v38 = vld [vmem:[%s14077_s7 + $0x1a0] sm:$0xff] }
 0x4ba   : > { %4498 = vst [vmem:[#allocation4 + $0x43c] sm:$0xf] %v4466_v45  ;;  %v4083_v23 = vmul.f32 0.044715, %v4051_v48  ;;  %v10413_v16 = vld [vmem:[#allocation4 + $0x24c] sm:$0xf] }
 0x4bb   : > { %v4273_v8 = vmul.f32 %v4241_v20, %v12673_v25  ;;  %v10527_v25 = vld [vmem:[%s14077_s7 + $0x158] sm:$0xff]  ;;  %10679 = vtanh.f32 %v4146_v32  ;;  %v6924_v17 = vpop.f32.mrf.mxu1  ;;  %v9524_v19 = vor.u32 %v10413_v16, %v9521_v36  ;;  %4855 = vst [vmem:[#allocation4 + $0x80] sm:$0xf] %v4823_v57  ;;  %v10525_v45 = vld [vmem:[%s14077_s7 + $0x148] sm:$0xff]  ;;  %v9732_v36 = vor.u32 %v10466_v59, %v9729_v7 }
 0x4bc   : > { %v4338_v15 = vld [vmem:[#allocation3 + $0x168] sm:$0xff]  ;;  %v6684_v2 = vpop.f32.mrf.mxu2  ;;  %7097 = vmatpush.bf16.msrb.mxu3 %v10527_v25  ;;  %v4115_v35 = vadd.f32 %v4083_v23, %v12751_v47  ;;  %v12792_v51 = vadd.f32 %v6924_v17, %v12485_v27  ;;  %v10535_v34 = vld [vmem:[%s14077_s7 + $0x198] sm:$0xff]  ;;  %7185 = vmatpush.bf16.msra.mxu0 %v10536_v38  ;;  %4950 = vst [vmem:[#allocation4 + $0x60] sm:$0xf] %v4918_v31  ;;  %v10534_v23 = vld [vmem:[%s14077_s7 + $0x190] sm:$0xff] }
 0x4bd   : > { %4305 = vst [vmem:[#allocation3 + $0x171] sm:$0xff] %v4273_v8  ;;  %v12774_v37 = vpack.c.bf16 %v4338_v15, %v4338_v15  ;;  %v4467_v13 = vpack.c.bf16 %v4273_v8, %v4273_v8  ;;  %v6685_v22 = vadd.f32 %v12797_v52, %v6684_v2  ;;  %v6773_v29 = vpop.f32.mrf.mxu3  ;;  %v4696_v8 = vld [vmem:[#allocation3 + $0x49] sm:$0xff]  ;;  %v4697_v57 = vld [vmem:[#allocation3 + $0x51] sm:$0xff] }
 0x4be   : > { %v10470_v20 = vld [vmem:[#allocation4 + $0x410] sm:$0xf0]  ;;  %v4147_v24 = vmul.f32 0.7978846, %v4115_v35  ;;  %6963 = vmatmul.bf16.gmra.mxu1 %v9524_v19  ;;  %v4792_v38 = vld [vmem:[#allocation3 + $0x4a] sm:$0xff] }
 0x4bf   : > { %4402 = vst [vmem:[#allocation4 + $0x438] sm:$0xf] %v12774_v37  ;;  %v12803_v26 = vadd.f32 %v6773_v29, %v6685_v22  ;;  %v9728_v50 = vor.u32 %v10470_v20, %v9727_v62  ;;  %v9735_v25 = vld [vmem:[#allocation4 + $0x3f8] sm:$0xf]  ;;  %v4888_v19 = vld [vmem:[#allocation3 + $0x60] sm:$0xff]  ;;  %v4824_v20 = vpack.c.bf16 %v4792_v38, %v4792_v38 }
 0x4c0   : > { %4499 = vst [vmem:[#allocation4 + $0x460] sm:$0xf] %v4467_v13  ;;  %7098 = vmatpush.bf16.msrb.mxu3 %v10526_v9  ;;  %10681 = vtanh.f32 %v4147_v24  ;;  %v10471_v33 = vld [vmem:[#allocation4 + $0x418] sm:$0xf0]  ;;  %7186 = vmatpush.bf16.msra.mxu0 %v10535_v34  ;;  %v12821_v9 = vpack.c.bf16 %v4696_v8, %v4696_v8  ;;  %v4825_v24 = vpack.c.bf16 %v4793_v6, %v4793_v6  ;;  %v4794_v38 = vld [vmem:[#allocation3 + $0x62] sm:$0xff]  ;;  %v4890_v6 = vld [vmem:[#allocation3 + $0x78] sm:$0xff] }
 0x4c1   : > { %v10680_v27 = vpop.eup %10679  ;;  %v9736_v17 = vor.u32 %v10471_v33, %v9735_v25  ;;  %v12823_v35 = vpop.f32.mrf.mxu0  ;;  %v4889_v34 = vld [vmem:[#allocation3 + $0x68] sm:$0xff]  ;;  %v12839_v8 = vadd.f32 %v12597_v30, %v12610_v12  ;;  %4856 = vst [vmem:[#allocation4 + $0xa4] sm:$0xf] %v4824_v20  ;;  %v10532_v12 = vld [vmem:[%s14077_s7 + $0x180] sm:$0xff] }
 0x4c2   : > { %v4210_v32 = vadd.f32 1.0, %v10680_v27  ;;  %6726 = vmatmul.bf16.gmra.mxu2 %v9728_v50  ;;  %6815 = vmatmul.bf16.gmra.mxu3 %v9732_v36  ;;  %v10533_v27 = vld [vmem:[%s14077_s7 + $0x188] sm:$0xff]  ;;  %4760 = vst [vmem:[#allocation4 + $0xa0] sm:$0xf] %v12821_v9  ;;  %v4920_v50 = vpack.c.bf16 %v4888_v19, %v4888_v19  ;;  %v4921_v4 = vpack.c.bf16 %v4889_v34, %v4889_v34 }
 0x4c3   : > { %v12816_v2 = vpop.f32.mrf.mxu1  ;;  %v4698_v30 = vld [vmem:[#allocation3 + $0x61] sm:$0xff]  ;;  %4857 = vst [vmem:[#allocation4 + $0xc8] sm:$0xf] %v4825_v24  ;;  %v4826_v19 = vpack.c.bf16 %v4794_v38, %v4794_v38  ;;  %v9593_v38 = vld [vmem:[#allocation4 + $0x2fc] sm:$0xf0] }
 0x4c4   : > { %v4339_v55 = vld [vmem:[#allocation3 + $0x170] sm:$0xff]  ;;  %v4242_v44 = vmul.f32 0.5, %v4210_v32  ;;  %v6687_v16 = vpop.f32.mrf.mxu2  ;;  %7099 = vmatpush.bf16.msrb.mxu3 %v10525_v45  ;;  %7187 = vmatpush.bf16.msra.mxu0 %v10534_v23  ;;  %v10555_v45 = vld [vmem:[%s14077_s7 + $0x238] sm:$0xff]  ;;  %4952 = vst [vmem:[#allocation4 + $0xa8] sm:$0xf] %v4920_v50  ;;  %v12858_v23 = vpack.c.bf16 %v4698_v30, %v4698_v30  ;;  %v4701_v30 = vld [vmem:[#allocation3 + $0x81] sm:$0xff] }
 0x4c5   : > { %v4530_v56 = vld [vmem:[#allocation3 + $0x16a] sm:$0xff]  ;;  %v4531_v15 = vld [vmem:[#allocation3 + $0x172] sm:$0xff]  ;;  %v12808_v48 = vpack.c.bf16 %v4339_v55, %v4339_v55  ;;  %v6688_v22 = vadd.f32 %v12797_v52, %v6687_v16  ;;  %v6776_v29 = vpop.f32.mrf.mxu3  ;;  %7360 = vmatpush.bf16.msra.mxu2 %v10555_v45  ;;  %4953 = vst [vmem:[#allocation4 + $0xcc] sm:$0xf] %v4921_v4 }
 0x4c6   : > { %v4562_v13 = vpack.c.bf16 %v4530_v56, %v4530_v56  ;;  %v4563_v40 = vpack.c.bf16 %v4531_v15, %v4531_v15  ;;  %v4274_v31 = vmul.f32 %v4242_v44, %v12704_v5  ;;  %v12826_v5 = vpack.c.bf16 %v4697_v57, %v4697_v57  ;;  %v10682_v62 = vpop.eup %10681  ;;  %6904 = vmatmul.bf16.gmra.mxu0 %v9736_v17  ;;  %v10547_v32 = vld [vmem:[%s14077_s7 + $0x1f8] sm:$0xff]  ;;  %v9557_v56 = vld [vmem:[#allocation4 + $0x2b4] sm:$0xf0] }
 0x4c7   : > { %4403 = vst [vmem:[#allocation4 + $0x45c] sm:$0xf] %v12808_v48  ;;  %v12828_v7 = vadd.f32 %v6776_v29, %v6688_v22  ;;  %v4211_v59 = vadd.f32 1.0, %v10682_v62  ;;  %7271 = vmatpush.bf16.msra.mxu1 %v10547_v32  ;;  %v12848_v15 = vadd.f32 %v12616_v42, %v12640_v0  ;;  %v4699_v44 = vld [vmem:[#allocation3 + $0x69] sm:$0xff]  ;;  %v4700_v45 = vld [vmem:[#allocation3 + $0x79] sm:$0xff] }
 0x4c8   : > { %4594 = vst [vmem:[#allocation4 + $0x440] sm:$0xf] %v4562_v13  ;;  %7100 = vmatpush.bf16.msrb.mxu3 %v10524_v53  ;;  %7188 = vmatpush.bf16.msra.mxu0 %v10533_v27  ;;  %v4795_v17 = vld [vmem:[#allocation3 + $0x6a] sm:$0xff] }
 0x4c9   : > { %4595 = vst [vmem:[#allocation4 + $0x464] sm:$0xf] %v4563_v40  ;;  %v4243_v55 = vmul.f32 0.5, %v4211_v59  ;;  %v10422_v40 = vld [vmem:[#allocation4 + $0x294] sm:$0xf]  ;;  %v4827_v27 = vpack.c.bf16 %v4795_v17, %v4795_v17  ;;  %v4922_v59 = vpack.c.bf16 %v4890_v6, %v4890_v6 }
 0x4ca   : > { %4306 = vst [vmem:[#allocation3 + $0x181] sm:$0xff] %v4274_v31  ;;  %v9560_v57 = vor.u32 %v10422_v40, %v9557_v56  ;;  %v9765_v53 = vld [vmem:[#allocation4 + $0x45c] sm:$0xf0]  ;;  %v9763_v22 = vld [vmem:[#allocation4 + $0x438] sm:$0xf]  ;;  %v4891_v56 = vld [vmem:[#allocation3 + $0x80] sm:$0xff]  ;;  %v12877_v40 = vpack.c.bf16 %v4701_v30, %v4701_v30 }
 0x4cb   : > { %4761 = vst [vmem:[#allocation4 + $0xc4] sm:$0xf] %v12826_v5  ;;  %v4275_v25 = vmul.f32 %v4243_v55, %v12751_v47  ;;  %v6929_v33 = vpop.f32.mrf.mxu1  ;;  %v12860_v47 = vpop.f32.mrf.mxu0  ;;  %v10475_v29 = vld [vmem:[#allocation4 + $0x43c] sm:$0xf]  ;;  %v4798_v30 = vld [vmem:[#allocation3 + $0x92] sm:$0xff] }
 0x4cc   : > { %v6689_v13 = vpop.f32.mrf.mxu2  ;;  %v12855_v36 = vadd.f32 %v6929_v33, %v12714_v60  ;;  %7189 = vmatpush.bf16.msra.mxu0 %v10532_v12  ;;  %v12865_v60 = vpack.c.bf16 %v4699_v44, %v4699_v44  ;;  %4687 = vst [vmem:[#allocation4 + $0x3d8] sm:$0xf] %v12729_v1  ;;  %v9768_v24 = vor.u32 %v10475_v29, %v9765_v53  ;;  %v4797_v44 = vld [vmem:[#allocation3 + $0x82] sm:$0xff]  ;;  %v10431_v53 = vld [vmem:[#allocation4 + $0x2dc] sm:$0xf]  ;;  %v4702_v29 = vld [vmem:[#allocation3 + $0x91] sm:$0xff] }
 0x4cd   : > { %v6690_v42 = vadd.f32 %v12797_v52, %v6689_v13  ;;  %v6778_v0 = vpop.f32.mrf.mxu3  ;;  %4307 = vst [vmem:[#allocation3 + $0x189] sm:$0xff] %v4275_v25  ;;  %v4732_v12 = vpack.c.bf16 %v4700_v45, %v4700_v45  ;;  %v4796_v25 = vld [vmem:[#allocation3 + $0x7a] sm:$0xff]  ;;  %v4923_v13 = vpack.c.bf16 %v4891_v56, %v4891_v56  ;;  %v9596_v6 = vor.u32 %v10431_v53, %v9593_v38  ;;  %v5076_v38 = vld [vmem:[#allocation3 + $0x32] sm:$0xff] }
 0x4ce   : > { %v10479_v31 = vld [vmem:[#allocation4 + $0x458] sm:$0xf0]  ;;  %6968 = vmatmul.bf16.gmra.mxu1 %v9560_v57  ;;  %4762 = vst [vmem:[#allocation4 + $0xe8] sm:$0xf] %v12858_v23  ;;  %v4829_v57 = vpack.c.bf16 %v4797_v44, %v4797_v44  ;;  %v4703_v56 = vld [vmem:[#allocation3 + $0x99] sm:$0xff]  ;;  %v12923_v53 = vadd.f32 %v12737_v54, %v12761_v21 }
 0x4cf   : > { %v12862_v16 = vadd.f32 %v6778_v0, %v6690_v42  ;;  %v9764_v20 = vor.u32 %v10479_v31, %v9763_v22  ;;  %v9771_v34 = vld [vmem:[#allocation4 + $0x440] sm:$0xf]  ;;  %4763 = vst [vmem:[#allocation4 + $0x10c] sm:$0xf] %v12865_v60  ;;  %v4828_v42 = vpack.c.bf16 %v4796_v25, %v4796_v25  ;;  %v12888_v31 = vadd.f32 %v12669_v41, %v12681_v43  ;;  %v4799_v44 = vld [vmem:[#allocation3 + $0x9a] sm:$0xff]  ;;  %v4894_v21 = vld [vmem:[#allocation3 + $0xa8] sm:$0xff] }
 0x4d0   : > { %v10480_v62 = vld [vmem:[#allocation4 + $0x460] sm:$0xf0]  ;;  %4858 = vst [vmem:[#allocation4 + $0xec] sm:$0xf] %v4826_v19  ;;  %v4734_v19 = vpack.c.bf16 %v4702_v29, %v4702_v29 }
 0x4d1   : > { %v9772_v58 = vor.u32 %v10480_v62, %v9771_v34  ;;  %4859 = vst [vmem:[#allocation4 + $0x110] sm:$0xf] %v4827_v27  ;;  %v4892_v22 = vld [vmem:[#allocation3 + $0x90] sm:$0xff]  ;;  %v9241_v34 = vld [vmem:[#allocation4 + $0x34] sm:$0xf0] }
 0x4d2   : > { %6731 = vmatmul.bf16.gmra.mxu2 %v9764_v20  ;;  %6820 = vmatmul.bf16.gmra.mxu3 %v9768_v24  ;;  %4954 = vst [vmem:[#allocation4 + $0xf0] sm:$0xf] %v4922_v59  ;;  %v4924_v43 = vpack.c.bf16 %v4892_v22, %v4892_v22  ;;  %v10346_v20 = vld [vmem:[#allocation4 + $0x30] sm:$0xf0]  ;;  %v9239_v62 = vld [vmem:[#allocation4 + $0x10] sm:$0xf] }
 0x4d3   : > { %v6931_v32 = vpop.f32.mrf.mxu1  ;;  %4688 = vst [vmem:[#allocation4 + $0x3fc] sm:$0xf] %v12774_v37  ;;  %v12884_v0 = vpop.f32.mrf.mxu0  ;;  %v9240_v24 = vor.u32 %v10346_v20, %v9239_v62  ;;  %v10347_v59 = vld [vmem:[#allocation4 + $0x38] sm:$0xf0]  ;;  %v5079_v54 = vld [vmem:[#allocation3 + $0x52] sm:$0xff] }
 0x4d4   : > { %v6692_v50 = vpop.f32.mrf.mxu2  ;;  %v12871_v4 = vadd.f32 %v6931_v32, %v12771_v3  ;;  %v12881_v3 = vadd.f32 %v12647_v18, %v12663_v14  ;;  %4689 = vst [vmem:[#allocation4 + $0x420] sm:$0xf] %v12808_v48  ;;  %v9247_v32 = vld [vmem:[#allocation4 + $0x18] sm:$0xf] }
 0x4d5   : > { %v6693_v1 = vadd.f32 %v12797_v52, %v6692_v50  ;;  %v6781_v55 = vpop.f32.mrf.mxu3  ;;  %4955 = vst [vmem:[#allocation4 + $0x114] sm:$0xf] %v4923_v13  ;;  %v5078_v22 = vld [vmem:[#allocation3 + $0x4a] sm:$0xff] }
 0x4d6   : > { %6909 = vmatmul.bf16.gmra.mxu0 %v9772_v58  ;;  %4764 = vst [vmem:[#allocation4 + $0x130] sm:$0xf] %v4732_v12 }
 0x4d7   : > { %v12874_v33 = vadd.f32 %v6781_v55, %v6693_v1  ;;  %4765 = vst [vmem:[#allocation4 + $0x154] sm:$0xf] %v12877_v40  ;;  %v9248_v1 = vor.u32 %v10347_v59, %v9247_v32  ;;  %v4893_v55 = vld [vmem:[#allocation3 + $0x98] sm:$0xff]  ;;  %v5110_v59 = vpack.c.bf16 %v5078_v22, %v5078_v22  ;;  %v9277_v32 = vld [vmem:[#allocation4 + $0x7c] sm:$0xf0] }
 0x4d8   : > { %4860 = vst [vmem:[#allocation4 + $0x134] sm:$0xf] %v4828_v42  ;;  %v4925_v13 = vpack.c.bf16 %v4893_v55, %v4893_v55  ;;  %v4830_v42 = vpack.c.bf16 %v4798_v30, %v4798_v30  ;;  %v10356_v55 = vld [vmem:[#allocation4 + $0x80] sm:$0xf0] }
 0x4d9   : > { %4861 = vst [vmem:[#allocation4 + $0x158] sm:$0xf] %v4829_v57  ;;  %v10546_v57 = vld [vmem:[%s14077_s7 + $0x1f0] sm:$0xff] }
 0x4da   : > { %5045 = vst [vmem:[#allocation4 + $0x40] sm:$0xf] %v12756_v63  ;;  %7272 = vmatpush.bf16.msra.mxu1 %v10546_v57 }
 0x4db   : > { %v6934_v37 = vpop.f32.mrf.mxu1  ;;  %5046 = vst [vmem:[#allocation4 + $0x64] sm:$0xf] %v12821_v9  ;;  %v12900_v27 = vpop.f32.mrf.mxu0 }
 0x4dc   : > { %v6694_v17 = vpop.f32.mrf.mxu2  ;;  %v12892_v18 = vadd.f32 %v6934_v37, %v12778_v49  ;;  %5047 = vst [vmem:[#allocation4 + $0x88] sm:$0xf] %v12826_v5  ;;  %v10342_v49 = vld [vmem:[#allocation4 + $0x14] sm:$0xf]  ;;  %v5077_v37 = vld [vmem:[#allocation3 + $0x3a] sm:$0xff] }
 0x4dd   : > { %v6695_v14 = vadd.f32 %v12797_v52, %v6694_v17  ;;  %v6783_v48 = vpop.f32.mrf.mxu3  ;;  %4956 = vst [vmem:[#allocation4 + $0x138] sm:$0xf] %v4924_v43  ;;  %v9244_v63 = vor.u32 %v10342_v49, %v9241_v34  ;;  %v9629_v17 = vld [vmem:[#allocation4 + $0x344] sm:$0xf0]  ;;  %v5080_v34 = vld [vmem:[#allocation3 + $0x62] sm:$0xff] }
 0x4de   : > { %6973 = vmatmul.bf16.gmra.mxu1 %v9596_v6  ;;  %4766 = vst [vmem:[#allocation4 + $0x178] sm:$0xf] %v4734_v19  ;;  %v5109_v6 = vpack.c.bf16 %v5077_v37, %v5077_v37 }
 0x4df   : > { %v12896_v41 = vadd.f32 %v6783_v48, %v6695_v14  ;;  %5048 = vst [vmem:[#allocation4 + $0xac] sm:$0xf] %v12858_v23  ;;  %v4735_v23 = vpack.c.bf16 %v4703_v56, %v4703_v56  ;;  %v10440_v48 = vld [vmem:[#allocation4 + $0x324] sm:$0xf] }
 0x4e0   : > { %5049 = vst [vmem:[#allocation4 + $0xd0] sm:$0xf] %v12865_v60  ;;  %v12915_v60 = vadd.f32 %v12689_v61, %v12706_v28  ;;  %v5108_v61 = vpack.c.bf16 %v5076_v38, %v5076_v38  ;;  %v9632_v49 = vor.u32 %v10440_v48, %v9629_v17 }
 0x4e1   : > { %5050 = vst [vmem:[#allocation4 + $0xf4] sm:$0xf] %v4732_v12  ;;  %v4831_v12 = vpack.c.bf16 %v4799_v44, %v4799_v44 }
 0x4e2   : > { %7012 = vmatmul.bf16.vlgmr.msrb.gmra.mxu2 %v9240_v24  ;;  %7101 = vmatmul.bf16.vlgmr.msrb.gmra.mxu3 %v9244_v63  ;;  %5051 = vst [vmem:[#allocation4 + $0x118] sm:$0xf] %v12877_v40  ;;  %v4926_v24 = vpack.c.bf16 %v4894_v21, %v4894_v21  ;;  %v5081_v63 = vld [vmem:[#allocation3 + $0x6a] sm:$0xff]  ;;  %v5083_v21 = vld [vmem:[#allocation3 + $0x82] sm:$0xff] }
 0x4e3   : > { %v6936_v45 = vpop.f32.mrf.mxu1  ;;  %4957 = vst [vmem:[#allocation4 + $0x15c] sm:$0xf] %v4925_v13  ;;  %v12925_v40 = vpop.f32.mrf.mxu0 }
 0x4e4   : > { %v6697_v58 = vpop.f32.mrf.mxu2  ;;  %v12904_v9 = vadd.f32 %v6936_v45, %v12839_v8  ;;  %v10554_v8 = vld [vmem:[%s14077_s7 + $0x230] sm:$0xff]  ;;  %4767 = vst [vmem:[#allocation4 + $0x19c] sm:$0xf] %v4735_v23  ;;  %v10355_v45 = vld [vmem:[#allocation4 + $0x78] sm:$0xf0] }
 0x4e5   : > { %v6698_v5 = vadd.f32 %v12797_v52, %v6697_v58  ;;  %v6786_v50 = vpop.f32.mrf.mxu3  ;;  %7361 = vmatpush.bf16.msra.mxu2 %v10554_v8  ;;  %4862 = vst [vmem:[#allocation4 + $0x17c] sm:$0xf] %v4830_v42  ;;  %v10351_v58 = vld [vmem:[#allocation4 + $0x5c] sm:$0xf] }
 0x4e6   : > { %7190 = vmatmul.bf16.vlgmr.msra.gmra.mxu0 %v9248_v1  ;;  %4863 = vst [vmem:[#allocation4 + $0x1a0] sm:$0xf] %v4831_v12  ;;  %v9280_v56 = vor.u32 %v10351_v58, %v9277_v32  ;;  %v4895_v12 = vld [vmem:[#allocation3 + $0xb0] sm:$0xff] }
 0x4e7   : > { %v12908_v25 = vadd.f32 %v6786_v50, %v6698_v5  ;;  %5052 = vst [vmem:[#allocation4 + $0x13c] sm:$0xf] %v4734_v19  ;;  %v5112_v5 = vpack.c.bf16 %v5080_v34, %v5080_v34  ;;  %v9275_v50 = vld [vmem:[#allocation4 + $0x58] sm:$0xf]  ;;  %v5113_v19 = vpack.c.bf16 %v5081_v63, %v5081_v63  ;;  %v4927_v17 = vpack.c.bf16 %v4895_v12, %v4895_v12 }
 0x4e8   : > { %5053 = vst [vmem:[#allocation4 + $0x160] sm:$0xf] %v4735_v23  ;;  %v9276_v1 = vor.u32 %v10355_v45, %v9275_v50  ;;  %v9283_v23 = vld [vmem:[#allocation4 + $0x60] sm:$0xf]  ;;  %v5115_v34 = vpack.c.bf16 %v5083_v21, %v5083_v21  ;;  %v10365_v45 = vld [vmem:[#allocation4 + $0xc8] sm:$0xf0] }
 0x4e9   : > { %5140 = vst [vmem:[#allocation4 + $0x20] sm:$0xf] %v5108_v61  ;;  %v9284_v57 = vor.u32 %v10356_v55, %v9283_v23  ;;  %v12943_v61 = vadd.f32 %v12781_v39, %v12803_v26  ;;  %v10553_v23 = vld [vmem:[%s14077_s7 + $0x228] sm:$0xff] }
 0x4ea   : > { %5141 = vst [vmem:[#allocation4 + $0x44] sm:$0xf] %v5109_v6  ;;  %v10449_v6 = vld [vmem:[#allocation4 + $0x36c] sm:$0xf]  ;;  %7362 = vmatpush.bf16.msra.mxu2 %v10553_v23 }
 0x4eb   : > { %v6939_v28 = vpop.f32.mrf.mxu1  ;;  %4958 = vst [vmem:[#allocation4 + $0x180] sm:$0xf] %v4926_v24  ;;  %v12937_v38 = vpop.f32.mrf.mxu0  ;;  %v10364_v24 = vld [vmem:[#allocation4 + $0xc0] sm:$0xf0] }
 0x4ec   : > { %v6699_v14 = vpop.f32.mrf.mxu2  ;;  %v12928_v29 = vadd.f32 %v6939_v28, %v12848_v15  ;;  %v5111_v15 = vpack.c.bf16 %v5079_v54, %v5079_v54  ;;  %5142 = vst [vmem:[#allocation4 + $0x68] sm:$0xf] %v5110_v59  ;;  %v12947_v28 = vadd.f32 %v12823_v35, %v12828_v7  ;;  %v5082_v54 = vld [vmem:[#allocation3 + $0x7a] sm:$0xff]  ;;  %v10360_v7 = vld [vmem:[#allocation4 + $0xa4] sm:$0xf] }
 0x4ed   : > { %v6700_v43 = vadd.f32 %v12797_v52, %v6699_v14  ;;  %v6788_v20 = vpop.f32.mrf.mxu3  ;;  %5144 = vst [vmem:[#allocation4 + $0xb0] sm:$0xf] %v5112_v5  ;;  %v5114_v39 = vpack.c.bf16 %v5082_v54, %v5082_v54  ;;  %v9313_v59 = vld [vmem:[#allocation4 + $0xc4] sm:$0xf0] }
 0x4ee   : > { %6978 = vmatmul.bf16.gmra.mxu1 %v9632_v49  ;;  %5143 = vst [vmem:[#allocation4 + $0x8c] sm:$0xf] %v5111_v15  ;;  %v4704_v15 = vld [vmem:[#allocation3 + $0xa9] sm:$0xff]  ;;  %v9316_v58 = vor.u32 %v10360_v7, %v9313_v59 }
 0x4ef   : > { %v12931_v62 = vadd.f32 %v6788_v20, %v6700_v43  ;;  %5145 = vst [vmem:[#allocation4 + $0xd4] sm:$0xf] %v5113_v19  ;;  %v4736_v50 = vpack.c.bf16 %v4704_v15, %v4704_v15  ;;  %v9319_v19 = vld [vmem:[#allocation4 + $0xa8] sm:$0xf] }
 0x4f0   : > { %4959 = vst [vmem:[#allocation4 + $0x1a4] sm:$0xf] %v4927_v17  ;;  %v4705_v17 = vld [vmem:[#allocation3 + $0xb1] sm:$0xff] }
 0x4f1   : > { %5146 = vst [vmem:[#allocation4 + $0xf8] sm:$0xf] %v5114_v39 }
 0x4f2   : > { %7017 = vmatmul.bf16.gmra.mxu2 %v9276_v1  ;;  %7106 = vmatmul.bf16.gmra.mxu3 %v9280_v56  ;;  %5147 = vst [vmem:[#allocation4 + $0x11c] sm:$0xf] %v5115_v34  ;;  %v5085_v34 = vld [vmem:[#allocation3 + $0x9a] sm:$0xff] }
 0x4f3   : > { %v6941_v30 = vpop.f32.mrf.mxu1  ;;  %v12955_v35 = vpop.f32.mrf.mxu0  ;;  %4768 = vst [vmem:[#allocation4 + $0x1c0] sm:$0xf] %v4736_v50  ;;  %v5117_v59 = vpack.c.bf16 %v5085_v34, %v5085_v34  ;;  %v4802_v34 = vld [vmem:[#allocation3 + $0xc2] sm:$0xff] }
 0x4f4   : > { %v6702_v13 = vpop.f32.mrf.mxu2  ;;  %v12934_v44 = vadd.f32 %v6941_v30, %v12881_v3  ;;  %v9665_v3 = vld [vmem:[#allocation4 + $0x38c] sm:$0xf0]  ;;  %v9320_v30 = vor.u32 %v10365_v45, %v9319_v19  ;;  %5054 = vst [vmem:[#allocation4 + $0x184] sm:$0xf] %v4736_v50  ;;  %v9347_v45 = vld [vmem:[#allocation4 + $0xe8] sm:$0xf] }
 0x4f5   : > { %v6703_v42 = vadd.f32 %v12797_v52, %v6702_v13  ;;  %v6791_v8 = vpop.f32.mrf.mxu3  ;;  %v9668_v49 = vor.u32 %v10449_v6, %v9665_v3  ;;  %v4800_v3 = vld [vmem:[#allocation3 + $0xaa] sm:$0xff]  ;;  %5149 = vst [vmem:[#allocation4 + $0x164] sm:$0xf] %v5117_v59  ;;  %v9355_v19 = vld [vmem:[#allocation4 + $0xf0] sm:$0xf] }
 0x4f6   : > { %7195 = vmatmul.bf16.gmra.mxu0 %v9284_v57  ;;  %v12975_v57 = vadd.f32 %v12884_v0, %v12874_v33  ;;  %v10544_v33 = vld [vmem:[%s14077_s7 + $0x1e0] sm:$0xff]  ;;  %v5084_v0 = vld [vmem:[#allocation3 + $0x92] sm:$0xff] }
 0x4f7   : > { %v12939_v37 = vadd.f32 %v6791_v8, %v6703_v42  ;;  %v12968_v42 = vadd.f32 %v12860_v47, %v12862_v16  ;;  %v9701_v8 = vld [vmem:[#allocation4 + $0x3d4] sm:$0xf0]  ;;  %v10458_v47 = vld [vmem:[#allocation4 + $0x3b4] sm:$0xf]  ;;  %v4737_v16 = vpack.c.bf16 %v4705_v17, %v4705_v17 }
 0x4f8   : > { %v9704_v39 = vor.u32 %v10458_v47, %v9701_v8 }
 0x4f9   : > { %4769 = vst [vmem:[#allocation4 + $0x1e4] sm:$0xf] %v4737_v16 }
 0x4fa   : > { %5055 = vst [vmem:[#allocation4 + $0x1a8] sm:$0xf] %v4737_v16 }
 0x4fb   : > { %v6944_v14 = vpop.f32.mrf.mxu1  ;;  %v12977_v12 = vpop.f32.mrf.mxu0 }
 0x4fc   : > { %v6704_v48 = vpop.f32.mrf.mxu2  ;;  %v12950_v22 = vadd.f32 %v6944_v14, %v12888_v31  ;;  %v9311_v31 = vld [vmem:[#allocation4 + $0xa0] sm:$0xf] }
 0x4fd   : > { %v6705_v43 = vadd.f32 %v12797_v52, %v6704_v48  ;;  %v6793_v20 = vpop.f32.mrf.mxu3  ;;  %v9312_v63 = vor.u32 %v10364_v24, %v9311_v31  ;;  %v4801_v14 = vld [vmem:[#allocation3 + $0xb2] sm:$0xff]  ;;  %v5116_v24 = vpack.c.bf16 %v5084_v0, %v5084_v0  ;;  %v10373_v31 = vld [vmem:[#allocation4 + $0x108] sm:$0xf0]  ;;  %v4707_v0 = vld [vmem:[#allocation3 + $0xc9] sm:$0xff] }
 0x4fe   : > { %6983 = vmatmul.bf16.gmra.mxu1 %v9668_v49  ;;  %v9348_v15 = vor.u32 %v10373_v31, %v9347_v45  ;;  %v4803_v45 = vld [vmem:[#allocation3 + $0xca] sm:$0xff] }
 0x4ff   : > { %v12953_v26 = vadd.f32 %v6793_v20, %v6705_v43  ;;  %v4832_v43 = vpack.c.bf16 %v4800_v3, %v4800_v3  ;;  %v4833_v20 = vpack.c.bf16 %v4801_v14, %v4801_v14  ;;  %5148 = vst [vmem:[#allocation4 + $0x140] sm:$0xf] %v5116_v24  ;;  %v4626_v3 = vld [vmem:[#allocation3 + $0x180] sm:$0xff]  ;;  %v4627_v14 = vld [vmem:[#allocation3 + $0x188] sm:$0xff] }
 0x500   : > { %v4658_v16 = vpack.c.bf16 %v4626_v3, %v4626_v3  ;;  %v9383_v3 = vld [vmem:[#allocation4 + $0x130] sm:$0xf] }
 0x501   : > { %4864 = vst [vmem:[#allocation4 + $0x1c4] sm:$0xf] %v4832_v43  ;;  %v4659_v43 = vpack.c.bf16 %v4627_v14, %v4627_v14 }
 0x502   : > { %7022 = vmatmul.bf16.gmra.mxu2 %v9312_v63  ;;  %7111 = vmatmul.bf16.gmra.mxu3 %v9316_v58  ;;  %4865 = vst [vmem:[#allocation4 + $0x1e8] sm:$0xf] %v4833_v20  ;;  %v9349_v63 = vld [vmem:[#allocation4 + $0x10c] sm:$0xf0]  ;;  %v10374_v58 = vld [vmem:[#allocation4 + $0x110] sm:$0xf0] }
 0x503   : > { %v6946_v32 = vpop.f32.mrf.mxu1  ;;  %v9356_v47 = vor.u32 %v10374_v58, %v9355_v19  ;;  %4690 = vst [vmem:[#allocation4 + $0x444] sm:$0xf] %v4658_v16  ;;  %v5086_v19 = vld [vmem:[#allocation3 + $0xaa] sm:$0xff]  ;;  %v4708_v16 = vld [vmem:[#allocation3 + $0xd9] sm:$0xff] }
 0x504   : > { %v6707_v5 = vpop.f32.mrf.mxu2  ;;  %v12958_v1 = vadd.f32 %v6946_v32, %v12915_v60  ;;  %v10545_v60 = vld [vmem:[%s14077_s7 + $0x1e8] sm:$0xff]  ;;  %v4896_v32 = vld [vmem:[#allocation3 + $0xc0] sm:$0xff]  ;;  %4691 = vst [vmem:[#allocation4 + $0x468] sm:$0xf] %v4659_v43 }
 0x505   : > { %v6708_v55 = vadd.f32 %v12797_v52, %v6707_v5  ;;  %v6796_v56 = vpop.f32.mrf.mxu3  ;;  %7273 = vmatpush.bf16.msra.mxu1 %v10545_v60  ;;  %v4706_v5 = vld [vmem:[#allocation3 + $0xc1] sm:$0xff] }
 0x506   : > { %7200 = vmatmul.bf16.gmra.mxu0 %v9320_v30  ;;  %v4928_v30 = vpack.c.bf16 %v4896_v32, %v4896_v32  ;;  %v4738_v23 = vpack.c.bf16 %v4706_v5, %v4706_v5  ;;  %v10541_v32 = vld [vmem:[%s14077_s7 + $0x1c8] sm:$0xff]  ;;  %v13015_v5 = vadd.f32 %v12925_v40, %v12908_v25  ;;  %v10378_v40 = vld [vmem:[#allocation4 + $0x134] sm:$0xf] }
 0x507   : > { %v12961_v13 = vadd.f32 %v6796_v56, %v6708_v55 }
 0x508   : > { %4960 = vst [vmem:[#allocation4 + $0x1c8] sm:$0xf] %v4928_v30 }
 0x509   : > { %7274 = vmatpush.bf16.msra.mxu1 %v10544_v33  ;;  %4770 = vst [vmem:[#allocation4 + $0x208] sm:$0xf] %v4738_v23  ;;  %v4897_v33 = vld [vmem:[#allocation3 + $0xc8] sm:$0xff] }
 0x50a   : > { %5056 = vst [vmem:[#allocation4 + $0x1cc] sm:$0xf] %v4738_v23  ;;  %v10382_v23 = vld [vmem:[#allocation4 + $0x150] sm:$0xf0] }
 0x50b   : > { %v6949_v48 = vpop.f32.mrf.mxu1  ;;  %v9384_v14 = vor.u32 %v10382_v23, %v9383_v3 }
 0x50c   : > { %v6709_v6 = vpop.f32.mrf.mxu2  ;;  %v12980_v49 = vadd.f32 %v6949_v48, %v12923_v53  ;;  %v10369_v53 = vld [vmem:[#allocation4 + $0xec] sm:$0xf] }
 0x50d   : > { %v6710_v54 = vadd.f32 %v12797_v52, %v6709_v6  ;;  %v6798_v21 = vpop.f32.mrf.mxu3  ;;  %v9352_v50 = vor.u32 %v10369_v53, %v9349_v63  ;;  %v10543_v48 = vld [vmem:[%s14077_s7 + $0x1d8] sm:$0xff]  ;;  %v12995_v6 = vpop.f32.mrf.mxu0  ;;  %v4929_v53 = vpack.c.bf16 %v4897_v33, %v4897_v33  ;;  %v4739_v63 = vpack.c.bf16 %v4707_v0, %v4707_v0  ;;  %v9391_v0 = vld [vmem:[#allocation4 + $0x138] sm:$0xf] }
 0x50e   : > { %6988 = vmatmul.bf16.gmra.mxu1 %v9704_v39  ;;  %v10467_v39 = vld [vmem:[#allocation4 + $0x3fc] sm:$0xf]  ;;  %v4740_v33 = vpack.c.bf16 %v4708_v16, %v4708_v16 }
 0x50f   : > { %v12986_v7 = vadd.f32 %v6798_v21, %v6710_v54  ;;  %7275 = vmatpush.bf16.msra.mxu1 %v10543_v48  ;;  %v10542_v54 = vld [vmem:[%s14077_s7 + $0x1d0] sm:$0xff]  ;;  %4961 = vst [vmem:[#allocation4 + $0x1ec] sm:$0xf] %v4929_v53  ;;  %v10383_v48 = vld [vmem:[#allocation4 + $0x158] sm:$0xf0] }
 0x510   : > { %v9737_v21 = vld [vmem:[#allocation4 + $0x41c] sm:$0xf0]  ;;  %4771 = vst [vmem:[#allocation4 + $0x22c] sm:$0xf] %v4739_v63 }
 0x511   : > { %v9740_v31 = vor.u32 %v10467_v39, %v9737_v21  ;;  %5057 = vst [vmem:[#allocation4 + $0x1f0] sm:$0xf] %v4739_v63  ;;  %v10552_v63 = vld [vmem:[%s14077_s7 + $0x220] sm:$0xff] }
 0x512   : > { %7027 = vmatmul.bf16.gmra.mxu2 %v9348_v15  ;;  %7116 = vmatmul.bf16.gmra.mxu3 %v9352_v50  ;;  %v4835_v50 = vpack.c.bf16 %v4803_v45, %v4803_v45  ;;  %4772 = vst [vmem:[#allocation4 + $0x250] sm:$0xf] %v4740_v33  ;;  %v13035_v45 = vadd.f32 %v12937_v38, %v12931_v62 }
 0x513   : > { %v6951_v55 = vpop.f32.mrf.mxu1  ;;  %7276 = vmatpush.bf16.msra.mxu1 %v10542_v54  ;;  %5058 = vst [vmem:[#allocation4 + $0x214] sm:$0xf] %v4740_v33  ;;  %7363 = vmatpush.bf16.msra.mxu2 %v10552_v63  ;;  %v13045_v38 = vadd.f32 %v12955_v35, %v12939_v37  ;;  %v9419_v33 = vld [vmem:[#allocation4 + $0x178] sm:$0xf]  ;;  %v10392_v35 = vld [vmem:[#allocation4 + $0x1a0] sm:$0xf0] }
 0x514   : > { %v6712_v56 = vpop.f32.mrf.mxu2  ;;  %v12989_v60 = vadd.f32 %v6951_v55, %v12943_v61  ;;  %v13001_v61 = vadd.f32 %v12900_v27, %v12896_v41  ;;  %v4834_v41 = vpack.c.bf16 %v4802_v34, %v4802_v34  ;;  %v5087_v55 = vld [vmem:[#allocation3 + $0xb2] sm:$0xff]  ;;  %4867 = vst [vmem:[#allocation4 + $0x230] sm:$0xf] %v4835_v50  ;;  %v4804_v50 = vld [vmem:[#allocation3 + $0xda] sm:$0xff] }
 0x515   : > { %v6713_v8 = vadd.f32 %v12797_v52, %v6712_v56  ;;  %v6801_v17 = vpop.f32.mrf.mxu3  ;;  %v13019_v30 = vpop.f32.mrf.mxu0  ;;  %v5119_v25 = vpack.c.bf16 %v5087_v55, %v5087_v55 }
 0x516   : > { %7205 = vmatmul.bf16.gmra.mxu0 %v9356_v47  ;;  %4866 = vst [vmem:[#allocation4 + $0x20c] sm:$0xf] %v4834_v41  ;;  %v4898_v47 = vld [vmem:[#allocation3 + $0xd8] sm:$0xff] }
 0x517   : > { %v12997_v20 = vadd.f32 %v6801_v17, %v6713_v8  ;;  %7277 = vmatpush.bf16.msra.mxu1 %v10541_v32  ;;  %v10540_v8 = vld [vmem:[%s14077_s7 + $0x1c0] sm:$0xff]  ;;  %v9385_v17 = vld [vmem:[#allocation4 + $0x154] sm:$0xf0]  ;;  %v4930_v39 = vpack.c.bf16 %v4898_v47, %v4898_v47  ;;  %5151 = vst [vmem:[#allocation4 + $0x1ac] sm:$0xf] %v5119_v25 }
 0x518   : > { %v9388_v43 = vor.u32 %v10378_v40, %v9385_v17  ;;  %v4709_v32 = vld [vmem:[#allocation3 + $0xe1] sm:$0xff]  ;;  %v4836_v40 = vpack.c.bf16 %v4804_v50, %v4804_v50 }
 0x519   : > { %4962 = vst [vmem:[#allocation4 + $0x210] sm:$0xf] %v4930_v39  ;;  %v4805_v25 = vld [vmem:[#allocation3 + $0xe2] sm:$0xff]  ;;  %v9421_v39 = vld [vmem:[#allocation4 + $0x19c] sm:$0xf0] }
 0x51a   : > { %v4837_v3 = vpack.c.bf16 %v4805_v25, %v4805_v25  ;;  %4868 = vst [vmem:[#allocation4 + $0x254] sm:$0xf] %v4836_v40  ;;  %v4901_v40 = vld [vmem:[#allocation3 + $0xf8] sm:$0xff] }
 0x51b   : > { %v6954_v24 = vpop.f32.mrf.mxu1  ;;  %7278 = vmatpush.bf16.msra.mxu1 %v10540_v8  ;;  %v4741_v8 = vpack.c.bf16 %v4709_v32, %v4709_v32 }
 0x51c   : > { %v6714_v59 = vpop.f32.mrf.mxu2  ;;  %v13007_v27 = vadd.f32 %v6954_v24, %v12947_v28  ;;  %v5118_v28 = vpack.c.bf16 %v5086_v19, %v5086_v19  ;;  %4869 = vst [vmem:[#allocation4 + $0x278] sm:$0xf] %v4837_v3 }
 0x51d   : > { %v6715_v15 = vadd.f32 %v12797_v52, %v6714_v59  ;;  %v6803_v58 = vpop.f32.mrf.mxu3  ;;  %v13037_v41 = vpop.f32.mrf.mxu0  ;;  %4773 = vst [vmem:[#allocation4 + $0x274] sm:$0xf] %v4741_v8 }
 0x51e   : > { %6993 = vmatmul.bf16.gmra.mxu1 %v9740_v31  ;;  %5150 = vst [vmem:[#allocation4 + $0x188] sm:$0xf] %v5118_v28  ;;  %v9392_v31 = vor.u32 %v10383_v48, %v9391_v0  ;;  %v5089_v48 = vld [vmem:[#allocation3 + $0xca] sm:$0xff] }
 0x51f   : > { %v13017_v56 = vadd.f32 %v6803_v58, %v6715_v15  ;;  %v10476_v15 = vld [vmem:[#allocation4 + $0x444] sm:$0xf]  ;;  %v4899_v58 = vld [vmem:[#allocation3 + $0xe0] sm:$0xff]  ;;  %5059 = vst [vmem:[#allocation4 + $0x238] sm:$0xf] %v4741_v8 }
 0x520   : > { %v4931_v23 = vpack.c.bf16 %v4899_v58, %v4899_v58  ;;  %v4900_v0 = vld [vmem:[#allocation3 + $0xf0] sm:$0xff] }
 0x521   : > { %v9427_v58 = vld [vmem:[#allocation4 + $0x180] sm:$0xf] }
 0x522   : > { %7032 = vmatmul.bf16.gmra.mxu2 %v9384_v14  ;;  %7121 = vmatmul.bf16.gmra.mxu3 %v9388_v43  ;;  %v5088_v14 = vld [vmem:[#allocation3 + $0xc2] sm:$0xff]  ;;  %4963 = vst [vmem:[#allocation4 + $0x234] sm:$0xf] %v4931_v23  ;;  %v9428_v50 = vor.u32 %v10392_v35, %v9427_v58  ;;  %v9249_v8 = vld [vmem:[#allocation4 + $0x3c] sm:$0xf0] }
 0x523   : > { %v6956_v54 = vpop.f32.mrf.mxu1  ;;  %v5120_v43 = vpack.c.bf16 %v5088_v14, %v5088_v14  ;;  %v10343_v14 = vld [vmem:[#allocation4 + $0x1c] sm:$0xf] }
 0x524   : > { %v6717_v21 = vpop.f32.mrf.mxu2  ;;  %v13025_v34 = vadd.f32 %v6956_v54, %v12968_v42  ;;  %v9773_v42 = vld [vmem:[#allocation4 + $0x464] sm:$0xf0]  ;;  %v10391_v54 = vld [vmem:[#allocation4 + $0x198] sm:$0xf0] }
 0x525   : > { %v6718_v24 = vadd.f32 %v12797_v52, %v6717_v21  ;;  %v6806_v59 = vpop.f32.mrf.mxu3  ;;  %v9776_v28 = vor.u32 %v10476_v15, %v9773_v42  ;;  %v10387_v21 = vld [vmem:[#allocation4 + $0x17c] sm:$0xf]  ;;  %v9420_v37 = vor.u32 %v10391_v54, %v9419_v33  ;;  %5152 = vst [vmem:[#allocation4 + $0x1d0] sm:$0xf] %v5120_v43  ;;  %v4932_v42 = vpack.c.bf16 %v4900_v0, %v4900_v0  ;;  %v4807_v43 = vld [vmem:[#allocation3 + $0xfa] sm:$0xff] }
 0x526   : > { %7210 = vmatmul.bf16.gmra.mxu0 %v9392_v31  ;;  %v9424_v31 = vor.u32 %v10387_v21, %v9421_v39  ;;  %v5090_v21 = vld [vmem:[#allocation3 + $0xda] sm:$0xff]  ;;  %v5091_v39 = vld [vmem:[#allocation3 + $0xe2] sm:$0xff]  ;;  %v10400_v0 = vld [vmem:[#allocation4 + $0x1e0] sm:$0xf0] }
 0x527   : > { %v13028_v53 = vadd.f32 %v6806_v59, %v6718_v24  ;;  %v4710_v24 = vld [vmem:[#allocation3 + $0xf1] sm:$0xff]  ;;  %v13049_v59 = vpop.f32.mrf.mxu0  ;;  %4964 = vst [vmem:[#allocation4 + $0x258] sm:$0xf] %v4932_v42 }
 0x528   : > { %v4742_v15 = vpack.c.bf16 %v4710_v24, %v4710_v24  ;;  %v5123_v24 = vpack.c.bf16 %v5091_v39, %v5091_v39  ;;  %v9455_v42 = vld [vmem:[#allocation4 + $0x1c0] sm:$0xf] }
 0x529   : > { %v9456_v58 = vor.u32 %v10400_v0, %v9455_v42  ;;  %v4903_v39 = vld [vmem:[#allocation3 + $0x110] sm:$0xff]  ;;  %v13098_v42 = vadd.f32 %v13037_v41, %v12997_v20  ;;  %v9491_v20 = vld [vmem:[#allocation4 + $0x208] sm:$0xf] }
 0x52a   : > { %4774 = vst [vmem:[#allocation4 + $0x298] sm:$0xf] %v4742_v15 }
 0x52b   : > { %v6959_v19 = vpop.f32.mrf.mxu1  ;;  %5060 = vst [vmem:[#allocation4 + $0x25c] sm:$0xf] %v4742_v15 }
 0x52c   : > { %v6719_v55 = vpop.f32.mrf.mxu2  ;;  %v13040_v17 = vadd.f32 %v6959_v19, %v12975_v57  ;;  %v5121_v57 = vpack.c.bf16 %v5089_v48, %v5089_v48  ;;  %v4933_v48 = vpack.c.bf16 %v4901_v40, %v4901_v40  ;;  %5155 = vst [vmem:[#allocation4 + $0x23c] sm:$0xf] %v5123_v24  ;;  %v10352_v24 = vld [vmem:[#allocation4 + $0x64] sm:$0xf] }
 0x52d   : > { %v6720_v62 = vadd.f32 %v12797_v52, %v6719_v55  ;;  %v6808_v47 = vpop.f32.mrf.mxu3  ;;  %v13056_v55 = vadd.f32 %v12977_v12, %v12953_v26  ;;  %v9252_v26 = vor.u32 %v10343_v14, %v9249_v8  ;;  %v4839_v12 = vpack.c.bf16 %v4807_v43, %v4807_v43  ;;  %v10551_v43 = vld [vmem:[%s14077_s7 + $0x218] sm:$0xff] }
 0x52e   : > { %6998 = vmatmul.bf16.gmra.mxu1 %v9776_v28  ;;  %5153 = vst [vmem:[#allocation4 + $0x1f4] sm:$0xf] %v5121_v57  ;;  %7364 = vmatpush.bf16.msra.mxu2 %v10551_v43 }
 0x52f   : > { %v13047_v16 = vadd.f32 %v6808_v47, %v6720_v62  ;;  %v4806_v62 = vld [vmem:[#allocation3 + $0xf2] sm:$0xff]  ;;  %v13068_v33 = vpop.f32.mrf.mxu0  ;;  %4965 = vst [vmem:[#allocation4 + $0x27c] sm:$0xf] %v4933_v48 }
 0x530   : > { %v4838_v54 = vpack.c.bf16 %v4806_v62, %v4806_v62  ;;  %4871 = vst [vmem:[#allocation4 + $0x2c0] sm:$0xf] %v4839_v12  ;;  %v9463_v62 = vld [vmem:[#allocation4 + $0x1c8] sm:$0xf] }
 0x531   : > { %v9285_v12 = vld [vmem:[#allocation4 + $0x84] sm:$0xf0] }
 0x532   : > { %7037 = vmatmul.bf16.gmra.mxu2 %v9420_v37  ;;  %7126 = vmatmul.bf16.gmra.mxu3 %v9424_v31  ;;  %v5122_v37 = vpack.c.bf16 %v5090_v21, %v5090_v21  ;;  %4870 = vst [vmem:[#allocation4 + $0x29c] sm:$0xf] %v4838_v54  ;;  %v10396_v31 = vld [vmem:[#allocation4 + $0x1c4] sm:$0xf]  ;;  %v13088_v54 = vadd.f32 %v13019_v30, %v12986_v7 }
 0x533   : > { %v6961_v63 = vpop.f32.mrf.mxu1  ;;  %v9288_v30 = vor.u32 %v10352_v24, %v9285_v12  ;;  %v4714_v12 = vld [vmem:[#allocation3 + $0x121] sm:$0xff] }
 0x534   : > { %v13052_v32 = vadd.f32 %v6961_v63, %v13001_v61  ;;  %v4711_v61 = vld [vmem:[#allocation3 + $0xf9] sm:$0xff]  ;;  %5154 = vst [vmem:[#allocation4 + $0x218] sm:$0xf] %v5122_v37  ;;  %v4713_v37 = vld [vmem:[#allocation3 + $0x111] sm:$0xff] }
 0x535   : > { %v6722_v19 = vpop.f32.mrf.mxu2  ;;  %v6811_v23 = vpop.f32.mrf.mxu3  ;;  %v4743_v47 = vpack.c.bf16 %v4711_v61, %v4711_v61  ;;  %v9457_v63 = vld [vmem:[#allocation4 + $0x1e4] sm:$0xf0]  ;;  %v9499_v24 = vld [vmem:[#allocation4 + $0x210] sm:$0xf] }
 0x536   : > { %7215 = vmatmul.bf16.gmra.mxu0 %v9428_v50  ;;  %v6723_v28 = vadd.f32 %v12797_v52, %v6722_v19  ;;  %v13066_v52 = vadd.f32 %v12995_v6, %v12961_v13  ;;  %v10401_v50 = vld [vmem:[#allocation4 + $0x1e8] sm:$0xf0]  ;;  %v4902_v19 = vld [vmem:[#allocation3 + $0x108] sm:$0xff] }
 0x537   : > { %4775 = vst [vmem:[#allocation4 + $0x2bc] sm:$0xf] %v4743_v47  ;;  %v4934_v40 = vpack.c.bf16 %v4902_v19, %v4902_v19  ;;  %v9464_v14 = vor.u32 %v10401_v50, %v9463_v62  ;;  %v13081_v48 = vpop.f32.mrf.mxu0  ;;  %v5092_v50 = vld [vmem:[#allocation3 + $0xf2] sm:$0xff]  ;;  %v5093_v19 = vld [vmem:[#allocation3 + $0xfa] sm:$0xff] }
 0x538   : > { %v13059_v25 = vadd.f32 %v6811_v23, %v6723_v28  ;;  %5061 = vst [vmem:[#allocation4 + $0x280] sm:$0xf] %v4743_v47  ;;  %v4712_v28 = vld [vmem:[#allocation3 + $0x109] sm:$0xff]  ;;  %v9460_v23 = vor.u32 %v10396_v31, %v9457_v63  ;;  %v4809_v31 = vld [vmem:[#allocation3 + $0x112] sm:$0xff]  ;;  %v10405_v62 = vld [vmem:[#allocation4 + $0x20c] sm:$0xf] }
 0x539   : > { %v4744_v61 = vpack.c.bf16 %v4712_v28, %v4712_v28  ;;  %4966 = vst [vmem:[#allocation4 + $0x2a0] sm:$0xf] %v4934_v40  ;;  %v5124_v28 = vpack.c.bf16 %v5092_v50, %v5092_v50  ;;  %v5125_v40 = vpack.c.bf16 %v5093_v19, %v5093_v19  ;;  %v9321_v50 = vld [vmem:[#allocation4 + $0xcc] sm:$0xf0] }
 0x53b   : > { %v6964_v3 = vpop.f32.mrf.mxu1  ;;  %4776 = vst [vmem:[#allocation4 + $0x2e0] sm:$0xf] %v4744_v61 }
 0x53c   : > { %v13062_v57 = vadd.f32 %v6964_v3, %v13015_v5  ;;  %v13073_v5 = vld [vmem:[%s14078_s8] ss:$0 sm:$0xff]  ;;  %5062 = vst [vmem:[#allocation4 + $0x2a4] sm:$0xf] %v4744_v61 }
 0x53d   : > { %v6724_v35 = vpop.f32.mrf.mxu2  ;;  %v6813_v6 = vpop.f32.mrf.mxu3  ;;  %5156 = vst [vmem:[#allocation4 + $0x260] sm:$0xf] %v5124_v28  ;;  %v4905_v28 = vld [vmem:[#allocation3 + $0x128] sm:$0xff] }
 0x53e   : > { %7279 = vmatmul.bf16.vlgmr.msra.gmra.mxu1 %v9252_v26  ;;  %v6725_v13 = vadd.f32 %v13073_v5, %v6724_v35  ;;  %v4808_v35 = vld [vmem:[#allocation3 + $0x10a] sm:$0xff]  ;;  %5157 = vst [vmem:[#allocation4 + $0x284] sm:$0xf] %v5125_v40 }
 0x53f   : > { %v4840_v63 = vpack.c.bf16 %v4808_v35, %v4808_v35 }
 0x540   : > { %v13076_v15 = vadd.f32 %v6813_v6, %v6725_v13  ;;  %v4935_v13 = vpack.c.bf16 %v4903_v39, %v4903_v39  ;;  %v4745_v6 = vpack.c.bf16 %v4713_v37, %v4713_v37 }
 0x541   : > { %4872 = vst [vmem:[#allocation4 + $0x2e4] sm:$0xf] %v4840_v63  ;;  %v13110_v63 = vadd.f32 %v13049_v59, %v13017_v56 }
 0x542   : > { %7042 = vmatmul.bf16.gmra.mxu2 %v9456_v58  ;;  %7131 = vmatmul.bf16.gmra.mxu3 %v9460_v23  ;;  %v4841_v58 = vpack.c.bf16 %v4809_v31, %v4809_v31  ;;  %4967 = vst [vmem:[#allocation4 + $0x2c4] sm:$0xf] %v4935_v13 }
 0x543   : > { %v6966_v8 = vpop.f32.mrf.mxu1  ;;  %4777 = vst [vmem:[#allocation4 + $0x304] sm:$0xf] %v4745_v6 }
 0x544   : > { %v13079_v3 = vadd.f32 %v6966_v8, %v13035_v45  ;;  %v10409_v8 = vld [vmem:[#allocation4 + $0x228] sm:$0xf0]  ;;  %4873 = vst [vmem:[#allocation4 + $0x308] sm:$0xf] %v4841_v58 }
 0x545   : > { %v6727_v47 = vpop.f32.mrf.mxu2  ;;  %v6816_v26 = vpop.f32.mrf.mxu3  ;;  %5063 = vst [vmem:[#allocation4 + $0x2c8] sm:$0xf] %v4745_v6  ;;  %v9492_v43 = vor.u32 %v10409_v8, %v9491_v20 }
 0x546   : > { %7220 = vmatmul.bf16.gmra.mxu0 %v9464_v14  ;;  %v6728_v45 = vadd.f32 %v13073_v5, %v6727_v47  ;;  %v9493_v14 = vld [vmem:[#allocation4 + $0x22c] sm:$0xf0]  ;;  %v13101_v47 = vpop.f32.mrf.mxu0 }
 0x547   : > { %v9496_v39 = vor.u32 %v10405_v62, %v9493_v14  ;;  %v4811_v14 = vld [vmem:[#allocation3 + $0x12a] sm:$0xff] }
 0x548   : > { %v13091_v21 = vadd.f32 %v6816_v26, %v6728_v45  ;;  %v10410_v45 = vld [vmem:[#allocation4 + $0x230] sm:$0xf0] }
 0x549   : > { %v4904_v26 = vld [vmem:[#allocation3 + $0x120] sm:$0xff]  ;;  %v9500_v31 = vor.u32 %v10410_v45, %v9499_v24  ;;  %v4843_v45 = vpack.c.bf16 %v4811_v14, %v4811_v14  ;;  %v9535_v14 = vld [vmem:[#allocation4 + $0x258] sm:$0xf] }
 0x54a   : > { %v4936_v35 = vpack.c.bf16 %v4904_v26, %v4904_v26  ;;  %v5094_v26 = vld [vmem:[#allocation3 + $0x10a] sm:$0xff] }
 0x54b   : > { %v6969_v0 = vpop.f32.mrf.mxu1  ;;  %4875 = vst [vmem:[#allocation4 + $0x350] sm:$0xf] %v4843_v45 }
 0x54c   : > { %v13094_v7 = vadd.f32 %v6969_v0, %v13045_v38  ;;  %v4746_v0 = vpack.c.bf16 %v4714_v12, %v4714_v12  ;;  %4968 = vst [vmem:[#allocation4 + $0x2e8] sm:$0xf] %v4936_v35  ;;  %v5095_v12 = vld [vmem:[#allocation3 + $0x112] sm:$0xff]  ;;  %v10418_v35 = vld [vmem:[#allocation4 + $0x270] sm:$0xf0] }
 0x54d   : > { %v6729_v23 = vpop.f32.mrf.mxu2  ;;  %v6818_v38 = vpop.f32.mrf.mxu3 }
 0x54e   : > { %7284 = vmatmul.bf16.gmra.mxu1 %v9288_v30  ;;  %v6730_v61 = vadd.f32 %v13073_v5, %v6729_v23  ;;  %4778 = vst [vmem:[#allocation4 + $0x328] sm:$0xf] %v4746_v0  ;;  %v4810_v23 = vld [vmem:[#allocation3 + $0x122] sm:$0xff]  ;;  %v13115_v8 = vpop.f32.mrf.mxu0 }
 0x54f   : > { %5064 = vst [vmem:[#allocation4 + $0x2ec] sm:$0xf] %v4746_v0  ;;  %v4842_v20 = vpack.c.bf16 %v4810_v23, %v4810_v23  ;;  %v5127_v0 = vpack.c.bf16 %v5095_v12, %v5095_v12 }
 0x550   : > { %v13103_v41 = vadd.f32 %v6818_v38, %v6730_v61  ;;  %v10361_v61 = vld [vmem:[#allocation4 + $0xac] sm:$0xf]  ;;  %v4937_v38 = vpack.c.bf16 %v4905_v28, %v4905_v28 }
 0x551   : > { %v9324_v59 = vor.u32 %v10361_v61, %v9321_v50  ;;  %4874 = vst [vmem:[#allocation4 + $0x32c] sm:$0xf] %v4842_v20  ;;  %v4906_v50 = vld [vmem:[#allocation3 + $0x138] sm:$0xff] }
 0x552   : > { %7047 = vmatmul.bf16.gmra.mxu2 %v9492_v43  ;;  %7136 = vmatmul.bf16.gmra.mxu3 %v9496_v39  ;;  %v13122_v43 = vadd.f32 %v13068_v33, %v13028_v53  ;;  %4969 = vst [vmem:[#allocation4 + $0x30c] sm:$0xf] %v4937_v38  ;;  %v5126_v39 = vpack.c.bf16 %v5094_v26, %v5094_v26  ;;  %v4716_v28 = vld [vmem:[#allocation3 + $0x139] sm:$0xff] }
 0x553   : > { %v6971_v37 = vpop.f32.mrf.mxu1  ;;  %v4938_v61 = vpack.c.bf16 %v4906_v50, %v4906_v50  ;;  %v4748_v38 = vpack.c.bf16 %v4716_v28, %v4716_v28  ;;  %5159 = vst [vmem:[#allocation4 + $0x2cc] sm:$0xf] %v5127_v0  ;;  %v13140_v26 = vadd.f32 %v13081_v48, %v13047_v16  ;;  %v4812_v0 = vld [vmem:[#allocation3 + $0x13a] sm:$0xff]  ;;  %v13154_v50 = vadd.f32 %v13101_v47, %v13059_v25  ;;  %v10423_v25 = vld [vmem:[#allocation4 + $0x29c] sm:$0xf] }
 0x554   : > { %v13106_v13 = vadd.f32 %v6971_v37, %v13056_v55  ;;  %v4715_v55 = vld [vmem:[#allocation3 + $0x129] sm:$0xff]  ;;  %5158 = vst [vmem:[#allocation4 + $0x2a8] sm:$0xf] %v5126_v39  ;;  %v4844_v16 = vpack.c.bf16 %v4812_v0, %v4812_v0 }
 0x555   : > { %v6732_v6 = vpop.f32.mrf.mxu2  ;;  %v6821_v58 = vpop.f32.mrf.mxu3  ;;  %v4747_v62 = vpack.c.bf16 %v4715_v55, %v4715_v55  ;;  %v6660_v55 = vadd.f32 %v13073_v5, %v12518_v11  ;;  %4970 = vst [vmem:[#allocation4 + $0x330] sm:$0xf] %v4938_v61  ;;  %v9357_v39 = vld [vmem:[#allocation4 + $0x114] sm:$0xf0]  ;;  %v9565_v47 = vld [vmem:[#allocation4 + $0x2bc] sm:$0xf0] }
 0x556   : > { %7225 = vmatmul.bf16.gmra.mxu0 %v9500_v31  ;;  %v6733_v30 = vadd.f32 %v13073_v5, %v6732_v6  ;;  %v10414_v31 = vld [vmem:[#allocation4 + $0x254] sm:$0xf]  ;;  %v9529_v6 = vld [vmem:[#allocation4 + $0x274] sm:$0xf0]  ;;  %4780 = vst [vmem:[#allocation4 + $0x370] sm:$0xf] %v4748_v38 }
 0x557   : > { %4779 = vst [vmem:[#allocation4 + $0x34c] sm:$0xf] %v4747_v62  ;;  %v9532_v23 = vor.u32 %v10414_v31, %v9529_v6  ;;  %v6749_v45 = vadd.f32 %v12514_v10, %v6660_v55  ;;  %v4717_v10 = vld [vmem:[#allocation3 + $0x141] sm:$0xff]  ;;  %v5097_v55 = vld [vmem:[#allocation3 + $0x12a] sm:$0xff] }
 0x558   : > { %v13113_v19 = vadd.f32 %v6821_v58, %v6733_v30  ;;  %v9527_v30 = vld [vmem:[#allocation4 + $0x250] sm:$0xf]  ;;  %5065 = vst [vmem:[#allocation4 + $0x310] sm:$0xf] %v4747_v62  ;;  %v10419_v58 = vld [vmem:[#allocation4 + $0x278] sm:$0xf0]  ;;  %v13132_v62 = vpop.f32.mrf.mxu0 }
 0x559   : > { %v9528_v33 = vor.u32 %v10418_v35, %v9527_v30  ;;  %5066 = vst [vmem:[#allocation4 + $0x334] sm:$0xf] %v4748_v38  ;;  %v4907_v35 = vld [vmem:[#allocation3 + $0x140] sm:$0xff]  ;;  %v4749_v30 = vpack.c.bf16 %v4717_v10, %v4717_v10  ;;  %v10427_v38 = vld [vmem:[#allocation4 + $0x2b8] sm:$0xf0] }
 0x55a   : > { %v10370_v31 = vld [vmem:[#allocation4 + $0xf4] sm:$0xf]  ;;  %v4939_v6 = vpack.c.bf16 %v4907_v35, %v4907_v35  ;;  %4876 = vst [vmem:[#allocation4 + $0x374] sm:$0xf] %v4844_v16  ;;  %v9568_v35 = vor.u32 %v10423_v25, %v9565_v47  ;;  %v5098_v47 = vld [vmem:[#allocation3 + $0x13a] sm:$0xff] }
 0x55b   : > { %v6974_v40 = vpop.f32.mrf.mxu1  ;;  %4781 = vst [vmem:[#allocation4 + $0x394] sm:$0xf] %v4749_v30 }
 0x55c   : > { %v13118_v56 = vadd.f32 %v6974_v40, %v13066_v52  ;;  %4971 = vst [vmem:[#allocation4 + $0x354] sm:$0xf] %v4939_v6 }
 0x55d   : > { %v6734_v37 = vpop.f32.mrf.mxu2  ;;  %v6823_v52 = vpop.f32.mrf.mxu3  ;;  %5067 = vst [vmem:[#allocation4 + $0x358] sm:$0xf] %v4749_v30 }
 0x55e   : > { %7289 = vmatmul.bf16.gmra.mxu1 %v9324_v59  ;;  %v6735_v24 = vadd.f32 %v13073_v5, %v6734_v37  ;;  %v9536_v59 = vor.u32 %v10419_v58, %v9535_v14  ;;  %v10550_v5 = vld [vmem:[%s14077_s7 + $0x210] sm:$0xff]  ;;  %v10563_v58 = vld [vmem:[%s14079_s9 + $0x38] sm:$0xff]  ;;  %v5129_v14 = vpack.c.bf16 %v5097_v55, %v5097_v55 }
 0x55f   : > { %7365 = vmatpush.bf16.msra.mxu2 %v10550_v5  ;;  %7853 = vmatpush.bf16.msra.mxu3 %v10563_v58  ;;  %v4719_v55 = vld [vmem:[#allocation3 + $0x159] sm:$0xff] }
 0x560   : > { %v13125_v53 = vadd.f32 %v6823_v52, %v6735_v24  ;;  %v6838_v24 = vadd.f32 %v12504_v46, %v6749_v45  ;;  %v5096_v46 = vld [vmem:[#allocation3 + $0x122] sm:$0xff]  ;;  %5161 = vst [vmem:[#allocation4 + $0x314] sm:$0xf] %v5129_v14  ;;  %v4751_v14 = vpack.c.bf16 %v4719_v55, %v4719_v55 }
 0x562   : > { %7052 = vmatmul.bf16.gmra.mxu2 %v9528_v33  ;;  %7141 = vmatmul.bf16.gmra.mxu3 %v9532_v23  ;;  %v4813_v33 = vld [vmem:[#allocation3 + $0x142] sm:$0xff]  ;;  %v6927_v23 = vadd.f32 %v12816_v2, %v6838_v24  ;;  %4783 = vst [vmem:[#allocation4 + $0x3dc] sm:$0xf] %v4751_v14 }
 0x563   : > { %v6976_v40 = vpop.f32.mrf.mxu1  ;;  %v4845_v28 = vpack.c.bf16 %v4813_v33, %v4813_v33  ;;  %v13166_v33 = vadd.f32 %v13115_v8, %v13076_v15  ;;  %5069 = vst [vmem:[#allocation4 + $0x3a0] sm:$0xf] %v4751_v14 }
 0x564   : > { %v13130_v20 = vadd.f32 %v6976_v40, %v13088_v54  ;;  %v13157_v40 = vpop.f32.mrf.mxu0 }
 0x565   : > { %v7013_v11 = vpop.f32.mrf.mxu2  ;;  %v7102_v12 = vpop.f32.mrf.mxu3  ;;  %4877 = vst [vmem:[#allocation4 + $0x398] sm:$0xf] %v4845_v28  ;;  %v9393_v28 = vld [vmem:[#allocation4 + $0x15c] sm:$0xf0]  ;;  %v13193_v14 = vadd.f32 %v13157_v40, %v13103_v41 }
 0x566   : > { %7230 = vmatmul.bf16.gmra.mxu0 %v9536_v59  ;;  %v7014_v54 = vadd.f32 %v7013_v11, %v12792_v51  ;;  %v9360_v51 = vor.u32 %v10370_v31, %v9357_v39  ;;  %v9563_v11 = vld [vmem:[#allocation4 + $0x298] sm:$0xf]  ;;  %v4718_v39 = vld [vmem:[#allocation3 + $0x151] sm:$0xff] }
 0x567   : > { %v9564_v2 = vor.u32 %v10427_v38, %v9563_v11  ;;  %v4750_v24 = vpack.c.bf16 %v4718_v39, %v4718_v39  ;;  %v5099_v11 = vld [vmem:[#allocation3 + $0x142] sm:$0xff] }
 0x568   : > { %v13143_v37 = vadd.f32 %v7102_v12, %v7014_v54  ;;  %v10428_v54 = vld [vmem:[#allocation4 + $0x2c0] sm:$0xf0]  ;;  %v5131_v39 = vpack.c.bf16 %v5099_v11, %v5099_v11  ;;  %v4816_v11 = vld [vmem:[#allocation3 + $0x16a] sm:$0xff] }
 0x569   : > { %v4908_v12 = vld [vmem:[#allocation3 + $0x150] sm:$0xff]  ;;  %4782 = vst [vmem:[#allocation4 + $0x3b8] sm:$0xf] %v4750_v24 }
 0x56a   : > { %v4940_v0 = vpack.c.bf16 %v4908_v12, %v4908_v12  ;;  %5068 = vst [vmem:[#allocation4 + $0x37c] sm:$0xf] %v4750_v24  ;;  %v10436_v12 = vld [vmem:[#allocation4 + $0x300] sm:$0xf0]  ;;  %v9599_v24 = vld [vmem:[#allocation4 + $0x2e0] sm:$0xf] }
 0x56b   : > { %v6979_v52 = vpop.f32.mrf.mxu1  ;;  %5163 = vst [vmem:[#allocation4 + $0x35c] sm:$0xf] %v5131_v39 }
 0x56c   : > { %v13147_v48 = vadd.f32 %v6979_v52, %v13098_v42  ;;  %v5128_v42 = vpack.c.bf16 %v5096_v46, %v5096_v46  ;;  %v9571_v52 = vld [vmem:[#allocation4 + $0x2a0] sm:$0xf]  ;;  %4972 = vst [vmem:[#allocation4 + $0x378] sm:$0xf] %v4940_v0  ;;  %v13169_v58 = vpop.f32.mrf.mxu0  ;;  %v9601_v0 = vld [vmem:[#allocation4 + $0x304] sm:$0xf0] }
 0x56d   : > { %v7015_v61 = vpop.f32.mrf.mxu2  ;;  %v7104_v45 = vpop.f32.mrf.mxu3  ;;  %v9572_v6 = vor.u32 %v10428_v54, %v9571_v52  ;;  %v10437_v52 = vld [vmem:[#allocation4 + $0x308] sm:$0xf0] }
 0x56e   : > { %7294 = vmatmul.bf16.gmra.mxu1 %v9360_v51  ;;  %v7016_v59 = vadd.f32 %v7015_v61, %v6927_v23  ;;  %5160 = vst [vmem:[#allocation4 + $0x2f0] sm:$0xf] %v5128_v42  ;;  %v4814_v23 = vld [vmem:[#allocation3 + $0x152] sm:$0xff]  ;;  %v10379_v61 = vld [vmem:[#allocation4 + $0x13c] sm:$0xf] }
 0x56f   : > { %v9396_v8 = vor.u32 %v10379_v61, %v9393_v28 }
 0x570   : > { %v13159_v5 = vadd.f32 %v7104_v45, %v7016_v59  ;;  %v4815_v59 = vld [vmem:[#allocation3 + $0x15a] sm:$0xff]  ;;  %v4846_v45 = vpack.c.bf16 %v4814_v23, %v4814_v23 }
 0x571   : > { %v4847_v25 = vpack.c.bf16 %v4815_v59, %v4815_v59 }
 0x572   : > { %7057 = vmatmul.bf16.gmra.mxu2 %v9564_v2  ;;  %7146 = vmatmul.bf16.gmra.mxu3 %v9568_v35  ;;  %v5130_v2 = vpack.c.bf16 %v5098_v47, %v5098_v47  ;;  %4878 = vst [vmem:[#allocation4 + $0x3bc] sm:$0xf] %v4846_v45  ;;  %v4721_v47 = vld [vmem:[#allocation3 + $0x171] sm:$0xff] }
 0x573   : > { %v6981_v10 = vpop.f32.mrf.mxu1  ;;  %4879 = vst [vmem:[#allocation4 + $0x3e0] sm:$0xf] %v4847_v25  ;;  %v4911_v25 = vld [vmem:[#allocation3 + $0x170] sm:$0xff]  ;;  %v4753_v39 = vpack.c.bf16 %v4721_v47, %v4721_v47 }
 0x574   : > { %v13162_v31 = vadd.f32 %v6981_v10, %v13110_v63  ;;  %v4909_v63 = vld [vmem:[#allocation3 + $0x158] sm:$0xff]  ;;  %v10432_v10 = vld [vmem:[#allocation4 + $0x2e4] sm:$0xf]  ;;  %5162 = vst [vmem:[#allocation4 + $0x338] sm:$0xf] %v5130_v2 }
 0x575   : > { %v7018_v30 = vpop.f32.mrf.mxu2  ;;  %v7107_v51 = vpop.f32.mrf.mxu3  ;;  %v4941_v38 = vpack.c.bf16 %v4909_v63, %v4909_v63  ;;  %4785 = vst [vmem:[#allocation4 + $0x424] sm:$0xf] %v4753_v39 }
 0x576   : > { %7235 = vmatmul.bf16.gmra.mxu0 %v9572_v6  ;;  %v7019_v16 = vadd.f32 %v7018_v30, %v12855_v36  ;;  %v13178_v36 = vadd.f32 %v13132_v62, %v13091_v21  ;;  %v9600_v62 = vor.u32 %v10436_v12, %v9599_v24  ;;  %v4910_v6 = vld [vmem:[#allocation3 + $0x168] sm:$0xff]  ;;  %v4943_v12 = vpack.c.bf16 %v4911_v25, %v4911_v25  ;;  %v5100_v24 = vld [vmem:[#allocation3 + $0x152] sm:$0xff] }
 0x577   : > { %4973 = vst [vmem:[#allocation4 + $0x39c] sm:$0xf] %v4941_v38  ;;  %v4720_v30 = vld [vmem:[#allocation3 + $0x169] sm:$0xff]  ;;  %v4942_v63 = vpack.c.bf16 %v4910_v6, %v4910_v6  ;;  %v5132_v6 = vpack.c.bf16 %v5100_v24, %v5100_v24 }
 0x578   : > { %v13171_v46 = vadd.f32 %v7107_v51, %v7019_v16  ;;  %v13183_v16 = vpop.f32.mrf.mxu0  ;;  %v9604_v51 = vor.u32 %v10432_v10, %v9601_v0  ;;  %v4752_v55 = vpack.c.bf16 %v4720_v30, %v4720_v30  ;;  %v10549_v38 = vld [vmem:[%s14077_s7 + $0x208] sm:$0xff]  ;;  %v13206_v10 = vadd.f32 %v13169_v58, %v13113_v19  ;;  %4975 = vst [vmem:[#allocation4 + $0x3e4] sm:$0xf] %v4943_v12  ;;  %v10445_v30 = vld [vmem:[#allocation4 + $0x348] sm:$0xf0] }
 0x579   : > { %4974 = vst [vmem:[#allocation4 + $0x3c0] sm:$0xf] %v4942_v63  ;;  %7366 = vmatpush.bf16.msra.mxu2 %v10549_v38  ;;  %v9635_v19 = vld [vmem:[#allocation4 + $0x328] sm:$0xf]  ;;  %v4912_v38 = vld [vmem:[#allocation3 + $0x180] sm:$0xff] }
 0x57a   : > { %4784 = vst [vmem:[#allocation4 + $0x400] sm:$0xf] %v4752_v55  ;;  %v4944_v25 = vpack.c.bf16 %v4912_v38, %v4912_v38  ;;  %v4818_v24 = vld [vmem:[#allocation3 + $0x182] sm:$0xff] }
 0x57b   : > { %v6984_v42 = vpop.f32.mrf.mxu1  ;;  %5070 = vst [vmem:[#allocation4 + $0x3c4] sm:$0xf] %v4752_v55  ;;  %v10441_v55 = vld [vmem:[#allocation4 + $0x32c] sm:$0xf] }
 0x57c   : > { %v13174_v15 = vadd.f32 %v6984_v42, %v13122_v43  ;;  %5071 = vst [vmem:[#allocation4 + $0x3e8] sm:$0xf] %v4753_v39  ;;  %v13216_v39 = vadd.f32 %v13183_v16, %v13125_v53 }
 0x57d   : > { %v7020_v54 = vpop.f32.mrf.mxu2  ;;  %v7109_v43 = vpop.f32.mrf.mxu3  ;;  %5164 = vst [vmem:[#allocation4 + $0x380] sm:$0xf] %v5132_v6  ;;  %v10397_v6 = vld [vmem:[#allocation4 + $0x1cc] sm:$0xf] }
 0x57e   : > { %7299 = vmatmul.bf16.gmra.mxu1 %v9396_v8  ;;  %v7021_v35 = vadd.f32 %v7020_v54, %v12871_v4  ;;  %v9607_v4 = vld [vmem:[#allocation4 + $0x2e8] sm:$0xf]  ;;  %v10388_v54 = vld [vmem:[#allocation4 + $0x184] sm:$0xf]  ;;  %4976 = vst [vmem:[#allocation4 + $0x408] sm:$0xf] %v4944_v25 }
 0x57f   : > { %v9608_v42 = vor.u32 %v10437_v52, %v9607_v4  ;;  %v5101_v52 = vld [vmem:[#allocation3 + $0x15a] sm:$0xff] }
 0x580   : > { %v13181_v21 = vadd.f32 %v7109_v43, %v7021_v35  ;;  %v4817_v35 = vld [vmem:[#allocation3 + $0x172] sm:$0xff]  ;;  %v4848_v43 = vpack.c.bf16 %v4816_v11, %v4816_v11  ;;  %v9637_v4 = vld [vmem:[#allocation4 + $0x34c] sm:$0xf0] }
 0x581   : > { %v4849_v0 = vpack.c.bf16 %v4817_v35, %v4817_v35 }
 0x582   : > { %7062 = vmatmul.bf16.gmra.mxu2 %v9600_v62  ;;  %7151 = vmatmul.bf16.gmra.mxu3 %v9604_v51  ;;  %v7191_v62 = vpop.f32.mrf.mxu0  ;;  %4880 = vst [vmem:[#allocation4 + $0x404] sm:$0xf] %v4848_v43  ;;  %v5133_v51 = vpack.c.bf16 %v5101_v52, %v5101_v52 }
 0x583   : > { %v6986_v28 = vpop.f32.mrf.mxu1  ;;  %4881 = vst [vmem:[#allocation4 + $0x428] sm:$0xf] %v4849_v0  ;;  %v4723_v0 = vld [vmem:[#allocation3 + $0x189] sm:$0xff]  ;;  %v13225_v16 = vadd.f32 %v7191_v62, %v13143_v37  ;;  %v9671_v37 = vld [vmem:[#allocation4 + $0x370] sm:$0xf] }
 0x584   : > { %v13186_v23 = vadd.f32 %v6986_v28, %v13140_v26  ;;  %v9429_v26 = vld [vmem:[#allocation4 + $0x1a4] sm:$0xf0]  ;;  %5165 = vst [vmem:[#allocation4 + $0x3a4] sm:$0xf] %v5133_v51  ;;  %v4819_v51 = vld [vmem:[#allocation3 + $0x18a] sm:$0xff] }
 0x585   : > { %v7023_v61 = vpop.f32.mrf.mxu2  ;;  %v7112_v45 = vpop.f32.mrf.mxu3  ;;  %v9432_v40 = vor.u32 %v10388_v54, %v9429_v26 }
 0x586   : > { %7240 = vmatmul.bf16.gmra.mxu0 %v9608_v42  ;;  %v7024_v59 = vadd.f32 %v7023_v61, %v12892_v18  ;;  %v10562_v18 = vld [vmem:[%s14079_s9 + $0x30] sm:$0xff]  ;;  %v9636_v42 = vor.u32 %v10445_v30, %v9635_v19  ;;  %v10446_v61 = vld [vmem:[#allocation4 + $0x350] sm:$0xf0]  ;;  %v4755_v30 = vpack.c.bf16 %v4723_v0, %v4723_v0 }
 0x587   : > { %7854 = vmatpush.bf16.msra.mxu3 %v10562_v18 }
 0x588   : > { %v13196_v8 = vadd.f32 %v7112_v45, %v7024_v59  ;;  %v4722_v59 = vld [vmem:[#allocation3 + $0x181] sm:$0xff]  ;;  %v9640_v45 = vor.u32 %v10441_v55, %v9637_v4  ;;  %v5102_v55 = vld [vmem:[#allocation3 + $0x16a] sm:$0xff]  ;;  %v5103_v4 = vld [vmem:[#allocation3 + $0x172] sm:$0xff]  ;;  %4787 = vst [vmem:[#allocation4 + $0x46c] sm:$0xf] %v4755_v30 }
 0x589   : > { %v4754_v47 = vpack.c.bf16 %v4722_v59, %v4722_v59  ;;  %v5134_v19 = vpack.c.bf16 %v5102_v55, %v5102_v55  ;;  %v5135_v38 = vpack.c.bf16 %v5103_v4, %v5103_v4  ;;  %5073 = vst [vmem:[#allocation4 + $0x430] sm:$0xf] %v4755_v30 }
 0x58a   : > { %v7193_v54 = vpop.f32.mrf.mxu0 }
 0x58b   : > { %v6989_v2 = vpop.f32.mrf.mxu1  ;;  %4786 = vst [vmem:[#allocation4 + $0x448] sm:$0xf] %v4754_v47  ;;  %v13237_v0 = vadd.f32 %v7193_v54, %v13159_v5  ;;  %v5105_v54 = vld [vmem:[#allocation3 + $0x18a] sm:$0xff] }
 0x58c   : > { %v13199_v41 = vadd.f32 %v6989_v2, %v13154_v50  ;;  %5072 = vst [vmem:[#allocation4 + $0x40c] sm:$0xf] %v4754_v47  ;;  %v5137_v4 = vpack.c.bf16 %v5105_v54, %v5105_v54  ;;  %v9743_v54 = vld [vmem:[#allocation4 + $0x400] sm:$0xf] }
 0x58d   : > { %v7025_v50 = vpop.f32.mrf.mxu2  ;;  %v7114_v63 = vpop.f32.mrf.mxu3  ;;  %5166 = vst [vmem:[#allocation4 + $0x3c8] sm:$0xf] %v5134_v19 }
 0x58e   : > { %7304 = vmatmul.bf16.gmra.mxu1 %v9432_v40  ;;  %v7026_v28 = vadd.f32 %v7025_v50, %v12904_v9  ;;  %v9643_v9 = vld [vmem:[#allocation4 + $0x330] sm:$0xf]  ;;  %5167 = vst [vmem:[#allocation4 + $0x3ec] sm:$0xf] %v5135_v38  ;;  %v10459_v38 = vld [vmem:[#allocation4 + $0x3bc] sm:$0xf] }
 0x58f   : > { %v9644_v2 = vor.u32 %v10446_v61, %v9643_v9  ;;  %v9465_v40 = vld [vmem:[#allocation4 + $0x1ec] sm:$0xf0]  ;;  %v10454_v61 = vld [vmem:[#allocation4 + $0x390] sm:$0xf0]  ;;  %v10455_v9 = vld [vmem:[#allocation4 + $0x398] sm:$0xf0] }
 0x590   : > { %v13209_v58 = vadd.f32 %v7114_v63, %v7026_v28  ;;  %v4850_v28 = vpack.c.bf16 %v4818_v24, %v4818_v24  ;;  %v9468_v53 = vor.u32 %v10397_v6, %v9465_v40  ;;  %v9672_v47 = vor.u32 %v10454_v61, %v9671_v37  ;;  %v9501_v6 = vld [vmem:[#allocation4 + $0x234] sm:$0xf0]  ;;  %5169 = vst [vmem:[#allocation4 + $0x434] sm:$0xf] %v5137_v4  ;;  %v9715_v37 = vld [vmem:[#allocation4 + $0x3c0] sm:$0xf] }
 0x592   : > { %7067 = vmatmul.bf16.gmra.mxu2 %v9636_v42  ;;  %7156 = vmatmul.bf16.gmra.mxu3 %v9640_v45  ;;  %4882 = vst [vmem:[#allocation4 + $0x44c] sm:$0xf] %v4850_v28  ;;  %v7196_v25 = vpop.f32.mrf.mxu0 }
 0x593   : > { %v6991_v26 = vpop.f32.mrf.mxu1  ;;  %v13249_v5 = vadd.f32 %v7196_v25, %v13171_v46 }
 0x594   : > { %v13212_v11 = vadd.f32 %v6991_v26, %v13166_v33  ;;  %v4913_v33 = vld [vmem:[#allocation3 + $0x188] sm:$0xff] }
 0x595   : > { %v7028_v12 = vpop.f32.mrf.mxu2  ;;  %v7117_v43 = vpop.f32.mrf.mxu3  ;;  %v4945_v50 = vpack.c.bf16 %v4913_v33, %v4913_v33  ;;  %v9673_v26 = vld [vmem:[#allocation4 + $0x394] sm:$0xf0]  ;;  %v10548_v33 = vld [vmem:[%s14077_s7 + $0x200] sm:$0xff] }
 0x596   : > { %7245 = vmatmul.bf16.gmra.mxu0 %v9644_v2  ;;  %v7029_v35 = vadd.f32 %v7028_v12, %v12928_v29  ;;  %v4851_v29 = vpack.c.bf16 %v4819_v51, %v4819_v51  ;;  %7367 = vmatpush.bf16.msra.mxu2 %v10548_v33  ;;  %v10406_v51 = vld [vmem:[#allocation4 + $0x214] sm:$0xf] }
 0x597   : > { %4977 = vst [vmem:[#allocation4 + $0x42c] sm:$0xf] %v4945_v50 }
 0x598   : > { %v13219_v18 = vadd.f32 %v7117_v43, %v7029_v35  ;;  %4883 = vst [vmem:[#allocation4 + $0x470] sm:$0xf] %v4851_v29  ;;  %v9679_v35 = vld [vmem:[#allocation4 + $0x378] sm:$0xf] }
 0x599   : > { %v10561_v29 = vld [vmem:[%s14079_s9 + $0x28] sm:$0xff] }
 0x59a   : > { %7855 = vmatpush.bf16.msra.mxu3 %v10561_v29  ;;  %v10468_v29 = vld [vmem:[#allocation4 + $0x404] sm:$0xf] }
 0x59b   : > { %v6994_v52 = vpop.f32.mrf.mxu1 }
 0x59c   : > { %v13222_v63 = vadd.f32 %v6994_v52, %v13178_v36  ;;  %v10450_v36 = vld [vmem:[#allocation4 + $0x374] sm:$0xf] }
 0x59d   : > { %v7030_v42 = vpop.f32.mrf.mxu2  ;;  %v7119_v45 = vpop.f32.mrf.mxu3  ;;  %v9676_v2 = vor.u32 %v10450_v36, %v9673_v26  ;;  %v10464_v36 = vld [vmem:[#allocation4 + $0x3e0] sm:$0xf0] }
 0x59e   : > { %7309 = vmatmul.bf16.gmra.mxu1 %v9468_v53  ;;  %v7031_v59 = vadd.f32 %v7030_v42, %v12934_v44  ;;  %v9680_v44 = vor.u32 %v10455_v9, %v9679_v35  ;;  %v9504_v53 = vor.u32 %v10406_v51, %v9501_v6  ;;  %v10463_v42 = vld [vmem:[#allocation4 + $0x3d8] sm:$0xf0]  ;;  %v10473_v4 = vld [vmem:[#allocation4 + $0x428] sm:$0xf0] }
 0x5a0   : > { %v13228_v62 = vadd.f32 %v7119_v45, %v7031_v59  ;;  %v9709_v59 = vld [vmem:[#allocation4 + $0x3dc] sm:$0xf0]  ;;  %v9707_v45 = vld [vmem:[#allocation4 + $0x3b8] sm:$0xf] }
 0x5a1   : > { %v9708_v46 = vor.u32 %v10463_v42, %v9707_v45  ;;  %v9712_v26 = vor.u32 %v10459_v38, %v9709_v59  ;;  %v9751_v42 = vld [vmem:[#allocation4 + $0x408] sm:$0xf] }
 0x5a2   : > { %7072 = vmatmul.bf16.gmra.mxu2 %v9672_v47  ;;  %7161 = vmatmul.bf16.gmra.mxu3 %v9676_v2  ;;  %v9716_v2 = vor.u32 %v10464_v36, %v9715_v37  ;;  %v9752_v59 = vor.u32 %v10473_v4, %v9751_v42 }
 0x5a3   : > { %v6996_v12 = vpop.f32.mrf.mxu1 }
 0x5a4   : > { %v13231_v43 = vadd.f32 %v6996_v12, %v13193_v14  ;;  %v7198_v14 = vpop.f32.mrf.mxu0 }
 0x5a5   : > { %v7033_v40 = vpop.f32.mrf.mxu2  ;;  %v7122_v52 = vpop.f32.mrf.mxu3 }
 0x5a6   : > { %7250 = vmatmul.bf16.gmra.mxu0 %v9680_v44  ;;  %v7034_v24 = vadd.f32 %v7033_v40, %v12950_v22  ;;  %v5104_v22 = vld [vmem:[#allocation3 + $0x182] sm:$0xff]  ;;  %v9537_v40 = vld [vmem:[#allocation4 + $0x27c] sm:$0xf0] }
 0x5a7   : > { %v5136_v55 = vpack.c.bf16 %v5104_v22, %v5104_v22  ;;  %v9745_v22 = vld [vmem:[#allocation4 + $0x424] sm:$0xf0] }
 0x5a8   : > { %v13240_v50 = vadd.f32 %v7122_v52, %v7034_v24  ;;  %v10415_v52 = vld [vmem:[#allocation4 + $0x25c] sm:$0xf] }
 0x5a9   : > { %5168 = vst [vmem:[#allocation4 + $0x410] sm:$0xf] %v5136_v55 }
 0x5ab   : > { %v6999_v30 = vpop.f32.mrf.mxu1 }
 0x5ac   : > { %v13243_v28 = vadd.f32 %v6999_v30, %v13206_v10  ;;  %v7201_v9 = vpop.f32.mrf.mxu0 }
 0x5ad   : > { %v7035_v19 = vpop.f32.mrf.mxu2  ;;  %v13254_v61 = vpop.f32.mrf.mxu3  ;;  %v7202_v30 = vadd.f32 %v7201_v9, %v13196_v8  ;;  %v10424_v9 = vld [vmem:[#allocation4 + $0x2a4] sm:$0xf] }
 0x5ae   : > { %7314 = vmatmul.bf16.gmra.mxu1 %v9504_v53  ;;  %v13252_v10 = vadd.f32 %v7035_v19, %v12958_v1  ;;  %v7199_v1 = vadd.f32 %v7198_v14, %v13181_v21  ;;  %v10472_v21 = vld [vmem:[#allocation4 + $0x420] sm:$0xf0]  ;;  %v9748_v19 = vor.u32 %v10468_v29, %v9745_v22 }
 0x5af   : > { %v9744_v55 = vor.u32 %v10472_v21, %v9743_v54 }
 0x5b2   : > { %7077 = vmatmul.bf16.gmra.mxu2 %v9708_v46  ;;  %7166 = vmatmul.bf16.gmra.mxu3 %v9712_v26  ;;  %v9573_v26 = vld [vmem:[#allocation4 + $0x2c4] sm:$0xf0] }
 0x5b3   : > { %v7001_v25 = vpop.f32.mrf.mxu1 }
 0x5b4   : > { %v13257_v47 = vadd.f32 %v7001_v25, %v13216_v39  ;;  %v9540_v39 = vor.u32 %v10415_v52, %v9537_v40  ;;  %v7203_v51 = vpop.f32.mrf.mxu0  ;;  %v9781_v52 = vld [vmem:[#allocation4 + $0x46c] sm:$0xf0] }
 0x5b5   : > { %v7038_v12 = vpop.f32.mrf.mxu2  ;;  %v7127_v44 = vpop.f32.mrf.mxu3  ;;  %v7204_v38 = vadd.f32 %v7203_v51, %v13209_v58  ;;  %v10560_v58 = vld [vmem:[%s14079_s9 + $0x20] sm:$0xff]  ;;  %v9779_v51 = vld [vmem:[#allocation4 + $0x448] sm:$0xf] }
 0x5b6   : > { %7255 = vmatmul.bf16.gmra.mxu0 %v9716_v2  ;;  %v7039_v35 = vadd.f32 %v7038_v12, %v12980_v49  ;;  %7856 = vmatpush.bf16.msra.mxu3 %v10560_v58 }
 0x5b8   : > { %v13261_v33 = vadd.f32 %v7127_v44, %v7039_v35  ;;  %v10481_v35 = vld [vmem:[#allocation4 + $0x468] sm:$0xf0] }
 0x5b9   : > { %v10477_v44 = vld [vmem:[#allocation4 + $0x44c] sm:$0xf] }
 0x5ba   : > { %v9784_v29 = vor.u32 %v10477_v44, %v9781_v52 }
 0x5bb   : > { %v7280_v24 = vpop.f32.mrf.mxu1 }
 0x5bc   : > { %v13264_v6 = vadd.f32 %v7280_v24, %v13225_v16  ;;  %v7206_v36 = vpop.f32.mrf.mxu0 }
 0x5bd   : > { %v7040_v53 = vpop.f32.mrf.mxu2  ;;  %v13270_v49 = vpop.f32.mrf.mxu3  ;;  %v7207_v12 = vadd.f32 %v7206_v36, %v13219_v18 }
 0x5be   : > { %7319 = vmatmul.bf16.gmra.mxu1 %v9540_v39  ;;  %v13268_v14 = vadd.f32 %v7040_v53, %v12989_v60  ;;  %v10482_v39 = vld [vmem:[#allocation4 + $0x470] sm:$0xf0]  ;;  %v9780_v53 = vor.u32 %v10481_v35, %v9779_v51  ;;  %v9645_v35 = vld [vmem:[#allocation4 + $0x354] sm:$0xf0]  ;;  %v10559_v51 = vld [vmem:[%s14079_s9 + $0x18] sm:$0xff] }
 0x5bf   : > { %7857 = vmatpush.bf16.msra.mxu3 %v10559_v51  ;;  %v10375_v51 = vld [vmem:[#allocation4 + $0x118] sm:$0xf0] }
 0x5c2   : > { %7082 = vmatmul.bf16.gmra.mxu2 %v9744_v55  ;;  %7171 = vmatmul.bf16.gmra.mxu3 %v9748_v19 }
 0x5c3   : > { %v7282_v16 = vpop.f32.mrf.mxu1 }
 0x5c4   : > { %v13273_v8 = vadd.f32 %v7282_v16, %v13237_v0  ;;  %v9576_v0 = vor.u32 %v10424_v9, %v9573_v26  ;;  %v7208_v21 = vpop.f32.mrf.mxu0  ;;  %v9609_v16 = vld [vmem:[#allocation4 + $0x30c] sm:$0xf0]  ;;  %v10348_v26 = vld [vmem:[#allocation4 + $0x40] sm:$0xf0] }
 0x5c5   : > { %v7043_v60 = vpop.f32.mrf.mxu2  ;;  %v7132_v46 = vpop.f32.mrf.mxu3  ;;  %v7209_v55 = vadd.f32 %v7208_v21, %v13228_v62  ;;  %v10357_v21 = vld [vmem:[#allocation4 + $0x88] sm:$0xf0] }
 0x5c6   : > { %7260 = vmatmul.bf16.gmra.mxu0 %v9752_v59  ;;  %v7044_v45 = vadd.f32 %v7043_v60, %v13007_v27  ;;  %v10433_v60 = vld [vmem:[#allocation4 + $0x2ec] sm:$0xf] }
 0x5c8   : > { %v13277_v25 = vadd.f32 %v7132_v46, %v7044_v45  ;;  %v9612_v46 = vor.u32 %v10433_v60, %v9609_v16  ;;  %v9681_v16 = vld [vmem:[#allocation4 + $0x39c] sm:$0xf0]  ;;  %v10451_v60 = vld [vmem:[#allocation4 + $0x37c] sm:$0xf] }
 0x5cb   : > { %v7285_v37 = vpop.f32.mrf.mxu1 }
 0x5cc   : > { %v13280_v2 = vadd.f32 %v7285_v37, %v13249_v5  ;;  %v9787_v5 = vld [vmem:[#allocation4 + $0x450] sm:$0xf] }
 0x5cd   : > { %v7045_v27 = vpop.f32.mrf.mxu2  ;;  %v13289_v24 = vpop.f32.mrf.mxu3  ;;  %v9788_v54 = vor.u32 %v10482_v39, %v9787_v5  ;;  %v10442_v5 = vld [vmem:[#allocation4 + $0x334] sm:$0xf] }
 0x5ce   : > { %7324 = vmatmul.bf16.gmra.mxu1 %v9576_v0  ;;  %v13287_v40 = vadd.f32 %v7045_v27, %v13025_v34 }
 0x5d2   : > { %7087 = vmatmul.bf16.gmra.mxu2 %v9780_v53  ;;  %7176 = vmatmul.bf16.gmra.mxu3 %v9784_v29  ;;  %v9291_v53 = vld [vmem:[#allocation4 + $0x68] sm:$0xf] }
 0x5d3   : > { %v7287_v22 = vpop.f32.mrf.mxu1 }
 0x5d4   : > { %v13291_v18 = vadd.f32 %v7287_v22, %v7199_v1  ;;  %v9255_v1 = vld [vmem:[#allocation4 + $0x20] sm:$0xf]  ;;  %v9292_v22 = vor.u32 %v10357_v21, %v9291_v53 }
 0x5d5   : > { %v7048_v4 = vpop.f32.mrf.mxu2  ;;  %v7137_v19 = vpop.f32.mrf.mxu3  ;;  %v9256_v9 = vor.u32 %v10348_v26, %v9255_v1  ;;  %v10366_v1 = vld [vmem:[#allocation4 + $0xd0] sm:$0xf0] }
 0x5d6   : > { %7265 = vmatmul.bf16.gmra.mxu0 %v9788_v54  ;;  %v7049_v34 = vadd.f32 %v7048_v4, %v13040_v17 }
 0x5d8   : > { %v13295_v42 = vadd.f32 %v7137_v19, %v7049_v34 }
 0x5db   : > { %v7290_v59 = vpop.f32.mrf.mxu1 }
 0x5dc   : > { %v13297_v45 = vadd.f32 %v7290_v59, %v7202_v30 }
 0x5dd   : > { %v7050_v36 = vpop.f32.mrf.mxu2  ;;  %v13302_v37 = vpop.f32.mrf.mxu3 }
 0x5de   : > { %7329 = vmatmul.bf16.gmra.mxu1 %v9612_v46  ;;  %v13300_v62 = vadd.f32 %v7050_v36, %v13052_v32  ;;  %v9648_v32 = vor.u32 %v10442_v5, %v9645_v35  ;;  %v9684_v46 = vor.u32 %v10451_v60, %v9681_v16  ;;  %v10460_v35 = vld [vmem:[#allocation4 + $0x3c4] sm:$0xf] }
 0x5df   : > { %v10558_v5 = vld [vmem:[%s14079_s9 + $0x10] sm:$0xff] }
 0x5e0   : > { %7858 = vmatpush.bf16.msra.mxu3 %v10558_v5  ;;  %v9435_v5 = vld [vmem:[#allocation4 + $0x188] sm:$0xf] }
 0x5e2   : > { %7368 = vmatmul.bf16.vlgmr.msra.gmra.mxu2 %v9256_v9 }
 0x5e3   : > { %v7292_v17 = vpop.f32.mrf.mxu1 }
 0x5e4   : > { %v13304_v0 = vadd.f32 %v7292_v17, %v7204_v38 }
 0x5e5   : > { %v7053_v58 = vpop.f32.mrf.mxu2  ;;  %v7142_v30 = vpop.f32.mrf.mxu3 }
 0x5e6   : > { %v7054_v27 = vadd.f32 %v7053_v58, %v13062_v57 }
 0x5e8   : > { %v13307_v44 = vadd.f32 %v7142_v30, %v7054_v27  ;;  %v9717_v27 = vld [vmem:[#allocation4 + $0x3e4] sm:$0xf0] }
 0x5eb   : > { %v7295_v52 = vpop.f32.mrf.mxu1 }
 0x5ec   : > { %v13309_v39 = vadd.f32 %v7295_v52, %v7207_v12  ;;  %v9720_v52 = vor.u32 %v10460_v35, %v9717_v27 }
 0x5ed   : > { %v7055_v38 = vpop.f32.mrf.mxu2  ;;  %v13317_v29 = vpop.f32.mrf.mxu3 }
 0x5ee   : > { %7334 = vmatmul.bf16.gmra.mxu1 %v9648_v32  ;;  %v13315_v57 = vadd.f32 %v7055_v38, %v13079_v3  ;;  %v9327_v3 = vld [vmem:[#allocation4 + $0xb0] sm:$0xf]  ;;  %v9363_v32 = vld [vmem:[#allocation4 + $0xf8] sm:$0xf] }
 0x5f2   : > { %7373 = vmatmul.bf16.gmra.mxu2 %v9292_v22 }
 0x5f3   : > { %v7297_v54 = vpop.f32.mrf.mxu1 }
 0x5f4   : > { %v13319_v12 = vadd.f32 %v7297_v54, %v7209_v55  ;;  %v9328_v55 = vor.u32 %v10366_v1, %v9327_v3 }
 0x5f5   : > { %v7058_v4 = vpop.f32.mrf.mxu2  ;;  %v7147_v19 = vpop.f32.mrf.mxu3 }
 0x5f6   : > { %v7059_v34 = vadd.f32 %v7058_v4, %v13094_v7  ;;  %v9753_v4 = vld [vmem:[#allocation4 + $0x42c] sm:$0xf0] }
 0x5f8   : > { %v13322_v59 = vadd.f32 %v7147_v19, %v7059_v34  ;;  %v10469_v19 = vld [vmem:[#allocation4 + $0x40c] sm:$0xf] }
 0x5f9   : > { %v9756_v16 = vor.u32 %v10469_v19, %v9753_v4  ;;  %v9471_v19 = vld [vmem:[#allocation4 + $0x1d0] sm:$0xf] }
 0x5fd   : > { %v7060_v36 = vpop.f32.mrf.mxu2  ;;  %v13327_v9 = vpop.f32.mrf.mxu3 }
 0x5fe   : > { %7339 = vmatmul.bf16.gmra.mxu1 %v9684_v46  ;;  %v13325_v26 = vadd.f32 %v7060_v36, %v13106_v13  ;;  %v9399_v46 = vld [vmem:[#allocation4 + $0x140] sm:$0xf]  ;;  %v10384_v36 = vld [vmem:[#allocation4 + $0x160] sm:$0xf0] }
 0x5ff   : > { %v9400_v1 = vor.u32 %v10384_v36, %v9399_v46 }
 0x602   : > { %7378 = vmatmul.bf16.gmra.mxu2 %v9328_v55 }
 0x605   : > { %v7063_v17 = vpop.f32.mrf.mxu2  ;;  %v7152_v58 = vpop.f32.mrf.mxu3 }
 0x606   : > { %v7064_v7 = vadd.f32 %v7063_v17, %v13118_v56  ;;  %v9364_v56 = vor.u32 %v10375_v51, %v9363_v32  ;;  %v10478_v17 = vld [vmem:[#allocation4 + $0x454] sm:$0xf] }
 0x608   : > { %v13330_v30 = vadd.f32 %v7152_v58, %v7064_v7 }
 0x60d   : > { %v7065_v13 = vpop.f32.mrf.mxu2  ;;  %v13338_v53 = vpop.f32.mrf.mxu3 }
 0x60e   : > { %7344 = vmatmul.bf16.gmra.mxu1 %v9720_v52  ;;  %v13336_v38 = vadd.f32 %v7065_v13, %v13130_v20  ;;  %v10557_v52 = vld [vmem:[%s14079_s9 + $0x8] sm:$0xff]  ;;  %v10393_v13 = vld [vmem:[#allocation4 + $0x1a8] sm:$0xf0] }
 0x60f   : > { %7859 = vmatpush.bf16.msra.mxu3 %v10557_v52 }
 0x612   : > { %7383 = vmatmul.bf16.gmra.mxu2 %v9364_v56  ;;  %v9436_v56 = vor.u32 %v10393_v13, %v9435_v5 }
 0x615   : > { %v7068_v21 = vpop.f32.mrf.mxu2  ;;  %v7157_v54 = vpop.f32.mrf.mxu3 }
 0x616   : > { %v7069_v22 = vadd.f32 %v7068_v21, %v13147_v48  ;;  %v9789_v48 = vld [vmem:[#allocation4 + $0x474] sm:$0xf0] }
 0x617   : > { %v9792_v35 = vor.u32 %v10478_v17, %v9789_v48  ;;  %v9507_v48 = vld [vmem:[#allocation4 + $0x218] sm:$0xf] }
 0x618   : > { %v13341_v34 = vadd.f32 %v7157_v54, %v7069_v22 }
 0x61d   : > { %v7070_v60 = vpop.f32.mrf.mxu2  ;;  %v13346_v3 = vpop.f32.mrf.mxu3 }
 0x61e   : > { %7349 = vmatmul.bf16.gmra.mxu1 %v9756_v16  ;;  %v13344_v20 = vadd.f32 %v7070_v60, %v13162_v31  ;;  %v10402_v16 = vld [vmem:[#allocation4 + $0x1f0] sm:$0xf0] }
 0x622   : > { %7388 = vmatmul.bf16.gmra.mxu2 %v9400_v1 }
 0x625   : > { %v7073_v55 = vpop.f32.mrf.mxu2  ;;  %v7162_v58 = vpop.f32.mrf.mxu3 }
 0x626   : > { %v7074_v7 = vadd.f32 %v7073_v55, %v13174_v15 }
 0x628   : > { %v13349_v27 = vadd.f32 %v7162_v58, %v7074_v7  ;;  %v10411_v7 = vld [vmem:[#allocation4 + $0x238] sm:$0xf0] }
 0x62d   : > { %v7075_v31 = vpop.f32.mrf.mxu2  ;;  %v13357_v51 = vpop.f32.mrf.mxu3 }
 0x62e   : > { %7354 = vmatmul.bf16.gmra.mxu1 %v9792_v35  ;;  %v13355_v32 = vadd.f32 %v7075_v31, %v13186_v23  ;;  %v9472_v23 = vor.u32 %v10402_v16, %v9471_v19 }
 0x632   : > { %7393 = vmatmul.bf16.gmra.mxu2 %v9436_v56  ;;  %v9543_v56 = vld [vmem:[#allocation4 + $0x260] sm:$0xf] }
 0x635   : > { %v7078_v15 = vpop.f32.mrf.mxu2  ;;  %v7167_v22 = vpop.f32.mrf.mxu3 }
 0x636   : > { %v7079_v21 = vadd.f32 %v7078_v15, %v13199_v41  ;;  %v10420_v15 = vld [vmem:[#allocation4 + $0x280] sm:$0xf0] }
 0x638   : > { %v13360_v54 = vadd.f32 %v7167_v22, %v7079_v21  ;;  %v9544_v22 = vor.u32 %v10420_v15, %v9543_v56 }
 0x63d   : > { %v7080_v4 = vpop.f32.mrf.mxu2  ;;  %v13365_v46 = vpop.f32.mrf.mxu3 }
 0x63e   : > { %v13363_v60 = vadd.f32 %v7080_v4, %v13212_v11  ;;  %v9508_v11 = vor.u32 %v10411_v7, %v9507_v48 }
 0x642   : > { %7398 = vmatmul.bf16.gmra.mxu2 %v9472_v23 }
 0x645   : > { %v7083_v36 = vpop.f32.mrf.mxu2  ;;  %v7172_v55 = vpop.f32.mrf.mxu3 }
 0x646   : > { %v7084_v1 = vadd.f32 %v7083_v36, %v13222_v63 }
 0x648   : > { %v13368_v17 = vadd.f32 %v7172_v55, %v7084_v1  ;;  %v9579_v1 = vld [vmem:[#allocation4 + $0x2a8] sm:$0xf]  ;;  %v10429_v55 = vld [vmem:[#allocation4 + $0x2c8] sm:$0xf0] }
 0x64a   : > { %14198 = vst [vmem:[#allocation43_spill] sm:$0xff] %v13368_v17 }
 0x64d   : > { %v7085_v41 = vpop.f32.mrf.mxu2  ;;  %v13373_v35 = vpop.f32.mrf.mxu3 }
 0x64e   : > { %v13371_v58 = vadd.f32 %v7085_v41, %v13231_v43  ;;  %14200 = vst [vmem:[#allocation62_spill] sm:$0xff] %v13373_v35  ;;  %v10556_v43 = vld [vmem:[%s14079_s9] sm:$0xff] }
 0x64f   : > { %7860 = vmatpush.bf16.msra.mxu3 %v10556_v43 }
 0x650   : > { %14199 = vst [vmem:[#allocation44_spill] sm:$0xff] %v13371_v58 }
 0x652   : > { %7403 = vmatmul.bf16.gmra.mxu2 %v9508_v11  ;;  %v9580_v11 = vor.u32 %v10429_v55, %v9579_v1  ;;  %v9615_v55 = vld [vmem:[#allocation4 + $0x2f0] sm:$0xf] }
 0x655   : > { %v7088_v52 = vpop.f32.mrf.mxu2  ;;  %v7177_v5 = vpop.f32.mrf.mxu3 }
 0x656   : > { %v7089_v31 = vadd.f32 %v7088_v52, %v13243_v28  ;;  %v13386_v52 = vpop.f32.mrf.mxu0 }
 0x658   : > { %v13376_v13 = vadd.f32 %v7177_v5, %v7089_v31  ;;  %v13388_v5 = vpop.f32.mrf.mxu1 }
 0x65a   : > { %14201 = vst [vmem:[#allocation63_spill] sm:$0xff] %v13376_v13 }
 0x65d   : > { %v7090_v63 = vpop.f32.mrf.mxu2 }
 0x65e   : > { %v13379_v21 = vadd.f32 %v7090_v63, %v13257_v47 }
 0x660   : > { %14202 = vst [vmem:[#allocation45_spill] sm:$0xff] %v13379_v21 }
 0x662   : > { %7408 = vmatmul.bf16.gmra.mxu2 %v9544_v22 }
 0x665   : > { %v7369_v4 = vpop.f32.mrf.mxu2 }
 0x666   : > { %v7370_v19 = vadd.f32 %v7369_v4, %v13264_v6 }
 0x668   : > { %v7449_v28 = vmul.f32 %v7370_v19, %v7370_v19 }
 0x66a   : > { %v7481_v16 = vmul.f32 %v7449_v28, %v7370_v19 }
 0x66c   : > { %v7513_v23 = vmul.f32 0.044715, %v7481_v16  ;;  %v13391_v16 = vpop.f32.mrf.mxu0 }
 0x66d   : > { %v7371_v36 = vpop.f32.mrf.mxu2 }
 0x66e   : > { %v7545_v41 = vadd.f32 %v7513_v23, %v7370_v19  ;;  %v7372_v47 = vadd.f32 %v7371_v36, %v13273_v8  ;;  %v13393_v36 = vpop.f32.mrf.mxu1 }
 0x670   : > { %v7577_v48 = vmul.f32 0.7978846, %v7545_v41  ;;  %v7450_v7 = vmul.f32 %v7372_v47, %v7372_v47  ;;  %v10438_v41 = vld [vmem:[#allocation4 + $0x310] sm:$0xf0] }
 0x672   : > { %10683 = vtanh.f32 %v7577_v48  ;;  %v7482_v31 = vmul.f32 %v7450_v7, %v7372_v47  ;;  %7413 = vmatmul.bf16.gmra.mxu2 %v9580_v11 }
 0x674   : > { %v7514_v6 = vmul.f32 0.044715, %v7482_v31  ;;  %v13396_v35 = vpop.f32.mrf.mxu0 }
 0x675   : > { %v7374_v63 = vpop.f32.mrf.mxu2 }
 0x676   : > { %v7546_v56 = vadd.f32 %v7514_v6, %v7372_v47  ;;  %v7375_v15 = vadd.f32 %v7374_v63, %v13280_v2  ;;  %v9616_v63 = vor.u32 %v10438_v41, %v9615_v55  ;;  %v14204_v55 = vld [vmem:[#allocation12_spill] sm:$0xff] }
 0x678   : > { %v10684_v43 = vpop.eup %10683  ;;  %v7578_v22 = vmul.f32 0.7978846, %v7546_v56  ;;  %v7451_v4 = vmul.f32 %v7375_v15, %v7375_v15 }
 0x679   : > { %v7641_v28 = vadd.f32 1.0, %v10684_v43 }
 0x67a   : > { %10685 = vtanh.f32 %v7578_v22  ;;  %v7483_v8 = vmul.f32 %v7451_v4, %v7375_v15 }
 0x67b   : > { %v7673_v11 = vmul.f32 0.5, %v7641_v28  ;;  %v14203_v28 = vld [vmem:[#allocation11_spill] sm:$0xff] }
 0x67c   : > { %v7515_v23 = vmul.f32 0.044715, %v7483_v8 }
 0x67d   : > { %v7376_v1 = vpop.f32.mrf.mxu2  ;;  %v7705_v43 = vmul.f32 %v7673_v11, %v7370_v19 }
 0x67e   : > { %v7547_v48 = vadd.f32 %v7515_v23, %v7375_v15  ;;  %v7377_v7 = vadd.f32 %v7376_v1, %v13291_v18  ;;  %v13401_v18 = vpop.f32.mrf.mxu1 }
 0x67f   : > { %v7737_v1 = vadd.f32 %v7705_v43, %v14203_v28 }
 0x680   : > { %v10686_v31 = vpop.eup %10685  ;;  %v7579_v2 = vmul.f32 0.7978846, %v7547_v48  ;;  %v7452_v6 = vmul.f32 %v7377_v7, %v7377_v7 }
 0x681   : > { %v7642_v56 = vadd.f32 1.0, %v10686_v31 }
 0x682   : > { %10687 = vtanh.f32 %v7579_v2  ;;  %v7484_v22 = vmul.f32 %v7452_v6, %v7377_v7  ;;  %7418 = vmatmul.bf16.gmra.mxu2 %v9616_v63  ;;  %v10447_v63 = vld [vmem:[#allocation4 + $0x358] sm:$0xf0] }
 0x683   : > { %v7674_v4 = vmul.f32 0.5, %v7642_v56 }
 0x684   : > { %v7516_v8 = vmul.f32 0.044715, %v7484_v22 }
 0x685   : > { %v7706_v21 = vmul.f32 %v7674_v4, %v7372_v47  ;;  %v7379_v13 = vpop.f32.mrf.mxu2 }
 0x686   : > { %v7548_v58 = vadd.f32 %v7516_v8, %v7377_v7  ;;  %v13399_v23 = vadd.f32 %v7379_v13, %v13297_v45  ;;  %v9651_v13 = vld [vmem:[#allocation4 + $0x338] sm:$0xf] }
 0x687   : > { %v7738_v41 = vadd.f32 %v7706_v21, %v14204_v55  ;;  %v9652_v28 = vor.u32 %v10447_v63, %v9651_v13 }
 0x688   : > { %v10688_v48 = vpop.eup %10687  ;;  %v7580_v31 = vmul.f32 0.7978846, %v7548_v58  ;;  %v7453_v19 = vmul.f32 %v13399_v23, %v13399_v23  ;;  %v13410_v58 = vpop.f32.mrf.mxu0 }
 0x689   : > { %v7769_v11 = vpack.c.bf16 %v7738_v41, %v7737_v1  ;;  %v7643_v2 = vadd.f32 1.0, %v10688_v48  ;;  %v13412_v1 = vpop.f32.mrf.mxu1 }
 0x68a   : > { %10689 = vtanh.f32 %v7580_v31  ;;  %v7485_v47 = vmul.f32 %v7453_v19, %v13399_v23 }
 0x68b   : > { %7861 = vmatmul.bf16.vlgmr.msra.gmra.mxu3 %v7769_v11  ;;  %v7675_v21 = vmul.f32 0.5, %v7643_v2  ;;  %v14205_v2 = vld [vmem:[#allocation13_spill] sm:$0xff] }
 0x68c   : > { %v7517_v6 = vmul.f32 0.044715, %v7485_v47 }
 0x68d   : > { %v7381_v45 = vpop.f32.mrf.mxu2  ;;  %v7707_v31 = vmul.f32 %v7675_v21, %v7375_v15 }
 0x68e   : > { %v7549_v56 = vadd.f32 %v7517_v6, %v13399_v23  ;;  %v7382_v22 = vadd.f32 %v7381_v45, %v13304_v0 }
 0x68f   : > { %v7739_v45 = vadd.f32 %v7707_v31, %v14205_v2 }
 0x690   : > { %v10690_v43 = vpop.eup %10689  ;;  %v7581_v4 = vmul.f32 0.7978846, %v7549_v56  ;;  %v7454_v8 = vmul.f32 %v7382_v22, %v7382_v22  ;;  %v14206_v56 = vld [vmem:[#allocation14_spill] sm:$0xff] }
 0x691   : > { %v7644_v55 = vadd.f32 1.0, %v10690_v43 }
 0x692   : > { %10691 = vtanh.f32 %v7581_v4  ;;  %v7486_v41 = vmul.f32 %v7454_v8, %v7382_v22  ;;  %7423 = vmatmul.bf16.gmra.mxu2 %v9652_v28  ;;  %v13421_v8 = vpop.f32.mrf.mxu0 }
 0x693   : > { %v7676_v48 = vmul.f32 0.5, %v7644_v55  ;;  %v9687_v55 = vld [vmem:[#allocation4 + $0x380] sm:$0xf] }
 0x694   : > { %v7518_v19 = vmul.f32 0.044715, %v7486_v41  ;;  %v10456_v41 = vld [vmem:[#allocation4 + $0x3a0] sm:$0xf0] }
 0x695   : > { %v7384_v11 = vpop.f32.mrf.mxu2  ;;  %v7708_v47 = vmul.f32 %v7676_v48, %v7377_v7  ;;  %v13424_v7 = vpop.f32.mrf.mxu1 }
 0x696   : > { %v7550_v6 = vadd.f32 %v7518_v19, %v7382_v22  ;;  %v13415_v0 = vadd.f32 %v7384_v11, %v13309_v39 }
 0x697   : > { %v7740_v17 = vadd.f32 %v7708_v47, %v14206_v56 }
 0x698   : > { %v10692_v13 = vpop.eup %10691  ;;  %v7582_v63 = vmul.f32 0.7978846, %v7550_v6  ;;  %v7455_v43 = vmul.f32 %v13415_v0, %v13415_v0  ;;  %v9688_v6 = vor.u32 %v10456_v41, %v9687_v55 }
 0x699   : > { %v7770_v4 = vpack.c.bf16 %v7740_v17, %v7739_v45  ;;  %v7645_v39 = vadd.f32 1.0, %v10692_v13  ;;  %v7212_v45 = vadd.f32 %v13386_v52, %v13240_v50  ;;  %v14207_v52 = vld [vmem:[#allocation15_spill] sm:$0xff] }
 0x69a   : > { %10693 = vtanh.f32 %v7582_v63  ;;  %v7487_v15 = vmul.f32 %v7455_v43, %v13415_v0  ;;  %v13431_v43 = vpop.f32.mrf.mxu0 }
 0x69b   : > { %7866 = vmatmul.bf16.gmra.mxu3 %v7770_v4  ;;  %v7677_v19 = vmul.f32 0.5, %v7645_v39  ;;  %v7301_v4 = vadd.f32 %v13388_v5, %v7212_v45  ;;  %v9723_v45 = vld [vmem:[#allocation4 + $0x3c8] sm:$0xf] }
 0x69c   : > { %v7519_v21 = vmul.f32 0.044715, %v7487_v15 }
 0x69d   : > { %v7386_v28 = vpop.f32.mrf.mxu2  ;;  %v7709_v63 = vmul.f32 %v7677_v19, %v13399_v23  ;;  %v13434_v15 = vpop.f32.mrf.mxu1 }
 0x69e   : > { %v7551_v48 = vadd.f32 %v7519_v21, %v13415_v0  ;;  %v7387_v31 = vadd.f32 %v7386_v28, %v13319_v12  ;;  %v7125_v28 = vadd.f32 %v13254_v61, %v13252_v10 }
 0x69f   : > { %v7741_v41 = vadd.f32 %v7709_v63, %v14207_v52 }
 0x6a0   : > { %v10694_v11 = vpop.eup %10693  ;;  %v7583_v17 = vmul.f32 0.7978846, %v7551_v48  ;;  %v7456_v47 = vmul.f32 %v7387_v31, %v7387_v31  ;;  %v14208_v48 = vld [vmem:[#allocation16_spill] sm:$0xff] }
 0x6a1   : > { %v7646_v2 = vadd.f32 1.0, %v10694_v11 }
 0x6a2   : > { %10695 = vtanh.f32 %v7583_v17  ;;  %v7488_v56 = vmul.f32 %v7456_v47, %v7387_v31  ;;  %7428 = vmatmul.bf16.gmra.mxu2 %v9688_v6  ;;  %v7214_v47 = vadd.f32 %v13391_v16, %v7125_v28 }
 0x6a3   : > { %v7678_v13 = vmul.f32 0.5, %v7646_v2 }
 0x6a4   : > { %v7520_v12 = vmul.f32 0.044715, %v7488_v56  ;;  %v7303_v61 = vadd.f32 %v13393_v36, %v7214_v47  ;;  %v10465_v56 = vld [vmem:[#allocation4 + $0x3e8] sm:$0xf0]  ;;  %v7217_v36 = vadd.f32 %v13396_v35, %v13261_v33  ;;  %v7130_v47 = vadd.f32 %v13270_v49, %v13268_v14  ;;  %v14210_v33 = vld [vmem:[#allocation18_spill] sm:$0xff] }
 0x6a5   : > { %v7389_v39 = vpop.f32.mrf.mxu2  ;;  %v7710_v21 = vmul.f32 %v7678_v13, %v7382_v22  ;;  %v13447_v13 = vpop.f32.mrf.mxu0 }
 0x6a6   : > { %v7552_v55 = vadd.f32 %v7520_v12, %v7387_v31  ;;  %v13438_v50 = vadd.f32 %v7389_v39, %v7301_v4  ;;  %v13450_v12 = vpop.f32.mrf.mxu1 }
 0x6a7   : > { %v7742_v11 = vadd.f32 %v7710_v21, %v14208_v48 }
 0x6a8   : > { %v10696_v23 = vpop.eup %10695  ;;  %v7584_v19 = vmul.f32 0.7978846, %v7552_v55  ;;  %v7457_v5 = vmul.f32 %v13438_v50, %v13438_v50  ;;  %v9724_v55 = vor.u32 %v10465_v56, %v9723_v45 }
 0x6a9   : > { %v7771_v17 = vpack.c.bf16 %v7742_v11, %v7741_v41  ;;  %v7647_v10 = vadd.f32 1.0, %v10696_v23  ;;  %v7306_v23 = vadd.f32 %v13401_v18, %v7217_v36 }
 0x6aa   : > { %10697 = vtanh.f32 %v7584_v19  ;;  %v7489_v22 = vmul.f32 %v7457_v5, %v13438_v50 }
 0x6ab   : > { %7871 = vmatmul.bf16.gmra.mxu3 %v7771_v17  ;;  %v7679_v39 = vmul.f32 0.5, %v7647_v10 }
 0x6ac   : > { %v7521_v6 = vmul.f32 0.044715, %v7489_v22 }
 0x6ad   : > { %v7391_v2 = vpop.f32.mrf.mxu2  ;;  %v7711_v11 = vmul.f32 %v7679_v39, %v13415_v0  ;;  %v13462_v45 = vpop.f32.mrf.mxu0 }
 0x6ae   : > { %v7553_v63 = vadd.f32 %v7521_v6, %v13438_v50  ;;  %v7392_v4 = vadd.f32 %v7391_v2, %v7303_v61  ;;  %v14209_v61 = vld [vmem:[#allocation17_spill] sm:$0xff]  ;;  %v13466_v0 = vpop.f32.mrf.mxu1 }
 0x6af   : > { %v7743_v6 = vadd.f32 %v7711_v11, %v14209_v61 }
 0x6b0   : > { %v10698_v16 = vpop.eup %10697  ;;  %v7585_v21 = vmul.f32 0.7978846, %v7553_v63  ;;  %v7458_v28 = vmul.f32 %v7392_v4, %v7392_v4  ;;  %v7219_v63 = vadd.f32 %v13410_v58, %v7130_v47 }
 0x6b1   : > { %v7648_v52 = vadd.f32 1.0, %v10698_v16 }
 0x6b2   : > { %10699 = vtanh.f32 %v7585_v21  ;;  %v7490_v41 = vmul.f32 %v7458_v28, %v7392_v4  ;;  %7433 = vmatmul.bf16.gmra.mxu2 %v9724_v55  ;;  %v7308_v39 = vadd.f32 %v13412_v1, %v7219_v63  ;;  %v9759_v28 = vld [vmem:[#allocation4 + $0x410] sm:$0xf]  ;;  %v10474_v55 = vld [vmem:[#allocation4 + $0x430] sm:$0xf0]  ;;  %v14212_v63 = vld [vmem:[#allocation20_spill] sm:$0xff] }
 0x6b3   : > { %v7680_v48 = vmul.f32 0.5, %v7648_v52 }
 0x6b4   : > { %v7522_v19 = vmul.f32 0.044715, %v7490_v41 }
 0x6b5   : > { %v7394_v5 = vpop.f32.mrf.mxu2  ;;  %v7712_v17 = vmul.f32 %v7680_v48, %v7387_v31 }
 0x6b6   : > { %v7554_v22 = vadd.f32 %v7522_v19, %v7392_v4  ;;  %v13458_v10 = vadd.f32 %v7394_v5, %v7306_v23  ;;  %v9760_v19 = vor.u32 %v10474_v55, %v9759_v28  ;;  %v13472_v5 = vpop.f32.mrf.mxu0  ;;  %v13476_v47 = vpop.f32.mrf.mxu1 }
 0x6b7   : > { %v7744_v35 = vadd.f32 %v7712_v17, %v14210_v33  ;;  %v7222_v17 = vadd.f32 %v13421_v8, %v13277_v25  ;;  %v14211_v25 = vld [vmem:[#allocation19_spill] sm:$0xff] }
 0x6b8   : > { %v10700_v2 = vpop.eup %10699  ;;  %v7586_v56 = vmul.f32 0.7978846, %v7554_v22  ;;  %v7459_v18 = vmul.f32 %v13458_v10, %v13458_v10 }
 0x6b9   : > { %v7772_v31 = vpack.c.bf16 %v7744_v35, %v7743_v6  ;;  %v7649_v49 = vadd.f32 1.0, %v10700_v2  ;;  %v7311_v6 = vadd.f32 %v13424_v7, %v7222_v17 }
 0x6ba   : > { %10701 = vtanh.f32 %v7586_v56  ;;  %v7491_v14 = vmul.f32 %v7459_v18, %v13458_v10  ;;  %v7135_v56 = vadd.f32 %v13289_v24, %v13287_v40  ;;  %v9795_v40 = vld [vmem:[#allocation4 + $0x458] sm:$0xf]  ;;  %v10483_v24 = vld [vmem:[#allocation4 + $0x478] sm:$0xf0] }
 0x6bb   : > { %7876 = vmatmul.bf16.gmra.mxu3 %v7772_v31  ;;  %v7681_v41 = vmul.f32 0.5, %v7649_v49 }
 0x6bc   : > { %v7523_v16 = vmul.f32 0.044715, %v7491_v14  ;;  %v7224_v7 = vadd.f32 %v13431_v43, %v7135_v56 }
 0x6bd   : > { %v7396_v21 = vpop.f32.mrf.mxu2  ;;  %v7713_v61 = vmul.f32 %v7681_v41, %v13438_v50 }
 0x6be   : > { %v7555_v52 = vadd.f32 %v7523_v16, %v13458_v10  ;;  %v7397_v36 = vadd.f32 %v7396_v21, %v7308_v39  ;;  %v13490_v28 = vpop.f32.mrf.mxu0  ;;  %v7313_v55 = vadd.f32 %v13434_v15, %v7224_v7  ;;  %v13493_v41 = vpop.f32.mrf.mxu1 }
 0x6bf   : > { %v7745_v8 = vadd.f32 %v7713_v61, %v14211_v25  ;;  %v7227_v61 = vadd.f32 %v13447_v13, %v13295_v42  ;;  %v7140_v25 = vadd.f32 %v13302_v37, %v13300_v62  ;;  %v14213_v42 = vld [vmem:[#allocation21_spill] sm:$0xff] }
 0x6c0   : > { %v10702_v48 = vpop.eup %10701  ;;  %v7587_v11 = vmul.f32 0.7978846, %v7555_v52  ;;  %v7460_v23 = vmul.f32 %v7397_v36, %v7397_v36 }
 0x6c1   : > { %v7650_v58 = vadd.f32 1.0, %v10702_v48 }
 0x6c2   : > { %10703 = vtanh.f32 %v7587_v11  ;;  %v7492_v1 = vmul.f32 %v7460_v23, %v7397_v36  ;;  %7438 = vmatmul.bf16.gmra.mxu2 %v9760_v19  ;;  %v9796_v19 = vor.u32 %v10483_v24, %v9795_v40 }
 0x6c3   : > { %v7682_v22 = vmul.f32 0.5, %v7650_v58 }
 0x6c4   : > { %v7524_v33 = vmul.f32 0.044715, %v7492_v1 }
 0x6c5   : > { %v7399_v35 = vpop.f32.mrf.mxu2  ;;  %v7714_v2 = vmul.f32 %v7682_v22, %v7392_v4 }
 0x6c6   : > { %v7556_v18 = vadd.f32 %v7524_v33, %v7397_v36  ;;  %v13482_v31 = vadd.f32 %v7399_v35, %v7311_v6  ;;  %v7316_v35 = vadd.f32 %v13450_v12, %v7227_v61 }
 0x6c7   : > { %v7746_v14 = vadd.f32 %v7714_v2, %v14212_v63 }
 0x6c8   : > { %v10704_v49 = vpop.eup %10703  ;;  %v7588_v39 = vmul.f32 0.7978846, %v7556_v18  ;;  %v7461_v50 = vmul.f32 %v13482_v31, %v13482_v31 }
 0x6c9   : > { %v7773_v16 = vpack.c.bf16 %v7746_v14, %v7745_v8  ;;  %v7651_v21 = vadd.f32 1.0, %v10704_v49  ;;  %v7236_v8 = vpop.f32.mrf.mxu0  ;;  %v13504_v49 = vpop.f32.mrf.mxu1 }
 0x6ca   : > { %10705 = vtanh.f32 %v7588_v39  ;;  %v7493_v4 = vmul.f32 %v7461_v50, %v13482_v31  ;;  %v14214_v39 = vld [vmem:[#allocation22_spill] sm:$0xff] }
 0x6cb   : > { %7881 = vmatmul.bf16.gmra.mxu3 %v7773_v16  ;;  %v7683_v43 = vmul.f32 0.5, %v7651_v21 }
 0x6cc   : > { %v7525_v52 = vmul.f32 0.044715, %v7493_v4 }
 0x6cd   : > { %v7401_v48 = vpop.f32.mrf.mxu2  ;;  %v7715_v33 = vmul.f32 %v7683_v43, %v13458_v10 }
 0x6ce   : > { %v7557_v11 = vadd.f32 %v7525_v52, %v13482_v31  ;;  %v7402_v23 = vadd.f32 %v7401_v48, %v7313_v55 }
 0x6cf   : > { %v7747_v13 = vadd.f32 %v7715_v33, %v14213_v42 }
 0x6d0   : > { %v10706_v58 = vpop.eup %10705  ;;  %v7589_v17 = vmul.f32 0.7978846, %v7557_v11  ;;  %v7462_v1 = vmul.f32 %v7402_v23, %v7402_v23 }
 0x6d1   : > { %v7652_v22 = vadd.f32 1.0, %v10706_v58  ;;  %v7238_v11 = vpop.f32.mrf.mxu0  ;;  %v7327_v58 = vpop.f32.mrf.mxu1 }
 0x6d2   : > { %10707 = vtanh.f32 %v7589_v17  ;;  %v7494_v6 = vmul.f32 %v7462_v1, %v7402_v23  ;;  %7443 = vmatmul.bf16.gmra.mxu2 %v9796_v19 }
 0x6d3   : > { %v7684_v15 = vmul.f32 0.5, %v7652_v22 }
 0x6d4   : > { %v7526_v2 = vmul.f32 0.044715, %v7494_v6 }
 0x6d5   : > { %v7404_v56 = vpop.f32.mrf.mxu2  ;;  %v7716_v18 = vmul.f32 %v7684_v15, %v7397_v36  ;;  %v7229_v36 = vadd.f32 %v13462_v45, %v7140_v25  ;;  %v7232_v45 = vadd.f32 %v13472_v5, %v13307_v44 }
 0x6d6   : > { %v7558_v63 = vadd.f32 %v7526_v2, %v7402_v23  ;;  %v13502_v14 = vadd.f32 %v7404_v56, %v7316_v35  ;;  %v7145_v35 = vadd.f32 %v13317_v29, %v13315_v57 }
 0x6d7   : > { %v7748_v50 = vadd.f32 %v7716_v18, %v14214_v39  ;;  %v7318_v4 = vadd.f32 %v13466_v0, %v7229_v36  ;;  %v7321_v61 = vadd.f32 %v13476_v47, %v7232_v45  ;;  %v14215_v18 = vld [vmem:[#allocation23_spill] sm:$0xff] }
 0x6d8   : > { %v10708_v16 = vpop.eup %10707  ;;  %v7590_v10 = vmul.f32 0.7978846, %v7558_v63  ;;  %v7463_v12 = vmul.f32 %v13502_v14, %v13502_v14  ;;  %v14216_v63 = vld [vmem:[#allocation24_spill] sm:$0xff]  ;;  %v7234_v39 = vadd.f32 %v13490_v28, %v7145_v35  ;;  %v7237_v28 = vadd.f32 %v7236_v8, %v13322_v59  ;;  %v14218_v8 = vld [vmem:[#allocation26_spill] sm:$0xff] }
 0x6d9   : > { %v7774_v7 = vpack.c.bf16 %v7748_v50, %v7747_v13  ;;  %v7653_v37 = vadd.f32 1.0, %v10708_v16  ;;  %v7241_v47 = vpop.f32.mrf.mxu0  ;;  %v7330_v57 = vpop.f32.mrf.mxu1 }
 0x6da   : > { %10709 = vtanh.f32 %v7590_v10  ;;  %v7495_v62 = vmul.f32 %v7463_v12, %v13502_v14  ;;  %v7323_v50 = vadd.f32 %v13493_v41, %v7234_v39  ;;  %v7326_v41 = vadd.f32 %v13504_v49, %v7237_v28 }
 0x6db   : > { %7886 = vmatmul.bf16.gmra.mxu3 %v7774_v7  ;;  %v7685_v52 = vmul.f32 0.5, %v7653_v37 }
 0x6dc   : > { %v7527_v40 = vmul.f32 0.044715, %v7495_v62 }
 0x6dd   : > { %v7406_v24 = vpop.f32.mrf.mxu2  ;;  %v7717_v0 = vmul.f32 %v7685_v52, %v13482_v31 }
 0x6de   : > { %v7559_v21 = vadd.f32 %v7527_v40, %v13502_v14  ;;  %v7407_v55 = vadd.f32 %v7406_v24, %v7318_v4 }
 0x6df   : > { %v7749_v25 = vadd.f32 %v7717_v0, %v14215_v18 }
 0x6e0   : > { %v10710_v48 = vpop.eup %10709  ;;  %v7591_v19 = vmul.f32 0.7978846, %v7559_v21  ;;  %v7464_v43 = vmul.f32 %v7407_v55, %v7407_v55 }
 0x6e1   : > { %v7654_v17 = vadd.f32 1.0, %v10710_v48  ;;  %v7243_v48 = vpop.f32.mrf.mxu0 }
 0x6e2   : > { %10711 = vtanh.f32 %v7591_v19  ;;  %v7496_v1 = vmul.f32 %v7464_v43, %v7407_v55  ;;  %v7332_v43 = vpop.f32.mrf.mxu1 }
 0x6e3   : > { %v7686_v22 = vmul.f32 0.5, %v7654_v17 }
 0x6e4   : > { %v7528_v6 = vmul.f32 0.044715, %v7496_v1  ;;  %v7150_v1 = vadd.f32 %v13327_v9, %v13325_v26 }
 0x6e5   : > { %v7409_v15 = vpop.f32.mrf.mxu2  ;;  %v7718_v33 = vmul.f32 %v7686_v22, %v7402_v23 }
 0x6e6   : > { %v7560_v2 = vadd.f32 %v7528_v6, %v7407_v55  ;;  %v13520_v56 = vadd.f32 %v7409_v15, %v7321_v61  ;;  %v14217_v61 = vld [vmem:[#allocation25_spill] sm:$0xff]  ;;  %v7239_v35 = vadd.f32 %v7238_v11, %v7150_v1 }
 0x6e7   : > { %v7750_v44 = vadd.f32 %v7718_v33, %v14216_v63 }
 0x6e8   : > { %v10712_v5 = vpop.eup %10711  ;;  %v7592_v42 = vmul.f32 0.7978846, %v7560_v2  ;;  %v7465_v31 = vmul.f32 %v13520_v56, %v13520_v56  ;;  %v7328_v9 = vadd.f32 %v7327_v58, %v7239_v35  ;;  %v7242_v58 = vadd.f32 %v7241_v47, %v13330_v30 }
 0x6e9   : > { %v7775_v13 = vpack.c.bf16 %v7750_v44, %v7749_v25  ;;  %v7655_v29 = vadd.f32 1.0, %v10712_v5  ;;  %v13542_v25 = vpop.f32.mrf.mxu0 }
 0x6ea   : > { %10713 = vtanh.f32 %v7592_v42  ;;  %v7497_v23 = vmul.f32 %v7465_v31, %v13520_v56  ;;  %v13547_v5 = vpop.f32.mrf.mxu1 }
 0x6eb   : > { %7891 = vmatmul.bf16.gmra.mxu3 %v7775_v13  ;;  %v7687_v36 = vmul.f32 0.5, %v7655_v29 }
 0x6ec   : > { %v7529_v16 = vmul.f32 0.044715, %v7497_v23 }
 0x6ed   : > { %v7411_v10 = vpop.f32.mrf.mxu2  ;;  %v7719_v52 = vmul.f32 %v7687_v36, %v13502_v14 }
 0x6ee   : > { %v7561_v12 = vadd.f32 %v7529_v16, %v13520_v56  ;;  %v7412_v7 = vadd.f32 %v7411_v10, %v7323_v50  ;;  %v7331_v16 = vadd.f32 %v7330_v57, %v7242_v58 }
 0x6ef   : > { %v7751_v59 = vadd.f32 %v7719_v52, %v14217_v61 }
 0x6f0   : > { %v10714_v62 = vpop.eup %10713  ;;  %v7593_v37 = vmul.f32 0.7978846, %v7561_v12  ;;  %v7466_v4 = vmul.f32 %v7412_v7, %v7412_v7 }
 0x6f1   : > { %v7656_v40 = vadd.f32 1.0, %v10714_v62  ;;  %v7155_v62 = vadd.f32 %v13338_v53, %v13336_v38 }
 0x6f2   : > { %10715 = vtanh.f32 %v7593_v37  ;;  %v7498_v24 = vmul.f32 %v7466_v4, %v7412_v7  ;;  %v13557_v37 = vpop.f32.mrf.mxu3  ;;  %v14219_v4 = vld [vmem:[#allocation27_spill] sm:$0xff]  ;;  %v13566_v52 = vpop.f32.mrf.mxu1 }
 0x6f3   : > { %v7688_v21 = vmul.f32 0.5, %v7656_v40  ;;  %v7244_v53 = vadd.f32 %v7243_v48, %v7155_v62 }
 0x6f4   : > { %v7530_v19 = vmul.f32 0.044715, %v7498_v24  ;;  %v7248_v24 = vpop.f32.mrf.mxu0 }
 0x6f5   : > { %v7414_v17 = vpop.f32.mrf.mxu2  ;;  %v7720_v45 = vmul.f32 %v7688_v21, %v7407_v55 }
 0x6f6   : > { %v7562_v22 = vadd.f32 %v7530_v19, %v7412_v7  ;;  %v13535_v0 = vadd.f32 %v7414_v17, %v7326_v41  ;;  %v13572_v19 = vld [vmem:[%s14080_s10] ss:$0 sm:$0xff] }
 0x6f7   : > { %v7752_v6 = vadd.f32 %v7720_v45, %v14218_v8  ;;  %v7333_v45 = vadd.f32 %v7332_v43, %v7244_v53 }
 0x6f8   : > { %v10716_v15 = vpop.eup %10715  ;;  %v7594_v33 = vmul.f32 0.7978846, %v7562_v22  ;;  %v7467_v14 = vmul.f32 %v13535_v0, %v13535_v0  ;;  %v13574_v22 = vstv %s7943_s29 }
 0x6f9   : > { %v7776_v49 = vpack.c.bf16 %v7752_v6, %v7751_v59  ;;  %v7657_v26 = vadd.f32 1.0, %v10716_v15  ;;  %v13579_v6 = vstv %s7945_s28  ;;  %v8046_v15 = vld [vmem:[%s10974_s23] sm:$0xff] }
 0x6fa   : > { %10717 = vtanh.f32 %v7594_v33  ;;  %v7499_v55 = vmul.f32 %v7467_v14, %v13535_v0  ;;  %v13582_v33 = vstv %s7947_s20 }
 0x6fb   : > { %7896 = vmatmul.bf16.gmra.mxu3 %v7776_v49  ;;  %v7689_v42 = vmul.f32 0.5, %v7657_v26  ;;  %v10770_v49 = vld [vmem:[#allocation2] sm:$0xff] }
 0x6fc   : > { %v7531_v2 = vmul.f32 0.044715, %v7499_v55  ;;  %v7949_v35 = vmul.f32 %v10770_v49, %v13574_v22 }
 0x6fd   : > { %v7416_v18 = vpop.f32.mrf.mxu2  ;;  %v7721_v50 = vmul.f32 %v7689_v42, %v13520_v56  ;;  %v14220_v56 = vld [vmem:[#allocation28_spill] sm:$0xff]  ;;  %v7251_v42 = vpop.f32.mrf.mxu0 }
 0x6fe   : > { %v7563_v63 = vadd.f32 %v7531_v2, %v13535_v0  ;;  %v13545_v44 = vadd.f32 %v7416_v18, %v7328_v9  ;;  %v8079_v18 = vmul.f32 %v13582_v33, %v8046_v15 }
 0x6ff   : > { %v7753_v40 = vadd.f32 %v7721_v50, %v14219_v4 }
 0x700   : > { %v10718_v31 = vpop.eup %10717  ;;  %v7595_v11 = vmul.f32 0.7978846, %v7563_v63  ;;  %v7468_v13 = vmul.f32 %v13545_v44, %v13545_v44 }
 0x701   : > { %v7658_v39 = vadd.f32 1.0, %v10718_v31  ;;  %v7247_v31 = vadd.f32 %v13542_v25, %v13341_v34  ;;  %v7160_v34 = vadd.f32 %v13346_v3, %v13344_v20 }
 0x702   : > { %10719 = vtanh.f32 %v7595_v11  ;;  %v7500_v23 = vmul.f32 %v7468_v13, %v13545_v44  ;;  %v7340_v13 = vpop.f32.mrf.mxu1 }
 0x703   : > { %v7690_v29 = vmul.f32 0.5, %v7658_v39  ;;  %v7249_v53 = vadd.f32 %v7248_v24, %v7160_v34  ;;  %v8048_v24 = vld [vmem:[%s10974_s23 + $0x10] sm:$0xff] }
 0x704   : > { %v7532_v10 = vmul.f32 0.044715, %v7500_v23 }
 0x705   : > { %v7419_v12 = vpop.f32.mrf.mxu2  ;;  %v7722_v36 = vmul.f32 %v7690_v29, %v7412_v7  ;;  %v7336_v29 = vadd.f32 %v13547_v5, %v7247_v31  ;;  %v10771_v5 = vld [vmem:[#allocation2 + $0x8] sm:$0xff] }
 0x706   : > { %v7564_v30 = vadd.f32 %v7532_v10, %v13545_v44  ;;  %v13560_v47 = vadd.f32 %v7419_v12, %v7331_v16  ;;  %v7950_v4 = vmul.f32 %v10771_v5, %v13574_v22 }
 0x707   : > { %v7754_v28 = vadd.f32 %v7722_v36, %v14220_v56 }
 0x708   : > { %v10720_v57 = vpop.eup %10719  ;;  %v7596_v21 = vmul.f32 0.7978846, %v7564_v30  ;;  %v7469_v7 = vmul.f32 %v13560_v47, %v13560_v47  ;;  %v8047_v30 = vld [vmem:[%s10974_s23 + $0x8] sm:$0xff] }
 0x709   : > { %v7777_v38 = vpack.c.bf16 %v7754_v28, %v7753_v40  ;;  %v7659_v17 = vadd.f32 1.0, %v10720_v57  ;;  %v14221_v40 = vld [vmem:[#allocation29_spill] sm:$0xff] }
 0x70a   : > { %10721 = vtanh.f32 %v7596_v21  ;;  %v7501_v41 = vmul.f32 %v7469_v7, %v13560_v47  ;;  %v8080_v7 = vmul.f32 %v13582_v33, %v8047_v30 }
 0x70b   : > { %7901 = vmatmul.bf16.gmra.mxu3 %v7777_v38  ;;  %v7691_v43 = vmul.f32 0.5, %v7659_v17 }
 0x70c   : > { %v7533_v1 = vmul.f32 0.044715, %v7501_v41 }
 0x70d   : > { %v7421_v61 = vpop.f32.mrf.mxu2  ;;  %v7723_v23 = vmul.f32 %v7691_v43, %v13535_v0 }
 0x70e   : > { %v7565_v59 = vadd.f32 %v7533_v1, %v13560_v47  ;;  %v13577_v8 = vadd.f32 %v7421_v61, %v7333_v45  ;;  %v7862_v48 = vpop.f32.mrf.mxu3  ;;  %v7253_v1 = vpop.f32.mrf.mxu0  ;;  %v7338_v61 = vadd.f32 %v13566_v52, %v7249_v53 }
 0x70f   : > { %v7863_v14 = vadd.f32 %v13572_v19, %v7862_v48  ;;  %v7755_v56 = vadd.f32 %v7723_v23, %v14221_v40  ;;  %v7342_v48 = vpop.f32.mrf.mxu1  ;;  %v8049_v40 = vld [vmem:[%s10974_s23 + $0x18] sm:$0xff] }
 0x710   : > { %v10722_v55 = vpop.eup %10721  ;;  %v7597_v26 = vmul.f32 0.7978846, %v7565_v59  ;;  %v7470_v9 = vmul.f32 %v13577_v8, %v13577_v8 }
 0x711   : > { %v7982_v2 = vmul.f32 %v13579_v6, %v7863_v14  ;;  %v7660_v63 = vadd.f32 1.0, %v10722_v55 }
 0x712   : > { %10723 = vtanh.f32 %v7597_v26  ;;  %v7502_v11 = vmul.f32 %v7470_v9, %v13577_v8  ;;  %v10772_v26 = vld [vmem:[#allocation2 + $0x10] sm:$0xff] }
 0x713   : > { %v8014_v39 = vsub.f32 %v7949_v35, %v7982_v2  ;;  %v7692_v58 = vmul.f32 0.5, %v7660_v63  ;;  %v7951_v9 = vmul.f32 %v10772_v26, %v13574_v22  ;;  %v8050_v26 = vld [vmem:[%s10974_s23 + $0x20] sm:$0xff] }
 0x714   : > { %v7534_v50 = vmul.f32 0.044715, %v7502_v11  ;;  %v8081_v11 = vmul.f32 %v13582_v33, %v8048_v24 }
 0x715   : > { %v13595_v16 = vadd.f32 %v8079_v18, %v8014_v39  ;;  %v7424_v10 = vpop.f32.mrf.mxu2  ;;  %v7724_v12 = vmul.f32 %v7692_v58, %v13545_v44  ;;  %v14222_v44 = vld [vmem:[#allocation30_spill] sm:$0xff]  ;;  %v7252_v58 = vadd.f32 %v7251_v42, %v13349_v27 }
 0x716   : > { %v7566_v25 = vadd.f32 %v7534_v50, %v13577_v8  ;;  %v13601_v36 = vadd.f32 %v7424_v10, %v7336_v29  ;;  %v7864_v62 = vpop.f32.mrf.mxu3  ;;  %v7256_v5 = vpop.f32.mrf.mxu0 }
 0x717   : > { %8143 = vst.msk [vmem:[#allocation2] sm:$0xff] %vm672_vm2, %v13595_v16  ;;  %v7865_v0 = vadd.f32 %v13572_v19, %v7864_v62  ;;  %v7756_v28 = vadd.f32 %v7724_v12, %v14222_v44  ;;  %v7341_v12 = vadd.f32 %v7340_v13, %v7252_v58  ;;  %v10773_v13 = vld [vmem:[#allocation2 + $0x18] sm:$0xff]  ;;  %v8083_v58 = vmul.f32 %v13582_v33, %v8050_v26 }
 0x718   : > { %v10724_v57 = vpop.eup %10723  ;;  %v7598_v20 = vmul.f32 0.7978846, %v7566_v25  ;;  %v7471_v3 = vmul.f32 %v13601_v36, %v13601_v36  ;;  %v7952_v44 = vmul.f32 %v10773_v13, %v13574_v22  ;;  %v8051_v13 = vld [vmem:[%s10974_s23 + $0x28] sm:$0xff] }
 0x719   : > { %v7983_v21 = vmul.f32 %v13579_v6, %v7865_v0  ;;  %v7778_v38 = vpack.c.bf16 %v7756_v28, %v7755_v56  ;;  %v7661_v45 = vadd.f32 1.0, %v10724_v57  ;;  %v7165_v0 = vadd.f32 %v13357_v51, %v13355_v32  ;;  %v7345_v56 = vpop.f32.mrf.mxu1  ;;  %v14224_v57 = vld [vmem:[#allocation32_spill] sm:$0xff] }
 0x71a   : > { %10725 = vtanh.f32 %v7598_v20  ;;  %v7503_v41 = vmul.f32 %v7471_v3, %v13601_v36 }
 0x71b   : > { %v8015_v17 = vsub.f32 %v7950_v4, %v7983_v21  ;;  %7906 = vmatmul.bf16.gmra.mxu3 %v7778_v38  ;;  %v7693_v52 = vmul.f32 0.5, %v7661_v45  ;;  %v7254_v53 = vadd.f32 %v7253_v1, %v7165_v0 }
 0x71c   : > { %v7535_v59 = vmul.f32 0.044715, %v7503_v41 }
 0x71d   : > { %v13616_v15 = vadd.f32 %v8080_v7, %v8015_v17  ;;  %v7426_v14 = vpop.f32.mrf.mxu2  ;;  %v7725_v10 = vmul.f32 %v7693_v52, %v13560_v47  ;;  %v8082_v7 = vmul.f32 %v13582_v33, %v8049_v40  ;;  %v7170_v40 = vadd.f32 %v13365_v46, %v13363_v60 }
 0x71e   : > { %v7567_v49 = vadd.f32 %v7535_v59, %v13601_v36  ;;  %v13619_v35 = vadd.f32 %v7426_v14, %v7338_v61  ;;  %v7867_v43 = vpop.f32.mrf.mxu3  ;;  %v7343_v61 = vadd.f32 %v7342_v48, %v7254_v53 }
 0x71f   : > { %8144 = vst.msk [vmem:[#allocation2 + $0x8] sm:$0xff] %vm672_vm2, %v13616_v15  ;;  %v7868_v55 = vadd.f32 %v13572_v19, %v7867_v43 }
 0x720   : > { %v10726_v2 = vpop.eup %10725  ;;  %v7599_v18 = vmul.f32 0.7978846, %v7567_v49  ;;  %v7472_v63 = vmul.f32 %v13619_v35, %v13619_v35 }
 0x721   : > { %v7984_v31 = vmul.f32 %v13579_v6, %v7868_v55  ;;  %v7662_v39 = vadd.f32 1.0, %v10726_v2 }
 0x722   : > { %10727 = vtanh.f32 %v7599_v18  ;;  %v7504_v23 = vmul.f32 %v7472_v63, %v13619_v35  ;;  %v7258_v18 = vpop.f32.mrf.mxu0 }
 0x723   : > { %v8016_v29 = vsub.f32 %v7951_v9, %v7984_v31  ;;  %v7694_v50 = vmul.f32 0.5, %v7662_v39  ;;  %v10774_v9 = vld [vmem:[#allocation2 + $0x20] sm:$0xff] }
 0x724   : > { %v7536_v34 = vmul.f32 0.044715, %v7504_v23  ;;  %v7953_v52 = vmul.f32 %v10774_v9, %v13574_v22 }
 0x725   : > { %v13633_v25 = vadd.f32 %v8081_v11, %v8016_v29  ;;  %v7429_v62 = vpop.f32.mrf.mxu2  ;;  %v7726_v30 = vmul.f32 %v7694_v50, %v13577_v8  ;;  %v14223_v8 = vld [vmem:[#allocation31_spill] sm:$0xff]  ;;  %v7347_v11 = vpop.f32.mrf.mxu1  ;;  %v7257_v29 = vadd.f32 %v7256_v5, %v13360_v54 }
 0x726   : > { %v7568_v27 = vadd.f32 %v7536_v34, %v13619_v35  ;;  %v13639_v42 = vadd.f32 %v7429_v62, %v7341_v12  ;;  %v7869_v4 = vpop.f32.mrf.mxu3  ;;  %v7757_v28 = vadd.f32 %v7725_v10, %v14223_v8  ;;  %v14225_v8 = vld [vmem:[#allocation33_spill] sm:$0xff] }
 0x727   : > { %8145 = vst.msk [vmem:[#allocation2 + $0x10] sm:$0xff] %vm672_vm2, %v13633_v25  ;;  %v7870_v47 = vadd.f32 %v13572_v19, %v7869_v4  ;;  %v7758_v32 = vadd.f32 %v7726_v30, %v14224_v57  ;;  %v7346_v62 = vadd.f32 %v7345_v56, %v7257_v29  ;;  %v10775_v56 = vld [vmem:[#allocation2 + $0x28] sm:$0xff] }
 0x728   : > { %v10728_v51 = vpop.eup %10727  ;;  %v7600_v20 = vmul.f32 0.7978846, %v7568_v27  ;;  %v7473_v3 = vmul.f32 %v13639_v42, %v13639_v42 }
 0x729   : > { %v7985_v21 = vmul.f32 %v13579_v6, %v7870_v47  ;;  %v7779_v38 = vpack.c.bf16 %v7758_v32, %v7757_v28  ;;  %v7663_v45 = vadd.f32 1.0, %v10728_v51 }
 0x72a   : > { %10729 = vtanh.f32 %v7600_v20  ;;  %v7505_v41 = vmul.f32 %v7473_v3, %v13639_v42  ;;  %v8084_v20 = vmul.f32 %v13582_v33, %v8051_v13  ;;  %v14228_v13 = vld [vmem:[#allocation44_spill] sm:$0xff] }
 0x72b   : > { %v8017_v17 = vsub.f32 %v7952_v44, %v7985_v21  ;;  %7911 = vmatmul.bf16.gmra.mxu3 %v7779_v38  ;;  %v7695_v2 = vmul.f32 0.5, %v7663_v45  ;;  %v7954_v44 = vmul.f32 %v10775_v56, %v13574_v22  ;;  %v7261_v21 = vpop.f32.mrf.mxu0 }
 0x72c   : > { %v7537_v59 = vmul.f32 0.044715, %v7505_v41 }
 0x72d   : > { %v13653_v14 = vadd.f32 %v8082_v7, %v8017_v17  ;;  %v7431_v49 = vpop.f32.mrf.mxu2  ;;  %v7727_v34 = vmul.f32 %v7695_v2, %v13601_v36  ;;  %v7259_v7 = vadd.f32 %v7258_v18, %v7170_v40  ;;  %v7350_v53 = vpop.f32.mrf.mxu1 }
 0x72e   : > { %v7569_v43 = vadd.f32 %v7537_v59, %v13639_v42  ;;  %v13656_v24 = vadd.f32 %v7431_v49, %v7343_v61  ;;  %v7872_v55 = vpop.f32.mrf.mxu3 }
 0x72f   : > { %8146 = vst.msk [vmem:[#allocation2 + $0x18] sm:$0xff] %vm672_vm2, %v13653_v14  ;;  %v7873_v1 = vadd.f32 %v13572_v19, %v7872_v55  ;;  %v7759_v28 = vadd.f32 %v7727_v34, %v14225_v8  ;;  %v7348_v45 = vadd.f32 %v7347_v11, %v7259_v7 }
 0x730   : > { %v10730_v48 = vpop.eup %10729  ;;  %v7601_v63 = vmul.f32 0.7978846, %v7569_v43  ;;  %v7474_v31 = vmul.f32 %v13656_v24, %v13656_v24 }
 0x731   : > { %v7986_v39 = vmul.f32 %v13579_v6, %v7873_v1  ;;  %v7664_v23 = vadd.f32 1.0, %v10730_v48  ;;  %v8052_v1 = vld [vmem:[%s10974_s23 + $0x30] sm:$0xff] }
 0x732   : > { %10731 = vtanh.f32 %v7601_v63  ;;  %v7506_v50 = vmul.f32 %v7474_v31, %v13656_v24 }
 0x733   : > { %v8018_v10 = vsub.f32 %v7953_v52, %v7986_v39  ;;  %v7696_v12 = vmul.f32 0.5, %v7664_v23  ;;  %v10776_v52 = vld [vmem:[#allocation2 + $0x30] sm:$0xff]  ;;  %v8085_v39 = vmul.f32 %v13582_v33, %v8052_v1 }
 0x734   : > { %v7538_v30 = vmul.f32 0.044715, %v7506_v50  ;;  %v7955_v2 = vmul.f32 %v10776_v52, %v13574_v22  ;;  %v14227_v23 = vld [vmem:[#allocation43_spill] sm:$0xff] }
 0x735   : > { %v13670_v0 = vadd.f32 %v8083_v58, %v8018_v10  ;;  %v7434_v27 = vpop.f32.mrf.mxu2  ;;  %v7728_v4 = vmul.f32 %v7696_v12, %v13619_v35  ;;  %v14226_v35 = vld [vmem:[#allocation34_spill] sm:$0xff]  ;;  %v7262_v29 = vadd.f32 %v7261_v21, %v14227_v23 }
 0x736   : > { %v7570_v47 = vadd.f32 %v7538_v30, %v13656_v24  ;;  %v13676_v54 = vadd.f32 %v7434_v27, %v7346_v62  ;;  %v7874_v5 = vpop.f32.mrf.mxu3  ;;  %v7263_v62 = vpop.f32.mrf.mxu0 }
 0x737   : > { %8147 = vst.msk [vmem:[#allocation2 + $0x20] sm:$0xff] %vm672_vm2, %v13670_v0  ;;  %v7875_v36 = vadd.f32 %v13572_v19, %v7874_v5  ;;  %v7760_v57 = vadd.f32 %v7728_v4, %v14226_v35  ;;  %v7351_v30 = vadd.f32 %v7350_v53, %v7262_v29  ;;  %v7352_v4 = vpop.f32.mrf.mxu1  ;;  %v8053_v35 = vld [vmem:[%s10974_s23 + $0x38] sm:$0xff] }
 0x738   : > { %v10732_v32 = vpop.eup %10731  ;;  %v7602_v60 = vmul.f32 0.7978846, %v7570_v47  ;;  %v7475_v46 = vmul.f32 %v13676_v54, %v13676_v54 }
 0x739   : > { %v7987_v51 = vmul.f32 %v13579_v6, %v7875_v36  ;;  %v7780_v3 = vpack.c.bf16 %v7760_v57, %v7759_v28  ;;  %v7665_v17 = vadd.f32 1.0, %v10732_v32  ;;  %v14229_v36 = vld [vmem:[#allocation62_spill] sm:$0xff]  ;;  %v10777_v57 = vld [vmem:[#allocation2 + $0x38] sm:$0xff] }
 0x73a   : > { %10733 = vtanh.f32 %v7602_v60  ;;  %v7507_v38 = vmul.f32 %v7475_v46, %v13676_v54  ;;  %v7175_v56 = vadd.f32 %v14229_v36, %v14228_v13  ;;  %v7956_v32 = vmul.f32 %v10777_v57, %v13574_v22  ;;  %v14230_v60 = vld [vmem:[#allocation35_spill] sm:$0xff] }
 0x73b   : > { %v8019_v41 = vsub.f32 %v7954_v44, %v7987_v51  ;;  %7916 = vmatmul.bf16.gmra.mxu3 %v7780_v3  ;;  %v7697_v48 = vmul.f32 0.5, %v7665_v17 }
 0x73c   : > { %v7539_v61 = vmul.f32 0.044715, %v7507_v38  ;;  %v8086_v38 = vmul.f32 %v13582_v33, %v8053_v35  ;;  %v14233_v35 = vld [vmem:[#allocation45_spill] sm:$0xff] }
 0x73d   : > { %v13690_v59 = vadd.f32 %v8084_v20, %v8019_v41  ;;  %v7436_v49 = vpop.f32.mrf.mxu2  ;;  %v7729_v34 = vmul.f32 %v7697_v48, %v13639_v42  ;;  %v7264_v41 = vadd.f32 %v7263_v62, %v7175_v56  ;;  %v14232_v62 = vld [vmem:[#allocation63_spill] sm:$0xff] }
 0x73e   : > { %v7571_v43 = vadd.f32 %v7539_v61, %v13676_v54  ;;  %v13693_v55 = vadd.f32 %v7436_v49, %v7348_v45  ;;  %v7877_v26 = vpop.f32.mrf.mxu3 }
 0x73f   : > { %8148 = vst.msk [vmem:[#allocation2 + $0x28] sm:$0xff] %vm672_vm2, %v13690_v59  ;;  %v7878_v9 = vadd.f32 %v13572_v19, %v7877_v26  ;;  %v7761_v46 = vadd.f32 %v7729_v34, %v14230_v60  ;;  %v7353_v49 = vadd.f32 %v7352_v4, %v7264_v41  ;;  %v7266_v26 = vpop.f32.mrf.mxu0 }
 0x740   : > { %v10734_v18 = vpop.eup %10733  ;;  %v7603_v63 = vmul.f32 0.7978846, %v7571_v43  ;;  %v7476_v31 = vmul.f32 %v13693_v55, %v13693_v55 }
 0x741   : > { %v7988_v11 = vmul.f32 %v13579_v6, %v7878_v9  ;;  %v7666_v58 = vadd.f32 1.0, %v10734_v18  ;;  %v8054_v18 = vld [vmem:[%s10974_s23 + $0x40] sm:$0xff] }
 0x742   : > { %10735 = vtanh.f32 %v7603_v63  ;;  %v7508_v50 = vmul.f32 %v7476_v31, %v13693_v55  ;;  %v7355_v63 = vpop.f32.mrf.mxu1 }
 0x743   : > { %v8020_v10 = vsub.f32 %v7955_v2, %v7988_v11  ;;  %v7698_v12 = vmul.f32 0.5, %v7666_v58  ;;  %v10778_v11 = vld [vmem:[#allocation2 + $0x40] sm:$0xff] }
 0x744   : > { %v7540_v27 = vmul.f32 0.044715, %v7508_v50 }
 0x745   : > { %v13707_v40 = vadd.f32 %v8085_v39, %v8020_v10  ;;  %v7439_v47 = vpop.f32.mrf.mxu2  ;;  %v7730_v5 = vmul.f32 %v7698_v12, %v13656_v24  ;;  %v14231_v24 = vld [vmem:[#allocation36_spill] sm:$0xff]  ;;  %v7957_v39 = vmul.f32 %v10778_v11, %v13574_v22  ;;  %v8087_v12 = vmul.f32 %v13582_v33, %v8054_v18 }
 0x746   : > { %v7572_v44 = vadd.f32 %v7540_v27, %v13693_v55  ;;  %v13713_v8 = vadd.f32 %v7439_v47, %v7351_v30  ;;  %v7879_v28 = vpop.f32.mrf.mxu3  ;;  %v7267_v30 = vadd.f32 %v7266_v26, %v14232_v62 }
 0x747   : > { %8149 = vst.msk [vmem:[#allocation2 + $0x30] sm:$0xff] %vm672_vm2, %v13707_v40  ;;  %v7880_v42 = vadd.f32 %v13572_v19, %v7879_v28  ;;  %v7762_v51 = vadd.f32 %v7730_v5, %v14231_v24  ;;  %v7268_v24 = vpop.f32.mrf.mxu0 }
 0x748   : > { %v10736_v20 = vpop.eup %10735  ;;  %v7604_v3 = vmul.f32 0.7978846, %v7572_v44  ;;  %v7477_v21 = vmul.f32 %v13713_v8, %v13713_v8  ;;  %v7356_v13 = vadd.f32 %v7355_v63, %v7267_v30 }
 0x749   : > { %v7989_v7 = vmul.f32 %v13579_v6, %v7880_v42  ;;  %v7781_v53 = vpack.c.bf16 %v7762_v51, %v7761_v46  ;;  %v7667_v61 = vadd.f32 1.0, %v10736_v20  ;;  %v7180_v42 = vadd.f32 %v13557_v37, %v14233_v35  ;;  %v8055_v46 = vld [vmem:[%s10974_s23 + $0x48] sm:$0xff] }
 0x74a   : > { %10737 = vtanh.f32 %v7604_v3  ;;  %v7509_v17 = vmul.f32 %v7477_v21, %v13713_v8  ;;  %v10779_v51 = vld [vmem:[#allocation2 + $0x48] sm:$0xff]  ;;  %v14234_v3 = vld [vmem:[#allocation37_spill] sm:$0xff]  ;;  %v7357_v41 = vpop.f32.mrf.mxu1 }
 0x74b   : > { %v8021_v45 = vsub.f32 %v7956_v32, %v7989_v7  ;;  %7921 = vmatmul.bf16.gmra.mxu3 %v7781_v53  ;;  %v7699_v58 = vmul.f32 0.5, %v7667_v61  ;;  %v7958_v20 = vmul.f32 %v10779_v51, %v13574_v22  ;;  %v14235_v21 = vld [vmem:[#allocation38_spill] sm:$0xff]  ;;  %v14236_v51 = vld [vmem:[#allocation39_spill] sm:$0xff] }
 0x74c   : > { %v7541_v43 = vmul.f32 0.044715, %v7509_v17 }
 0x74d   : > { %v13727_v1 = vadd.f32 %v8086_v38, %v8021_v45  ;;  %v7441_v9 = vpop.f32.mrf.mxu2  ;;  %v7731_v5 = vmul.f32 %v7699_v58, %v13676_v54  ;;  %v8088_v45 = vmul.f32 %v13582_v33, %v8055_v46  ;;  %v8056_v58 = vld [vmem:[%s10974_s23 + $0x50] sm:$0xff] }
 0x74e   : > { %v7573_v52 = vadd.f32 %v7541_v43, %v13713_v8  ;;  %v13730_v2 = vadd.f32 %v7441_v9, %v7353_v49  ;;  %v7882_v48 = vpop.f32.mrf.mxu3  ;;  %v7269_v49 = vadd.f32 %v7268_v24, %v7180_v42  ;;  %v10781_v24 = vld [vmem:[#allocation2 + $0x58] sm:$0xff] }
 0x74f   : > { %8150 = vst.msk [vmem:[#allocation2 + $0x38] sm:$0xff] %vm672_vm2, %v13727_v1  ;;  %v7883_v31 = vadd.f32 %v13572_v19, %v7882_v48 }
 0x750   : > { %v10738_v23 = vpop.eup %10737  ;;  %v7605_v29 = vmul.f32 0.7978846, %v7573_v52  ;;  %v7478_v50 = vmul.f32 %v13730_v2, %v13730_v2  ;;  %v7358_v52 = vadd.f32 %v7357_v41, %v7269_v49  ;;  %v10782_v49 = vld [vmem:[#allocation2 + $0x60] sm:$0xff] }
 0x751   : > { %v7990_v10 = vmul.f32 %v13579_v6, %v7883_v31  ;;  %v7668_v34 = vadd.f32 1.0, %v10738_v23 }
 0x752   : > { %10739 = vtanh.f32 %v7605_v29  ;;  %v7510_v27 = vmul.f32 %v7478_v50, %v13730_v2  ;;  %v10780_v29 = vld [vmem:[#allocation2 + $0x50] sm:$0xff] }
 0x753   : > { %v8022_v4 = vsub.f32 %v7957_v39, %v7990_v10  ;;  %v7700_v47 = vmul.f32 0.5, %v7668_v34  ;;  %v7959_v50 = vmul.f32 %v10780_v29, %v13574_v22 }
 0x754   : > { %v7542_v36 = vmul.f32 0.044715, %v7510_v27  ;;  %v8089_v27 = vmul.f32 %v13582_v33, %v8056_v58 }
 0x755   : > { %v13744_v56 = vadd.f32 %v8087_v12, %v8022_v4  ;;  %v7444_v44 = vpop.f32.mrf.mxu2  ;;  %v7732_v28 = vmul.f32 %v7700_v47, %v13693_v55  ;;  %v7763_v55 = vadd.f32 %v7731_v5, %v14234_v3 }
 0x756   : > { %v7574_v57 = vadd.f32 %v7542_v36, %v13730_v2  ;;  %v13750_v32 = vadd.f32 %v7444_v44, %v7356_v13  ;;  %v7884_v60 = vpop.f32.mrf.mxu3 }
 0x757   : > { %8151 = vst.msk [vmem:[#allocation2 + $0x40] sm:$0xff] %vm672_vm2, %v13744_v56  ;;  %v7885_v54 = vadd.f32 %v13572_v19, %v7884_v60  ;;  %v7764_v7 = vadd.f32 %v7732_v28, %v14235_v21  ;;  %v8057_v60 = vld [vmem:[%s10974_s23 + $0x58] sm:$0xff] }
 0x758   : > { %v10740_v37 = vpop.eup %10739  ;;  %v7606_v38 = vmul.f32 0.7978846, %v7574_v57  ;;  %v7479_v53 = vmul.f32 %v13750_v32, %v13750_v32 }
 0x759   : > { %v7991_v17 = vmul.f32 %v13579_v6, %v7885_v54  ;;  %v7782_v61 = vpack.c.bf16 %v7764_v7, %v7763_v55  ;;  %v7669_v9 = vadd.f32 1.0, %v10740_v37  ;;  %v7960_v54 = vmul.f32 %v10781_v24, %v13574_v22 }
 0x75a   : > { %10741 = vtanh.f32 %v7606_v38  ;;  %v7511_v43 = vmul.f32 %v7479_v53, %v13750_v32  ;;  %v8090_v7 = vmul.f32 %v13582_v33, %v8057_v60 }
 0x75b   : > { %v8023_v26 = vsub.f32 %v7958_v20, %v7991_v17  ;;  %7926 = vmatmul.bf16.gmra.mxu3 %v7782_v61  ;;  %v7701_v10 = vmul.f32 0.5, %v7669_v9 }
 0x75c   : > { %v7543_v48 = vmul.f32 0.044715, %v7511_v43  ;;  %v7961_v43 = vmul.f32 %v10782_v49, %v13574_v22 }
 0x75d   : > { %v13764_v18 = vadd.f32 %v8088_v45, %v8023_v26  ;;  %v7446_v63 = vpop.f32.mrf.mxu2  ;;  %v7733_v36 = vmul.f32 %v7701_v10, %v13713_v8  ;;  %v14237_v8 = vld [vmem:[#allocation40_spill] sm:$0xff]  ;;  %v8058_v45 = vld [vmem:[%s10974_s23 + $0x60] sm:$0xff]  ;;  %v8059_v10 = vld [vmem:[%s10974_s23 + $0x68] sm:$0xff] }
 0x75e   : > { %v7575_v31 = vadd.f32 %v7543_v48, %v13750_v32  ;;  %v7447_v11 = vadd.f32 %v7446_v63, %v7358_v52  ;;  %v7887_v39 = vpop.f32.mrf.mxu3  ;;  %v8091_v48 = vmul.f32 %v13582_v33, %v8058_v45 }
 0x75f   : > { %8152 = vst.msk [vmem:[#allocation2 + $0x48] sm:$0xff] %vm672_vm2, %v13764_v18  ;;  %v7888_v23 = vadd.f32 %v13572_v19, %v7887_v39  ;;  %v7765_v20 = vadd.f32 %v7733_v36, %v14236_v51 }
 0x760   : > { %v10742_v12 = vpop.eup %10741  ;;  %v7607_v34 = vmul.f32 0.7978846, %v7575_v31  ;;  %v7480_v62 = vmul.f32 %v7447_v11, %v7447_v11 }
 0x761   : > { %v7992_v30 = vmul.f32 %v13579_v6, %v7888_v23  ;;  %v7670_v4 = vadd.f32 1.0, %v10742_v12 }
 0x762   : > { %10743 = vtanh.f32 %v7607_v34  ;;  %v7512_v47 = vmul.f32 %v7480_v62, %v7447_v11  ;;  %v10783_v34 = vld [vmem:[#allocation2 + $0x68] sm:$0xff] }
 0x763   : > { %v8024_v5 = vsub.f32 %v7959_v50, %v7992_v30  ;;  %v7702_v13 = vmul.f32 0.5, %v7670_v4  ;;  %v7962_v62 = vmul.f32 %v10783_v34, %v13574_v22  ;;  %v14238_v30 = vld [vmem:[#allocation41_spill] sm:$0xff]  ;;  %v14239_v4 = vld [vmem:[#allocation42_spill] sm:$0xff] }
 0x764   : > { %v7544_v44 = vmul.f32 0.044715, %v7512_v47 }
 0x765   : > { %v13775_v28 = vadd.f32 %v8089_v27, %v8024_v5  ;;  %v7734_v35 = vmul.f32 %v7702_v13, %v13730_v2  ;;  %v8092_v5 = vmul.f32 %v13582_v33, %v8059_v10 }
 0x766   : > { %v7576_v42 = vadd.f32 %v7544_v44, %v7447_v11  ;;  %v7889_v57 = vpop.f32.mrf.mxu3 }
 0x767   : > { %8153 = vst.msk [vmem:[#allocation2 + $0x50] sm:$0xff] %vm672_vm2, %v13775_v28  ;;  %v7890_v46 = vadd.f32 %v13572_v19, %v7889_v57  ;;  %v7766_v3 = vadd.f32 %v7734_v35, %v14237_v8  ;;  %v8060_v35 = vld [vmem:[%s10974_s23 + $0x70] sm:$0xff]  ;;  %v8061_v8 = vld [vmem:[%s10974_s23 + $0x78] sm:$0xff] }
 0x768   : > { %v10744_v55 = vpop.eup %10743  ;;  %v7608_v21 = vmul.f32 0.7978846, %v7576_v42  ;;  %v10784_v57 = vld [vmem:[#allocation2 + $0x70] sm:$0xff]  ;;  %v8093_v24 = vmul.f32 %v13582_v33, %v8060_v35 }
 0x769   : > { %v7993_v2 = vmul.f32 %v13579_v6, %v7890_v46  ;;  %v7783_v37 = vpack.c.bf16 %v7766_v3, %v7765_v20  ;;  %v7671_v53 = vadd.f32 1.0, %v10744_v55  ;;  %v7963_v60 = vmul.f32 %v10784_v57, %v13574_v22  ;;  %v10785_v55 = vld [vmem:[#allocation2 + $0x78] sm:$0xff] }
 0x76a   : > { %10745 = vtanh.f32 %v7608_v21  ;;  %v7964_v21 = vmul.f32 %v10785_v55, %v13574_v22  ;;  %v10790_v55 = vld [vmem:[#allocation2 + $0xa0] sm:$0xff] }
 0x76b   : > { %v8025_v38 = vsub.f32 %v7960_v54, %v7993_v2  ;;  %7931 = vmatmul.bf16.gmra.mxu3 %v7783_v37  ;;  %v7703_v26 = vmul.f32 0.5, %v7671_v53 }
 0x76d   : > { %v13787_v41 = vadd.f32 %v8090_v7, %v8025_v38  ;;  %v7735_v58 = vmul.f32 %v7703_v26, %v13750_v32  ;;  %v8094_v7 = vmul.f32 %v13582_v33, %v8061_v8  ;;  %v8066_v8 = vld [vmem:[%s10974_s23 + $0xa0] sm:$0xff] }
 0x76e   : > { %v7892_v17 = vpop.f32.mrf.mxu3 }
 0x76f   : > { %8154 = vst.msk [vmem:[#allocation2 + $0x58] sm:$0xff] %vm672_vm2, %v13787_v41  ;;  %v7893_v61 = vadd.f32 %v13572_v19, %v7892_v17  ;;  %v7767_v27 = vadd.f32 %v7735_v58, %v14238_v30  ;;  %v8062_v17 = vld [vmem:[%s10974_s23 + $0x80] sm:$0xff] }
 0x770   : > { %v10746_v9 = vpop.eup %10745  ;;  %v8095_v26 = vmul.f32 %v13582_v33, %v8062_v17 }
 0x771   : > { %v7994_v52 = vmul.f32 %v13579_v6, %v7893_v61  ;;  %v7672_v63 = vadd.f32 1.0, %v10746_v9  ;;  %v10786_v61 = vld [vmem:[#allocation2 + $0x80] sm:$0xff] }
 0x772   : > { %v7965_v49 = vmul.f32 %v10786_v61, %v13574_v22 }
 0x773   : > { %v8026_v31 = vsub.f32 %v7961_v43, %v7994_v52  ;;  %v7704_v39 = vmul.f32 0.5, %v7672_v63  ;;  %v8063_v63 = vld [vmem:[%s10974_s23 + $0x88] sm:$0xff] }
 0x775   : > { %v13797_v23 = vadd.f32 %v8091_v48, %v8026_v31  ;;  %v7736_v29 = vmul.f32 %v7704_v39, %v7447_v11  ;;  %v10787_v39 = vld [vmem:[#allocation2 + $0x88] sm:$0xff] }
 0x776   : > { %v7894_v50 = vpop.f32.mrf.mxu3  ;;  %v7966_v58 = vmul.f32 %v10787_v39, %v13574_v22  ;;  %v8068_v39 = vld [vmem:[%s10974_s23 + $0xb0] sm:$0xff] }
 0x777   : > { %8155 = vst.msk [vmem:[#allocation2 + $0x60] sm:$0xff] %vm672_vm2, %v13797_v23  ;;  %v7895_v12 = vadd.f32 %v13572_v19, %v7894_v50  ;;  %v7768_v47 = vadd.f32 %v7736_v29, %v14239_v4  ;;  %v8096_v50 = vmul.f32 %v13582_v33, %v8063_v63 }
 0x779   : > { %v7995_v32 = vmul.f32 %v13579_v6, %v7895_v12  ;;  %v7784_v11 = vpack.c.bf16 %v7768_v47, %v7767_v27  ;;  %v10788_v27 = vld [vmem:[#allocation2 + $0x90] sm:$0xff] }
 0x77a   : > { %v7967_v4 = vmul.f32 %v10788_v27, %v13574_v22 }
 0x77b   : > { %v8027_v13 = vsub.f32 %v7962_v62, %v7995_v32  ;;  %7936 = vmatmul.bf16.gmra.mxu3 %v7784_v11  ;;  %v8064_v62 = vld [vmem:[%s10974_s23 + $0x90] sm:$0xff] }
 0x77c   : > { %v8097_v32 = vmul.f32 %v13582_v33, %v8064_v62 }
 0x77d   : > { %v13808_v36 = vadd.f32 %v8092_v5, %v8027_v13 }
 0x77e   : > { %v7897_v44 = vpop.f32.mrf.mxu3 }
 0x77f   : > { %8156 = vst.msk [vmem:[#allocation2 + $0x68] sm:$0xff] %vm672_vm2, %v13808_v36  ;;  %v7898_v42 = vadd.f32 %v13572_v19, %v7897_v44  ;;  %v8065_v44 = vld [vmem:[%s10974_s23 + $0x98] sm:$0xff] }
 0x781   : > { %v7996_v46 = vmul.f32 %v13579_v6, %v7898_v42  ;;  %v10789_v42 = vld [vmem:[#allocation2 + $0x98] sm:$0xff] }
 0x782   : > { %v7968_v57 = vmul.f32 %v10789_v42, %v13574_v22 }
 0x783   : > { %v8028_v54 = vsub.f32 %v7963_v60, %v7996_v46  ;;  %v8098_v46 = vmul.f32 %v13582_v33, %v8065_v44 }
 0x785   : > { %v13817_v51 = vadd.f32 %v8093_v24, %v8028_v54 }
 0x786   : > { %v7899_v20 = vpop.f32.mrf.mxu3 }
 0x787   : > { %8157 = vst.msk [vmem:[#allocation2 + $0x70] sm:$0xff] %vm672_vm2, %v13817_v51  ;;  %v7900_v3 = vadd.f32 %v13572_v19, %v7899_v20 }
 0x789   : > { %v7997_v2 = vmul.f32 %v13579_v6, %v7900_v3 }
 0x78b   : > { %v8029_v37 = vsub.f32 %v7964_v21, %v7997_v2  ;;  %v7969_v21 = vmul.f32 %v10790_v55, %v13574_v22 }
 0x78d   : > { %v13826_v38 = vadd.f32 %v8094_v7, %v8029_v37  ;;  %v8099_v7 = vmul.f32 %v13582_v33, %v8066_v8 }
 0x78e   : > { %v7902_v53 = vpop.f32.mrf.mxu3 }
 0x78f   : > { %8158 = vst.msk [vmem:[#allocation2 + $0x78] sm:$0xff] %vm672_vm2, %v13826_v38  ;;  %v7903_v45 = vadd.f32 %v13572_v19, %v7902_v53 }
 0x791   : > { %v7998_v43 = vmul.f32 %v13579_v6, %v7903_v45  ;;  %v8067_v45 = vld [vmem:[%s10974_s23 + $0xa8] sm:$0xff] }
 0x793   : > { %v8030_v9 = vsub.f32 %v7965_v49, %v7998_v43  ;;  %v10791_v49 = vld [vmem:[#allocation2 + $0xa8] sm:$0xff] }
 0x794   : > { %v7970_v43 = vmul.f32 %v10791_v49, %v13574_v22 }
 0x795   : > { %v13835_v52 = vadd.f32 %v8095_v26, %v8030_v9  ;;  %v8100_v9 = vmul.f32 %v13582_v33, %v8067_v45 }
 0x796   : > { %v7904_v48 = vpop.f32.mrf.mxu3 }
 0x797   : > { %8159 = vst.msk [vmem:[#allocation2 + $0x80] sm:$0xff] %vm672_vm2, %v13835_v52  ;;  %v7905_v31 = vadd.f32 %v13572_v19, %v7904_v48 }
 0x799   : > { %v7999_v29 = vmul.f32 %v13579_v6, %v7905_v31 }
 0x79b   : > { %v8031_v10 = vsub.f32 %v7966_v58, %v7999_v29  ;;  %v10792_v29 = vld [vmem:[#allocation2 + $0xb0] sm:$0xff] }
 0x79d   : > { %v13844_v12 = vadd.f32 %v8096_v50, %v8031_v10  ;;  %v7971_v50 = vmul.f32 %v10792_v29, %v13574_v22 }
 0x79e   : > { %v7907_v34 = vpop.f32.mrf.mxu3 }
 0x79f   : > { %8160 = vst.msk [vmem:[#allocation2 + $0x88] sm:$0xff] %vm672_vm2, %v13844_v12  ;;  %v7908_v30 = vadd.f32 %v13572_v19, %v7907_v34  ;;  %v8101_v34 = vmul.f32 %v13582_v33, %v8068_v39  ;;  %v10796_v39 = vld [vmem:[#allocation2 + $0xd0] sm:$0xff] }
 0x7a1   : > { %v8000_v47 = vmul.f32 %v13579_v6, %v7908_v30 }
 0x7a3   : > { %v8032_v5 = vsub.f32 %v7967_v4, %v8000_v47  ;;  %v8069_v4 = vld [vmem:[%s10974_s23 + $0xb8] sm:$0xff] }
 0x7a4   : > { %v8102_v44 = vmul.f32 %v13582_v33, %v8069_v4 }
 0x7a5   : > { %v13853_v11 = vadd.f32 %v8097_v32, %v8032_v5  ;;  %v10793_v32 = vld [vmem:[#allocation2 + $0xb8] sm:$0xff] }
 0x7a6   : > { %v7909_v13 = vpop.f32.mrf.mxu3  ;;  %v7972_v5 = vmul.f32 %v10793_v32, %v13574_v22 }
 0x7a7   : > { %8161 = vst.msk [vmem:[#allocation2 + $0x90] sm:$0xff] %vm672_vm2, %v13853_v11  ;;  %v7910_v35 = vadd.f32 %v13572_v19, %v7909_v13 }
 0x7a9   : > { %v8001_v60 = vmul.f32 %v13579_v6, %v7910_v35 }
 0x7ab   : > { %v8033_v24 = vsub.f32 %v7968_v57, %v8001_v60  ;;  %v8070_v60 = vld [vmem:[%s10974_s23 + $0xc0] sm:$0xff] }
 0x7ad   : > { %v13862_v54 = vadd.f32 %v8098_v46, %v8033_v24  ;;  %v10794_v24 = vld [vmem:[#allocation2 + $0xc0] sm:$0xff] }
 0x7ae   : > { %v7912_v20 = vpop.f32.mrf.mxu3 }
 0x7af   : > { %8162 = vst.msk [vmem:[#allocation2 + $0x98] sm:$0xff] %vm672_vm2, %v13862_v54  ;;  %v7913_v3 = vadd.f32 %v13572_v19, %v7912_v20  ;;  %v7973_v20 = vmul.f32 %v10794_v24, %v13574_v22  ;;  %v10798_v24 = vld [vmem:[#allocation2 + $0xe0] sm:$0xff] }
 0x7b1   : > { %v8002_v2 = vmul.f32 %v13579_v6, %v7913_v3  ;;  %v8103_v3 = vmul.f32 %v13582_v33, %v8070_v60  ;;  %v8074_v60 = vld [vmem:[%s10974_s23 + $0xe0] sm:$0xff] }
 0x7b3   : > { %v8034_v37 = vsub.f32 %v7969_v21, %v8002_v2 }
 0x7b5   : > { %v13871_v53 = vadd.f32 %v8099_v7, %v8034_v37  ;;  %v8071_v7 = vld [vmem:[%s10974_s23 + $0xc8] sm:$0xff] }
 0x7b6   : > { %v7914_v17 = vpop.f32.mrf.mxu3  ;;  %v8104_v49 = vmul.f32 %v13582_v33, %v8071_v7 }
 0x7b7   : > { %8163 = vst.msk [vmem:[#allocation2 + $0xa0] sm:$0xff] %vm672_vm2, %v13871_v53  ;;  %v7915_v61 = vadd.f32 %v13572_v19, %v7914_v17  ;;  %v10795_v17 = vld [vmem:[#allocation2 + $0xc8] sm:$0xff] }
 0x7b8   : > { %v7974_v45 = vmul.f32 %v10795_v17, %v13574_v22 }
 0x7b9   : > { %v8003_v26 = vmul.f32 %v13579_v6, %v7915_v61 }
 0x7bb   : > { %v8035_v48 = vsub.f32 %v7970_v43, %v8003_v26 }
 0x7bd   : > { %v13880_v63 = vadd.f32 %v8100_v9, %v8035_v48  ;;  %v8072_v48 = vld [vmem:[%s10974_s23 + $0xd0] sm:$0xff] }
 0x7be   : > { %v7917_v31 = vpop.f32.mrf.mxu3 }
 0x7bf   : > { %8164 = vst.msk [vmem:[#allocation2 + $0xa8] sm:$0xff] %vm672_vm2, %v13880_v63  ;;  %v7918_v58 = vadd.f32 %v13572_v19, %v7917_v31 }
 0x7c1   : > { %v8004_v10 = vmul.f32 %v13579_v6, %v7918_v58  ;;  %v7975_v58 = vmul.f32 %v10796_v39, %v13574_v22  ;;  %v8076_v39 = vld [vmem:[%s10974_s23 + $0xf0] sm:$0xff] }
 0x7c3   : > { %v8036_v62 = vsub.f32 %v7971_v50, %v8004_v10  ;;  %v8105_v50 = vmul.f32 %v13582_v33, %v8072_v48 }
 0x7c5   : > { %v13889_v30 = vadd.f32 %v8101_v34, %v8036_v62 }
 0x7c6   : > { %v7919_v27 = vpop.f32.mrf.mxu3 }
 0x7c7   : > { %8165 = vst.msk [vmem:[#allocation2 + $0xb0] sm:$0xff] %vm672_vm2, %v13889_v30  ;;  %v7920_v47 = vadd.f32 %v13572_v19, %v7919_v27  ;;  %v8073_v27 = vld [vmem:[%s10974_s23 + $0xd8] sm:$0xff] }
 0x7c9   : > { %v8005_v13 = vmul.f32 %v13579_v6, %v7920_v47  ;;  %v10797_v47 = vld [vmem:[#allocation2 + $0xd8] sm:$0xff] }
 0x7ca   : > { %v7976_v32 = vmul.f32 %v10797_v47, %v13574_v22 }
 0x7cb   : > { %v8037_v35 = vsub.f32 %v7972_v5, %v8005_v13  ;;  %v8106_v13 = vmul.f32 %v13582_v33, %v8073_v27 }
 0x7cd   : > { %v13898_v42 = vadd.f32 %v8102_v44, %v8037_v35 }
 0x7ce   : > { %v7922_v57 = vpop.f32.mrf.mxu3 }
 0x7cf   : > { %8166 = vst.msk [vmem:[#allocation2 + $0xb8] sm:$0xff] %vm672_vm2, %v13898_v42  ;;  %v7923_v46 = vadd.f32 %v13572_v19, %v7922_v57 }
 0x7d1   : > { %v8006_v8 = vmul.f32 %v13579_v6, %v7923_v46 }
 0x7d3   : > { %v8038_v55 = vsub.f32 %v7973_v20, %v8006_v8  ;;  %v7977_v20 = vmul.f32 %v10798_v24, %v13574_v22 }
 0x7d5   : > { %v13907_v21 = vadd.f32 %v8103_v3, %v8038_v55  ;;  %v8107_v3 = vmul.f32 %v13582_v33, %v8074_v60 }
 0x7d6   : > { %v7924_v2 = vpop.f32.mrf.mxu3 }
 0x7d7   : > { %8167 = vst.msk [vmem:[#allocation2 + $0xc0] sm:$0xff] %vm672_vm2, %v13907_v21  ;;  %v7925_v37 = vadd.f32 %v13572_v19, %v7924_v2 }
 0x7d9   : > { %v8007_v61 = vmul.f32 %v13579_v6, %v7925_v37  ;;  %v8075_v37 = vld [vmem:[%s10974_s23 + $0xe8] sm:$0xff] }
 0x7db   : > { %v8039_v43 = vsub.f32 %v7974_v45, %v8007_v61  ;;  %v10799_v45 = vld [vmem:[#allocation2 + $0xe8] sm:$0xff] }
 0x7dc   : > { %v7978_v61 = vmul.f32 %v10799_v45, %v13574_v22 }
 0x7dd   : > { %v13916_v26 = vadd.f32 %v8104_v49, %v8039_v43  ;;  %v8108_v43 = vmul.f32 %v13582_v33, %v8075_v37 }
 0x7de   : > { %v7927_v9 = vpop.f32.mrf.mxu3 }
 0x7df   : > { %8168 = vst.msk [vmem:[#allocation2 + $0xc8] sm:$0xff] %vm672_vm2, %v13916_v26  ;;  %v7928_v31 = vadd.f32 %v13572_v19, %v7927_v9 }
 0x7e1   : > { %v8008_v29 = vmul.f32 %v13579_v6, %v7928_v31 }
 0x7e3   : > { %v8040_v10 = vsub.f32 %v7975_v58, %v8008_v29  ;;  %v10800_v29 = vld [vmem:[#allocation2 + $0xf0] sm:$0xff] }
 0x7e5   : > { %v13925_v34 = vadd.f32 %v8105_v50, %v8040_v10  ;;  %v7979_v50 = vmul.f32 %v10800_v29, %v13574_v22 }
 0x7e6   : > { %v7929_v62 = vpop.f32.mrf.mxu3 }
 0x7e7   : > { %8169 = vst.msk [vmem:[#allocation2 + $0xd0] sm:$0xff] %vm672_vm2, %v13925_v34  ;;  %v7930_v4 = vadd.f32 %v13572_v19, %v7929_v62  ;;  %v8109_v62 = vmul.f32 %v13582_v33, %v8076_v39 }
 0x7e9   : > { %v8009_v5 = vmul.f32 %v13579_v6, %v7930_v4 }
 0x7eb   : > { %v8041_v44 = vsub.f32 %v7976_v32, %v8009_v5  ;;  %v8077_v32 = vld [vmem:[%s10974_s23 + $0xf8] sm:$0xff] }
 0x7ec   : > { %v8110_v60 = vmul.f32 %v13582_v33, %v8077_v32 }
 0x7ed   : > { %v13934_v35 = vadd.f32 %v8106_v13, %v8041_v44  ;;  %v10801_v13 = vld [vmem:[#allocation2 + $0xf8] sm:$0xff] }
 0x7ee   : > { %v7932_v57 = vpop.f32.mrf.mxu3  ;;  %v7980_v44 = vmul.f32 %v10801_v13, %v13574_v22 }
 0x7ef   : > { %8170 = vst.msk [vmem:[#allocation2 + $0xd8] sm:$0xff] %vm672_vm2, %v13934_v35  ;;  %v7933_v46 = vadd.f32 %v13572_v19, %v7932_v57 }
 0x7f1   : > { %v8010_v8 = vmul.f32 %v13579_v6, %v7933_v46 }
 0x7f3   : > { %v8042_v55 = vsub.f32 %v7977_v20, %v8010_v8 }
 0x7f5   : > { %v8139_v2 = vadd.f32 %v8107_v3, %v8042_v55 }
 0x7f6   : > { %v7934_v7 = vpop.f32.mrf.mxu3 }
 0x7f7   : > { %8171 = vst.msk [vmem:[#allocation2 + $0xe0] sm:$0xff] %vm672_vm2, %v8139_v2  ;;  %v7935_v17 = vadd.f32 %v13572_v19, %v7934_v7 }
 0x7f9   : > { %v8011_v49 = vmul.f32 %v13579_v6, %v7935_v17 }
 0x7fb   : > { %v8043_v9 = vsub.f32 %v7978_v61, %v8011_v49 }
 0x7fd   : > { %v8140_v48 = vadd.f32 %v8108_v43, %v8043_v9 }
 0x7fe   : > { %v7937_v31 = vpop.f32.mrf.mxu3 }
 0x7ff   : > { %8172 = vst.msk [vmem:[#allocation2 + $0xe8] sm:$0xff] %vm672_vm2, %v8140_v48  ;;  %v7938_v58 = vadd.f32 %v13572_v19, %v7937_v31 }
 0x801   : > { %v8012_v10 = vmul.f32 %v13579_v6, %v7938_v58 }
 0x803   : > { %v8044_v27 = vsub.f32 %v7979_v50, %v8012_v10 }
 0x805   : > { %v8141_v4 = vadd.f32 %v8109_v62, %v8044_v27 }
 0x806   : > { %v7939_v47 = vpop.f32.mrf.mxu3 }
 0x807   : > { %8173 = vst.msk [vmem:[#allocation2 + $0xf0] sm:$0xff] %vm672_vm2, %v8141_v4  ;;  %v7940_v5 = vadd.f32 %v13572_v19, %v7939_v47 }
 0x809   : > { %v8013_v57 = vmul.f32 %v13579_v6, %v7940_v5 }
 0x80b   : > { %v8045_v46 = vsub.f32 %v7980_v44, %v8013_v57  ;;  %8178 = sbr.rel (%p10118_p11) target bundleno = 2096 (0x830), region = 76 }
 0x80d   : > { %v8142_v24 = vadd.f32 %v8110_v60, %v8045_v46 }
 0x80f   : > { %8174 = vst.msk [vmem:[#allocation2 + $0xf8] sm:$0xff] %vm672_vm2, %v8142_v24 }
 0x810   : > { %8179 = vst.msk [vmem:[%s10979_s18] sm:$0xff] %vm672_vm2, %v13595_v16 }
 0x811   : > { %8180 = vst.msk [vmem:[%s10979_s18 + $0x8] sm:$0xff] %vm672_vm2, %v13616_v15 }
 0x812   : > { %8181 = vst.msk [vmem:[%s10979_s18 + $0x10] sm:$0xff] %vm672_vm2, %v13633_v25 }
 0x813   : > { %8182 = vst.msk [vmem:[%s10979_s18 + $0x18] sm:$0xff] %vm672_vm2, %v13653_v14 }
 0x814   : > { %8183 = vst.msk [vmem:[%s10979_s18 + $0x20] sm:$0xff] %vm672_vm2, %v13670_v0 }
 0x815   : > { %8184 = vst.msk [vmem:[%s10979_s18 + $0x28] sm:$0xff] %vm672_vm2, %v13690_v59 }
 0x816   : > { %8185 = vst.msk [vmem:[%s10979_s18 + $0x30] sm:$0xff] %vm672_vm2, %v13707_v40 }
 0x817   : > { %8186 = vst.msk [vmem:[%s10979_s18 + $0x38] sm:$0xff] %vm672_vm2, %v13727_v1 }
 0x818   : > { %8187 = vst.msk [vmem:[%s10979_s18 + $0x40] sm:$0xff] %vm672_vm2, %v13744_v56 }
 0x819   : > { %8188 = vst.msk [vmem:[%s10979_s18 + $0x48] sm:$0xff] %vm672_vm2, %v13764_v18 }
 0x81a   : > { %8189 = vst.msk [vmem:[%s10979_s18 + $0x50] sm:$0xff] %vm672_vm2, %v13775_v28 }
 0x81b   : > { %8190 = vst.msk [vmem:[%s10979_s18 + $0x58] sm:$0xff] %vm672_vm2, %v13787_v41 }
 0x81c   : > { %8191 = vst.msk [vmem:[%s10979_s18 + $0x60] sm:$0xff] %vm672_vm2, %v13797_v23 }
 0x81d   : > { %8192 = vst.msk [vmem:[%s10979_s18 + $0x68] sm:$0xff] %vm672_vm2, %v13808_v36 }
 0x81e   : > { %8193 = vst.msk [vmem:[%s10979_s18 + $0x70] sm:$0xff] %vm672_vm2, %v13817_v51 }
 0x81f   : > { %8194 = vst.msk [vmem:[%s10979_s18 + $0x78] sm:$0xff] %vm672_vm2, %v13826_v38 }
 0x820   : > { %8195 = vst.msk [vmem:[%s10979_s18 + $0x80] sm:$0xff] %vm672_vm2, %v13835_v52 }
 0x821   : > { %8196 = vst.msk [vmem:[%s10979_s18 + $0x88] sm:$0xff] %vm672_vm2, %v13844_v12 }
 0x822   : > { %8197 = vst.msk [vmem:[%s10979_s18 + $0x90] sm:$0xff] %vm672_vm2, %v13853_v11 }
 0x823   : > { %8198 = vst.msk [vmem:[%s10979_s18 + $0x98] sm:$0xff] %vm672_vm2, %v13862_v54 }
 0x824   : > { %8199 = vst.msk [vmem:[%s10979_s18 + $0xa0] sm:$0xff] %vm672_vm2, %v13871_v53 }
 0x825   : > { %8200 = vst.msk [vmem:[%s10979_s18 + $0xa8] sm:$0xff] %vm672_vm2, %v13880_v63 }
 0x826   : > { %8201 = vst.msk [vmem:[%s10979_s18 + $0xb0] sm:$0xff] %vm672_vm2, %v13889_v30 }
 0x827   : > { %8202 = vst.msk [vmem:[%s10979_s18 + $0xb8] sm:$0xff] %vm672_vm2, %v13898_v42 }
 0x828   : > { %8203 = vst.msk [vmem:[%s10979_s18 + $0xc0] sm:$0xff] %vm672_vm2, %v13907_v21 }
 0x829   : > { %8204 = vst.msk [vmem:[%s10979_s18 + $0xc8] sm:$0xff] %vm672_vm2, %v13916_v26 }
 0x82a   : > { %8205 = vst.msk [vmem:[%s10979_s18 + $0xd0] sm:$0xff] %vm672_vm2, %v13925_v34 }
 0x82b   : > { %8206 = vst.msk [vmem:[%s10979_s18 + $0xd8] sm:$0xff] %vm672_vm2, %v13934_v35 }
 0x82c   : > { %8207 = vst.msk [vmem:[%s10979_s18 + $0xe0] sm:$0xff] %vm672_vm2, %v8139_v2 }
 0x82d   : > { %8208 = vst.msk [vmem:[%s10979_s18 + $0xe8] sm:$0xff] %vm672_vm2, %v8140_v48 }
 0x82e   : > { %8209 = vst.msk [vmem:[%s10979_s18 + $0xf0] sm:$0xff] %vm672_vm2, %v8141_v4 }
 0x82f   : > { %8210 = vst.msk [vmem:[%s10979_s18 + $0xf8] sm:$0xff] %vm672_vm2, %v8142_v24 }
 0x830 PF: > { %s22_s21 = sadd.s32 1, %s10859_s21   ;;  %s14240_s18 = sld [smem:[#allocation8_spill]] }
 0x831   : > { %p19_p12 = scmp.ge.s32.totalorder %s22_s21, 18   ;;  %s14241_s23 = sld [smem:[#allocation9_spill]] }
 0x832   : > { %s14242_s20 = sld [smem:[#allocation10_spill]]  ;;  %s14243_s17 = smov %s10851_s19 }
 0x833   :  { %21 = sbr.rel (!%p19_p12) target bundleno = 5 (0x5), region = 116 }
 0x837   : > { %s14244_s19 = smov %s14241_s23 }
 0x838   :  { %8232 = vsyncpa [#allocation6], 1 }
 0x839   :  { %8234 = vsyncpa [#allocation6 + $0x1], 1 }

</bundles_post_ra>
